<compile_context>
chip_gen: v7x
topology: tpu7x:2x2x1
jax: 0.10.0
libtpu: 0.0.40
codegen_flags: <defaults>
</compile_context>

<pallas_src>
import jax
import jax.numpy as jnp
from jax.experimental import pallas as pl
from jax.experimental.pallas import tpu as pltpu


CIN_PAD = 8   # pad the 3 RGB channels to 8 so conv0's im2col K = 4*4*8 = 128


# ----------------------------------------------------------------------------
# Pallas kernels
# ----------------------------------------------------------------------------
def _conv_relu_bn_kernel(a_ref, w_ref, b_ref, s_ref, t_ref, o_ref):
    """(im2col'd 4x4 s2 conv) -> bias -> ReLU -> folded BatchNorm affine."""
    acc = jnp.dot(a_ref[...], w_ref[...], preferred_element_type=jnp.float32)
    acc = jnp.maximum(acc + b_ref[...], 0.0)
    o_ref[...] = (acc * s_ref[...] + t_ref[...]).astype(o_ref.dtype)


def _tail_kernel(a3_ref, w3_ref, b3_ref,
                 aff0_ref, w1a_ref, w2a_ref,
                 aff1_ref, w1b_ref, w2b_ref,
                 cbt_ref, cbsq_ref,
                 o_ref, mid_ref):
    """Final 4x4 s2 conv + two residual blocks + vector quantization.

    Rows are ordered (latent pixel, batch); the latent is 2x2, so every input
    pixel lies inside every output pixel's 3x3 neighbourhood and the padded
    3x3 conv reduces to 9 full (M, C) x (C, C) tap matmuls combined by
    per-pixel row slices -- no spatial padding or in-kernel reshapes needed.
    """
    f32 = jnp.float32
    M = o_ref.shape[0]          # B * 2 * 2
    nb = M // 4                 # rows per latent pixel (= batch size)

    # --- final encoder conv: 4x4 stride-2, bias only (no ReLU / BN) ---------
    h = jnp.dot(a3_ref[...], w3_ref[...], preferred_element_type=f32)
    h = h + b3_ref[...]

    # --- two residual blocks -------------------------------------------------
    for aff_ref, w1_ref, w2_ref in ((aff0_ref, w1a_ref, w2a_ref),
                                    (aff1_ref, w1b_ref, w2b_ref)):
        aff = aff_ref[...]
        s1, sh1 = aff[0:1, :], aff[1:2, :]
        b1 = aff[2:3, :]
        s2, sh2 = aff[3:4, :], aff[4:5, :]
        b2 = aff[5:6, :]

        t = jnp.maximum(h * s1 + sh1, 0.0).astype(jnp.bfloat16)   # BN1 + ReLU

        # 3x3 pad-1 conv on the 2x2 latent via 9 whole-activation tap matmuls.
        y = [jnp.dot(t, w1_ref[k], preferred_element_type=f32) for k in range(9)]
        for p in range(4):
            ho, wo = p // 2, p % 2
            u = b1
            for q in range(4):
                hi, wi = q // 2, q % 2
                k = (hi - ho + 1) * 3 + (wi - wo + 1)
                u = u + y[k][nb * q:nb * (q + 1), :]
            # BN2 + ReLU on the conv output, staged in a VMEM scratch
            mid_ref[nb * p:nb * (p + 1), :] = jnp.maximum(u * s2 + sh2, 0.0)
        mid = mid_ref[...].astype(jnp.bfloat16)
        # 1x1 conv + residual skip
        h = h + jnp.dot(mid, w2_ref[...], preferred_element_type=f32) + b2

    # --- vector quantization: nearest codebook row per latent position ------
    # argmin_k ||h - w_k||^2 == argmax_k (2 h.w_k - ||w_k||^2); ||h||^2 dropped.
    xw = jnp.dot(h, cbt_ref[...], preferred_element_type=f32)     # (M, Kc) f32
    neg = 2.0 * xw - cbsq_ref[...]
    mx = jnp.max(neg, axis=1, keepdims=True)
    ids = jax.lax.broadcasted_iota(jnp.int32, neg.shape, 1)
    cand = jnp.where(neg >= mx, ids, jnp.int32(neg.shape[1]))
    idx = jnp.min(cand, axis=1, keepdims=True)                    # first-max tie-break
    o_ref[...] = jnp.broadcast_to(idx, o_ref.shape)               # lane-dense store


# ----------------------------------------------------------------------------
# Plain-JAX glue
# ----------------------------------------------------------------------------
def extract_patches(x_nhwc, kh, kw, stride, pad):
    """im2col: returns (B, Ho, Wo, kh*kw*C); columns ordered (kh, kw, cin)."""
    xp = jnp.pad(x_nhwc, ((0, 0), (pad, pad), (pad, pad), (0, 0)))
    B, Hp, Wp, C = xp.shape
    Ho = (Hp - kh) // stride + 1
    Wo = (Wp - kw) // stride + 1
    cols = []
    for i in range(kh):
        for j in range(kw):
            cols.append(xp[:, i:i + stride * Ho:stride,
                            j:j + stride * Wo:stride, :])
    return jnp.concatenate(cols, axis=-1), Ho, Wo


def bn_fold(bn, eps=1e-5):
    scale = bn['gamma'] * jax.lax.rsqrt(bn['var'] + eps)
    shift = bn['beta'] - bn['mean'] * scale
    return scale, shift


def conv_stage(x_nhwc, w, b, scale, shift):
    """One fused (Conv 4x4 s2 p1 -> ReLU -> BN) stage as a single pallas_call."""
    B = x_nhwc.shape[0]
    p, Ho, Wo = extract_patches(x_nhwc, 4, 4, 2, 1)
    K = p.shape[-1]
    N = w.shape[-1]
    M = B * Ho * Wo
    a = p.reshape(M, K)
    tm = M // 2 if M % 16 == 0 else M      # 2 row tiles when cleanly divisible
    out = pl.pallas_call(
        _conv_relu_bn_kernel,
        out_shape=jax.ShapeDtypeStruct((M, N), jnp.bfloat16),
        grid=(M // tm,),
        in_specs=[
            pl.BlockSpec((tm, K), lambda i: (i, 0)),
            pl.BlockSpec((K, N), lambda i: (0, 0)),   # weight resident across steps
            pl.BlockSpec((1, N), lambda i: (0, 0)),
            pl.BlockSpec((1, N), lambda i: (0, 0)),
            pl.BlockSpec((1, N), lambda i: (0, 0)),
        ],
        out_specs=pl.BlockSpec((tm, N), lambda i: (i, 0)),
        compiler_params=pltpu.CompilerParams(
            dimension_semantics=("parallel",),
            vmem_limit_bytes=32 * 1024 * 1024),
    )(a, w, b.reshape(1, N), scale.reshape(1, N), shift.reshape(1, N))
    return out.reshape(B, Ho, Wo, N)


def encode(x_nchw, params):
    """Forward pass of LargeVectorQuantizedVAE_Encode: returns indices (B,h,w)."""
    x = jnp.transpose(x_nchw, (0, 2, 3, 1)).astype(jnp.float32)   # NHWC
    x = jnp.pad(x, ((0, 0), (0, 0), (0, 0), (0, CIN_PAD - x.shape[-1])))
    h = x.astype(jnp.bfloat16)

    # three fused (Conv 4x4 s2 p1 -> ReLU -> BN) stages
    for i in range(3):
        cw = params[f'conv{i}']['w'].astype(jnp.bfloat16)
        cb = params[f'conv{i}']['b']
        scale, shift = bn_fold(params[f'bn{i}'])
        h = conv_stage(h, cw, cb, scale, shift)

    # tail: final Conv 4x4 s2 p1 + both residual blocks + quantization fused
    B = h.shape[0]
    p3, Ho, Wo = extract_patches(h, 4, 4, 2, 1)
    # TODO(synk): tail kernel is specialised to the 2x2 latent produced by
    # 32x32 inputs (the module's standard configuration).
    assert Ho == 2 and Wo == 2, "tail kernel expects a 2x2 latent"
    # rows ordered (pixel, batch) so per-pixel row blocks are contiguous slices
    a3 = p3.transpose(1, 2, 0, 3).reshape(Ho * Wo * B, p3.shape[-1])
    M = a3.shape[0]
    N = params['conv3']['w'].shape[-1]

    w3 = params['conv3']['w'].astype(jnp.bfloat16)
    b3 = params['conv3']['b'].reshape(1, N)
    res_inputs = []
    for r in range(2):
        rp = params[f'res{r}']
        s1, sh1 = bn_fold(rp['bn1'])
        s2, sh2 = bn_fold(rp['bn2'])
        aff = jnp.stack([s1, sh1, rp['conv1_b'], s2, sh2, rp['conv2_b']], 0)
        res_inputs += [aff,
                       rp['conv1_w'].astype(jnp.bfloat16),
                       rp['conv2_w'].astype(jnp.bfloat16)]
    cb = params['codebook']
    cbt = cb.T                                    # (code_dim, code_size) f32
    cbsq = jnp.sum(cb * cb, axis=1).reshape(1, -1)
    code_size = cb.shape[0]

    inputs = [a3, w3, b3, *res_inputs, cbt, cbsq]

    def _full(arr):
        nd = arr.ndim
        return pl.BlockSpec(arr.shape, lambda *_: (0,) * nd)

    out = pl.pallas_call(
        _tail_kernel,
        out_shape=jax.ShapeDtypeStruct((M, code_size), jnp.int32),
        grid=(1,),
        in_specs=[_full(t) for t in inputs],
        out_specs=pl.BlockSpec((M, code_size), lambda i: (0, 0)),
        scratch_shapes=[pltpu.VMEM((M, N), jnp.float32)],
        compiler_params=pltpu.CompilerParams(
            dimension_semantics=("arbitrary",),
            vmem_limit_bytes=32 * 1024 * 1024),
    )(*inputs)

    idx = out[:, 0]                               # rows ordered (ho, wo, b)
    return idx.reshape(Ho, Wo, B).transpose(2, 0, 1)


# ----------------------------------------------------------------------------
# Deterministic parameter initialization (synthetic, not a checkpoint load)
# ----------------------------------------------------------------------------
# Weight layouts (for a real checkpoint, convert from PyTorch as noted):
#   4x4 convs : (kh*kw*cin, cout), rows ordered (kh, kw, cin)
#               == W_pt.transpose(2, 3, 1, 0).reshape(-1, cout)
#   3x3 convs : (9, cin, cout) with tap index ki*3+kj
#               == W_pt.transpose(2, 3, 1, 0).reshape(9, cin, cout)
#   1x1 convs : (cin, cout) == W_pt[:, :, 0, 0].T
def init_params(key, code_size=128, code_dim=256):
    keys = jax.random.split(key, 64)
    it = iter(keys)

    def nrm(shape, scale=0.05):
        return scale * jax.random.normal(next(it), shape, jnp.float32)

    def bn_params(c):
        return {'gamma': 1.0 + nrm((c,), 0.02),
                'beta': nrm((c,), 0.02),
                'mean': nrm((c,), 0.02),
                'var': 1.0 + 0.05 * jax.random.uniform(next(it), (c,), jnp.float32)}

    ch = code_dim        # encoder width (256) == code_dim, as in the module
    params = {}
    # conv0: 3->256, real 3 input channels zero-padded to CIN_PAD
    w0 = nrm((4, 4, 3, ch))
    w0 = jnp.pad(w0, ((0, 0), (0, 0), (0, CIN_PAD - 3), (0, 0)))
    params['conv0'] = {'w': w0.reshape(4 * 4 * CIN_PAD, ch), 'b': nrm((ch,))}
    for i in (1, 2, 3):
        params[f'conv{i}'] = {'w': nrm((4 * 4 * ch, ch)), 'b': nrm((ch,))}
    for i in range(3):
        params[f'bn{i}'] = bn_params(ch)
    for r in range(2):
        params[f'res{r}'] = {
            'bn1': bn_params(ch),
            'conv1_w': nrm((9, ch, ch)), 'conv1_b': nrm((ch,)),
            'bn2': bn_params(ch),
            'conv2_w': nrm((ch, ch)), 'conv2_b': nrm((ch,)),
        }
    params['codebook'] = jax.random.uniform(
        next(it), (code_size, code_dim), jnp.float32,
        -1.0 / code_size, 1.0 / code_size)
    return params


# ----------------------------------------------------------------------------
if __name__ == "__main__":
    key = jax.random.PRNGKey(0)
    pkey, xkey = jax.random.split(key)
    code_size, code_dim = 128, 256
    params = init_params(pkey, code_size=code_size, code_dim=code_dim)

    # NCHW input like PyTorch; 32x32 -> 2x2 latent after four stride-2 convs.
    x = jax.random.normal(xkey, (2, 3, 32, 32), jnp.float32)

    indices = jax.jit(encode)(x, params)
    indices = jax.block_until_ready(indices)

    assert indices.shape == (2, 2, 2)
    assert indices.dtype == jnp.int32
    assert bool(jnp.all((indices >= 0) & (indices < code_size)))
    print("KERNEL_OK")
</pallas_src>

<mosaic_0001>
module attributes {stable_mosaic.version = 11 : i64} {
  func.func @_conv_relu_bn_kernel(%arg0: i32, %arg1: memref<256x128xbf16, #tpu.memory_space<vmem>>, %arg2: memref<128x256xbf16, #tpu.memory_space<vmem>>, %arg3: memref<1x256xf32, #tpu.memory_space<vmem>>, %arg4: memref<1x256xf32, #tpu.memory_space<vmem>>, %arg5: memref<1x256xf32, #tpu.memory_space<vmem>>, %arg6: memref<256x256xbf16, #tpu.memory_space<vmem>>) attributes {dimension_semantics = [#tpu.dimension_semantics<parallel>], iteration_bounds = array<i64: 2>, scalar_prefetch = 0 : i64, scratch_operands = 0 : i64, tpu.core_type = #tpu.core_type<tc>, window_params = [{transform_indices = @transform_0, window_bounds = array<i64: 256, 128>}, {pipeline_mode = #tpu.pipeline_mode<synchronous>, transform_indices = @transform_1, window_bounds = array<i64: 128, 256>}, {pipeline_mode = #tpu.pipeline_mode<synchronous>, transform_indices = @transform_2, window_bounds = array<i64: 1, 256>}, {pipeline_mode = #tpu.pipeline_mode<synchronous>, transform_indices = @transform_3, window_bounds = array<i64: 1, 256>}, {pipeline_mode = #tpu.pipeline_mode<synchronous>, transform_indices = @transform_4, window_bounds = array<i64: 1, 256>}, {transform_indices = @transform_5, window_bounds = array<i64: 256, 256>}]} {
    %c0 = arith.constant 0 : index
    %c0_0 = arith.constant 0 : index
    %0 = vector.load %arg1[%c0, %c0_0] : memref<256x128xbf16, #tpu.memory_space<vmem>>, vector<256x128xbf16>
    %c0_1 = arith.constant 0 : index
    %c0_2 = arith.constant 0 : index
    %1 = vector.load %arg2[%c0_1, %c0_2] : memref<128x256xbf16, #tpu.memory_space<vmem>>, vector<128x256xbf16>
    %cst = arith.constant dense<0.000000e+00> : vector<256x256xf32>
    %2 = tpu.matmul %0, %1, %cst {dimension_numbers = #tpu.dot_dimension_numbers<[1], [0], [0], [1], [0, 0, 1, 1], [], []>} : vector<256x128xbf16>, vector<128x256xbf16>, vector<256x256xf32> -> vector<256x256xf32>
    %c0_3 = arith.constant 0 : index
    %c0_4 = arith.constant 0 : index
    %3 = vector.load %arg3[%c0_3, %c0_4] : memref<1x256xf32, #tpu.memory_space<vmem>>, vector<1x256xf32>
    %4 = vector.broadcast %3 : vector<1x256xf32> to vector<256x256xf32>
    %5 = arith.addf %2, %4 : vector<256x256xf32>
    %cst_5 = arith.constant 0.000000e+00 : f32
    %6 = vector.broadcast %cst_5 : f32 to vector<256x256xf32>
    %7 = arith.maximumf %5, %6 : vector<256x256xf32>
    %c0_6 = arith.constant 0 : index
    %c0_7 = arith.constant 0 : index
    %8 = vector.load %arg4[%c0_6, %c0_7] : memref<1x256xf32, #tpu.memory_space<vmem>>, vector<1x256xf32>
    %9 = vector.broadcast %8 : vector<1x256xf32> to vector<256x256xf32>
    %10 = arith.mulf %7, %9 : vector<256x256xf32>
    %c0_8 = arith.constant 0 : index
    %c0_9 = arith.constant 0 : index
    %11 = vector.load %arg5[%c0_8, %c0_9] : memref<1x256xf32, #tpu.memory_space<vmem>>, vector<1x256xf32>
    %12 = vector.broadcast %11 : vector<1x256xf32> to vector<256x256xf32>
    %13 = arith.addf %10, %12 : vector<256x256xf32>
    %14 = arith.truncf %13 : vector<256x256xf32> to vector<256x256xbf16>
    %c0_10 = arith.constant 0 : index
    %c0_11 = arith.constant 0 : index
    %15 = vector.load %arg6[%c0_10, %c0_11] : memref<256x256xbf16, #tpu.memory_space<vmem>>, vector<256x256xbf16>
    tpu.vector_store %arg6[%c0_10, %c0_11], %14 {strides = array<i32>} : memref<256x256xbf16, #tpu.memory_space<vmem>>, vector<256x256xbf16>,
    return
  }
  func.func @transform_0(%arg0: i32) -> (i32, i32) {
    %c0_i32 = arith.constant 0 : i32
    %c0_i32_0 = arith.constant 0 : i32
    return %arg0, %c0_i32 : i32, i32
  }
  func.func @transform_1(%arg0: i32) -> (i32, i32) {
    %c0_i32 = arith.constant 0 : i32
    %c0_i32_0 = arith.constant 0 : i32
    %c0_i32_1 = arith.constant 0 : i32
    return %c0_i32, %c0_i32_0 : i32, i32
  }
  func.func @transform_2(%arg0: i32) -> (i32, i32) {
    %c0_i32 = arith.constant 0 : i32
    %c0_i32_0 = arith.constant 0 : i32
    %c0_i32_1 = arith.constant 0 : i32
    return %c0_i32, %c0_i32_0 : i32, i32
  }
  func.func @transform_3(%arg0: i32) -> (i32, i32) {
    %c0_i32 = arith.constant 0 : i32
    %c0_i32_0 = arith.constant 0 : i32
    %c0_i32_1 = arith.constant 0 : i32
    return %c0_i32, %c0_i32_0 : i32, i32
  }
  func.func @transform_4(%arg0: i32) -> (i32, i32) {
    %c0_i32 = arith.constant 0 : i32
    %c0_i32_0 = arith.constant 0 : i32
    %c0_i32_1 = arith.constant 0 : i32
    return %c0_i32, %c0_i32_0 : i32, i32
  }
  func.func @transform_5(%arg0: i32) -> (i32, i32) {
    %c0_i32 = arith.constant 0 : i32
    %c0_i32_0 = arith.constant 0 : i32
    return %arg0, %c0_i32 : i32, i32
  }
}

module attributes {stable_mosaic.version = 11 : i64} {
  func.func @_conv_relu_bn_kernel(%arg0: i32, %arg1: memref<64x4096xbf16, #tpu.memory_space<vmem>>, %arg2: memref<4096x256xbf16, #tpu.memory_space<vmem>>, %arg3: memref<1x256xf32, #tpu.memory_space<vmem>>, %arg4: memref<1x256xf32, #tpu.memory_space<vmem>>, %arg5: memref<1x256xf32, #tpu.memory_space<vmem>>, %arg6: memref<64x256xbf16, #tpu.memory_space<vmem>>) attributes {dimension_semantics = [#tpu.dimension_semantics<parallel>], iteration_bounds = array<i64: 2>, scalar_prefetch = 0 : i64, scratch_operands = 0 : i64, tpu.core_type = #tpu.core_type<tc>, window_params = [{transform_indices = @transform_0, window_bounds = array<i64: 64, 4096>}, {pipeline_mode = #tpu.pipeline_mode<synchronous>, transform_indices = @transform_1, window_bounds = array<i64: 4096, 256>}, {pipeline_mode = #tpu.pipeline_mode<synchronous>, transform_indices = @transform_2, window_bounds = array<i64: 1, 256>}, {pipeline_mode = #tpu.pipeline_mode<synchronous>, transform_indices = @transform_3, window_bounds = array<i64: 1, 256>}, {pipeline_mode = #tpu.pipeline_mode<synchronous>, transform_indices = @transform_4, window_bounds = array<i64: 1, 256>}, {transform_indices = @transform_5, window_bounds = array<i64: 64, 256>}]} {
    %c0 = arith.constant 0 : index
    %c0_0 = arith.constant 0 : index
    %0 = vector.load %arg1[%c0, %c0_0] : memref<64x4096xbf16, #tpu.memory_space<vmem>>, vector<64x4096xbf16>
    %c0_1 = arith.constant 0 : index
    %c0_2 = arith.constant 0 : index
    %1 = vector.load %arg2[%c0_1, %c0_2] : memref<4096x256xbf16, #tpu.memory_space<vmem>>, vector<4096x256xbf16>
    %cst = arith.constant dense<0.000000e+00> : vector<64x256xf32>
    %2 = tpu.matmul %0, %1, %cst {dimension_numbers = #tpu.dot_dimension_numbers<[1], [0], [0], [1], [0, 0, 1, 1], [], []>} : vector<64x4096xbf16>, vector<4096x256xbf16>, vector<64x256xf32> -> vector<64x256xf32>
    %c0_3 = arith.constant 0 : index
    %c0_4 = arith.constant 0 : index
    %3 = vector.load %arg3[%c0_3, %c0_4] : memref<1x256xf32, #tpu.memory_space<vmem>>, vector<1x256xf32>
    %4 = vector.broadcast %3 : vector<1x256xf32> to vector<64x256xf32>
    %5 = arith.addf %2, %4 : vector<64x256xf32>
    %cst_5 = arith.constant 0.000000e+00 : f32
    %6 = vector.broadcast %cst_5 : f32 to vector<64x256xf32>
    %7 = arith.maximumf %5, %6 : vector<64x256xf32>
    %c0_6 = arith.constant 0 : index
    %c0_7 = arith.constant 0 : index
    %8 = vector.load %arg4[%c0_6, %c0_7] : memref<1x256xf32, #tpu.memory_space<vmem>>, vector<1x256xf32>
    %9 = vector.broadcast %8 : vector<1x256xf32> to vector<64x256xf32>
    %10 = arith.mulf %7, %9 : vector<64x256xf32>
    %c0_8 = arith.constant 0 : index
    %c0_9 = arith.constant 0 : index
    %11 = vector.load %arg5[%c0_8, %c0_9] : memref<1x256xf32, #tpu.memory_space<vmem>>, vector<1x256xf32>
    %12 = vector.broadcast %11 : vector<1x256xf32> to vector<64x256xf32>
    %13 = arith.addf %10, %12 : vector<64x256xf32>
    %14 = arith.truncf %13 : vector<64x256xf32> to vector<64x256xbf16>
    %c0_10 = arith.constant 0 : index
    %c0_11 = arith.constant 0 : index
    %15 = vector.load %arg6[%c0_10, %c0_11] : memref<64x256xbf16, #tpu.memory_space<vmem>>, vector<64x256xbf16>
    tpu.vector_store %arg6[%c0_10, %c0_11], %14 {strides = array<i32>} : memref<64x256xbf16, #tpu.memory_space<vmem>>, vector<64x256xbf16>,
    return
  }
  func.func @transform_0(%arg0: i32) -> (i32, i32) {
    %c0_i32 = arith.constant 0 : i32
    %c0_i32_0 = arith.constant 0 : i32
    return %arg0, %c0_i32 : i32, i32
  }
  func.func @transform_1(%arg0: i32) -> (i32, i32) {
    %c0_i32 = arith.constant 0 : i32
    %c0_i32_0 = arith.constant 0 : i32
    %c0_i32_1 = arith.constant 0 : i32
    return %c0_i32, %c0_i32_0 : i32, i32
  }
  func.func @transform_2(%arg0: i32) -> (i32, i32) {
    %c0_i32 = arith.constant 0 : i32
    %c0_i32_0 = arith.constant 0 : i32
    %c0_i32_1 = arith.constant 0 : i32
    return %c0_i32, %c0_i32_0 : i32, i32
  }
  func.func @transform_3(%arg0: i32) -> (i32, i32) {
    %c0_i32 = arith.constant 0 : i32
    %c0_i32_0 = arith.constant 0 : i32
    %c0_i32_1 = arith.constant 0 : i32
    return %c0_i32, %c0_i32_0 : i32, i32
  }
  func.func @transform_4(%arg0: i32) -> (i32, i32) {
    %c0_i32 = arith.constant 0 : i32
    %c0_i32_0 = arith.constant 0 : i32
    %c0_i32_1 = arith.constant 0 : i32
    return %c0_i32, %c0_i32_0 : i32, i32
  }
  func.func @transform_5(%arg0: i32) -> (i32, i32) {
    %c0_i32 = arith.constant 0 : i32
    %c0_i32_0 = arith.constant 0 : i32
    return %arg0, %c0_i32 : i32, i32
  }
}

module attributes {stable_mosaic.version = 11 : i64} {
  func.func @_conv_relu_bn_kernel(%arg0: i32, %arg1: memref<16x4096xbf16, #tpu.memory_space<vmem>>, %arg2: memref<4096x256xbf16, #tpu.memory_space<vmem>>, %arg3: memref<1x256xf32, #tpu.memory_space<vmem>>, %arg4: memref<1x256xf32, #tpu.memory_space<vmem>>, %arg5: memref<1x256xf32, #tpu.memory_space<vmem>>, %arg6: memref<16x256xbf16, #tpu.memory_space<vmem>>) attributes {dimension_semantics = [#tpu.dimension_semantics<parallel>], iteration_bounds = array<i64: 2>, scalar_prefetch = 0 : i64, scratch_operands = 0 : i64, tpu.core_type = #tpu.core_type<tc>, window_params = [{transform_indices = @transform_0, window_bounds = array<i64: 16, 4096>}, {pipeline_mode = #tpu.pipeline_mode<synchronous>, transform_indices = @transform_1, window_bounds = array<i64: 4096, 256>}, {pipeline_mode = #tpu.pipeline_mode<synchronous>, transform_indices = @transform_2, window_bounds = array<i64: 1, 256>}, {pipeline_mode = #tpu.pipeline_mode<synchronous>, transform_indices = @transform_3, window_bounds = array<i64: 1, 256>}, {pipeline_mode = #tpu.pipeline_mode<synchronous>, transform_indices = @transform_4, window_bounds = array<i64: 1, 256>}, {transform_indices = @transform_5, window_bounds = array<i64: 16, 256>}]} {
    %c0 = arith.constant 0 : index
    %c0_0 = arith.constant 0 : index
    %0 = vector.load %arg1[%c0, %c0_0] : memref<16x4096xbf16, #tpu.memory_space<vmem>>, vector<16x4096xbf16>
    %c0_1 = arith.constant 0 : index
    %c0_2 = arith.constant 0 : index
    %1 = vector.load %arg2[%c0_1, %c0_2] : memref<4096x256xbf16, #tpu.memory_space<vmem>>, vector<4096x256xbf16>
    %cst = arith.constant dense<0.000000e+00> : vector<16x256xf32>
    %2 = tpu.matmul %0, %1, %cst {dimension_numbers = #tpu.dot_dimension_numbers<[1], [0], [0], [1], [0, 0, 1, 1], [], []>} : vector<16x4096xbf16>, vector<4096x256xbf16>, vector<16x256xf32> -> vector<16x256xf32>
    %c0_3 = arith.constant 0 : index
    %c0_4 = arith.constant 0 : index
    %3 = vector.load %arg3[%c0_3, %c0_4] : memref<1x256xf32, #tpu.memory_space<vmem>>, vector<1x256xf32>
    %4 = vector.broadcast %3 : vector<1x256xf32> to vector<16x256xf32>
    %5 = arith.addf %2, %4 : vector<16x256xf32>
    %cst_5 = arith.constant 0.000000e+00 : f32
    %6 = vector.broadcast %cst_5 : f32 to vector<16x256xf32>
    %7 = arith.maximumf %5, %6 : vector<16x256xf32>
    %c0_6 = arith.constant 0 : index
    %c0_7 = arith.constant 0 : index
    %8 = vector.load %arg4[%c0_6, %c0_7] : memref<1x256xf32, #tpu.memory_space<vmem>>, vector<1x256xf32>
    %9 = vector.broadcast %8 : vector<1x256xf32> to vector<16x256xf32>
    %10 = arith.mulf %7, %9 : vector<16x256xf32>
    %c0_8 = arith.constant 0 : index
    %c0_9 = arith.constant 0 : index
    %11 = vector.load %arg5[%c0_8, %c0_9] : memref<1x256xf32, #tpu.memory_space<vmem>>, vector<1x256xf32>
    %12 = vector.broadcast %11 : vector<1x256xf32> to vector<16x256xf32>
    %13 = arith.addf %10, %12 : vector<16x256xf32>
    %14 = arith.truncf %13 : vector<16x256xf32> to vector<16x256xbf16>
    %c0_10 = arith.constant 0 : index
    %c0_11 = arith.constant 0 : index
    %15 = vector.load %arg6[%c0_10, %c0_11] : memref<16x256xbf16, #tpu.memory_space<vmem>>, vector<16x256xbf16>
    tpu.vector_store %arg6[%c0_10, %c0_11], %14 {strides = array<i32>} : memref<16x256xbf16, #tpu.memory_space<vmem>>, vector<16x256xbf16>,
    return
  }
  func.func @transform_0(%arg0: i32) -> (i32, i32) {
    %c0_i32 = arith.constant 0 : i32
    %c0_i32_0 = arith.constant 0 : i32
    return %arg0, %c0_i32 : i32, i32
  }
  func.func @transform_1(%arg0: i32) -> (i32, i32) {
    %c0_i32 = arith.constant 0 : i32
    %c0_i32_0 = arith.constant 0 : i32
    %c0_i32_1 = arith.constant 0 : i32
    return %c0_i32, %c0_i32_0 : i32, i32
  }
  func.func @transform_2(%arg0: i32) -> (i32, i32) {
    %c0_i32 = arith.constant 0 : i32
    %c0_i32_0 = arith.constant 0 : i32
    %c0_i32_1 = arith.constant 0 : i32
    return %c0_i32, %c0_i32_0 : i32, i32
  }
  func.func @transform_3(%arg0: i32) -> (i32, i32) {
    %c0_i32 = arith.constant 0 : i32
    %c0_i32_0 = arith.constant 0 : i32
    %c0_i32_1 = arith.constant 0 : i32
    return %c0_i32, %c0_i32_0 : i32, i32
  }
  func.func @transform_4(%arg0: i32) -> (i32, i32) {
    %c0_i32 = arith.constant 0 : i32
    %c0_i32_0 = arith.constant 0 : i32
    %c0_i32_1 = arith.constant 0 : i32
    return %c0_i32, %c0_i32_0 : i32, i32
  }
  func.func @transform_5(%arg0: i32) -> (i32, i32) {
    %c0_i32 = arith.constant 0 : i32
    %c0_i32_0 = arith.constant 0 : i32
    return %arg0, %c0_i32 : i32, i32
  }
}

module attributes {stable_mosaic.version = 11 : i64} {
  func.func @_tail_kernel(%arg0: i32, %arg1: memref<8x4096xbf16, #tpu.memory_space<vmem>>, %arg2: memref<4096x256xbf16, #tpu.memory_space<vmem>>, %arg3: memref<1x256xf32, #tpu.memory_space<vmem>>, %arg4: memref<6x256xf32, #tpu.memory_space<vmem>>, %arg5: memref<9x256x256xbf16, #tpu.memory_space<vmem>>, %arg6: memref<256x256xbf16, #tpu.memory_space<vmem>>, %arg7: memref<6x256xf32, #tpu.memory_space<vmem>>, %arg8: memref<9x256x256xbf16, #tpu.memory_space<vmem>>, %arg9: memref<256x256xbf16, #tpu.memory_space<vmem>>, %arg10: memref<256x128xf32, #tpu.memory_space<vmem>>, %arg11: memref<1x128xf32, #tpu.memory_space<vmem>>, %arg12: memref<8x128xi32, #tpu.memory_space<vmem>>, %arg13: memref<8x256xf32, #tpu.memory_space<vmem>>) attributes {dimension_semantics = [#tpu.dimension_semantics<arbitrary>], iteration_bounds = array<i64: 1>, scalar_prefetch = 0 : i64, scratch_operands = 1 : i64, tpu.core_type = #tpu.core_type<tc>, window_params = [{pipeline_mode = #tpu.pipeline_mode<synchronous>, transform_indices = @transform_0, window_bounds = array<i64: 8, 4096>}, {pipeline_mode = #tpu.pipeline_mode<synchronous>, transform_indices = @transform_1, window_bounds = array<i64: 4096, 256>}, {pipeline_mode = #tpu.pipeline_mode<synchronous>, transform_indices = @transform_2, window_bounds = array<i64: 1, 256>}, {pipeline_mode = #tpu.pipeline_mode<synchronous>, transform_indices = @transform_3, window_bounds = array<i64: 6, 256>}, {pipeline_mode = #tpu.pipeline_mode<synchronous>, transform_indices = @transform_4, window_bounds = array<i64: 9, 256, 256>}, {pipeline_mode = #tpu.pipeline_mode<synchronous>, transform_indices = @transform_5, window_bounds = array<i64: 256, 256>}, {pipeline_mode = #tpu.pipeline_mode<synchronous>, transform_indices = @transform_6, window_bounds = array<i64: 6, 256>}, {pipeline_mode = #tpu.pipeline_mode<synchronous>, transform_indices = @transform_7, window_bounds = array<i64: 9, 256, 256>}, {pipeline_mode = #tpu.pipeline_mode<synchronous>, transform_indices = @transform_8, window_bounds = array<i64: 256, 256>}, {pipeline_mode = #tpu.pipeline_mode<synchronous>, transform_indices = @transform_9, window_bounds = array<i64: 256, 128>}, {pipeline_mode = #tpu.pipeline_mode<synchronous>, transform_indices = @transform_10, window_bounds = array<i64: 1, 128>}, {pipeline_mode = #tpu.pipeline_mode<synchronous>, transform_indices = @transform_11, window_bounds = array<i64: 8, 128>}]} {
    %c0 = arith.constant 0 : index
    %c0_0 = arith.constant 0 : index
    %0 = vector.load %arg1[%c0, %c0_0] : memref<8x4096xbf16, #tpu.memory_space<vmem>>, vector<8x4096xbf16>
    %c0_1 = arith.constant 0 : index
    %c0_2 = arith.constant 0 : index
    %1 = vector.load %arg2[%c0_1, %c0_2] : memref<4096x256xbf16, #tpu.memory_space<vmem>>, vector<4096x256xbf16>
    %cst = arith.constant dense<0.000000e+00> : vector<8x256xf32>
    %2 = tpu.matmul %0, %1, %cst {dimension_numbers = #tpu.dot_dimension_numbers<[1], [0], [0], [1], [0, 0, 1, 1], [], []>} : vector<8x4096xbf16>, vector<4096x256xbf16>, vector<8x256xf32> -> vector<8x256xf32>
    %c0_3 = arith.constant 0 : index
    %c0_4 = arith.constant 0 : index
    %3 = vector.load %arg3[%c0_3, %c0_4] : memref<1x256xf32, #tpu.memory_space<vmem>>, vector<1x256xf32>
    %4 = vector.broadcast %3 : vector<1x256xf32> to vector<8x256xf32>
    %5 = arith.addf %2, %4 : vector<8x256xf32>
    %c0_5 = arith.constant 0 : index
    %c0_6 = arith.constant 0 : index
    %6 = vector.load %arg4[%c0_5, %c0_6] : memref<6x256xf32, #tpu.memory_space<vmem>>, vector<6x256xf32>
    %7 = vector.extract_strided_slice %6 {offsets = [0, 0], sizes = [1, 256], strides = [1, 1]} : vector<6x256xf32> to vector<1x256xf32>
    %8 = vector.extract_strided_slice %6 {offsets = [1, 0], sizes = [1, 256], strides = [1, 1]} : vector<6x256xf32> to vector<1x256xf32>
    %9 = vector.extract_strided_slice %6 {offsets = [2, 0], sizes = [1, 256], strides = [1, 1]} : vector<6x256xf32> to vector<1x256xf32>
    %10 = vector.extract_strided_slice %6 {offsets = [3, 0], sizes = [1, 256], strides = [1, 1]} : vector<6x256xf32> to vector<1x256xf32>
    %11 = vector.extract_strided_slice %6 {offsets = [4, 0], sizes = [1, 256], strides = [1, 1]} : vector<6x256xf32> to vector<1x256xf32>
    %12 = vector.extract_strided_slice %6 {offsets = [5, 0], sizes = [1, 256], strides = [1, 1]} : vector<6x256xf32> to vector<1x256xf32>
    %13 = vector.broadcast %7 : vector<1x256xf32> to vector<8x256xf32>
    %14 = arith.mulf %5, %13 : vector<8x256xf32>
    %15 = vector.broadcast %8 : vector<1x256xf32> to vector<8x256xf32>
    %16 = arith.addf %14, %15 : vector<8x256xf32>
    %cst_7 = arith.constant 0.000000e+00 : f32
    %17 = vector.broadcast %cst_7 : f32 to vector<8x256xf32>
    %18 = arith.maximumf %16, %17 : vector<8x256xf32>
    %19 = arith.truncf %18 : vector<8x256xf32> to vector<8x256xbf16>
    %c0_8 = arith.constant 0 : index
    %c0_9 = arith.constant 0 : index
    %c0_10 = arith.constant 0 : index
    %20 = vector.load %arg5[%c0_8, %c0_9, %c0_10] : memref<9x256x256xbf16, #tpu.memory_space<vmem>>, vector<1x256x256xbf16>
    %21 = vector.shape_cast %20 : vector<1x256x256xbf16> to vector<256x256xbf16>
    %cst_11 = arith.constant dense<0.000000e+00> : vector<8x256xf32>
    %22 = tpu.matmul %19, %21, %cst_11 {dimension_numbers = #tpu.dot_dimension_numbers<[1], [0], [0], [1], [0, 0, 1, 1], [], []>} : vector<8x256xbf16>, vector<256x256xbf16>, vector<8x256xf32> -> vector<8x256xf32>
    %c1 = arith.constant 1 : index
    %c0_12 = arith.constant 0 : index
    %c0_13 = arith.constant 0 : index
    %23 = vector.load %arg5[%c1, %c0_12, %c0_13] : memref<9x256x256xbf16, #tpu.memory_space<vmem>>, vector<1x256x256xbf16>
    %24 = vector.shape_cast %23 : vector<1x256x256xbf16> to vector<256x256xbf16>
    %cst_14 = arith.constant dense<0.000000e+00> : vector<8x256xf32>
    %25 = tpu.matmul %19, %24, %cst_14 {dimension_numbers = #tpu.dot_dimension_numbers<[1], [0], [0], [1], [0, 0, 1, 1], [], []>} : vector<8x256xbf16>, vector<256x256xbf16>, vector<8x256xf32> -> vector<8x256xf32>
    %c2 = arith.constant 2 : index
    %c0_15 = arith.constant 0 : index
    %c0_16 = arith.constant 0 : index
    %26 = vector.load %arg5[%c2, %c0_15, %c0_16] : memref<9x256x256xbf16, #tpu.memory_space<vmem>>, vector<1x256x256xbf16>
    %27 = vector.shape_cast %26 : vector<1x256x256xbf16> to vector<256x256xbf16>
    %cst_17 = arith.constant dense<0.000000e+00> : vector<8x256xf32>
    %28 = tpu.matmul %19, %27, %cst_17 {dimension_numbers = #tpu.dot_dimension_numbers<[1], [0], [0], [1], [0, 0, 1, 1], [], []>} : vector<8x256xbf16>, vector<256x256xbf16>, vector<8x256xf32> -> vector<8x256xf32>
    %c3 = arith.constant 3 : index
    %c0_18 = arith.constant 0 : index
    %c0_19 = arith.constant 0 : index
    %29 = vector.load %arg5[%c3, %c0_18, %c0_19] : memref<9x256x256xbf16, #tpu.memory_space<vmem>>, vector<1x256x256xbf16>
    %30 = vector.shape_cast %29 : vector<1x256x256xbf16> to vector<256x256xbf16>
    %cst_20 = arith.constant dense<0.000000e+00> : vector<8x256xf32>
    %31 = tpu.matmul %19, %30, %cst_20 {dimension_numbers = #tpu.dot_dimension_numbers<[1], [0], [0], [1], [0, 0, 1, 1], [], []>} : vector<8x256xbf16>, vector<256x256xbf16>, vector<8x256xf32> -> vector<8x256xf32>
    %c4 = arith.constant 4 : index
    %c0_21 = arith.constant 0 : index
    %c0_22 = arith.constant 0 : index
    %32 = vector.load %arg5[%c4, %c0_21, %c0_22] : memref<9x256x256xbf16, #tpu.memory_space<vmem>>, vector<1x256x256xbf16>
    %33 = vector.shape_cast %32 : vector<1x256x256xbf16> to vector<256x256xbf16>
    %cst_23 = arith.constant dense<0.000000e+00> : vector<8x256xf32>
    %34 = tpu.matmul %19, %33, %cst_23 {dimension_numbers = #tpu.dot_dimension_numbers<[1], [0], [0], [1], [0, 0, 1, 1], [], []>} : vector<8x256xbf16>, vector<256x256xbf16>, vector<8x256xf32> -> vector<8x256xf32>
    %c5 = arith.constant 5 : index
    %c0_24 = arith.constant 0 : index
    %c0_25 = arith.constant 0 : index
    %35 = vector.load %arg5[%c5, %c0_24, %c0_25] : memref<9x256x256xbf16, #tpu.memory_space<vmem>>, vector<1x256x256xbf16>
    %36 = vector.shape_cast %35 : vector<1x256x256xbf16> to vector<256x256xbf16>
    %cst_26 = arith.constant dense<0.000000e+00> : vector<8x256xf32>
    %37 = tpu.matmul %19, %36, %cst_26 {dimension_numbers = #tpu.dot_dimension_numbers<[1], [0], [0], [1], [0, 0, 1, 1], [], []>} : vector<8x256xbf16>, vector<256x256xbf16>, vector<8x256xf32> -> vector<8x256xf32>
    %c6 = arith.constant 6 : index
    %c0_27 = arith.constant 0 : index
    %c0_28 = arith.constant 0 : index
    %38 = vector.load %arg5[%c6, %c0_27, %c0_28] : memref<9x256x256xbf16, #tpu.memory_space<vmem>>, vector<1x256x256xbf16>
    %39 = vector.shape_cast %38 : vector<1x256x256xbf16> to vector<256x256xbf16>
    %cst_29 = arith.constant dense<0.000000e+00> : vector<8x256xf32>
    %40 = tpu.matmul %19, %39, %cst_29 {dimension_numbers = #tpu.dot_dimension_numbers<[1], [0], [0], [1], [0, 0, 1, 1], [], []>} : vector<8x256xbf16>, vector<256x256xbf16>, vector<8x256xf32> -> vector<8x256xf32>
    %c7 = arith.constant 7 : index
    %c0_30 = arith.constant 0 : index
    %c0_31 = arith.constant 0 : index
    %41 = vector.load %arg5[%c7, %c0_30, %c0_31] : memref<9x256x256xbf16, #tpu.memory_space<vmem>>, vector<1x256x256xbf16>
    %42 = vector.shape_cast %41 : vector<1x256x256xbf16> to vector<256x256xbf16>
    %cst_32 = arith.constant dense<0.000000e+00> : vector<8x256xf32>
    %43 = tpu.matmul %19, %42, %cst_32 {dimension_numbers = #tpu.dot_dimension_numbers<[1], [0], [0], [1], [0, 0, 1, 1], [], []>} : vector<8x256xbf16>, vector<256x256xbf16>, vector<8x256xf32> -> vector<8x256xf32>
    %c8 = arith.constant 8 : index
    %c0_33 = arith.constant 0 : index
    %c0_34 = arith.constant 0 : index
    %44 = vector.load %arg5[%c8, %c0_33, %c0_34] : memref<9x256x256xbf16, #tpu.memory_space<vmem>>, vector<1x256x256xbf16>
    %45 = vector.shape_cast %44 : vector<1x256x256xbf16> to vector<256x256xbf16>
    %cst_35 = arith.constant dense<0.000000e+00> : vector<8x256xf32>
    %46 = tpu.matmul %19, %45, %cst_35 {dimension_numbers = #tpu.dot_dimension_numbers<[1], [0], [0], [1], [0, 0, 1, 1], [], []>} : vector<8x256xbf16>, vector<256x256xbf16>, vector<8x256xf32> -> vector<8x256xf32>
    %47 = vector.extract_strided_slice %34 {offsets = [0, 0], sizes = [2, 256], strides = [1, 1]} : vector<8x256xf32> to vector<2x256xf32>
    %48 = vector.broadcast %9 : vector<1x256xf32> to vector<2x256xf32>
    %49 = arith.addf %48, %47 : vector<2x256xf32>
    %50 = vector.extract_strided_slice %37 {offsets = [2, 0], sizes = [2, 256], strides = [1, 1]} : vector<8x256xf32> to vector<2x256xf32>
    %51 = arith.addf %49, %50 : vector<2x256xf32>
    %52 = vector.extract_strided_slice %43 {offsets = [4, 0], sizes = [2, 256], strides = [1, 1]} : vector<8x256xf32> to vector<2x256xf32>
    %53 = arith.addf %51, %52 : vector<2x256xf32>
    %54 = vector.extract_strided_slice %46 {offsets = [6, 0], sizes = [2, 256], strides = [1, 1]} : vector<8x256xf32> to vector<2x256xf32>
    %55 = arith.addf %53, %54 : vector<2x256xf32>
    %56 = vector.broadcast %10 : vector<1x256xf32> to vector<2x256xf32>
    %57 = arith.mulf %55, %56 : vector<2x256xf32>
    %58 = vector.broadcast %11 : vector<1x256xf32> to vector<2x256xf32>
    %59 = arith.addf %57, %58 : vector<2x256xf32>
    %cst_36 = arith.constant 0.000000e+00 : f32
    %60 = vector.broadcast %cst_36 : f32 to vector<2x256xf32>
    %61 = arith.maximumf %59, %60 : vector<2x256xf32>
    %c0_37 = arith.constant 0 : index
    %c0_38 = arith.constant 0 : index
    %62 = vector.load %arg13[%c0_37, %c0_38] : memref<8x256xf32, #tpu.memory_space<vmem>>, vector<2x256xf32>
    tpu.vector_store %arg13[%c0_37, %c0_38], %61 {strides = array<i32>} : memref<8x256xf32, #tpu.memory_space<vmem>>, vector<2x256xf32>,
    %63 = vector.extract_strided_slice %31 {offsets = [0, 0], sizes = [2, 256], strides = [1, 1]} : vector<8x256xf32> to vector<2x256xf32>
    %64 = vector.broadcast %9 : vector<1x256xf32> to vector<2x256xf32>
    %65 = arith.addf %64, %63 : vector<2x256xf32>
    %66 = vector.extract_strided_slice %34 {offsets = [2, 0], sizes = [2, 256], strides = [1, 1]} : vector<8x256xf32> to vector<2x256xf32>
    %67 = arith.addf %65, %66 : vector<2x256xf32>
    %68 = vector.extract_strided_slice %40 {offsets = [4, 0], sizes = [2, 256], strides = [1, 1]} : vector<8x256xf32> to vector<2x256xf32>
    %69 = arith.addf %67, %68 : vector<2x256xf32>
    %70 = vector.extract_strided_slice %43 {offsets = [6, 0], sizes = [2, 256], strides = [1, 1]} : vector<8x256xf32> to vector<2x256xf32>
    %71 = arith.addf %69, %70 : vector<2x256xf32>
    %72 = vector.broadcast %10 : vector<1x256xf32> to vector<2x256xf32>
    %73 = arith.mulf %71, %72 : vector<2x256xf32>
    %74 = vector.broadcast %11 : vector<1x256xf32> to vector<2x256xf32>
    %75 = arith.addf %73, %74 : vector<2x256xf32>
    %cst_39 = arith.constant 0.000000e+00 : f32
    %76 = vector.broadcast %cst_39 : f32 to vector<2x256xf32>
    %77 = arith.maximumf %75, %76 : vector<2x256xf32>
    %c2_40 = arith.constant 2 : index
    %c0_41 = arith.constant 0 : index
    %78 = vector.load %arg13[%c2_40, %c0_41] : memref<8x256xf32, #tpu.memory_space<vmem>>, vector<2x256xf32>
    tpu.vector_store %arg13[%c2_40, %c0_41], %77 {strides = array<i32>} : memref<8x256xf32, #tpu.memory_space<vmem>>, vector<2x256xf32>,
    %79 = vector.extract_strided_slice %25 {offsets = [0, 0], sizes = [2, 256], strides = [1, 1]} : vector<8x256xf32> to vector<2x256xf32>
    %80 = vector.broadcast %9 : vector<1x256xf32> to vector<2x256xf32>
    %81 = arith.addf %80, %79 : vector<2x256xf32>
    %82 = vector.extract_strided_slice %28 {offsets = [2, 0], sizes = [2, 256], strides = [1, 1]} : vector<8x256xf32> to vector<2x256xf32>
    %83 = arith.addf %81, %82 : vector<2x256xf32>
    %84 = vector.extract_strided_slice %34 {offsets = [4, 0], sizes = [2, 256], strides = [1, 1]} : vector<8x256xf32> to vector<2x256xf32>
    %85 = arith.addf %83, %84 : vector<2x256xf32>
    %86 = vector.extract_strided_slice %37 {offsets = [6, 0], sizes = [2, 256], strides = [1, 1]} : vector<8x256xf32> to vector<2x256xf32>
    %87 = arith.addf %85, %86 : vector<2x256xf32>
    %88 = vector.broadcast %10 : vector<1x256xf32> to vector<2x256xf32>
    %89 = arith.mulf %87, %88 : vector<2x256xf32>
    %90 = vector.broadcast %11 : vector<1x256xf32> to vector<2x256xf32>
    %91 = arith.addf %89, %90 : vector<2x256xf32>
    %cst_42 = arith.constant 0.000000e+00 : f32
    %92 = vector.broadcast %cst_42 : f32 to vector<2x256xf32>
    %93 = arith.maximumf %91, %92 : vector<2x256xf32>
    %c4_43 = arith.constant 4 : index
    %c0_44 = arith.constant 0 : index
    %94 = vector.load %arg13[%c4_43, %c0_44] : memref<8x256xf32, #tpu.memory_space<vmem>>, vector<2x256xf32>
    tpu.vector_store %arg13[%c4_43, %c0_44], %93 {strides = array<i32>} : memref<8x256xf32, #tpu.memory_space<vmem>>, vector<2x256xf32>,
    %95 = vector.extract_strided_slice %22 {offsets = [0, 0], sizes = [2, 256], strides = [1, 1]} : vector<8x256xf32> to vector<2x256xf32>
    %96 = vector.broadcast %9 : vector<1x256xf32> to vector<2x256xf32>
    %97 = arith.addf %96, %95 : vector<2x256xf32>
    %98 = vector.extract_strided_slice %25 {offsets = [2, 0], sizes = [2, 256], strides = [1, 1]} : vector<8x256xf32> to vector<2x256xf32>
    %99 = arith.addf %97, %98 : vector<2x256xf32>
    %100 = vector.extract_strided_slice %31 {offsets = [4, 0], sizes = [2, 256], strides = [1, 1]} : vector<8x256xf32> to vector<2x256xf32>
    %101 = arith.addf %99, %100 : vector<2x256xf32>
    %102 = vector.extract_strided_slice %34 {offsets = [6, 0], sizes = [2, 256], strides = [1, 1]} : vector<8x256xf32> to vector<2x256xf32>
    %103 = arith.addf %101, %102 : vector<2x256xf32>
    %104 = vector.broadcast %10 : vector<1x256xf32> to vector<2x256xf32>
    %105 = arith.mulf %103, %104 : vector<2x256xf32>
    %106 = vector.broadcast %11 : vector<1x256xf32> to vector<2x256xf32>
    %107 = arith.addf %105, %106 : vector<2x256xf32>
    %cst_45 = arith.constant 0.000000e+00 : f32
    %108 = vector.broadcast %cst_45 : f32 to vector<2x256xf32>
    %109 = arith.maximumf %107, %108 : vector<2x256xf32>
    %c6_46 = arith.constant 6 : index
    %c0_47 = arith.constant 0 : index
    %110 = vector.load %arg13[%c6_46, %c0_47] : memref<8x256xf32, #tpu.memory_space<vmem>>, vector<2x256xf32>
    tpu.vector_store %arg13[%c6_46, %c0_47], %109 {strides = array<i32>} : memref<8x256xf32, #tpu.memory_space<vmem>>, vector<2x256xf32>,
    %c0_48 = arith.constant 0 : index
    %c0_49 = arith.constant 0 : index
    %111 = vector.load %arg13[%c0_48, %c0_49] : memref<8x256xf32, #tpu.memory_space<vmem>>, vector<8x256xf32>
    %112 = arith.truncf %111 : vector<8x256xf32> to vector<8x256xbf16>
    %c0_50 = arith.constant 0 : index
    %c0_51 = arith.constant 0 : index
    %113 = vector.load %arg6[%c0_50, %c0_51] : memref<256x256xbf16, #tpu.memory_space<vmem>>, vector<256x256xbf16>
    %cst_52 = arith.constant dense<0.000000e+00> : vector<8x256xf32>
    %114 = tpu.matmul %112, %113, %cst_52 {dimension_numbers = #tpu.dot_dimension_numbers<[1], [0], [0], [1], [0, 0, 1, 1], [], []>} : vector<8x256xbf16>, vector<256x256xbf16>, vector<8x256xf32> -> vector<8x256xf32>
    %115 = arith.addf %5, %114 : vector<8x256xf32>
    %116 = vector.broadcast %12 : vector<1x256xf32> to vector<8x256xf32>
    %117 = arith.addf %115, %116 : vector<8x256xf32>
    %c0_53 = arith.constant 0 : index
    %c0_54 = arith.constant 0 : index
    %118 = vector.load %arg7[%c0_53, %c0_54] : memref<6x256xf32, #tpu.memory_space<vmem>>, vector<6x256xf32>
    %119 = vector.extract_strided_slice %118 {offsets = [0, 0], sizes = [1, 256], strides = [1, 1]} : vector<6x256xf32> to vector<1x256xf32>
    %120 = vector.extract_strided_slice %118 {offsets = [1, 0], sizes = [1, 256], strides = [1, 1]} : vector<6x256xf32> to vector<1x256xf32>
    %121 = vector.extract_strided_slice %118 {offsets = [2, 0], sizes = [1, 256], strides = [1, 1]} : vector<6x256xf32> to vector<1x256xf32>
    %122 = vector.extract_strided_slice %118 {offsets = [3, 0], sizes = [1, 256], strides = [1, 1]} : vector<6x256xf32> to vector<1x256xf32>
    %123 = vector.extract_strided_slice %118 {offsets = [4, 0], sizes = [1, 256], strides = [1, 1]} : vector<6x256xf32> to vector<1x256xf32>
    %124 = vector.extract_strided_slice %118 {offsets = [5, 0], sizes = [1, 256], strides = [1, 1]} : vector<6x256xf32> to vector<1x256xf32>
    %125 = vector.broadcast %119 : vector<1x256xf32> to vector<8x256xf32>
    %126 = arith.mulf %117, %125 : vector<8x256xf32>
    %127 = vector.broadcast %120 : vector<1x256xf32> to vector<8x256xf32>
    %128 = arith.addf %126, %127 : vector<8x256xf32>
    %cst_55 = arith.constant 0.000000e+00 : f32
    %129 = vector.broadcast %cst_55 : f32 to vector<8x256xf32>
    %130 = arith.maximumf %128, %129 : vector<8x256xf32>
    %131 = arith.truncf %130 : vector<8x256xf32> to vector<8x256xbf16>
    %c0_56 = arith.constant 0 : index
    %c0_57 = arith.constant 0 : index
    %c0_58 = arith.constant 0 : index
    %132 = vector.load %arg8[%c0_56, %c0_57, %c0_58] : memref<9x256x256xbf16, #tpu.memory_space<vmem>>, vector<1x256x256xbf16>
    %133 = vector.shape_cast %132 : vector<1x256x256xbf16> to vector<256x256xbf16>
    %cst_59 = arith.constant dense<0.000000e+00> : vector<8x256xf32>
    %134 = tpu.matmul %131, %133, %cst_59 {dimension_numbers = #tpu.dot_dimension_numbers<[1], [0], [0], [1], [0, 0, 1, 1], [], []>} : vector<8x256xbf16>, vector<256x256xbf16>, vector<8x256xf32> -> vector<8x256xf32>
    %c1_60 = arith.constant 1 : index
    %c0_61 = arith.constant 0 : index
    %c0_62 = arith.constant 0 : index
    %135 = vector.load %arg8[%c1_60, %c0_61, %c0_62] : memref<9x256x256xbf16, #tpu.memory_space<vmem>>, vector<1x256x256xbf16>
    %136 = vector.shape_cast %135 : vector<1x256x256xbf16> to vector<256x256xbf16>
    %cst_63 = arith.constant dense<0.000000e+00> : vector<8x256xf32>
    %137 = tpu.matmul %131, %136, %cst_63 {dimension_numbers = #tpu.dot_dimension_numbers<[1], [0], [0], [1], [0, 0, 1, 1], [], []>} : vector<8x256xbf16>, vector<256x256xbf16>, vector<8x256xf32> -> vector<8x256xf32>
    %c2_64 = arith.constant 2 : index
    %c0_65 = arith.constant 0 : index
    %c0_66 = arith.constant 0 : index
    %138 = vector.load %arg8[%c2_64, %c0_65, %c0_66] : memref<9x256x256xbf16, #tpu.memory_space<vmem>>, vector<1x256x256xbf16>
    %139 = vector.shape_cast %138 : vector<1x256x256xbf16> to vector<256x256xbf16>
    %cst_67 = arith.constant dense<0.000000e+00> : vector<8x256xf32>
    %140 = tpu.matmul %131, %139, %cst_67 {dimension_numbers = #tpu.dot_dimension_numbers<[1], [0], [0], [1], [0, 0, 1, 1], [], []>} : vector<8x256xbf16>, vector<256x256xbf16>, vector<8x256xf32> -> vector<8x256xf32>
    %c3_68 = arith.constant 3 : index
    %c0_69 = arith.constant 0 : index
    %c0_70 = arith.constant 0 : index
    %141 = vector.load %arg8[%c3_68, %c0_69, %c0_70] : memref<9x256x256xbf16, #tpu.memory_space<vmem>>, vector<1x256x256xbf16>
    %142 = vector.shape_cast %141 : vector<1x256x256xbf16> to vector<256x256xbf16>
    %cst_71 = arith.constant dense<0.000000e+00> : vector<8x256xf32>
    %143 = tpu.matmul %131, %142, %cst_71 {dimension_numbers = #tpu.dot_dimension_numbers<[1], [0], [0], [1], [0, 0, 1, 1], [], []>} : vector<8x256xbf16>, vector<256x256xbf16>, vector<8x256xf32> -> vector<8x256xf32>
    %c4_72 = arith.constant 4 : index
    %c0_73 = arith.constant 0 : index
    %c0_74 = arith.constant 0 : index
    %144 = vector.load %arg8[%c4_72, %c0_73, %c0_74] : memref<9x256x256xbf16, #tpu.memory_space<vmem>>, vector<1x256x256xbf16>
    %145 = vector.shape_cast %144 : vector<1x256x256xbf16> to vector<256x256xbf16>
    %cst_75 = arith.constant dense<0.000000e+00> : vector<8x256xf32>
    %146 = tpu.matmul %131, %145, %cst_75 {dimension_numbers = #tpu.dot_dimension_numbers<[1], [0], [0], [1], [0, 0, 1, 1], [], []>} : vector<8x256xbf16>, vector<256x256xbf16>, vector<8x256xf32> -> vector<8x256xf32>
    %c5_76 = arith.constant 5 : index
    %c0_77 = arith.constant 0 : index
    %c0_78 = arith.constant 0 : index
    %147 = vector.load %arg8[%c5_76, %c0_77, %c0_78] : memref<9x256x256xbf16, #tpu.memory_space<vmem>>, vector<1x256x256xbf16>
    %148 = vector.shape_cast %147 : vector<1x256x256xbf16> to vector<256x256xbf16>
    %cst_79 = arith.constant dense<0.000000e+00> : vector<8x256xf32>
    %149 = tpu.matmul %131, %148, %cst_79 {dimension_numbers = #tpu.dot_dimension_numbers<[1], [0], [0], [1], [0, 0, 1, 1], [], []>} : vector<8x256xbf16>, vector<256x256xbf16>, vector<8x256xf32> -> vector<8x256xf32>
    %c6_80 = arith.constant 6 : index
    %c0_81 = arith.constant 0 : index
    %c0_82 = arith.constant 0 : index
    %150 = vector.load %arg8[%c6_80, %c0_81, %c0_82] : memref<9x256x256xbf16, #tpu.memory_space<vmem>>, vector<1x256x256xbf16>
    %151 = vector.shape_cast %150 : vector<1x256x256xbf16> to vector<256x256xbf16>
    %cst_83 = arith.constant dense<0.000000e+00> : vector<8x256xf32>
    %152 = tpu.matmul %131, %151, %cst_83 {dimension_numbers = #tpu.dot_dimension_numbers<[1], [0], [0], [1], [0, 0, 1, 1], [], []>} : vector<8x256xbf16>, vector<256x256xbf16>, vector<8x256xf32> -> vector<8x256xf32>
    %c7_84 = arith.constant 7 : index
    %c0_85 = arith.constant 0 : index
    %c0_86 = arith.constant 0 : index
    %153 = vector.load %arg8[%c7_84, %c0_85, %c0_86] : memref<9x256x256xbf16, #tpu.memory_space<vmem>>, vector<1x256x256xbf16>
    %154 = vector.shape_cast %153 : vector<1x256x256xbf16> to vector<256x256xbf16>
    %cst_87 = arith.constant dense<0.000000e+00> : vector<8x256xf32>
    %155 = tpu.matmul %131, %154, %cst_87 {dimension_numbers = #tpu.dot_dimension_numbers<[1], [0], [0], [1], [0, 0, 1, 1], [], []>} : vector<8x256xbf16>, vector<256x256xbf16>, vector<8x256xf32> -> vector<8x256xf32>
    %c8_88 = arith.constant 8 : index
    %c0_89 = arith.constant 0 : index
    %c0_90 = arith.constant 0 : index
    %156 = vector.load %arg8[%c8_88, %c0_89, %c0_90] : memref<9x256x256xbf16, #tpu.memory_space<vmem>>, vector<1x256x256xbf16>
    %157 = vector.shape_cast %156 : vector<1x256x256xbf16> to vector<256x256xbf16>
    %cst_91 = arith.constant dense<0.000000e+00> : vector<8x256xf32>
    %158 = tpu.matmul %131, %157, %cst_91 {dimension_numbers = #tpu.dot_dimension_numbers<[1], [0], [0], [1], [0, 0, 1, 1], [], []>} : vector<8x256xbf16>, vector<256x256xbf16>, vector<8x256xf32> -> vector<8x256xf32>
    %159 = vector.extract_strided_slice %146 {offsets = [0, 0], sizes = [2, 256], strides = [1, 1]} : vector<8x256xf32> to vector<2x256xf32>
    %160 = vector.broadcast %121 : vector<1x256xf32> to vector<2x256xf32>
    %161 = arith.addf %160, %159 : vector<2x256xf32>
    %162 = vector.extract_strided_slice %149 {offsets = [2, 0], sizes = [2, 256], strides = [1, 1]} : vector<8x256xf32> to vector<2x256xf32>
    %163 = arith.addf %161, %162 : vector<2x256xf32>
    %164 = vector.extract_strided_slice %155 {offsets = [4, 0], sizes = [2, 256], strides = [1, 1]} : vector<8x256xf32> to vector<2x256xf32>
    %165 = arith.addf %163, %164 : vector<2x256xf32>
    %166 = vector.extract_strided_slice %158 {offsets = [6, 0], sizes = [2, 256], strides = [1, 1]} : vector<8x256xf32> to vector<2x256xf32>
    %167 = arith.addf %165, %166 : vector<2x256xf32>
    %168 = vector.broadcast %122 : vector<1x256xf32> to vector<2x256xf32>
    %169 = arith.mulf %167, %168 : vector<2x256xf32>
    %170 = vector.broadcast %123 : vector<1x256xf32> to vector<2x256xf32>
    %171 = arith.addf %169, %170 : vector<2x256xf32>
    %cst_92 = arith.constant 0.000000e+00 : f32
    %172 = vector.broadcast %cst_92 : f32 to vector<2x256xf32>
    %173 = arith.maximumf %171, %172 : vector<2x256xf32>
    %c0_93 = arith.constant 0 : index
    %c0_94 = arith.constant 0 : index
    %174 = vector.load %arg13[%c0_93, %c0_94] : memref<8x256xf32, #tpu.memory_space<vmem>>, vector<2x256xf32>
    tpu.vector_store %arg13[%c0_93, %c0_94], %173 {strides = array<i32>} : memref<8x256xf32, #tpu.memory_space<vmem>>, vector<2x256xf32>,
    %175 = vector.extract_strided_slice %143 {offsets = [0, 0], sizes = [2, 256], strides = [1, 1]} : vector<8x256xf32> to vector<2x256xf32>
    %176 = vector.broadcast %121 : vector<1x256xf32> to vector<2x256xf32>
    %177 = arith.addf %176, %175 : vector<2x256xf32>
    %178 = vector.extract_strided_slice %146 {offsets = [2, 0], sizes = [2, 256], strides = [1, 1]} : vector<8x256xf32> to vector<2x256xf32>
    %179 = arith.addf %177, %178 : vector<2x256xf32>
    %180 = vector.extract_strided_slice %152 {offsets = [4, 0], sizes = [2, 256], strides = [1, 1]} : vector<8x256xf32> to vector<2x256xf32>
    %181 = arith.addf %179, %180 : vector<2x256xf32>
    %182 = vector.extract_strided_slice %155 {offsets = [6, 0], sizes = [2, 256], strides = [1, 1]} : vector<8x256xf32> to vector<2x256xf32>
    %183 = arith.addf %181, %182 : vector<2x256xf32>
    %184 = vector.broadcast %122 : vector<1x256xf32> to vector<2x256xf32>
    %185 = arith.mulf %183, %184 : vector<2x256xf32>
    %186 = vector.broadcast %123 : vector<1x256xf32> to vector<2x256xf32>
    %187 = arith.addf %185, %186 : vector<2x256xf32>
    %cst_95 = arith.constant 0.000000e+00 : f32
    %188 = vector.broadcast %cst_95 : f32 to vector<2x256xf32>
    %189 = arith.maximumf %187, %188 : vector<2x256xf32>
    %c2_96 = arith.constant 2 : index
    %c0_97 = arith.constant 0 : index
    %190 = vector.load %arg13[%c2_96, %c0_97] : memref<8x256xf32, #tpu.memory_space<vmem>>, vector<2x256xf32>
    tpu.vector_store %arg13[%c2_96, %c0_97], %189 {strides = array<i32>} : memref<8x256xf32, #tpu.memory_space<vmem>>, vector<2x256xf32>,
    %191 = vector.extract_strided_slice %137 {offsets = [0, 0], sizes = [2, 256], strides = [1, 1]} : vector<8x256xf32> to vector<2x256xf32>
    %192 = vector.broadcast %121 : vector<1x256xf32> to vector<2x256xf32>
    %193 = arith.addf %192, %191 : vector<2x256xf32>
    %194 = vector.extract_strided_slice %140 {offsets = [2, 0], sizes = [2, 256], strides = [1, 1]} : vector<8x256xf32> to vector<2x256xf32>
    %195 = arith.addf %193, %194 : vector<2x256xf32>
    %196 = vector.extract_strided_slice %146 {offsets = [4, 0], sizes = [2, 256], strides = [1, 1]} : vector<8x256xf32> to vector<2x256xf32>
    %197 = arith.addf %195, %196 : vector<2x256xf32>
    %198 = vector.extract_strided_slice %149 {offsets = [6, 0], sizes = [2, 256], strides = [1, 1]} : vector<8x256xf32> to vector<2x256xf32>
    %199 = arith.addf %197, %198 : vector<2x256xf32>
    %200 = vector.broadcast %122 : vector<1x256xf32> to vector<2x256xf32>
    %201 = arith.mulf %199, %200 : vector<2x256xf32>
    %202 = vector.broadcast %123 : vector<1x256xf32> to vector<2x256xf32>
    %203 = arith.addf %201, %202 : vector<2x256xf32>
    %cst_98 = arith.constant 0.000000e+00 : f32
    %204 = vector.broadcast %cst_98 : f32 to vector<2x256xf32>
    %205 = arith.maximumf %203, %204 : vector<2x256xf32>
    %c4_99 = arith.constant 4 : index
    %c0_100 = arith.constant 0 : index
    %206 = vector.load %arg13[%c4_99, %c0_100] : memref<8x256xf32, #tpu.memory_space<vmem>>, vector<2x256xf32>
    tpu.vector_store %arg13[%c4_99, %c0_100], %205 {strides = array<i32>} : memref<8x256xf32, #tpu.memory_space<vmem>>, vector<2x256xf32>,
    %207 = vector.extract_strided_slice %134 {offsets = [0, 0], sizes = [2, 256], strides = [1, 1]} : vector<8x256xf32> to vector<2x256xf32>
    %208 = vector.broadcast %121 : vector<1x256xf32> to vector<2x256xf32>
    %209 = arith.addf %208, %207 : vector<2x256xf32>
    %210 = vector.extract_strided_slice %137 {offsets = [2, 0], sizes = [2, 256], strides = [1, 1]} : vector<8x256xf32> to vector<2x256xf32>
    %211 = arith.addf %209, %210 : vector<2x256xf32>
    %212 = vector.extract_strided_slice %143 {offsets = [4, 0], sizes = [2, 256], strides = [1, 1]} : vector<8x256xf32> to vector<2x256xf32>
    %213 = arith.addf %211, %212 : vector<2x256xf32>
    %214 = vector.extract_strided_slice %146 {offsets = [6, 0], sizes = [2, 256], strides = [1, 1]} : vector<8x256xf32> to vector<2x256xf32>
    %215 = arith.addf %213, %214 : vector<2x256xf32>
    %216 = vector.broadcast %122 : vector<1x256xf32> to vector<2x256xf32>
    %217 = arith.mulf %215, %216 : vector<2x256xf32>
    %218 = vector.broadcast %123 : vector<1x256xf32> to vector<2x256xf32>
    %219 = arith.addf %217, %218 : vector<2x256xf32>
    %cst_101 = arith.constant 0.000000e+00 : f32
    %220 = vector.broadcast %cst_101 : f32 to vector<2x256xf32>
    %221 = arith.maximumf %219, %220 : vector<2x256xf32>
    %c6_102 = arith.constant 6 : index
    %c0_103 = arith.constant 0 : index
    %222 = vector.load %arg13[%c6_102, %c0_103] : memref<8x256xf32, #tpu.memory_space<vmem>>, vector<2x256xf32>
    tpu.vector_store %arg13[%c6_102, %c0_103], %221 {strides = array<i32>} : memref<8x256xf32, #tpu.memory_space<vmem>>, vector<2x256xf32>,
    %c0_104 = arith.constant 0 : index
    %c0_105 = arith.constant 0 : index
    %223 = vector.load %arg13[%c0_104, %c0_105] : memref<8x256xf32, #tpu.memory_space<vmem>>, vector<8x256xf32>
    %224 = arith.truncf %223 : vector<8x256xf32> to vector<8x256xbf16>
    %c0_106 = arith.constant 0 : index
    %c0_107 = arith.constant 0 : index
    %225 = vector.load %arg9[%c0_106, %c0_107] : memref<256x256xbf16, #tpu.memory_space<vmem>>, vector<256x256xbf16>
    %cst_108 = arith.constant dense<0.000000e+00> : vector<8x256xf32>
    %226 = tpu.matmul %224, %225, %cst_108 {dimension_numbers = #tpu.dot_dimension_numbers<[1], [0], [0], [1], [0, 0, 1, 1], [], []>} : vector<8x256xbf16>, vector<256x256xbf16>, vector<8x256xf32> -> vector<8x256xf32>
    %227 = arith.addf %117, %226 : vector<8x256xf32>
    %228 = vector.broadcast %124 : vector<1x256xf32> to vector<8x256xf32>
    %229 = arith.addf %227, %228 : vector<8x256xf32>
    %c0_109 = arith.constant 0 : index
    %c0_110 = arith.constant 0 : index
    %230 = vector.load %arg10[%c0_109, %c0_110] : memref<256x128xf32, #tpu.memory_space<vmem>>, vector<256x128xf32>
    %cst_111 = arith.constant dense<0.000000e+00> : vector<8x128xf32>
    %231 = tpu.matmul %229, %230, %cst_111 {dimension_numbers = #tpu.dot_dimension_numbers<[1], [0], [0], [1], [0, 0, 1, 1], [], []>} : vector<8x256xf32>, vector<256x128xf32>, vector<8x128xf32> -> vector<8x128xf32>
    %cst_112 = arith.constant 2.000000e+00 : f32
    %232 = vector.broadcast %cst_112 : f32 to vector<8x128xf32>
    %233 = arith.mulf %232, %231 : vector<8x128xf32>
    %c0_113 = arith.constant 0 : index
    %c0_114 = arith.constant 0 : index
    %234 = vector.load %arg11[%c0_113, %c0_114] : memref<1x128xf32, #tpu.memory_space<vmem>>, vector<1x128xf32>
    %235 = vector.broadcast %234 : vector<1x128xf32> to vector<8x128xf32>
    %236 = arith.subf %233, %235 : vector<8x128xf32>
    %cst_115 = arith.constant dense<0xFF800000> : vector<8xf32>
    %237 = vector.multi_reduction <maximumf>, %236, %cst_115 [1] : vector<8x128xf32> to vector<8xf32>
    %238 = vector.shape_cast %237 : vector<8xf32> to vector<8x1xf32>
    %239 = tpu.iota {dimensions = array<i32: 1>} : vector<8x128xi32>
    %240 = vector.broadcast %238 : vector<8x1xf32> to vector<8x128xf32>
    %241 = arith.cmpf oge, %236, %240 : vector<8x128xf32>
    %c128_i32 = arith.constant 128 : i32
    %242 = vector.broadcast %c128_i32 : i32 to vector<8x128xi32>
    %243 = arith.select %241, %239, %242 : vector<8x128xi1>, vector<8x128xi32>
    %cst_116 = arith.constant dense<2147483647> : vector<8xi32>
    %244 = vector.multi_reduction <minsi>, %243, %cst_116 [1] : vector<8x128xi32> to vector<8xi32>
    %245 = vector.shape_cast %244 : vector<8xi32> to vector<8x1xi32>
    %246 = vector.shape_cast %245 : vector<8x1xi32> to vector<8x1xi32>
    %247 = vector.broadcast %246 : vector<8x1xi32> to vector<8x128xi32>
    %c0_117 = arith.constant 0 : index
    %c0_118 = arith.constant 0 : index
    %248 = vector.load %arg12[%c0_117, %c0_118] : memref<8x128xi32, #tpu.memory_space<vmem>>, vector<8x128xi32>
    tpu.vector_store %arg12[%c0_117, %c0_118], %247 {strides = array<i32>} : memref<8x128xi32, #tpu.memory_space<vmem>>, vector<8x128xi32>,
    return
  }
  func.func @transform_0(%arg0: i32) -> (i32, i32) {
    %c0_i32 = arith.constant 0 : i32
    %c0_i32_0 = arith.constant 0 : i32
    %c0_i32_1 = arith.constant 0 : i32
    return %c0_i32, %c0_i32_0 : i32, i32
  }
  func.func @transform_1(%arg0: i32) -> (i32, i32) {
    %c0_i32 = arith.constant 0 : i32
    %c0_i32_0 = arith.constant 0 : i32
    %c0_i32_1 = arith.constant 0 : i32
    return %c0_i32, %c0_i32_0 : i32, i32
  }
  func.func @transform_2(%arg0: i32) -> (i32, i32) {
    %c0_i32 = arith.constant 0 : i32
    %c0_i32_0 = arith.constant 0 : i32
    %c0_i32_1 = arith.constant 0 : i32
    return %c0_i32, %c0_i32_0 : i32, i32
  }
  func.func @transform_3(%arg0: i32) -> (i32, i32) {
    %c0_i32 = arith.constant 0 : i32
    %c0_i32_0 = arith.constant 0 : i32
    %c0_i32_1 = arith.constant 0 : i32
    return %c0_i32, %c0_i32_0 : i32, i32
  }
  func.func @transform_4(%arg0: i32) -> (i32, i32, i32) {
    %c0_i32 = arith.constant 0 : i32
    %c0_i32_0 = arith.constant 0 : i32
    %c0_i32_1 = arith.constant 0 : i32
    %c0_i32_2 = arith.constant 0 : i32
    return %c0_i32, %c0_i32_0, %c0_i32_1 : i32, i32, i32
  }
  func.func @transform_5(%arg0: i32) -> (i32, i32) {
    %c0_i32 = arith.constant 0 : i32
    %c0_i32_0 = arith.constant 0 : i32
    %c0_i32_1 = arith.constant 0 : i32
    return %c0_i32, %c0_i32_0 : i32, i32
  }
  func.func @transform_6(%arg0: i32) -> (i32, i32) {
    %c0_i32 = arith.constant 0 : i32
    %c0_i32_0 = arith.constant 0 : i32
    %c0_i32_1 = arith.constant 0 : i32
    return %c0_i32, %c0_i32_0 : i32, i32
  }
  func.func @transform_7(%arg0: i32) -> (i32, i32, i32) {
    %c0_i32 = arith.constant 0 : i32
    %c0_i32_0 = arith.constant 0 : i32
    %c0_i32_1 = arith.constant 0 : i32
    %c0_i32_2 = arith.constant 0 : i32
    return %c0_i32, %c0_i32_0, %c0_i32_1 : i32, i32, i32
  }
  func.func @transform_8(%arg0: i32) -> (i32, i32) {
    %c0_i32 = arith.constant 0 : i32
    %c0_i32_0 = arith.constant 0 : i32
    %c0_i32_1 = arith.constant 0 : i32
    return %c0_i32, %c0_i32_0 : i32, i32
  }
  func.func @transform_9(%arg0: i32) -> (i32, i32) {
    %c0_i32 = arith.constant 0 : i32
    %c0_i32_0 = arith.constant 0 : i32
    %c0_i32_1 = arith.constant 0 : i32
    return %c0_i32, %c0_i32_0 : i32, i32
  }
  func.func @transform_10(%arg0: i32) -> (i32, i32) {
    %c0_i32 = arith.constant 0 : i32
    %c0_i32_0 = arith.constant 0 : i32
    %c0_i32_1 = arith.constant 0 : i32
    return %c0_i32, %c0_i32_0 : i32, i32
  }
  func.func @transform_11(%arg0: i32) -> (i32, i32) {
    %c0_i32 = arith.constant 0 : i32
    %c0_i32_0 = arith.constant 0 : i32
    %c0_i32_1 = arith.constant 0 : i32
    return %c0_i32, %c0_i32_0 : i32, i32
  }
}

</mosaic_0001>

<bundles_post_ra>
// kernel: encode.4
= control target key start
LH: loop header
LB: loop body
LE: loop exit
PB: predicated region body
PF: predicated region fallthrough
CT: control target
= control target key end

     0   :  { %s1371_s18 = smov 0   ;;  %s1721_s0 = inlined_call_operand.vmem [shape: bf16[512,128], index: 0, kind: input, shape index: {}]   ;;  %s1722_s1 = inlined_call_operand.vmem [shape: bf16[128,256], index: 1, kind: input, shape index: {}]   ;;  %s1723_s2 = inlined_call_operand.vmem [shape: f32[1,256], index: 2, kind: input, shape index: {}]   ;;  %s1724_s3 = inlined_call_operand.vmem [shape: f32[1,256], index: 3, kind: input, shape index: {}]   ;;  %s1725_s4 = inlined_call_operand.vmem [shape: f32[1,256], index: 4, kind: input, shape index: {}]   ;;  %s1726_s5 = inlined_call_operand.vmem [shape: bf16[512,256], index: 5, kind: output, shape index: {}]  }
   0x1 LB: > { %s1158_s19 = sadd.s32 4294967295, %s1338_s18   ;;  %p1162_p0 = scmp.ge.s32.totalorder %s1338_s18, 1  ;;  %s1338_s18 = sphi %s1371_s18, %s15_s18  }
   0x2   : > { %p188_p1 = scmp.lt.s32.totalorder %s1338_s18, 3 }
   0x4   : > { %p189_p2 = pnand %p1162_p0, %p188_p1 }
   0x5   : > { %v1292_v0 = vld [vmem:[%s1722_s1 + $0x4] ss:$8 sps:$4 sm:$0xff] (!%p189_p2)   ;;  %s1163_s22 = sshll.u32 (!%p189_p2), %s1158_s19, 5  ;;  %v1294_v1 = vld [vmem:[%s1722_s1] ss:$8 sps:$4 sm:$0xff] (!%p189_p2)   ;;  %v1340_v2 = vmov (!%p189_p2), 0   ;;  %v281_v33 = vlaneseq (!%p189_p2) }
   0x6   : > { %192 = sbr.rel (%p189_p2) target bundleno = 331 (0x14b), region = 40  ;;  %499 = vmatprep.mubr.bf16.mxu0 (!%p189_p2), %v1340_v2  ;;  %579 = vmatprep.mubr.bf16.mxu1 (!%p189_p2), %v1340_v2  ;;  %p218_p3 = scmp.lt.s32.totalorder (!%p189_p2), %s1163_s22, 63  ;;  %v1295_v3 = vld [vmem:[%s1722_s1 + $0x14] ss:$8 sps:$4 sm:$0xff] (!%p189_p2)   ;;  %v1297_v4 = vld [vmem:[%s1722_s1 + $0x10] ss:$8 sps:$4 sm:$0xff] (!%p189_p2)  }
   0x7   : > { %467 = vmatprep.subr.bf16.mxu0 (!%p189_p2), %v1292_v0  ;;  %1267 = vmatprep.subr.bf16.mxu1 (!%p189_p2), %v1292_v0  ;;  %v1298_v5 = vld [vmem:[%s1722_s1 + $0x24] ss:$8 sps:$4 sm:$0xff] (!%p189_p2)   ;;  %v1300_v6 = vld [vmem:[%s1722_s1 + $0x20] ss:$8 sps:$4 sm:$0xff] (!%p189_p2)   ;;  %v1301_v7 = vld [vmem:[%s1722_s1 + $0x34] ss:$8 sps:$4 sm:$0xff] (!%p189_p2)  }
   0x8   : > { %468 = vmatpush1.bf16.msra.mxu0 (!%p189_p2), %v1294_v1  ;;  %1275 = vmatpush1.bf16.msra.mxu1 (!%p189_p2), %v1294_v1  ;;  %v1303_v8 = vld [vmem:[%s1722_s1 + $0x30] ss:$8 sps:$4 sm:$0xff] (!%p189_p2)   ;;  %v1304_v9 = vld [vmem:[%s1722_s1 + $0x44] ss:$8 sps:$4 sm:$0xff] (!%p189_p2)   ;;  %v1306_v10 = vld [vmem:[%s1722_s1 + $0x40] ss:$8 sps:$4 sm:$0xff] (!%p189_p2)  }
   0x9   : > { %469 = vmatprep.subr.bf16.mxu0 (!%p189_p2), %v1295_v3  ;;  %1268 = vmatprep.subr.bf16.mxu1 (!%p189_p2), %v1295_v3  ;;  %v1307_v11 = vld [vmem:[%s1722_s1 + $0x54] ss:$8 sps:$4 sm:$0xff] (!%p189_p2)   ;;  %v1309_v12 = vld [vmem:[%s1722_s1 + $0x50] ss:$8 sps:$4 sm:$0xff] (!%p189_p2)   ;;  %v1310_v13 = vld [vmem:[%s1722_s1 + $0x64] ss:$8 sps:$4 sm:$0xff] (!%p189_p2)  }
   0xa   : > { %v1312_v14 = vld [vmem:[%s1722_s1 + $0x60] ss:$8 sps:$4 sm:$0xff] (!%p189_p2)   ;;  %v1313_v15 = vld [vmem:[%s1722_s1 + $0x74] ss:$8 sps:$4 sm:$0xff] (!%p189_p2)   ;;  %v1315_v16 = vld [vmem:[%s1722_s1 + $0x70] ss:$8 sps:$4 sm:$0xff] (!%p189_p2)  }
   0xb   : > { %v282_v34 = vshrl.u32 (!%p189_p2), %v281_v33, 7  ;;  %v279_v36 = vld [vmem:[%s1723_s2] sm:$0x3] (!%p189_p2) }
   0xc   : > { %470 = vmatpush1.bf16.msra.mxu0 (!%p189_p2), %v1297_v4  ;;  %1276 = vmatpush1.bf16.msra.mxu1 (!%p189_p2), %v1297_v4  ;;  %v724_v39 = vld [vmem:[%s1724_s3] sm:$0x3] (!%p189_p2) }
   0xd   : > { %s1728_s22 = smov (!%p218_p3, %s1163_s22), 63  ;;  %471 = vmatprep.subr.bf16.mxu0 %v1298_v5  ;;  %1269 = vmatprep.subr.bf16.mxu1 %v1298_v5  ;;  %v283_v35 = vsub.s32 0, %v282_v34  ;;  %v287_v37 = vsub.s32 1, %v282_v34  ;;  %v800_v41 = vld [vmem:[%s1725_s4] sm:$0x3] }
   0xe   : > { %s1164_s6 = sshll.u32 %s1728_s22, 2  ;;  %s1234_s15 = sshll.u32 %s1728_s22, 3 }
   0xf   : > { %s1408_s13 = scalar_lea.vmem %s1721_s0, %s1164_s6  ;;  %v1470_v38 = vrot.slane %v279_v36, %v283_v35  ;;  %v1475_v40 = vrot.slane %v279_v36, %v287_v37  ;;  %v1481_v45 = vrot.slane %v724_v39, %v283_v35  ;;  %v1484_v48 = vrot.slane %v724_v39, %v287_v37  ;;  %s1512_s17 = scalar_lea.vmem %s1726_s5, %s1234_s15 }
  0x10   : > { %472 = vmatpush1.bf16.msra.mxu0 %v1300_v6  ;;  %1277 = vmatpush1.bf16.msra.mxu1 %v1300_v6  ;;  %v1316_v17 = vld [vmem:[%s1408_s13] sm:$0xff]   ;;  %v1318_v19 = vld [vmem:[%s1408_s13 + $0x8] sm:$0xff]   ;;  %v1320_v21 = vld [vmem:[%s1408_s13 + $0x10] sm:$0xff]   ;;  %v1486_v50 = vrot.slane %v800_v41, %v283_v35  ;;  %v1489_v52 = vrot.slane %v800_v41, %v287_v37 }
  0x11   : > { %473 = vmatprep.subr.bf16.mxu0 %v1301_v7  ;;  %1270 = vmatprep.subr.bf16.mxu1 %v1301_v7  ;;  %v1317_v18 = vld [vmem:[%s1408_s13 + $0x40] sm:$0xff]   ;;  %v1319_v20 = vld [vmem:[%s1408_s13 + $0x48] sm:$0xff]   ;;  %v1321_v22 = vld [vmem:[%s1408_s13 + $0x50] sm:$0xff]  }
  0x12   : > { %v1322_v23 = vld [vmem:[%s1408_s13 + $0x18] sm:$0xff]   ;;  %v1324_v25 = vld [vmem:[%s1408_s13 + $0x20] sm:$0xff]   ;;  %v1326_v27 = vld [vmem:[%s1408_s13 + $0x28] sm:$0xff]  }
  0x13   : > { %v1323_v24 = vld [vmem:[%s1408_s13 + $0x58] sm:$0xff]   ;;  %v1325_v26 = vld [vmem:[%s1408_s13 + $0x60] sm:$0xff]   ;;  %v1327_v28 = vld [vmem:[%s1408_s13 + $0x68] sm:$0xff]  }
  0x14   : > { %474 = vmatpush1.bf16.msra.mxu0 %v1303_v8  ;;  %1278 = vmatpush1.bf16.msra.mxu1 %v1303_v8  ;;  %v1328_v29 = vld [vmem:[%s1408_s13 + $0x30] sm:$0xff]   ;;  %v1330_v31 = vld [vmem:[%s1408_s13 + $0x38] sm:$0xff]  }
  0x15   : > { %475 = vmatprep.subr.bf16.mxu0 %v1304_v9  ;;  %1271 = vmatprep.subr.bf16.mxu1 %v1304_v9  ;;  %v1329_v30 = vld [vmem:[%s1408_s13 + $0x70] sm:$0xff]   ;;  %v1331_v32 = vld [vmem:[%s1408_s13 + $0x78] sm:$0xff]  }
  0x18   : > { %476 = vmatpush1.bf16.msra.mxu0 %v1306_v10  ;;  %1279 = vmatpush1.bf16.msra.mxu1 %v1306_v10 }
  0x19   : > { %477 = vmatprep.subr.bf16.mxu0 %v1307_v11  ;;  %1272 = vmatprep.subr.bf16.mxu1 %v1307_v11 }
  0x1c   : > { %478 = vmatpush1.bf16.msra.mxu0 %v1309_v12  ;;  %1280 = vmatpush1.bf16.msra.mxu1 %v1309_v12 }
  0x1d   : > { %479 = vmatprep.subr.bf16.mxu0 %v1310_v13  ;;  %1273 = vmatprep.subr.bf16.mxu1 %v1310_v13 }
  0x20   : > { %480 = vmatpush1.bf16.msra.mxu0 %v1312_v14  ;;  %1281 = vmatpush1.bf16.msra.mxu1 %v1312_v14 }
  0x21   : > { %481 = vmatprep.subr.bf16.mxu0 %v1313_v15  ;;  %1274 = vmatprep.subr.bf16.mxu1 %v1313_v15 }
  0x24   : > { %482 = vmatpush1.bf16.msra.mxu0 %v1315_v16  ;;  %1282 = vmatpush1.bf16.msra.mxu1 %v1315_v16 }
  0x27   : > { %500 = vmatmul.mubr.bf16.vlgmr.msra.gmra.mrb[0].mxu0 %v1316_v17  ;;  %580 = vmatmul.mubr.bf16.vlgmr.msra.gmra.mrb[0].mxu1 %v1317_v18 }
  0x28   : > { %509 = vmatprep.mubr.bf16.mxu0 %v1340_v2  ;;  %589 = vmatprep.mubr.bf16.mxu1 %v1340_v2 }
  0x2f   : > { %510 = vmatmul.mubr.bf16.gmra.mrb[4].mxu0 %v1318_v19  ;;  %590 = vmatmul.mubr.bf16.gmra.mrb[4].mxu1 %v1319_v20 }
  0x30   : > { %519 = vmatprep.mubr.bf16.mxu0 %v1340_v2  ;;  %599 = vmatprep.mubr.bf16.mxu1 %v1340_v2 }
  0x37   : > { %520 = vmatmul.mubr.bf16.gmra.mrb[8].mxu0 %v1320_v21  ;;  %600 = vmatmul.mubr.bf16.gmra.mrb[8].mxu1 %v1321_v22 }
  0x38   : > { %529 = vmatprep.mubr.bf16.mxu0 %v1340_v2  ;;  %609 = vmatprep.mubr.bf16.mxu1 %v1340_v2 }
  0x3f   : > { %530 = vmatmul.mubr.bf16.gmra.mrb[12].mxu0 %v1322_v23  ;;  %610 = vmatmul.mubr.bf16.gmra.mrb[12].mxu1 %v1323_v24 }
  0x40   : > { %539 = vmatprep.mubr.bf16.mxu0 %v1340_v2  ;;  %619 = vmatprep.mubr.bf16.mxu1 %v1340_v2 }
  0x47   : > { %540 = vmatmul.mubr.bf16.gmra.mrb[16].mxu0 %v1324_v25  ;;  %620 = vmatmul.mubr.bf16.gmra.mrb[16].mxu1 %v1325_v26 }
  0x48   : > { %549 = vmatprep.mubr.bf16.mxu0 %v1340_v2  ;;  %629 = vmatprep.mubr.bf16.mxu1 %v1340_v2 }
  0x4f   : > { %550 = vmatmul.mubr.bf16.gmra.mrb[20].mxu0 %v1326_v27  ;;  %630 = vmatmul.mubr.bf16.gmra.mrb[20].mxu1 %v1327_v28 }
  0x50   : > { %559 = vmatprep.mubr.bf16.mxu0 %v1340_v2  ;;  %639 = vmatprep.mubr.bf16.mxu1 %v1340_v2 }
  0x57   : > { %560 = vmatmul.mubr.bf16.gmra.mrb[24].mxu0 %v1328_v29  ;;  %640 = vmatmul.mubr.bf16.gmra.mrb[24].mxu1 %v1329_v30 }
  0x58   : > { %569 = vmatprep.mubr.bf16.mxu0 %v1340_v2  ;;  %649 = vmatprep.mubr.bf16.mxu1 %v1340_v2 }
  0x5f   : > { %570 = vmatmul.mubr.bf16.gmra.mrb[28].mxu0 %v1330_v31  ;;  %650 = vmatmul.mubr.bf16.gmra.mrb[28].mxu1 %v1331_v32 }
  0xfa   : > { %v501_v42 = vpop.f32.mrb[0].mxu0  ;;  %v581_v43 = vpop.f32.mrb[0].mxu1 }
  0xfb   : > { %v502_v44 = vadd.f32 %v501_v42, %v1470_v38  ;;  %v582_v46 = vadd.f32 %v581_v43, %v1470_v38  ;;  %v503_v47 = vpop.f32.mrb[1].mxu0  ;;  %v583_v49 = vpop.f32.mrb[1].mxu1 }
  0xfc   : > { %v504_v51 = vadd.f32 %v503_v47, %v1475_v40  ;;  %v584_v53 = vadd.f32 %v583_v49, %v1475_v40  ;;  %v505_v54 = vpop.f32.mrb[2].mxu0  ;;  %v585_v55 = vpop.f32.mrb[2].mxu1 }
  0xfd   : > { %v660_v56 = vmax.f32 %v502_v44, 0.0  ;;  %v692_v57 = vmax.f32 %v582_v46, 0.0  ;;  %v506_v58 = vadd.f32 %v505_v54, %v1470_v38  ;;  %v586_v59 = vadd.f32 %v585_v55, %v1470_v38  ;;  %v507_v60 = vpop.f32.mrb[3].mxu0  ;;  %v587_v61 = vpop.f32.mrb[3].mxu1 }
  0xfe   : > { %v661_v62 = vmax.f32 %v504_v51, 0.0  ;;  %v693_v63 = vmax.f32 %v584_v53, 0.0  ;;  %v508_v0 = vadd.f32 %v507_v60, %v1475_v40  ;;  %v588_v1 = vadd.f32 %v587_v61, %v1475_v40 }
  0xff   : > { %v736_v2 = vmul.f32 %v1481_v45, %v660_v56  ;;  %v768_v3 = vmul.f32 %v1481_v45, %v692_v57  ;;  %v662_v4 = vmax.f32 %v506_v58, 0.0  ;;  %v694_v5 = vmax.f32 %v586_v59, 0.0 }
 0x100   : > { %v737_v6 = vmul.f32 %v1484_v48, %v661_v62  ;;  %v769_v7 = vmul.f32 %v1484_v48, %v693_v63  ;;  %v663_v8 = vmax.f32 %v508_v0, 0.0  ;;  %v695_v9 = vmax.f32 %v588_v1, 0.0 }
 0x101   : > { %v812_v10 = vadd.f32 %v1486_v50, %v736_v2  ;;  %v844_v11 = vadd.f32 %v1486_v50, %v768_v3  ;;  %v738_v12 = vmul.f32 %v1481_v45, %v662_v4  ;;  %v770_v13 = vmul.f32 %v1481_v45, %v694_v5 }
 0x102   : > { %v813_v14 = vadd.f32 %v1489_v52, %v737_v6  ;;  %v845_v15 = vadd.f32 %v1489_v52, %v769_v7  ;;  %v739_v16 = vmul.f32 %v1484_v48, %v663_v8  ;;  %v771_v17 = vmul.f32 %v1484_v48, %v695_v9  ;;  %v511_v18 = vpop.f32.mrb[4].mxu0  ;;  %v591_v19 = vpop.f32.mrb[4].mxu1 }
 0x103   : > { %v814_v20 = vadd.f32 %v1486_v50, %v738_v12  ;;  %v846_v21 = vadd.f32 %v1486_v50, %v770_v13  ;;  %v512_v22 = vadd.f32 %v511_v18, %v1470_v38  ;;  %v592_v23 = vadd.f32 %v591_v19, %v1470_v38  ;;  %v513_v24 = vpop.f32.mrb[5].mxu0  ;;  %v593_v25 = vpop.f32.mrb[5].mxu1 }
 0x104   : > { %v1235_v26 = vpack.c.bf16 %v813_v14, %v812_v10  ;;  %v1251_v27 = vpack.c.bf16 %v845_v15, %v844_v11  ;;  %v815_v28 = vadd.f32 %v1489_v52, %v739_v16  ;;  %v847_v29 = vadd.f32 %v1489_v52, %v771_v17  ;;  %v515_v30 = vpop.f32.mrb[6].mxu0  ;;  %v595_v31 = vpop.f32.mrb[6].mxu1 }
 0x105   : > { %v664_v32 = vmax.f32 %v512_v22, 0.0  ;;  %v696_v33 = vmax.f32 %v592_v23, 0.0  ;;  %v514_v34 = vadd.f32 %v513_v24, %v1475_v40  ;;  %v594_v35 = vadd.f32 %v593_v25, %v1475_v40  ;;  %v517_v36 = vpop.f32.mrb[7].mxu0  ;;  %v597_v37 = vpop.f32.mrb[7].mxu1 }
 0x106   : > { %1068 = vst [vmem:[%s1512_s17] sm:$0xff] %v1235_v26  ;;  %1084 = vst [vmem:[%s1512_s17 + $0x80] sm:$0xff] %v1251_v27  ;;  %v1236_v39 = vpack.c.bf16 %v815_v28, %v814_v20  ;;  %v1252_v41 = vpack.c.bf16 %v847_v29, %v846_v21  ;;  %v516_v42 = vadd.f32 %v515_v30, %v1470_v38 }
 0x107   : > { %v596_v43 = vadd.f32 %v595_v31, %v1470_v38  ;;  %v740_v44 = vmul.f32 %v1481_v45, %v664_v32  ;;  %v772_v46 = vmul.f32 %v1481_v45, %v696_v33  ;;  %v665_v47 = vmax.f32 %v514_v34, 0.0 }
 0x108   : > { %v697_v49 = vmax.f32 %v594_v35, 0.0  ;;  %1069 = vst [vmem:[%s1512_s17 + $0x8] sm:$0xff] %v1236_v39  ;;  %1085 = vst [vmem:[%s1512_s17 + $0x88] sm:$0xff] %v1252_v41  ;;  %v666_v51 = vmax.f32 %v516_v42, 0.0  ;;  %v518_v54 = vadd.f32 %v517_v36, %v1475_v40  ;;  %v598_v55 = vadd.f32 %v597_v37, %v1475_v40 }
 0x109   : > { %v698_v53 = vmax.f32 %v596_v43, 0.0  ;;  %v816_v56 = vadd.f32 %v1486_v50, %v740_v44  ;;  %v848_v57 = vadd.f32 %v1486_v50, %v772_v46  ;;  %v741_v58 = vmul.f32 %v1484_v48, %v665_v47 }
 0x10a   : > { %v773_v59 = vmul.f32 %v1484_v48, %v697_v49  ;;  %v742_v60 = vmul.f32 %v1481_v45, %v666_v51  ;;  %v667_v62 = vmax.f32 %v518_v54, 0.0  ;;  %v699_v63 = vmax.f32 %v598_v55, 0.0  ;;  %v521_v0 = vpop.f32.mrb[8].mxu0  ;;  %v601_v1 = vpop.f32.mrb[8].mxu1 }
 0x10b   : > { %v774_v61 = vmul.f32 %v1481_v45, %v698_v53  ;;  %v817_v2 = vadd.f32 %v1489_v52, %v741_v58  ;;  %v522_v4 = vadd.f32 %v521_v0, %v1470_v38  ;;  %v602_v5 = vadd.f32 %v601_v1, %v1470_v38  ;;  %v523_v6 = vpop.f32.mrb[9].mxu0  ;;  %v603_v7 = vpop.f32.mrb[9].mxu1 }
 0x10c   : > { %v849_v3 = vadd.f32 %v1489_v52, %v773_v59  ;;  %v818_v8 = vadd.f32 %v1486_v50, %v742_v60  ;;  %v743_v10 = vmul.f32 %v1484_v48, %v667_v62  ;;  %v775_v11 = vmul.f32 %v1484_v48, %v699_v63  ;;  %v525_v12 = vpop.f32.mrb[10].mxu0  ;;  %v605_v13 = vpop.f32.mrb[10].mxu1 }
 0x10d   : > { %v850_v9 = vadd.f32 %v1486_v50, %v774_v61  ;;  %v1237_v14 = vpack.c.bf16 %v817_v2, %v816_v56  ;;  %v668_v16 = vmax.f32 %v522_v4, 0.0  ;;  %v700_v17 = vmax.f32 %v602_v5, 0.0  ;;  %v527_v18 = vpop.f32.mrb[11].mxu0  ;;  %v607_v19 = vpop.f32.mrb[11].mxu1 }
 0x10e   : > { %v1253_v15 = vpack.c.bf16 %v849_v3, %v848_v57  ;;  %v819_v20 = vadd.f32 %v1489_v52, %v743_v10  ;;  %v851_v21 = vadd.f32 %v1489_v52, %v775_v11  ;;  %v524_v22 = vadd.f32 %v523_v6, %v1475_v40 }
 0x10f   : > { %v604_v23 = vadd.f32 %v603_v7, %v1475_v40  ;;  %1070 = vst [vmem:[%s1512_s17 + $0x10] sm:$0xff] %v1237_v14  ;;  %v744_v24 = vmul.f32 %v1481_v45, %v668_v16  ;;  %v776_v25 = vmul.f32 %v1481_v45, %v700_v17  ;;  %v526_v26 = vadd.f32 %v525_v12, %v1470_v38 }
 0x110   : > { %1086 = vst [vmem:[%s1512_s17 + $0x90] sm:$0xff] %v1253_v15  ;;  %v606_v27 = vadd.f32 %v605_v13, %v1470_v38  ;;  %v1238_v28 = vpack.c.bf16 %v819_v20, %v818_v8  ;;  %v1254_v29 = vpack.c.bf16 %v851_v21, %v850_v9  ;;  %v669_v30 = vmax.f32 %v524_v22, 0.0 }
 0x111   : > { %v701_v31 = vmax.f32 %v604_v23, 0.0  ;;  %v820_v32 = vadd.f32 %v1486_v50, %v744_v24  ;;  %v852_v33 = vadd.f32 %v1486_v50, %v776_v25  ;;  %v670_v34 = vmax.f32 %v526_v26, 0.0 }
 0x112   : > { %v702_v35 = vmax.f32 %v606_v27, 0.0  ;;  %1071 = vst [vmem:[%s1512_s17 + $0x18] sm:$0xff] %v1238_v28  ;;  %1087 = vst [vmem:[%s1512_s17 + $0x98] sm:$0xff] %v1254_v29  ;;  %v745_v36 = vmul.f32 %v1484_v48, %v669_v30  ;;  %v528_v39 = vadd.f32 %v527_v18, %v1475_v40  ;;  %v608_v41 = vadd.f32 %v607_v19, %v1475_v40  ;;  %v531_v42 = vpop.f32.mrb[12].mxu0  ;;  %v611_v43 = vpop.f32.mrb[12].mxu1 }
 0x113   : > { %v777_v37 = vmul.f32 %v1484_v48, %v701_v31  ;;  %v746_v44 = vmul.f32 %v1481_v45, %v670_v34  ;;  %v532_v47 = vadd.f32 %v531_v42, %v1470_v38  ;;  %v612_v49 = vadd.f32 %v611_v43, %v1470_v38  ;;  %v533_v51 = vpop.f32.mrb[13].mxu0  ;;  %v613_v53 = vpop.f32.mrb[13].mxu1 }
 0x114   : > { %v778_v46 = vmul.f32 %v1481_v45, %v702_v35  ;;  %v821_v54 = vadd.f32 %v1489_v52, %v745_v36  ;;  %v671_v56 = vmax.f32 %v528_v39, 0.0  ;;  %v703_v57 = vmax.f32 %v608_v41, 0.0  ;;  %v535_v58 = vpop.f32.mrb[14].mxu0  ;;  %v615_v59 = vpop.f32.mrb[14].mxu1 }
 0x115   : > { %v853_v55 = vadd.f32 %v1489_v52, %v777_v37  ;;  %v822_v60 = vadd.f32 %v1486_v50, %v746_v44  ;;  %v672_v62 = vmax.f32 %v532_v47, 0.0  ;;  %v704_v63 = vmax.f32 %v612_v49, 0.0  ;;  %v537_v0 = vpop.f32.mrb[15].mxu0  ;;  %v617_v1 = vpop.f32.mrb[15].mxu1 }
 0x116   : > { %v854_v61 = vadd.f32 %v1486_v50, %v778_v46  ;;  %v1239_v2 = vpack.c.bf16 %v821_v54, %v820_v32  ;;  %v747_v4 = vmul.f32 %v1484_v48, %v671_v56  ;;  %v779_v5 = vmul.f32 %v1484_v48, %v703_v57 }
 0x117   : > { %v1255_v3 = vpack.c.bf16 %v853_v55, %v852_v33  ;;  %v748_v6 = vmul.f32 %v1481_v45, %v672_v62  ;;  %v780_v7 = vmul.f32 %v1481_v45, %v704_v63  ;;  %v534_v8 = vadd.f32 %v533_v51, %v1475_v40 }
 0x118   : > { %v614_v9 = vadd.f32 %v613_v53, %v1475_v40  ;;  %1072 = vst [vmem:[%s1512_s17 + $0x20] sm:$0xff] %v1239_v2  ;;  %v823_v10 = vadd.f32 %v1489_v52, %v747_v4  ;;  %v855_v11 = vadd.f32 %v1489_v52, %v779_v5  ;;  %v536_v12 = vadd.f32 %v535_v58, %v1470_v38 }
 0x119   : > { %1088 = vst [vmem:[%s1512_s17 + $0xa0] sm:$0xff] %v1255_v3  ;;  %v616_v13 = vadd.f32 %v615_v59, %v1470_v38  ;;  %v824_v14 = vadd.f32 %v1486_v50, %v748_v6  ;;  %v856_v15 = vadd.f32 %v1486_v50, %v780_v7  ;;  %v673_v16 = vmax.f32 %v534_v8, 0.0 }
 0x11a   : > { %v705_v17 = vmax.f32 %v614_v9, 0.0  ;;  %v1240_v18 = vpack.c.bf16 %v823_v10, %v822_v60  ;;  %v1256_v19 = vpack.c.bf16 %v855_v11, %v854_v61  ;;  %v674_v20 = vmax.f32 %v536_v12, 0.0  ;;  %v541_v22 = vpop.f32.mrb[16].mxu0  ;;  %v621_v23 = vpop.f32.mrb[16].mxu1 }
 0x11b   : > { %v706_v21 = vmax.f32 %v616_v13, 0.0  ;;  %v749_v24 = vmul.f32 %v1484_v48, %v673_v16  ;;  %v538_v26 = vadd.f32 %v537_v0, %v1475_v40  ;;  %v618_v27 = vadd.f32 %v617_v1, %v1475_v40  ;;  %v543_v28 = vpop.f32.mrb[17].mxu0  ;;  %v623_v29 = vpop.f32.mrb[17].mxu1 }
 0x11c   : > { %v781_v25 = vmul.f32 %v1484_v48, %v705_v17  ;;  %1073 = vst [vmem:[%s1512_s17 + $0x28] sm:$0xff] %v1240_v18  ;;  %1089 = vst [vmem:[%s1512_s17 + $0xa8] sm:$0xff] %v1256_v19  ;;  %v750_v30 = vmul.f32 %v1481_v45, %v674_v20  ;;  %v542_v32 = vadd.f32 %v541_v22, %v1470_v38  ;;  %v545_v34 = vpop.f32.mrb[18].mxu0  ;;  %v625_v35 = vpop.f32.mrb[18].mxu1 }
 0x11d   : > { %v782_v31 = vmul.f32 %v1481_v45, %v706_v21  ;;  %v622_v33 = vadd.f32 %v621_v23, %v1470_v38  ;;  %v825_v36 = vadd.f32 %v1489_v52, %v749_v24  ;;  %v675_v39 = vmax.f32 %v538_v26, 0.0  ;;  %v547_v42 = vpop.f32.mrb[19].mxu0  ;;  %v627_v43 = vpop.f32.mrb[19].mxu1 }
 0x11e   : > { %v857_v37 = vadd.f32 %v1489_v52, %v781_v25  ;;  %v707_v41 = vmax.f32 %v618_v27, 0.0  ;;  %v826_v44 = vadd.f32 %v1486_v50, %v750_v30  ;;  %v676_v47 = vmax.f32 %v542_v32, 0.0 }
 0x11f   : > { %v858_v46 = vadd.f32 %v1486_v50, %v782_v31  ;;  %v708_v49 = vmax.f32 %v622_v33, 0.0  ;;  %v1241_v51 = vpack.c.bf16 %v825_v36, %v824_v14  ;;  %v751_v54 = vmul.f32 %v1484_v48, %v675_v39 }
 0x120   : > { %v1257_v53 = vpack.c.bf16 %v857_v37, %v856_v15  ;;  %v783_v55 = vmul.f32 %v1484_v48, %v707_v41  ;;  %v752_v56 = vmul.f32 %v1481_v45, %v676_v47  ;;  %v544_v58 = vadd.f32 %v543_v28, %v1475_v40 }
 0x121   : > { %v784_v57 = vmul.f32 %v1481_v45, %v708_v49  ;;  %v624_v59 = vadd.f32 %v623_v29, %v1475_v40  ;;  %1074 = vst [vmem:[%s1512_s17 + $0x30] sm:$0xff] %v1241_v51  ;;  %v827_v60 = vadd.f32 %v1489_v52, %v751_v54  ;;  %v546_v62 = vadd.f32 %v545_v34, %v1470_v38 }
 0x122   : > { %1090 = vst [vmem:[%s1512_s17 + $0xb0] sm:$0xff] %v1257_v53  ;;  %v859_v61 = vadd.f32 %v1489_v52, %v783_v55  ;;  %v626_v63 = vadd.f32 %v625_v35, %v1470_v38  ;;  %v828_v0 = vadd.f32 %v1486_v50, %v752_v56  ;;  %v677_v2 = vmax.f32 %v544_v58, 0.0  ;;  %v551_v4 = vpop.f32.mrb[20].mxu0  ;;  %v631_v5 = vpop.f32.mrb[20].mxu1 }
 0x123   : > { %v860_v1 = vadd.f32 %v1486_v50, %v784_v57  ;;  %v709_v3 = vmax.f32 %v624_v59, 0.0  ;;  %v1242_v6 = vpack.c.bf16 %v827_v60, %v826_v44  ;;  %v678_v8 = vmax.f32 %v546_v62, 0.0  ;;  %v553_v10 = vpop.f32.mrb[21].mxu0  ;;  %v633_v11 = vpop.f32.mrb[21].mxu1 }
 0x124   : > { %v1258_v7 = vpack.c.bf16 %v859_v61, %v858_v46  ;;  %v710_v9 = vmax.f32 %v626_v63, 0.0  ;;  %v753_v12 = vmul.f32 %v1484_v48, %v677_v2  ;;  %v548_v14 = vadd.f32 %v547_v42, %v1475_v40  ;;  %v555_v16 = vpop.f32.mrb[22].mxu0  ;;  %v635_v17 = vpop.f32.mrb[22].mxu1 }
 0x125   : > { %v785_v13 = vmul.f32 %v1484_v48, %v709_v3  ;;  %v628_v15 = vadd.f32 %v627_v43, %v1475_v40  ;;  %1075 = vst [vmem:[%s1512_s17 + $0x38] sm:$0xff] %v1242_v6  ;;  %v754_v18 = vmul.f32 %v1481_v45, %v678_v8  ;;  %v552_v20 = vadd.f32 %v551_v4, %v1470_v38  ;;  %v557_v22 = vpop.f32.mrb[23].mxu0  ;;  %v637_v23 = vpop.f32.mrb[23].mxu1 }
 0x126   : > { %1091 = vst [vmem:[%s1512_s17 + $0xb8] sm:$0xff] %v1258_v7  ;;  %v786_v19 = vmul.f32 %v1481_v45, %v710_v9  ;;  %v632_v21 = vadd.f32 %v631_v5, %v1470_v38  ;;  %v829_v24 = vadd.f32 %v1489_v52, %v753_v12  ;;  %v679_v26 = vmax.f32 %v548_v14, 0.0 }
 0x127   : > { %v861_v25 = vadd.f32 %v1489_v52, %v785_v13  ;;  %v711_v27 = vmax.f32 %v628_v15, 0.0  ;;  %v830_v28 = vadd.f32 %v1486_v50, %v754_v18  ;;  %v680_v30 = vmax.f32 %v552_v20, 0.0 }
 0x128   : > { %v862_v29 = vadd.f32 %v1486_v50, %v786_v19  ;;  %v712_v31 = vmax.f32 %v632_v21, 0.0  ;;  %v1243_v32 = vpack.c.bf16 %v829_v24, %v828_v0  ;;  %v755_v34 = vmul.f32 %v1484_v48, %v679_v26 }
 0x129   : > { %v1259_v33 = vpack.c.bf16 %v861_v25, %v860_v1  ;;  %v787_v35 = vmul.f32 %v1484_v48, %v711_v27  ;;  %v756_v36 = vmul.f32 %v1481_v45, %v680_v30  ;;  %v554_v39 = vadd.f32 %v553_v10, %v1475_v40 }
 0x12a   : > { %v788_v37 = vmul.f32 %v1481_v45, %v712_v31  ;;  %v634_v41 = vadd.f32 %v633_v11, %v1475_v40  ;;  %1076 = vst [vmem:[%s1512_s17 + $0x40] sm:$0xff] %v1243_v32  ;;  %v831_v42 = vadd.f32 %v1489_v52, %v755_v34  ;;  %v556_v44 = vadd.f32 %v555_v16, %v1470_v38  ;;  %v561_v47 = vpop.f32.mrb[24].mxu0  ;;  %v641_v49 = vpop.f32.mrb[24].mxu1 }
 0x12b   : > { %1092 = vst [vmem:[%s1512_s17 + $0xc0] sm:$0xff] %v1259_v33  ;;  %v863_v43 = vadd.f32 %v1489_v52, %v787_v35  ;;  %v636_v46 = vadd.f32 %v635_v17, %v1470_v38  ;;  %v832_v51 = vadd.f32 %v1486_v50, %v756_v36  ;;  %v681_v54 = vmax.f32 %v554_v39, 0.0  ;;  %v563_v56 = vpop.f32.mrb[25].mxu0  ;;  %v643_v57 = vpop.f32.mrb[25].mxu1 }
 0x12c   : > { %v864_v53 = vadd.f32 %v1486_v50, %v788_v37  ;;  %v713_v55 = vmax.f32 %v634_v41, 0.0  ;;  %v1244_v58 = vpack.c.bf16 %v831_v42, %v830_v28  ;;  %v682_v60 = vmax.f32 %v556_v44, 0.0  ;;  %v565_v62 = vpop.f32.mrb[26].mxu0  ;;  %v645_v63 = vpop.f32.mrb[26].mxu1 }
 0x12d   : > { %v1260_v59 = vpack.c.bf16 %v863_v43, %v862_v29  ;;  %v714_v61 = vmax.f32 %v636_v46, 0.0  ;;  %v757_v0 = vmul.f32 %v1484_v48, %v681_v54  ;;  %v558_v2 = vadd.f32 %v557_v22, %v1475_v40  ;;  %v567_v4 = vpop.f32.mrb[27].mxu0  ;;  %v647_v5 = vpop.f32.mrb[27].mxu1 }
 0x12e   : > { %v789_v1 = vmul.f32 %v1484_v48, %v713_v55  ;;  %v638_v3 = vadd.f32 %v637_v23, %v1475_v40  ;;  %1077 = vst [vmem:[%s1512_s17 + $0x48] sm:$0xff] %v1244_v58  ;;  %v758_v6 = vmul.f32 %v1481_v45, %v682_v60  ;;  %v562_v8 = vadd.f32 %v561_v47, %v1470_v38 }
 0x12f   : > { %1093 = vst [vmem:[%s1512_s17 + $0xc8] sm:$0xff] %v1260_v59  ;;  %v790_v7 = vmul.f32 %v1481_v45, %v714_v61  ;;  %v642_v9 = vadd.f32 %v641_v49, %v1470_v38  ;;  %v833_v10 = vadd.f32 %v1489_v52, %v757_v0  ;;  %v683_v12 = vmax.f32 %v558_v2, 0.0 }
 0x130   : > { %v865_v11 = vadd.f32 %v1489_v52, %v789_v1  ;;  %v715_v13 = vmax.f32 %v638_v3, 0.0  ;;  %v834_v14 = vadd.f32 %v1486_v50, %v758_v6  ;;  %v684_v16 = vmax.f32 %v562_v8, 0.0 }
 0x131   : > { %v866_v15 = vadd.f32 %v1486_v50, %v790_v7  ;;  %v716_v17 = vmax.f32 %v642_v9, 0.0  ;;  %v1245_v18 = vpack.c.bf16 %v833_v10, %v832_v51  ;;  %v759_v20 = vmul.f32 %v1484_v48, %v683_v12 }
 0x132   : > { %v1261_v19 = vpack.c.bf16 %v865_v11, %v864_v53  ;;  %v791_v21 = vmul.f32 %v1484_v48, %v715_v13  ;;  %v760_v22 = vmul.f32 %v1481_v45, %v684_v16  ;;  %v564_v24 = vadd.f32 %v563_v56, %v1475_v40  ;;  %v571_v26 = vpop.f32.mrb[28].mxu0  ;;  %v651_v27 = vpop.f32.mrb[28].mxu1 }
 0x133   : > { %v792_v23 = vmul.f32 %v1481_v45, %v716_v17  ;;  %v644_v25 = vadd.f32 %v643_v57, %v1475_v40  ;;  %1078 = vst [vmem:[%s1512_s17 + $0x50] sm:$0xff] %v1245_v18  ;;  %v835_v28 = vadd.f32 %v1489_v52, %v759_v20  ;;  %v566_v30 = vadd.f32 %v565_v62, %v1470_v38  ;;  %v573_v32 = vpop.f32.mrb[29].mxu0  ;;  %v653_v33 = vpop.f32.mrb[29].mxu1 }
 0x134   : > { %1094 = vst [vmem:[%s1512_s17 + $0xd0] sm:$0xff] %v1261_v19  ;;  %v867_v29 = vadd.f32 %v1489_v52, %v791_v21  ;;  %v646_v31 = vadd.f32 %v645_v63, %v1470_v38  ;;  %v836_v34 = vadd.f32 %v1486_v50, %v760_v22  ;;  %v685_v36 = vmax.f32 %v564_v24, 0.0  ;;  %v575_v39 = vpop.f32.mrb[30].mxu0  ;;  %v655_v41 = vpop.f32.mrb[30].mxu1 }
 0x135   : > { %v868_v35 = vadd.f32 %v1486_v50, %v792_v23  ;;  %v717_v37 = vmax.f32 %v644_v25, 0.0  ;;  %v1246_v42 = vpack.c.bf16 %v835_v28, %v834_v14  ;;  %v686_v44 = vmax.f32 %v566_v30, 0.0  ;;  %v577_v47 = vpop.f32.mrb[31].mxu0  ;;  %v657_v49 = vpop.f32.mrb[31].mxu1 }
 0x136   : > { %v1262_v43 = vpack.c.bf16 %v867_v29, %v866_v15  ;;  %v718_v46 = vmax.f32 %v646_v31, 0.0  ;;  %v761_v51 = vmul.f32 %v1484_v48, %v685_v36  ;;  %v568_v54 = vadd.f32 %v567_v4, %v1475_v40 }
 0x137   : > { %v793_v53 = vmul.f32 %v1484_v48, %v717_v37  ;;  %v648_v55 = vadd.f32 %v647_v5, %v1475_v40  ;;  %1079 = vst [vmem:[%s1512_s17 + $0x58] sm:$0xff] %v1246_v42  ;;  %v762_v56 = vmul.f32 %v1481_v45, %v686_v44  ;;  %v572_v58 = vadd.f32 %v571_v26, %v1470_v38 }
 0x138   : > { %1095 = vst [vmem:[%s1512_s17 + $0xd8] sm:$0xff] %v1262_v43  ;;  %v794_v57 = vmul.f32 %v1481_v45, %v718_v46  ;;  %v652_v59 = vadd.f32 %v651_v27, %v1470_v38  ;;  %v837_v60 = vadd.f32 %v1489_v52, %v761_v51  ;;  %v687_v62 = vmax.f32 %v568_v54, 0.0 }
 0x139   : > { %v869_v61 = vadd.f32 %v1489_v52, %v793_v53  ;;  %v719_v63 = vmax.f32 %v648_v55, 0.0  ;;  %v838_v0 = vadd.f32 %v1486_v50, %v762_v56  ;;  %v688_v2 = vmax.f32 %v572_v58, 0.0 }
 0x13a   : > { %v870_v1 = vadd.f32 %v1486_v50, %v794_v57  ;;  %v720_v3 = vmax.f32 %v652_v59, 0.0  ;;  %v1247_v4 = vpack.c.bf16 %v837_v60, %v836_v34  ;;  %v763_v6 = vmul.f32 %v1484_v48, %v687_v62 }
 0x13b   : > { %v1263_v5 = vpack.c.bf16 %v869_v61, %v868_v35  ;;  %v795_v7 = vmul.f32 %v1484_v48, %v719_v63  ;;  %v764_v8 = vmul.f32 %v1481_v45, %v688_v2  ;;  %v574_v10 = vadd.f32 %v573_v32, %v1475_v40 }
 0x13c   : > { %v796_v9 = vmul.f32 %v1481_v45, %v720_v3  ;;  %v654_v11 = vadd.f32 %v653_v33, %v1475_v40  ;;  %1080 = vst [vmem:[%s1512_s17 + $0x60] sm:$0xff] %v1247_v4  ;;  %v839_v12 = vadd.f32 %v1489_v52, %v763_v6  ;;  %v576_v14 = vadd.f32 %v575_v39, %v1470_v38 }
 0x13d   : > { %1096 = vst [vmem:[%s1512_s17 + $0xe0] sm:$0xff] %v1263_v5  ;;  %v871_v13 = vadd.f32 %v1489_v52, %v795_v7  ;;  %v656_v15 = vadd.f32 %v655_v41, %v1470_v38  ;;  %v840_v16 = vadd.f32 %v1486_v50, %v764_v8  ;;  %v689_v18 = vmax.f32 %v574_v10, 0.0 }
 0x13e   : > { %v872_v17 = vadd.f32 %v1486_v50, %v796_v9  ;;  %v721_v19 = vmax.f32 %v654_v11, 0.0  ;;  %v1248_v20 = vpack.c.bf16 %v839_v12, %v838_v0  ;;  %v690_v22 = vmax.f32 %v576_v14, 0.0 }
 0x13f   : > { %v1264_v21 = vpack.c.bf16 %v871_v13, %v870_v1  ;;  %v722_v23 = vmax.f32 %v656_v15, 0.0  ;;  %v765_v24 = vmul.f32 %v1484_v48, %v689_v18  ;;  %v578_v26 = vadd.f32 %v577_v47, %v1475_v40 }
 0x140   : > { %v797_v25 = vmul.f32 %v1484_v48, %v721_v19  ;;  %v658_v27 = vadd.f32 %v657_v49, %v1475_v40  ;;  %1081 = vst [vmem:[%s1512_s17 + $0x68] sm:$0xff] %v1248_v20  ;;  %v766_v38 = vmul.f32 %v1481_v45, %v690_v22 }
 0x141   : > { %1097 = vst [vmem:[%s1512_s17 + $0xe8] sm:$0xff] %v1264_v21  ;;  %v798_v28 = vmul.f32 %v1481_v45, %v722_v23  ;;  %v841_v29 = vadd.f32 %v1489_v52, %v765_v24  ;;  %v691_v31 = vmax.f32 %v578_v26, 0.0 }
 0x142   : > { %v873_v30 = vadd.f32 %v1489_v52, %v797_v25  ;;  %v723_v32 = vmax.f32 %v658_v27, 0.0  ;;  %v842_v33 = vadd.f32 %v1486_v50, %v766_v38 }
 0x143   : > { %v874_v34 = vadd.f32 %v1486_v50, %v798_v28  ;;  %v1249_v40 = vpack.c.bf16 %v841_v29, %v840_v16  ;;  %v767_v36 = vmul.f32 %v1484_v48, %v691_v31 }
 0x144   : > { %v1265_v35 = vpack.c.bf16 %v873_v30, %v872_v17  ;;  %v799_v37 = vmul.f32 %v1484_v48, %v723_v32 }
 0x145   : > { %1082 = vst [vmem:[%s1512_s17 + $0x70] sm:$0xff] %v1249_v40  ;;  %v843_v45 = vadd.f32 %v1489_v52, %v767_v36 }
 0x146   : > { %1098 = vst [vmem:[%s1512_s17 + $0xf0] sm:$0xff] %v1265_v35  ;;  %v875_v39 = vadd.f32 %v1489_v52, %v799_v37 }
 0x147   : > { %v1250_v41 = vpack.c.bf16 %v843_v45, %v842_v33 }
 0x148   : > { %v1266_v42 = vpack.c.bf16 %v875_v39, %v874_v34 }
 0x149   : > { %1083 = vst [vmem:[%s1512_s17 + $0x78] sm:$0xff] %v1250_v41 }
 0x14a   : > { %1099 = vst [vmem:[%s1512_s17 + $0xf8] sm:$0xff] %v1266_v42 }
 0x14b PF: > { %s15_s18 = sadd.s32 1, %s1338_s18  }
 0x14c   : > { %p12_p4 = scmp.ge.s32.totalorder %s15_s18, 4  }
 0x14e   :  { %14 = sbr.rel (!%p12_p4) target bundleno = 1 (0x1), region = 70 }

// kernel: encode.5
= control target key start
LH: loop header
LB: loop body
LE: loop exit
PB: predicated region body
PF: predicated region fallthrough
CT: control target
= control target key end

     0   :  { %s7180_s18 = smov 0   ;;  %s9060_s0 = inlined_call_operand.vmem [shape: bf16[128,4096], index: 0, kind: input, shape index: {}]   ;;  %s9061_s1 = inlined_call_operand.vmem [shape: bf16[4096,256], index: 1, kind: input, shape index: {}]   ;;  %s9062_s2 = inlined_call_operand.vmem [shape: f32[1,256], index: 2, kind: input, shape index: {}]   ;;  %s9063_s3 = inlined_call_operand.vmem [shape: f32[1,256], index: 3, kind: input, shape index: {}]   ;;  %s9064_s4 = inlined_call_operand.vmem [shape: f32[1,256], index: 4, kind: input, shape index: {}]   ;;  %s9065_s5 = inlined_call_operand.vmem [shape: bf16[128,256], index: 5, kind: output, shape index: {}]  }
   0x1 LB: > { %s5439_s19 = sadd.s32 4294967295, %s7148_s18   ;;  %p5443_p0 = scmp.ge.s32.totalorder %s7148_s18, 1  ;;  %s7148_s18 = sphi %s7180_s18, %s15_s18  }
   0x2   : > { %p189_p1 = scmp.lt.s32.totalorder %s7148_s18, 3 }
   0x4   : > { %p190_p2 = pnand %p5443_p0, %p189_p1 }
   0x5   : > { %v6374_v0 = vld [vmem:[%s9061_s1 + $0x4] ss:$8 sps:$4 sm:$0xff] (!%p190_p2)   ;;  %v6378_v2 = vld [vmem:[%s9061_s1] ss:$8 sps:$4 sm:$0xff] (!%p190_p2)   ;;  %v6380_v4 = vld [vmem:[%s9061_s1 + $0x14] ss:$8 sps:$4 sm:$0xff] (!%p190_p2)  }
   0x6   : > { %193 = sbr.rel (%p190_p2) target bundleno = 770 (0x302), region = 40  ;;  %v6376_v1 = vld [vmem:[%s9061_s1 + $0x804] ss:$8 sps:$4 sm:$0xff] (!%p190_p2)   ;;  %4085 = vmatprep.subr.bf16.mxu1 (!%p190_p2), %v6374_v0  ;;  %v6379_v3 = vld [vmem:[%s9061_s1 + $0x800] ss:$8 sps:$4 sm:$0xff] (!%p190_p2)   ;;  %s5444_s9 = sshll.u32 (!%p190_p2), %s5439_s19, 3 }
   0x7   : > { %4669 = vmatprep.subr.bf16.mxu0 (!%p190_p2), %v6376_v1  ;;  %4086 = vmatpush1.bf16.msra.mxu1 (!%p190_p2), %v6378_v2  ;;  %v6382_v5 = vld [vmem:[%s9061_s1 + $0x814] ss:$8 sps:$4 sm:$0xff] (!%p190_p2)   ;;  %v6384_v6 = vld [vmem:[%s9061_s1 + $0x10] ss:$8 sps:$4 sm:$0xff] (!%p190_p2)   ;;  %v6386_v8 = vld [vmem:[%s9061_s1 + $0x24] ss:$8 sps:$4 sm:$0xff] (!%p190_p2)  }
   0x8   : > { %4670 = vmatpush1.bf16.msra.mxu0 (!%p190_p2), %v6379_v3  ;;  %4087 = vmatprep.subr.bf16.mxu1 (!%p190_p2), %v6380_v4  ;;  %v6385_v7 = vld [vmem:[%s9061_s1 + $0x810] ss:$8 sps:$4 sm:$0xff] (!%p190_p2)   ;;  %v6388_v9 = vld [vmem:[%s9061_s1 + $0x824] ss:$8 sps:$4 sm:$0xff] (!%p190_p2)   ;;  %v6390_v10 = vld [vmem:[%s9061_s1 + $0x20] ss:$8 sps:$4 sm:$0xff] (!%p190_p2)  }
   0x9   : > { %4671 = vmatprep.subr.bf16.mxu0 (!%p190_p2), %v6382_v5  ;;  %v6391_v11 = vld [vmem:[%s9061_s1 + $0x820] ss:$8 sps:$4 sm:$0xff] (!%p190_p2)   ;;  %v6392_v12 = vld [vmem:[%s9061_s1 + $0x34] ss:$8 sps:$4 sm:$0xff] (!%p190_p2)   ;;  %v6396_v14 = vld [vmem:[%s9061_s1 + $0x30] ss:$8 sps:$4 sm:$0xff] (!%p190_p2)  }
   0xa   : > { %v6394_v13 = vld [vmem:[%s9061_s1 + $0x834] ss:$8 sps:$4 sm:$0xff] (!%p190_p2)   ;;  %v6397_v15 = vld [vmem:[%s9061_s1 + $0x830] ss:$8 sps:$4 sm:$0xff] (!%p190_p2)   ;;  %v6398_v16 = vld [vmem:[%s9061_s1 + $0x44] ss:$8 sps:$4 sm:$0xff] (!%p190_p2)  }
   0xb   : > { %4088 = vmatpush1.bf16.msra.mxu1 (!%p190_p2), %v6384_v6  ;;  %v6400_v17 = vld [vmem:[%s9061_s1 + $0x844] ss:$8 sps:$4 sm:$0xff] (!%p190_p2)   ;;  %v6402_v18 = vld [vmem:[%s9061_s1 + $0x40] ss:$8 sps:$4 sm:$0xff] (!%p190_p2)   ;;  %v6404_v20 = vld [vmem:[%s9061_s1 + $0x54] ss:$8 sps:$4 sm:$0xff] (!%p190_p2)  }
   0xc   : > { %4672 = vmatpush1.bf16.msra.mxu0 (!%p190_p2), %v6385_v7  ;;  %4089 = vmatprep.subr.bf16.mxu1 (!%p190_p2), %v6386_v8  ;;  %v6403_v19 = vld [vmem:[%s9061_s1 + $0x840] ss:$8 sps:$4 sm:$0xff] (!%p190_p2)   ;;  %v6406_v21 = vld [vmem:[%s9061_s1 + $0x854] ss:$8 sps:$4 sm:$0xff] (!%p190_p2)   ;;  %v6408_v22 = vld [vmem:[%s9061_s1 + $0x50] ss:$8 sps:$4 sm:$0xff] (!%p190_p2)  }
   0xd   : > { %4673 = vmatprep.subr.bf16.mxu0 %v6388_v9  ;;  %v6409_v23 = vld [vmem:[%s9061_s1 + $0x850] ss:$8 sps:$4 sm:$0xff]   ;;  %v6410_v24 = vld [vmem:[%s9061_s1 + $0x64] ss:$8 sps:$4 sm:$0xff]   ;;  %v6414_v26 = vld [vmem:[%s9061_s1 + $0x60] ss:$8 sps:$4 sm:$0xff]  }
   0xe   : > { %v6412_v25 = vld [vmem:[%s9061_s1 + $0x864] ss:$8 sps:$4 sm:$0xff]   ;;  %v6415_v27 = vld [vmem:[%s9061_s1 + $0x860] ss:$8 sps:$4 sm:$0xff]   ;;  %v6416_v28 = vld [vmem:[%s9061_s1 + $0x74] ss:$8 sps:$4 sm:$0xff]  }
   0xf   : > { %4090 = vmatpush1.bf16.msra.mxu1 %v6390_v10  ;;  %v6418_v29 = vld [vmem:[%s9061_s1 + $0x874] ss:$8 sps:$4 sm:$0xff]   ;;  %v6420_v30 = vld [vmem:[%s9061_s1 + $0x70] ss:$8 sps:$4 sm:$0xff]   ;;  %v6422_v32 = vld [vmem:[%s9061_s1 + $0x84] ss:$8 sps:$4 sm:$0xff]  }
  0x10   : > { %4674 = vmatpush1.bf16.msra.mxu0 %v6391_v11  ;;  %4091 = vmatprep.subr.bf16.mxu1 %v6392_v12  ;;  %v6421_v31 = vld [vmem:[%s9061_s1 + $0x870] ss:$8 sps:$4 sm:$0xff]   ;;  %p220_p3 = scmp.lt.s32.totalorder %s5444_s9, 15  ;;  %v6424_v33 = vld [vmem:[%s9061_s1 + $0x884] ss:$8 sps:$4 sm:$0xff]  }
  0x11   : > { %4675 = vmatprep.subr.bf16.mxu0 %v6394_v13  ;;  %v6426_v34 = vld [vmem:[%s9061_s1 + $0x80] ss:$8 sps:$4 sm:$0xff]   ;;  %v6428_v36 = vld [vmem:[%s9061_s1 + $0x94] ss:$8 sps:$4 sm:$0xff]   ;;  %v6432_v38 = vld [vmem:[%s9061_s1 + $0x90] ss:$8 sps:$4 sm:$0xff]  }
  0x12   : > { %v6427_v35 = vld [vmem:[%s9061_s1 + $0x880] ss:$8 sps:$4 sm:$0xff]   ;;  %s9067_s9 = smov (!%p220_p3, %s5444_s9), 15  ;;  %v6430_v37 = vld [vmem:[%s9061_s1 + $0x894] ss:$8 sps:$4 sm:$0xff]  }
  0x13   : > { %4092 = vmatpush1.bf16.msra.mxu1 %v6396_v14  ;;  %v6433_v39 = vld [vmem:[%s9061_s1 + $0x890] ss:$8 sps:$4 sm:$0xff]   ;;  %v6434_v40 = vld [vmem:[%s9061_s1 + $0xa4] ss:$8 sps:$4 sm:$0xff]   ;;  %s6100_s8 = sshll.u32 %s9067_s9, 7  ;;  %s6101_s13 = sshll.u32 %s9067_s9, 3 }
  0x14   : > { %4676 = vmatpush1.bf16.msra.mxu0 %v6397_v15  ;;  %4093 = vmatprep.subr.bf16.mxu1 %v6398_v16  ;;  %v6436_v41 = vld [vmem:[%s9061_s1 + $0x8a4] ss:$8 sps:$4 sm:$0xff]   ;;  %v6438_v42 = vld [vmem:[%s9061_s1 + $0xa0] ss:$8 sps:$4 sm:$0xff]   ;;  %s7328_s19 = scalar_lea.vmem %s9060_s0, %s6100_s8  ;;  %v6440_v44 = vld [vmem:[%s9061_s1 + $0xb4] ss:$8 sps:$4 sm:$0xff]   ;;  %s9011_s15 = scalar_lea.vmem %s9065_s5, %s6101_s13 }
  0x15   : > { %4677 = vmatprep.subr.bf16.mxu0 %v6400_v17  ;;  %v6439_v43 = vld [vmem:[%s9061_s1 + $0x8a0] ss:$8 sps:$4 sm:$0xff]   ;;  %v6442_v45 = vld [vmem:[%s9061_s1 + $0x8b4] ss:$8 sps:$4 sm:$0xff]   ;;  %v6444_v46 = vld [vmem:[%s9061_s1 + $0xb0] ss:$8 sps:$4 sm:$0xff]  }
  0x16   : > { %v6445_v47 = vld [vmem:[%s9061_s1 + $0x8b0] ss:$8 sps:$4 sm:$0xff]   ;;  %v233_v48 = vld [vmem:[%s7328_s19] sm:$0xff]  ;;  %v6452_v58 = vld [vmem:[%s9061_s1 + $0xd4] ss:$8 sps:$4 sm:$0xff]  }
  0x17   : > { %4094 = vmatpush1.bf16.msra.mxu1 %v6402_v18  ;;  %v249_v49 = vld [vmem:[%s7328_s19 + $0x80] sm:$0xff]  ;;  %v6454_v59 = vld [vmem:[%s9061_s1 + $0x8d4] ss:$8 sps:$4 sm:$0xff]   ;;  %v6456_v60 = vld [vmem:[%s9061_s1 + $0xd0] ss:$8 sps:$4 sm:$0xff]  }
  0x18   : > { %4678 = vmatpush1.bf16.msra.mxu0 %v6403_v19  ;;  %4095 = vmatprep.subr.bf16.mxu1 %v6404_v20  ;;  %v6446_v50 = vld [vmem:[%s9061_s1 + $0xc4] ss:$8 sps:$4 sm:$0xff]   ;;  %v5451_v52 = vcombine.high %v233_v48, %v249_v49  ;;  %v6450_v56 = vld [vmem:[%s9061_s1 + $0xc0] ss:$8 sps:$4 sm:$0xff]   ;;  %v6457_v61 = vld [vmem:[%s9061_s1 + $0x8d0] ss:$8 sps:$4 sm:$0xff]   ;;  %v5450_v8 = vcombine.low %v233_v48, %v249_v49 }
  0x19   : > { %4679 = vmatprep.subr.bf16.mxu0 %v6406_v21  ;;  %v6448_v51 = vld [vmem:[%s9061_s1 + $0x8c4] ss:$8 sps:$4 sm:$0xff]   ;;  %v6451_v57 = vld [vmem:[%s9061_s1 + $0x8c0] ss:$8 sps:$4 sm:$0xff]   ;;  %v6464_v2 = vld [vmem:[%s9061_s1 + $0xf4] ss:$8 sps:$4 sm:$0xff]  }
  0x1a   : > { %v241_v53 = vld [vmem:[%s7328_s19 + $0x40] sm:$0xff]  ;;  %4117 = vmatprep.mubr.bf16.mxu1 %v5451_v52  ;;  %v6466_v3 = vld [vmem:[%s9061_s1 + $0x8f4] ss:$8 sps:$4 sm:$0xff]   ;;  %v6468_v4 = vld [vmem:[%s9061_s1 + $0xf0] ss:$8 sps:$4 sm:$0xff]  }
  0x1b   : > { %4096 = vmatpush1.bf16.msra.mxu1 %v6408_v22  ;;  %v257_v54 = vld [vmem:[%s7328_s19 + $0xc0] sm:$0xff]  ;;  %v6469_v5 = vld [vmem:[%s9061_s1 + $0x8f0] ss:$8 sps:$4 sm:$0xff]   ;;  %v6478_v12 = vld [vmem:[%s9061_s1 + $0x114] ss:$8 sps:$4 sm:$0xff]  }
  0x1c   : > { %4680 = vmatpush1.bf16.msra.mxu0 %v6409_v23  ;;  %4097 = vmatprep.subr.bf16.mxu1 %v6410_v24  ;;  %v5467_v55 = vcombine.high %v241_v53, %v257_v54  ;;  %v6458_v62 = vld [vmem:[%s9061_s1 + $0xe4] ss:$8 sps:$4 sm:$0xff]   ;;  %v6462_v0 = vld [vmem:[%s9061_s1 + $0xe0] ss:$8 sps:$4 sm:$0xff]   ;;  %v5466_v10 = vcombine.low %v241_v53, %v257_v54  ;;  %v6481_v13 = vld [vmem:[%s9061_s1 + $0x914] ss:$8 sps:$4 sm:$0xff]  }
  0x1d   : > { %4681 = vmatprep.subr.bf16.mxu0 %v6412_v25  ;;  %v6460_v63 = vld [vmem:[%s9061_s1 + $0x8e4] ss:$8 sps:$4 sm:$0xff]   ;;  %v6463_v1 = vld [vmem:[%s9061_s1 + $0x8e0] ss:$8 sps:$4 sm:$0xff]   ;;  %v6476_v14 = vld [vmem:[%s9061_s1 + $0x110] ss:$8 sps:$4 sm:$0xff]  }
  0x1e   : > { %4701 = vmatprep.mubr.bf16.mxu0 %v5467_v55  ;;  %v6472_v6 = vld [vmem:[%s9061_s1 + $0x104] ss:$8 sps:$4 sm:$0xff]   ;;  %v6470_v9 = vld [vmem:[%s9061_s1 + $0x100] ss:$8 sps:$4 sm:$0xff]   ;;  %v6479_v15 = vld [vmem:[%s9061_s1 + $0x910] ss:$8 sps:$4 sm:$0xff]  }
  0x1f   : > { %4098 = vmatpush1.bf16.msra.mxu1 %v6414_v26  ;;  %v6475_v7 = vld [vmem:[%s9061_s1 + $0x904] ss:$8 sps:$4 sm:$0xff]   ;;  %v6473_v11 = vld [vmem:[%s9061_s1 + $0x900] ss:$8 sps:$4 sm:$0xff]   ;;  %v6490_v22 = vld [vmem:[%s9061_s1 + $0x134] ss:$8 sps:$4 sm:$0xff]  }
  0x20   : > { %4682 = vmatpush1.bf16.msra.mxu0 %v6415_v27  ;;  %4099 = vmatprep.subr.bf16.mxu1 %v6416_v28  ;;  %v6484_v16 = vld [vmem:[%s9061_s1 + $0x124] ss:$8 sps:$4 sm:$0xff]   ;;  %v6482_v18 = vld [vmem:[%s9061_s1 + $0x120] ss:$8 sps:$4 sm:$0xff]   ;;  %v6493_v23 = vld [vmem:[%s9061_s1 + $0x934] ss:$8 sps:$4 sm:$0xff]  }
  0x21   : > { %4683 = vmatprep.subr.bf16.mxu0 %v6418_v29  ;;  %v6487_v17 = vld [vmem:[%s9061_s1 + $0x924] ss:$8 sps:$4 sm:$0xff]   ;;  %v6485_v19 = vld [vmem:[%s9061_s1 + $0x920] ss:$8 sps:$4 sm:$0xff]   ;;  %v6488_v29 = vld [vmem:[%s9061_s1 + $0x130] ss:$8 sps:$4 sm:$0xff]  }
  0x22   : > { %v265_v20 = vld [vmem:[%s7328_s19 + $0x100] sm:$0xff] }
  0x23   : > { %4100 = vmatpush1.bf16.msra.mxu1 %v6420_v30  ;;  %v281_v21 = vld [vmem:[%s7328_s19 + $0x180] sm:$0xff]  ;;  %v6491_v30 = vld [vmem:[%s9061_s1 + $0x930] ss:$8 sps:$4 sm:$0xff]  }
  0x24   : > { %4684 = vmatpush1.bf16.msra.mxu0 %v6421_v31  ;;  %4101 = vmatprep.subr.bf16.mxu1 %v6422_v32  ;;  %v5483_v24 = vcombine.high %v265_v20, %v281_v21  ;;  %v273_v25 = vld [vmem:[%s7328_s19 + $0x140] sm:$0xff]  ;;  %v5482_v26 = vcombine.low %v265_v20, %v281_v21  ;;  %v6536_v20 = vld [vmem:[%s9061_s1 + $0x1b0] ss:$8 sps:$4 sm:$0xff]  }
  0x25   : > { %4685 = vmatprep.subr.bf16.mxu0 %v6424_v33  ;;  %v289_v27 = vld [vmem:[%s7328_s19 + $0x1c0] sm:$0xff]  ;;  %v6539_v21 = vld [vmem:[%s9061_s1 + $0x9b0] ss:$8 sps:$4 sm:$0xff]  }
  0x26   : > { %v5499_v28 = vcombine.high %v273_v25, %v289_v27  ;;  %v5498_v31 = vcombine.low %v273_v25, %v289_v27  ;;  %v6496_v32 = vld [vmem:[%s9061_s1 + $0x144] ss:$8 sps:$4 sm:$0xff]   ;;  %v6506_v55 = vld [vmem:[%s9061_s1 + $0x160] ss:$8 sps:$4 sm:$0xff]   ;;  %v6553_v27 = vld [vmem:[%s9061_s1 + $0x9d4] ss:$8 sps:$4 sm:$0xff]  }
  0x27   : > { %4102 = vmatpush1.bf16.msra.mxu1 %v6426_v34  ;;  %v6499_v33 = vld [vmem:[%s9061_s1 + $0x944] ss:$8 sps:$4 sm:$0xff]   ;;  %v6545_v25 = vld [vmem:[%s9061_s1 + $0x9c0] ss:$8 sps:$4 sm:$0xff]  }
  0x28   : > { %4686 = vmatpush1.bf16.msra.mxu0 %v6427_v35  ;;  %4103 = vmatprep.subr.bf16.mxu1 %v6428_v36  ;;  %v297_v34 = vld [vmem:[%s7328_s19 + $0x200] sm:$0xff] }
  0x29   : > { %4687 = vmatprep.subr.bf16.mxu0 %v6430_v37  ;;  %v313_v35 = vld [vmem:[%s7328_s19 + $0x280] sm:$0xff] }
  0x2a   : > { %v6494_v36 = vld [vmem:[%s9061_s1 + $0x140] ss:$8 sps:$4 sm:$0xff]   ;;  %v5515_v37 = vcombine.high %v297_v34, %v313_v35 }
  0x2b   : > { %4104 = vmatpush1.bf16.msra.mxu1 %v6432_v38  ;;  %v6497_v38 = vld [vmem:[%s9061_s1 + $0x940] ss:$8 sps:$4 sm:$0xff]  }
  0x2c   : > { %4688 = vmatpush1.bf16.msra.mxu0 %v6433_v39  ;;  %4105 = vmatprep.subr.bf16.mxu1 %v6434_v40  ;;  %v305_v39 = vld [vmem:[%s7328_s19 + $0x240] sm:$0xff] }
  0x2d   : > { %4689 = vmatprep.subr.bf16.mxu0 %v6436_v41  ;;  %v321_v40 = vld [vmem:[%s7328_s19 + $0x2c0] sm:$0xff]  ;;  %v5514_v41 = vcombine.low %v297_v34, %v313_v35  ;;  %v6562_v34 = vld [vmem:[%s9061_s1 + $0x1f4] ss:$8 sps:$4 sm:$0xff]  }
  0x2e   : > { %v329_v48 = vld [vmem:[%s7328_s19 + $0x300] sm:$0xff]  ;;  %v6565_v35 = vld [vmem:[%s9061_s1 + $0x9f4] ss:$8 sps:$4 sm:$0xff]  }
  0x2f   : > { %4106 = vmatpush1.bf16.msra.mxu1 %v6438_v42  ;;  %v6502_v42 = vld [vmem:[%s9061_s1 + $0x154] ss:$8 sps:$4 sm:$0xff]   ;;  %v345_v49 = vld [vmem:[%s7328_s19 + $0x380] sm:$0xff] }
  0x30   : > { %4690 = vmatpush1.bf16.msra.mxu0 %v6439_v43  ;;  %4107 = vmatprep.subr.bf16.mxu1 %v6440_v44  ;;  %v5531_v43 = vcombine.high %v305_v39, %v321_v40  ;;  %v6505_v44 = vld [vmem:[%s9061_s1 + $0x954] ss:$8 sps:$4 sm:$0xff]   ;;  %v5547_v52 = vcombine.high %v329_v48, %v345_v49  ;;  %v337_v53 = vld [vmem:[%s7328_s19 + $0x340] sm:$0xff] }
  0x31   : > { %4691 = vmatprep.subr.bf16.mxu0 %v6442_v45  ;;  %v6500_v45 = vld [vmem:[%s9061_s1 + $0x150] ss:$8 sps:$4 sm:$0xff]   ;;  %v353_v54 = vld [vmem:[%s7328_s19 + $0x3c0] sm:$0xff] }
  0x33   : > { %4108 = vmatpush1.bf16.msra.mxu1 %v6444_v46  ;;  %v6503_v46 = vld [vmem:[%s9061_s1 + $0x950] ss:$8 sps:$4 sm:$0xff]  }
  0x34   : > { %4692 = vmatpush1.bf16.msra.mxu0 %v6445_v47  ;;  %4109 = vmatprep.subr.bf16.mxu1 %v6446_v50  ;;  %v5530_v47 = vcombine.low %v305_v39, %v321_v40  ;;  %v6508_v50 = vld [vmem:[%s9061_s1 + $0x164] ss:$8 sps:$4 sm:$0xff]   ;;  %v6566_v40 = vld [vmem:[%s9061_s1 + $0x200] ss:$8 sps:$4 sm:$0xff]  }
  0x35   : > { %4693 = vmatprep.subr.bf16.mxu0 %v6448_v51  ;;  %v6511_v51 = vld [vmem:[%s9061_s1 + $0x964] ss:$8 sps:$4 sm:$0xff]  }
  0x36   : > { %v6571_v39 = vld [vmem:[%s9061_s1 + $0xa04] ss:$8 sps:$4 sm:$0xff]  }
  0x37   : > { %4110 = vmatpush1.bf16.msra.mxu1 %v6450_v56  ;;  %v6509_v56 = vld [vmem:[%s9061_s1 + $0x960] ss:$8 sps:$4 sm:$0xff]  }
  0x38   : > { %4694 = vmatpush1.bf16.msra.mxu0 %v6451_v57  ;;  %4111 = vmatprep.subr.bf16.mxu1 %v6452_v58  ;;  %v5563_v57 = vcombine.high %v337_v53, %v353_v54  ;;  %v5546_v58 = vcombine.low %v329_v48, %v345_v49  ;;  %v6574_v48 = vld [vmem:[%s9061_s1 + $0x214] ss:$8 sps:$4 sm:$0xff]  }
  0x39   : > { %4695 = vmatprep.subr.bf16.mxu0 %v6454_v59  ;;  %v6514_v59 = vld [vmem:[%s9061_s1 + $0x174] ss:$8 sps:$4 sm:$0xff]  }
  0x3a   : > { %v6577_v49 = vld [vmem:[%s9061_s1 + $0xa14] ss:$8 sps:$4 sm:$0xff]  }
  0x3b   : > { %4112 = vmatpush1.bf16.msra.mxu1 %v6456_v60  ;;  %v6517_v60 = vld [vmem:[%s9061_s1 + $0x974] ss:$8 sps:$4 sm:$0xff]  }
  0x3c   : > { %4696 = vmatpush1.bf16.msra.mxu0 %v6457_v61  ;;  %4113 = vmatprep.subr.bf16.mxu1 %v6458_v62  ;;  %v6512_v61 = vld [vmem:[%s9061_s1 + $0x170] ss:$8 sps:$4 sm:$0xff]  }
  0x3d   : > { %4697 = vmatprep.subr.bf16.mxu0 %v6460_v63  ;;  %v6515_v62 = vld [vmem:[%s9061_s1 + $0x970] ss:$8 sps:$4 sm:$0xff]   ;;  %v7503_v63 = vld [vmem:[%s7328_s19 + $0x8] sm:$0xff] }
  0x3f   : > { %4114 = vmatpush1.bf16.msra.mxu1 %v6462_v0  ;;  %v5562_v0 = vcombine.low %v337_v53, %v353_v54  ;;  %v6575_v53 = vld [vmem:[%s9061_s1 + $0xa10] ss:$8 sps:$4 sm:$0xff]   ;;  %v6580_v54 = vld [vmem:[%s9061_s1 + $0x224] ss:$8 sps:$4 sm:$0xff]  }
  0x40   : > { %4698 = vmatpush1.bf16.msra.mxu0 %v6463_v1  ;;  %4115 = vmatprep.subr.bf16.mxu1 %v6464_v2  ;;  %v7506_v1 = vld [vmem:[%s7328_s19 + $0x88] sm:$0xff] }
  0x41   : > { %4699 = vmatprep.subr.bf16.mxu0 %v6466_v3  ;;  %v6520_v2 = vld [vmem:[%s9061_s1 + $0x184] ss:$8 sps:$4 sm:$0xff]  }
  0x42   : > { %v6523_v3 = vld [vmem:[%s9061_s1 + $0x984] ss:$8 sps:$4 sm:$0xff]  }
  0x43   : > { %4116 = vmatpush1.bf16.msra.mxu1 %v6468_v4  ;;  %v5453_v4 = vcombine.high %v7503_v63, %v7506_v1 }
  0x44   : > { %4700 = vmatpush1.bf16.msra.mxu0 %v6469_v5  ;;  %4158 = vmatprep.subr.bf16.mxu1 %v6472_v6  ;;  %v7517_v5 = vld [vmem:[%s7328_s19 + $0x48] sm:$0xff] }
  0x45   : > { %4742 = vmatprep.subr.bf16.mxu0 %v6475_v7  ;;  %v7520_v6 = vld [vmem:[%s7328_s19 + $0xc8] sm:$0xff] }
  0x46   : > { %4118 = vmatmul.mubr.bf16.vlgmr.msra.gmra.mrb[0].mxu1 %v5450_v8  ;;  %v5469_v7 = vcombine.high %v7517_v5, %v7520_v6  ;;  %v6518_v8 = vld [vmem:[%s9061_s1 + $0x180] ss:$8 sps:$4 sm:$0xff]  }
  0x47   : > { %4702 = vmatmul.mubr.bf16.vlgmr.msra.gmra.mrb[0].mxu0 %v5466_v10  ;;  %4159 = vmatpush1.bf16.msra.mxu1 %v6470_v9  ;;  %v6521_v9 = vld [vmem:[%s9061_s1 + $0x980] ss:$8 sps:$4 sm:$0xff]   ;;  %v6526_v10 = vld [vmem:[%s9061_s1 + $0x194] ss:$8 sps:$4 sm:$0xff]  }
  0x48   : > { %4743 = vmatpush1.bf16.msra.mxu0 %v6473_v11  ;;  %4160 = vmatprep.subr.bf16.mxu1 %v6478_v12  ;;  %v6529_v11 = vld [vmem:[%s9061_s1 + $0x994] ss:$8 sps:$4 sm:$0xff]   ;;  %v6524_v12 = vld [vmem:[%s9061_s1 + $0x190] ss:$8 sps:$4 sm:$0xff]  }
  0x49   : > { %4744 = vmatprep.subr.bf16.mxu0 %v6481_v13  ;;  %4127 = vmatprep.mubr.bf16.mxu1 %v5483_v24  ;;  %v6527_v13 = vld [vmem:[%s9061_s1 + $0x990] ss:$8 sps:$4 sm:$0xff]   ;;  %v6542_v24 = vld [vmem:[%s9061_s1 + $0x1c0] ss:$8 sps:$4 sm:$0xff]  }
  0x4a   : > { %4711 = vmatprep.mubr.bf16.mxu0 %v5499_v28  ;;  %v6548_v28 = vld [vmem:[%s9061_s1 + $0x1d0] ss:$8 sps:$4 sm:$0xff]  }
  0x4b   : > { %4161 = vmatpush1.bf16.msra.mxu1 %v6476_v14  ;;  %v6532_v14 = vld [vmem:[%s9061_s1 + $0x1a4] ss:$8 sps:$4 sm:$0xff]  }
  0x4c   : > { %4745 = vmatpush1.bf16.msra.mxu0 %v6479_v15  ;;  %4162 = vmatprep.subr.bf16.mxu1 %v6484_v16  ;;  %v6535_v15 = vld [vmem:[%s9061_s1 + $0x9a4] ss:$8 sps:$4 sm:$0xff]   ;;  %v6530_v16 = vld [vmem:[%s9061_s1 + $0x1a0] ss:$8 sps:$4 sm:$0xff]  }
  0x4d   : > { %4746 = vmatprep.subr.bf16.mxu0 %v6487_v17  ;;  %v6533_v17 = vld [vmem:[%s9061_s1 + $0x9a0] ss:$8 sps:$4 sm:$0xff]  }
  0x4e   : > { %4128 = vmatmul.mubr.bf16.gmra.mrb[4].mxu1 %v5482_v26  ;;  %v6550_v26 = vld [vmem:[%s9061_s1 + $0x1d4] ss:$8 sps:$4 sm:$0xff]  }
  0x4f   : > { %4163 = vmatpush1.bf16.msra.mxu1 %v6482_v18  ;;  %4712 = vmatmul.mubr.bf16.gmra.mrb[4].mxu0 %v5498_v31  ;;  %v6538_v18 = vld [vmem:[%s9061_s1 + $0x1b4] ss:$8 sps:$4 sm:$0xff]   ;;  %v6559_v31 = vld [vmem:[%s9061_s1 + $0x9e4] ss:$8 sps:$4 sm:$0xff]  }
  0x50   : > { %4747 = vmatpush1.bf16.msra.mxu0 %v6485_v19  ;;  %4164 = vmatprep.subr.bf16.mxu1 %v6490_v22  ;;  %v6541_v19 = vld [vmem:[%s9061_s1 + $0x9b4] ss:$8 sps:$4 sm:$0xff]   ;;  %v6544_v22 = vld [vmem:[%s9061_s1 + $0x1c4] ss:$8 sps:$4 sm:$0xff]  }
  0x51   : > { %4748 = vmatprep.subr.bf16.mxu0 %v6493_v23  ;;  %4137 = vmatprep.mubr.bf16.mxu1 %v5515_v37  ;;  %v6547_v23 = vld [vmem:[%s9061_s1 + $0x9c4] ss:$8 sps:$4 sm:$0xff]   ;;  %v6563_v37 = vld [vmem:[%s9061_s1 + $0x9f0] ss:$8 sps:$4 sm:$0xff]  }
  0x52   : > { %4721 = vmatprep.mubr.bf16.mxu0 %v5531_v43  ;;  %v5452_v43 = vcombine.low %v7503_v63, %v7506_v1  ;;  %v322_v63 = vld [vmem:[%s7328_s19 + $0x2c8] sm:$0xff]  ;;  %v6589_v1 = vld [vmem:[%s9061_s1 + $0xa34] ss:$8 sps:$4 sm:$0xff]  }
  0x53   : > { %4165 = vmatpush1.bf16.msra.mxu1 %v6488_v29  ;;  %v6551_v29 = vld [vmem:[%s9061_s1 + $0x9d0] ss:$8 sps:$4 sm:$0xff]  }
  0x54   : > { %4749 = vmatpush1.bf16.msra.mxu0 %v6491_v30  ;;  %4166 = vmatprep.subr.bf16.mxu1 %v6496_v32  ;;  %v6556_v30 = vld [vmem:[%s9061_s1 + $0x1e4] ss:$8 sps:$4 sm:$0xff]   ;;  %v6554_v32 = vld [vmem:[%s9061_s1 + $0x1e0] ss:$8 sps:$4 sm:$0xff]  }
  0x55   : > { %4750 = vmatprep.subr.bf16.mxu0 %v6499_v33  ;;  %v6557_v33 = vld [vmem:[%s9061_s1 + $0x9e0] ss:$8 sps:$4 sm:$0xff]  }
  0x56   : > { %4138 = vmatmul.mubr.bf16.gmra.mrb[8].mxu1 %v5514_v41  ;;  %v6569_v41 = vld [vmem:[%s9061_s1 + $0xa00] ss:$8 sps:$4 sm:$0xff]  }
  0x57   : > { %4167 = vmatpush1.bf16.msra.mxu1 %v6494_v36  ;;  %4722 = vmatmul.mubr.bf16.gmra.mrb[8].mxu0 %v5530_v47  ;;  %v6560_v36 = vld [vmem:[%s9061_s1 + $0x1f0] ss:$8 sps:$4 sm:$0xff]   ;;  %v290_v47 = vld [vmem:[%s7328_s19 + $0x1c8] sm:$0xff] }
  0x58   : > { %4751 = vmatpush1.bf16.msra.mxu0 %v6497_v38  ;;  %4168 = vmatprep.subr.bf16.mxu1 %v6502_v42  ;;  %v6568_v38 = vld [vmem:[%s9061_s1 + $0x204] ss:$8 sps:$4 sm:$0xff]  }
  0x59   : > { %4752 = vmatprep.subr.bf16.mxu0 %v6505_v44  ;;  %4147 = vmatprep.mubr.bf16.mxu1 %v5547_v52  ;;  %v266_v42 = vld [vmem:[%s7328_s19 + $0x108] sm:$0xff]  ;;  %v5468_v44 = vcombine.low %v7517_v5, %v7520_v6  ;;  %v6572_v52 = vld [vmem:[%s9061_s1 + $0x210] ss:$8 sps:$4 sm:$0xff]  }
  0x5a   : > { %4731 = vmatprep.mubr.bf16.mxu0 %v5563_v57  ;;  %v6581_v57 = vld [vmem:[%s9061_s1 + $0xa20] ss:$8 sps:$4 sm:$0xff]   ;;  %v6587_v5 = vld [vmem:[%s9061_s1 + $0xa30] ss:$8 sps:$4 sm:$0xff]   ;;  %v6592_v6 = vld [vmem:[%s9061_s1 + $0x244] ss:$8 sps:$4 sm:$0xff]  }
  0x5b   : > { %4169 = vmatpush1.bf16.msra.mxu1 %v6500_v45  ;;  %v282_v45 = vld [vmem:[%s7328_s19 + $0x188] sm:$0xff] }
  0x5c   : > { %4753 = vmatpush1.bf16.msra.mxu0 %v6503_v46  ;;  %4170 = vmatprep.subr.bf16.mxu1 %v6508_v50  ;;  %v274_v46 = vld [vmem:[%s7328_s19 + $0x148] sm:$0xff]  ;;  %v5485_v50 = vcombine.high %v266_v42, %v282_v45 }
  0x5d   : > { %4754 = vmatprep.subr.bf16.mxu0 %v6511_v51  ;;  %v5501_v51 = vcombine.high %v274_v46, %v290_v47 }
  0x5e   : > { %4148 = vmatmul.mubr.bf16.gmra.mrb[12].mxu1 %v5546_v58  ;;  %v298_v58 = vld [vmem:[%s7328_s19 + $0x208] sm:$0xff] }
  0x5f   : > { %4171 = vmatpush1.bf16.msra.mxu1 %v6506_v55  ;;  %4190 = vmatprep.mubr.bf16.mxu1 %v5453_v4  ;;  %v6583_v55 = vld [vmem:[%s9061_s1 + $0xa24] ss:$8 sps:$4 sm:$0xff]   ;;  %v6584_v4 = vld [vmem:[%s9061_s1 + $0x230] ss:$8 sps:$4 sm:$0xff]  }
  0x60   : > { %4755 = vmatpush1.bf16.msra.mxu0 %v6509_v56  ;;  %4172 = vmatprep.subr.bf16.mxu1 %v6514_v59  ;;  %v6578_v56 = vld [vmem:[%s9061_s1 + $0x220] ss:$8 sps:$4 sm:$0xff]  }
  0x61   : > { %4756 = vmatprep.subr.bf16.mxu0 %v6517_v60  ;;  %4732 = vmatmul.mubr.bf16.gmra.mrb[12].mxu0 %v5562_v0  ;;  %v314_v59 = vld [vmem:[%s7328_s19 + $0x288] sm:$0xff]  ;;  %v5484_v60 = vcombine.low %v266_v42, %v282_v45  ;;  %v6586_v0 = vld [vmem:[%s9061_s1 + $0x234] ss:$8 sps:$4 sm:$0xff]   ;;  %v6623_v45 = vld [vmem:[%s9061_s1 + $0xa90] ss:$8 sps:$4 sm:$0xff]  }
  0x62   : > { %4774 = vmatprep.mubr.bf16.mxu0 %v5469_v7  ;;  %v6595_v7 = vld [vmem:[%s9061_s1 + $0xa44] ss:$8 sps:$4 sm:$0xff]   ;;  %v6622_v42 = vld [vmem:[%s9061_s1 + $0x294] ss:$8 sps:$4 sm:$0xff]  }
  0x63   : > { %4173 = vmatpush1.bf16.msra.mxu1 %v6512_v61  ;;  %v5500_v61 = vcombine.low %v274_v46, %v290_v47  ;;  %v6628_v46 = vld [vmem:[%s9061_s1 + $0x2a4] ss:$8 sps:$4 sm:$0xff]  }
  0x64   : > { %4757 = vmatpush1.bf16.msra.mxu0 %v6515_v62  ;;  %4174 = vmatprep.subr.bf16.mxu1 %v6520_v2  ;;  %v306_v62 = vld [vmem:[%s7328_s19 + $0x248] sm:$0xff]  ;;  %v5517_v2 = vcombine.high %v298_v58, %v314_v59 }
  0x65   : > { %4758 = vmatprep.subr.bf16.mxu0 %v6523_v3  ;;  %v5533_v3 = vcombine.high %v306_v62, %v322_v63  ;;  %v6631_v47 = vld [vmem:[%s9061_s1 + $0xaa4] ss:$8 sps:$4 sm:$0xff]  }
  0x67   : > { %4175 = vmatpush1.bf16.msra.mxu1 %v6518_v8  ;;  %v6590_v8 = vld [vmem:[%s9061_s1 + $0x240] ss:$8 sps:$4 sm:$0xff]  }
  0x68   : > { %4759 = vmatpush1.bf16.msra.mxu0 %v6521_v9  ;;  %4176 = vmatprep.subr.bf16.mxu1 %v6526_v10  ;;  %v6593_v9 = vld [vmem:[%s9061_s1 + $0xa40] ss:$8 sps:$4 sm:$0xff]  }
  0x69   : > { %4760 = vmatprep.subr.bf16.mxu0 %v6529_v11  ;;  %v330_v10 = vld [vmem:[%s7328_s19 + $0x308] sm:$0xff] }
  0x6a   : > { %v346_v11 = vld [vmem:[%s7328_s19 + $0x388] sm:$0xff] }
  0x6b   : > { %4177 = vmatpush1.bf16.msra.mxu1 %v6524_v12  ;;  %v5516_v12 = vcombine.low %v298_v58, %v314_v59  ;;  %v6646_v58 = vld [vmem:[%s9061_s1 + $0x2d4] ss:$8 sps:$4 sm:$0xff]  }
  0x6c   : > { %4761 = vmatpush1.bf16.msra.mxu0 %v6527_v13  ;;  %4178 = vmatprep.subr.bf16.mxu1 %v6532_v14  ;;  %v5532_v13 = vcombine.low %v306_v62, %v322_v63  ;;  %v338_v14 = vld [vmem:[%s7328_s19 + $0x348] sm:$0xff]  ;;  %v6649_v59 = vld [vmem:[%s9061_s1 + $0xad4] ss:$8 sps:$4 sm:$0xff]  }
  0x6d   : > { %4762 = vmatprep.subr.bf16.mxu0 %v6535_v15  ;;  %v354_v15 = vld [vmem:[%s7328_s19 + $0x3c8] sm:$0xff] }
  0x6e   : > { %v6652_v62 = vld [vmem:[%s9061_s1 + $0x2e4] ss:$8 sps:$4 sm:$0xff]  }
  0x6f   : > { %4179 = vmatpush1.bf16.msra.mxu1 %v6530_v16  ;;  %v6598_v16 = vld [vmem:[%s9061_s1 + $0x254] ss:$8 sps:$4 sm:$0xff]   ;;  %v6655_v63 = vld [vmem:[%s9061_s1 + $0xae4] ss:$8 sps:$4 sm:$0xff]  }
  0x70   : > { %4763 = vmatpush1.bf16.msra.mxu0 %v6533_v17  ;;  %4180 = vmatprep.subr.bf16.mxu1 %v6538_v18  ;;  %v6601_v17 = vld [vmem:[%s9061_s1 + $0xa54] ss:$8 sps:$4 sm:$0xff]   ;;  %v5549_v18 = vcombine.high %v330_v10, %v346_v11 }
  0x71   : > { %4764 = vmatprep.subr.bf16.mxu0 %v6541_v19  ;;  %v5565_v19 = vcombine.high %v338_v14, %v354_v15 }
  0x73   : > { %4181 = vmatpush1.bf16.msra.mxu1 %v6536_v20  ;;  %v6596_v20 = vld [vmem:[%s9061_s1 + $0x250] ss:$8 sps:$4 sm:$0xff]  }
  0x74   : > { %4765 = vmatpush1.bf16.msra.mxu0 %v6539_v21  ;;  %4182 = vmatprep.subr.bf16.mxu1 %v6544_v22  ;;  %v6599_v21 = vld [vmem:[%s9061_s1 + $0xa50] ss:$8 sps:$4 sm:$0xff]   ;;  %v6604_v22 = vld [vmem:[%s9061_s1 + $0x264] ss:$8 sps:$4 sm:$0xff]  }
  0x75   : > { %4766 = vmatprep.subr.bf16.mxu0 %v6547_v23  ;;  %v6607_v23 = vld [vmem:[%s9061_s1 + $0xa64] ss:$8 sps:$4 sm:$0xff]  }
  0x77   : > { %4183 = vmatpush1.bf16.msra.mxu1 %v6542_v24  ;;  %v6602_v24 = vld [vmem:[%s9061_s1 + $0x260] ss:$8 sps:$4 sm:$0xff]  }
  0x78   : > { %4767 = vmatpush1.bf16.msra.mxu0 %v6545_v25  ;;  %4184 = vmatprep.subr.bf16.mxu1 %v6550_v26  ;;  %v6605_v25 = vld [vmem:[%s9061_s1 + $0xa60] ss:$8 sps:$4 sm:$0xff]   ;;  %v7715_v26 = vld [vmem:[%s7328_s19 + $0x10] sm:$0xff] }
  0x79   : > { %4768 = vmatprep.subr.bf16.mxu0 %v6553_v27  ;;  %v7718_v27 = vld [vmem:[%s7328_s19 + $0x90] sm:$0xff] }
  0x7b   : > { %4185 = vmatpush1.bf16.msra.mxu1 %v6548_v28  ;;  %v5548_v28 = vcombine.low %v330_v10, %v346_v11  ;;  %v267_v10 = vld [vmem:[%s7328_s19 + $0x110] sm:$0xff] }
  0x7c   : > { %4769 = vmatpush1.bf16.msra.mxu0 %v6551_v29  ;;  %4186 = vmatprep.subr.bf16.mxu1 %v6556_v30  ;;  %v5564_v29 = vcombine.low %v338_v14, %v354_v15  ;;  %v7721_v30 = vld [vmem:[%s7328_s19 + $0x50] sm:$0xff] }
  0x7d   : > { %4770 = vmatprep.subr.bf16.mxu0 %v6559_v31  ;;  %v7724_v31 = vld [vmem:[%s7328_s19 + $0xd0] sm:$0xff] }
  0x7e   : > { %v283_v11 = vld [vmem:[%s7328_s19 + $0x190] sm:$0xff] }
  0x7f   : > { %4187 = vmatpush1.bf16.msra.mxu1 %v6554_v32  ;;  %v6610_v32 = vld [vmem:[%s9061_s1 + $0x274] ss:$8 sps:$4 sm:$0xff]  }
  0x80   : > { %4771 = vmatpush1.bf16.msra.mxu0 %v6557_v33  ;;  %4188 = vmatprep.subr.bf16.mxu1 %v6562_v34  ;;  %v6613_v33 = vld [vmem:[%s9061_s1 + $0xa74] ss:$8 sps:$4 sm:$0xff]   ;;  %v5455_v34 = vcombine.high %v7715_v26, %v7718_v27 }
  0x81   : > { %4772 = vmatprep.subr.bf16.mxu0 %v6565_v35  ;;  %v5471_v35 = vcombine.high %v7721_v30, %v7724_v31  ;;  %v275_v14 = vld [vmem:[%s7328_s19 + $0x150] sm:$0xff] }
  0x82   : > { %v291_v15 = vld [vmem:[%s7328_s19 + $0x1d0] sm:$0xff] }
  0x83   : > { %4189 = vmatpush1.bf16.msra.mxu1 %v6560_v36  ;;  %v6608_v36 = vld [vmem:[%s9061_s1 + $0x270] ss:$8 sps:$4 sm:$0xff]  }
  0x84   : > { %4773 = vmatpush1.bf16.msra.mxu0 %v6563_v37  ;;  %4231 = vmatprep.subr.bf16.mxu1 %v6568_v38  ;;  %v6611_v37 = vld [vmem:[%s9061_s1 + $0xa70] ss:$8 sps:$4 sm:$0xff]   ;;  %v6616_v38 = vld [vmem:[%s9061_s1 + $0x284] ss:$8 sps:$4 sm:$0xff]  }
  0x85   : > { %4815 = vmatprep.subr.bf16.mxu0 %v6571_v39  ;;  %v6619_v39 = vld [vmem:[%s9061_s1 + $0xa84] ss:$8 sps:$4 sm:$0xff]  }
  0x86   : > { %4191 = vmatmul.mubr.bf16.vlgmr.msra.gmra.mrb[0].mxu1 %v5452_v43  ;;  %v6625_v43 = vld [vmem:[%s9061_s1 + $0xa94] ss:$8 sps:$4 sm:$0xff]  }
  0x87   : > { %4775 = vmatmul.mubr.bf16.vlgmr.msra.gmra.mrb[0].mxu0 %v5468_v44  ;;  %4232 = vmatpush1.bf16.msra.mxu1 %v6566_v40  ;;  %v6614_v40 = vld [vmem:[%s9061_s1 + $0x280] ss:$8 sps:$4 sm:$0xff]   ;;  %v6620_v44 = vld [vmem:[%s9061_s1 + $0x290] ss:$8 sps:$4 sm:$0xff]  }
  0x88   : > { %4816 = vmatpush1.bf16.msra.mxu0 %v6569_v41  ;;  %4233 = vmatprep.subr.bf16.mxu1 %v6574_v48  ;;  %v6617_v41 = vld [vmem:[%s9061_s1 + $0xa80] ss:$8 sps:$4 sm:$0xff]  }
  0x89   : > { %4817 = vmatprep.subr.bf16.mxu0 %v6577_v49  ;;  %4200 = vmatprep.mubr.bf16.mxu1 %v5485_v50  ;;  %v6626_v48 = vld [vmem:[%s9061_s1 + $0x2a0] ss:$8 sps:$4 sm:$0xff]   ;;  %v6634_v50 = vld [vmem:[%s9061_s1 + $0x2b4] ss:$8 sps:$4 sm:$0xff]  }
  0x8a   : > { %4784 = vmatprep.mubr.bf16.mxu0 %v5501_v51  ;;  %v6629_v49 = vld [vmem:[%s9061_s1 + $0xaa0] ss:$8 sps:$4 sm:$0xff]   ;;  %v6637_v51 = vld [vmem:[%s9061_s1 + $0xab4] ss:$8 sps:$4 sm:$0xff]  }
  0x8b   : > { %4234 = vmatpush1.bf16.msra.mxu1 %v6572_v52  ;;  %v6632_v52 = vld [vmem:[%s9061_s1 + $0x2b0] ss:$8 sps:$4 sm:$0xff]  }
  0x8c   : > { %4818 = vmatpush1.bf16.msra.mxu0 %v6575_v53  ;;  %4235 = vmatprep.subr.bf16.mxu1 %v6580_v54  ;;  %v6635_v53 = vld [vmem:[%s9061_s1 + $0xab0] ss:$8 sps:$4 sm:$0xff]   ;;  %v6640_v54 = vld [vmem:[%s9061_s1 + $0x2c4] ss:$8 sps:$4 sm:$0xff]  }
  0x8d   : > { %4819 = vmatprep.subr.bf16.mxu0 %v6583_v55  ;;  %v6643_v55 = vld [vmem:[%s9061_s1 + $0xac4] ss:$8 sps:$4 sm:$0xff]  }
  0x8e   : > { %4201 = vmatmul.mubr.bf16.gmra.mrb[4].mxu1 %v5484_v60  ;;  %v6644_v60 = vld [vmem:[%s9061_s1 + $0x2d0] ss:$8 sps:$4 sm:$0xff]  }
  0x8f   : > { %4785 = vmatmul.mubr.bf16.gmra.mrb[4].mxu0 %v5500_v61  ;;  %4236 = vmatpush1.bf16.msra.mxu1 %v6578_v56  ;;  %v6638_v56 = vld [vmem:[%s9061_s1 + $0x2c0] ss:$8 sps:$4 sm:$0xff]   ;;  %v6647_v61 = vld [vmem:[%s9061_s1 + $0xad0] ss:$8 sps:$4 sm:$0xff]  }
  0x90   : > { %4820 = vmatpush1.bf16.msra.mxu0 %v6581_v57  ;;  %4237 = vmatprep.subr.bf16.mxu1 %v6586_v0  ;;  %v6641_v57 = vld [vmem:[%s9061_s1 + $0xac0] ss:$8 sps:$4 sm:$0xff]  }
  0x91   : > { %4821 = vmatprep.subr.bf16.mxu0 %v6589_v1  ;;  %4210 = vmatprep.mubr.bf16.mxu1 %v5517_v2  ;;  %v6650_v0 = vld [vmem:[%s9061_s1 + $0x2e0] ss:$8 sps:$4 sm:$0xff]   ;;  %v6658_v2 = vld [vmem:[%s9061_s1 + $0x2f4] ss:$8 sps:$4 sm:$0xff]  }
  0x92   : > { %4794 = vmatprep.mubr.bf16.mxu0 %v5533_v3  ;;  %v6653_v1 = vld [vmem:[%s9061_s1 + $0xae0] ss:$8 sps:$4 sm:$0xff]   ;;  %v6661_v3 = vld [vmem:[%s9061_s1 + $0xaf4] ss:$8 sps:$4 sm:$0xff]  }
  0x93   : > { %4238 = vmatpush1.bf16.msra.mxu1 %v6584_v4  ;;  %v6656_v4 = vld [vmem:[%s9061_s1 + $0x2f0] ss:$8 sps:$4 sm:$0xff]  }
  0x94   : > { %4822 = vmatpush1.bf16.msra.mxu0 %v6587_v5  ;;  %4239 = vmatprep.subr.bf16.mxu1 %v6592_v6  ;;  %v6659_v5 = vld [vmem:[%s9061_s1 + $0xaf0] ss:$8 sps:$4 sm:$0xff]   ;;  %v6664_v6 = vld [vmem:[%s9061_s1 + $0x304] ss:$8 sps:$4 sm:$0xff]  }
  0x95   : > { %4823 = vmatprep.subr.bf16.mxu0 %v6595_v7  ;;  %v6667_v7 = vld [vmem:[%s9061_s1 + $0xb04] ss:$8 sps:$4 sm:$0xff]  }
  0x96   : > { %4211 = vmatmul.mubr.bf16.gmra.mrb[8].mxu1 %v5516_v12  ;;  %v5454_v12 = vcombine.low %v7715_v26, %v7718_v27  ;;  %v299_v26 = vld [vmem:[%s7328_s19 + $0x210] sm:$0xff] }
  0x97   : > { %4795 = vmatmul.mubr.bf16.gmra.mrb[8].mxu0 %v5532_v13  ;;  %4240 = vmatpush1.bf16.msra.mxu1 %v6590_v8  ;;  %v6662_v8 = vld [vmem:[%s9061_s1 + $0x300] ss:$8 sps:$4 sm:$0xff]   ;;  %v5470_v13 = vcombine.low %v7721_v30, %v7724_v31  ;;  %v315_v27 = vld [vmem:[%s7328_s19 + $0x290] sm:$0xff] }
  0x98   : > { %4824 = vmatpush1.bf16.msra.mxu0 %v6593_v9  ;;  %4241 = vmatprep.subr.bf16.mxu1 %v6598_v16  ;;  %v6665_v9 = vld [vmem:[%s9061_s1 + $0xb00] ss:$8 sps:$4 sm:$0xff]   ;;  %v6670_v16 = vld [vmem:[%s9061_s1 + $0x314] ss:$8 sps:$4 sm:$0xff]  }
  0x99   : > { %4825 = vmatprep.subr.bf16.mxu0 %v6601_v17  ;;  %4220 = vmatprep.mubr.bf16.mxu1 %v5549_v18  ;;  %v6673_v17 = vld [vmem:[%s9061_s1 + $0xb14] ss:$8 sps:$4 sm:$0xff]   ;;  %v5487_v18 = vcombine.high %v267_v10, %v283_v11 }
  0x9a   : > { %4804 = vmatprep.mubr.bf16.mxu0 %v5565_v19  ;;  %v5503_v19 = vcombine.high %v275_v14, %v291_v15  ;;  %v307_v30 = vld [vmem:[%s7328_s19 + $0x250] sm:$0xff] }
  0x9b   : > { %4242 = vmatpush1.bf16.msra.mxu1 %v6596_v20  ;;  %v6668_v20 = vld [vmem:[%s9061_s1 + $0x310] ss:$8 sps:$4 sm:$0xff]  }
  0x9c   : > { %4826 = vmatpush1.bf16.msra.mxu0 %v6599_v21  ;;  %4243 = vmatprep.subr.bf16.mxu1 %v6604_v22  ;;  %v6671_v21 = vld [vmem:[%s9061_s1 + $0xb10] ss:$8 sps:$4 sm:$0xff]   ;;  %v6676_v22 = vld [vmem:[%s9061_s1 + $0x324] ss:$8 sps:$4 sm:$0xff]  }
  0x9d   : > { %4827 = vmatprep.subr.bf16.mxu0 %v6607_v23  ;;  %v6679_v23 = vld [vmem:[%s9061_s1 + $0xb24] ss:$8 sps:$4 sm:$0xff]   ;;  %v323_v31 = vld [vmem:[%s7328_s19 + $0x2d0] sm:$0xff] }
  0x9e   : > { %4221 = vmatmul.mubr.bf16.gmra.mrb[12].mxu1 %v5548_v28  ;;  %v5486_v28 = vcombine.low %v267_v10, %v283_v11  ;;  %v6718_v10 = vld [vmem:[%s9061_s1 + $0x394] ss:$8 sps:$4 sm:$0xff]  }
  0x9f   : > { %4805 = vmatmul.mubr.bf16.gmra.mrb[12].mxu0 %v5564_v29  ;;  %4244 = vmatpush1.bf16.msra.mxu1 %v6602_v24  ;;  %v6674_v24 = vld [vmem:[%s9061_s1 + $0x320] ss:$8 sps:$4 sm:$0xff]   ;;  %v5502_v29 = vcombine.low %v275_v14, %v291_v15  ;;  %v6721_v11 = vld [vmem:[%s9061_s1 + $0xb94] ss:$8 sps:$4 sm:$0xff]   ;;  %v6724_v14 = vld [vmem:[%s9061_s1 + $0x3a4] ss:$8 sps:$4 sm:$0xff]  }
  0xa0   : > { %4828 = vmatpush1.bf16.msra.mxu0 %v6605_v25  ;;  %4245 = vmatprep.subr.bf16.mxu1 %v6610_v32  ;;  %v6677_v25 = vld [vmem:[%s9061_s1 + $0xb20] ss:$8 sps:$4 sm:$0xff]   ;;  %v6682_v32 = vld [vmem:[%s9061_s1 + $0x334] ss:$8 sps:$4 sm:$0xff]   ;;  %v6727_v15 = vld [vmem:[%s9061_s1 + $0xba4] ss:$8 sps:$4 sm:$0xff]  }
  0xa1   : > { %4829 = vmatprep.subr.bf16.mxu0 %v6613_v33  ;;  %4263 = vmatprep.mubr.bf16.mxu1 %v5455_v34  ;;  %v6685_v33 = vld [vmem:[%s9061_s1 + $0xb34] ss:$8 sps:$4 sm:$0xff]   ;;  %v5519_v34 = vcombine.high %v299_v26, %v315_v27 }
  0xa2   : > { %4847 = vmatprep.mubr.bf16.mxu0 %v5471_v35  ;;  %v5535_v35 = vcombine.high %v307_v30, %v323_v31 }
  0xa3   : > { %4246 = vmatpush1.bf16.msra.mxu1 %v6608_v36  ;;  %v6680_v36 = vld [vmem:[%s9061_s1 + $0x330] ss:$8 sps:$4 sm:$0xff]  }
  0xa4   : > { %4830 = vmatpush1.bf16.msra.mxu0 %v6611_v37  ;;  %4247 = vmatprep.subr.bf16.mxu1 %v6616_v38  ;;  %v6683_v37 = vld [vmem:[%s9061_s1 + $0xb30] ss:$8 sps:$4 sm:$0xff]   ;;  %v6688_v38 = vld [vmem:[%s9061_s1 + $0x344] ss:$8 sps:$4 sm:$0xff]  }
  0xa5   : > { %4831 = vmatprep.subr.bf16.mxu0 %v6619_v39  ;;  %v6691_v39 = vld [vmem:[%s9061_s1 + $0xb44] ss:$8 sps:$4 sm:$0xff]  }
  0xa7   : > { %4248 = vmatpush1.bf16.msra.mxu1 %v6614_v40  ;;  %v6686_v40 = vld [vmem:[%s9061_s1 + $0x340] ss:$8 sps:$4 sm:$0xff]  }
  0xa8   : > { %4832 = vmatpush1.bf16.msra.mxu0 %v6617_v41  ;;  %4249 = vmatprep.subr.bf16.mxu1 %v6622_v42  ;;  %v6689_v41 = vld [vmem:[%s9061_s1 + $0xb40] ss:$8 sps:$4 sm:$0xff]   ;;  %v331_v42 = vld [vmem:[%s7328_s19 + $0x310] sm:$0xff] }
  0xa9   : > { %4833 = vmatprep.subr.bf16.mxu0 %v6625_v43  ;;  %v347_v43 = vld [vmem:[%s7328_s19 + $0x390] sm:$0xff] }
  0xab   : > { %4250 = vmatpush1.bf16.msra.mxu1 %v6620_v44  ;;  %v5518_v44 = vcombine.low %v299_v26, %v315_v27  ;;  %v6742_v26 = vld [vmem:[%s9061_s1 + $0x3d4] ss:$8 sps:$4 sm:$0xff]  }
  0xac   : > { %4834 = vmatpush1.bf16.msra.mxu0 %v6623_v45  ;;  %4251 = vmatprep.subr.bf16.mxu1 %v6628_v46  ;;  %v5534_v45 = vcombine.low %v307_v30, %v323_v31  ;;  %v339_v46 = vld [vmem:[%s7328_s19 + $0x350] sm:$0xff]  ;;  %v6748_v30 = vld [vmem:[%s9061_s1 + $0x3e4] ss:$8 sps:$4 sm:$0xff]  }
  0xad   : > { %4835 = vmatprep.subr.bf16.mxu0 %v6631_v47  ;;  %v355_v47 = vld [vmem:[%s7328_s19 + $0x3d0] sm:$0xff]  ;;  %v6751_v31 = vld [vmem:[%s9061_s1 + $0xbe4] ss:$8 sps:$4 sm:$0xff]  }
  0xae   : > { %v6745_v27 = vld [vmem:[%s9061_s1 + $0xbd4] ss:$8 sps:$4 sm:$0xff]  }
  0xaf   : > { %4252 = vmatpush1.bf16.msra.mxu1 %v6626_v48  ;;  %v6694_v48 = vld [vmem:[%s9061_s1 + $0x354] ss:$8 sps:$4 sm:$0xff]  }
  0xb0   : > { %4836 = vmatpush1.bf16.msra.mxu0 %v6629_v49  ;;  %4253 = vmatprep.subr.bf16.mxu1 %v6634_v50  ;;  %v6697_v49 = vld [vmem:[%s9061_s1 + $0xb54] ss:$8 sps:$4 sm:$0xff]   ;;  %v5551_v50 = vcombine.high %v331_v42, %v347_v43 }
  0xb1   : > { %4837 = vmatprep.subr.bf16.mxu0 %v6637_v51  ;;  %v5567_v51 = vcombine.high %v339_v46, %v355_v47 }
  0xb3   : > { %4254 = vmatpush1.bf16.msra.mxu1 %v6632_v52  ;;  %v6692_v52 = vld [vmem:[%s9061_s1 + $0x350] ss:$8 sps:$4 sm:$0xff]  }
  0xb4   : > { %4838 = vmatpush1.bf16.msra.mxu0 %v6635_v53  ;;  %4255 = vmatprep.subr.bf16.mxu1 %v6640_v54  ;;  %v6695_v53 = vld [vmem:[%s9061_s1 + $0xb50] ss:$8 sps:$4 sm:$0xff]   ;;  %v6700_v54 = vld [vmem:[%s9061_s1 + $0x364] ss:$8 sps:$4 sm:$0xff]  }
  0xb5   : > { %4839 = vmatprep.subr.bf16.mxu0 %v6643_v55  ;;  %v6703_v55 = vld [vmem:[%s9061_s1 + $0xb64] ss:$8 sps:$4 sm:$0xff]  }
  0xb7   : > { %4256 = vmatpush1.bf16.msra.mxu1 %v6638_v56  ;;  %v7933_v56 = vld [vmem:[%s7328_s19 + $0x18] sm:$0xff] }
  0xb8   : > { %4840 = vmatpush1.bf16.msra.mxu0 %v6641_v57  ;;  %4257 = vmatprep.subr.bf16.mxu1 %v6646_v58  ;;  %v7936_v57 = vld [vmem:[%s7328_s19 + $0x98] sm:$0xff] }
  0xb9   : > { %4841 = vmatprep.subr.bf16.mxu0 %v6649_v59  ;;  %v7939_v58 = vld [vmem:[%s7328_s19 + $0x58] sm:$0xff]  ;;  %v5550_v59 = vcombine.low %v331_v42, %v347_v43 }
  0xba   : > { %v268_v42 = vld [vmem:[%s7328_s19 + $0x118] sm:$0xff] }
  0xbb   : > { %4258 = vmatpush1.bf16.msra.mxu1 %v6644_v60  ;;  %v5566_v60 = vcombine.low %v339_v46, %v355_v47  ;;  %v284_v43 = vld [vmem:[%s7328_s19 + $0x198] sm:$0xff] }
  0xbc   : > { %4842 = vmatpush1.bf16.msra.mxu0 %v6647_v61  ;;  %4259 = vmatprep.subr.bf16.mxu1 %v6652_v62  ;;  %v7942_v61 = vld [vmem:[%s7328_s19 + $0xd8] sm:$0xff]  ;;  %v6698_v62 = vld [vmem:[%s9061_s1 + $0x360] ss:$8 sps:$4 sm:$0xff]  }
  0xbd   : > { %4843 = vmatprep.subr.bf16.mxu0 %v6655_v63  ;;  %v6701_v63 = vld [vmem:[%s9061_s1 + $0xb60] ss:$8 sps:$4 sm:$0xff]   ;;  %v276_v46 = vld [vmem:[%s7328_s19 + $0x158] sm:$0xff] }
  0xbe   : > { %v292_v47 = vld [vmem:[%s7328_s19 + $0x1d8] sm:$0xff] }
  0xbf   : > { %4260 = vmatpush1.bf16.msra.mxu1 %v6650_v0  ;;  %v6706_v0 = vld [vmem:[%s9061_s1 + $0x374] ss:$8 sps:$4 sm:$0xff]  }
  0xc0   : > { %4844 = vmatpush1.bf16.msra.mxu0 %v6653_v1  ;;  %4261 = vmatprep.subr.bf16.mxu1 %v6658_v2  ;;  %v6709_v1 = vld [vmem:[%s9061_s1 + $0xb74] ss:$8 sps:$4 sm:$0xff]   ;;  %v5457_v2 = vcombine.high %v7933_v56, %v7936_v57 }
  0xc1   : > { %4845 = vmatprep.subr.bf16.mxu0 %v6661_v3  ;;  %v5473_v3 = vcombine.high %v7939_v58, %v7942_v61 }
  0xc3   : > { %4262 = vmatpush1.bf16.msra.mxu1 %v6656_v4  ;;  %v6704_v4 = vld [vmem:[%s9061_s1 + $0x370] ss:$8 sps:$4 sm:$0xff]  }
  0xc4   : > { %4846 = vmatpush1.bf16.msra.mxu0 %v6659_v5  ;;  %4304 = vmatprep.subr.bf16.mxu1 %v6664_v6  ;;  %v6707_v5 = vld [vmem:[%s9061_s1 + $0xb70] ss:$8 sps:$4 sm:$0xff]   ;;  %v6712_v6 = vld [vmem:[%s9061_s1 + $0x384] ss:$8 sps:$4 sm:$0xff]  }
  0xc5   : > { %4888 = vmatprep.subr.bf16.mxu0 %v6667_v7  ;;  %v6715_v7 = vld [vmem:[%s9061_s1 + $0xb84] ss:$8 sps:$4 sm:$0xff]  }
  0xc6   : > { %4264 = vmatmul.mubr.bf16.vlgmr.msra.gmra.mrb[0].mxu1 %v5454_v12  ;;  %v6716_v12 = vld [vmem:[%s9061_s1 + $0x390] ss:$8 sps:$4 sm:$0xff]  }
  0xc7   : > { %4848 = vmatmul.mubr.bf16.vlgmr.msra.gmra.mrb[0].mxu0 %v5470_v13  ;;  %4305 = vmatpush1.bf16.msra.mxu1 %v6662_v8  ;;  %v6710_v8 = vld [vmem:[%s9061_s1 + $0x380] ss:$8 sps:$4 sm:$0xff]   ;;  %v6719_v13 = vld [vmem:[%s9061_s1 + $0xb90] ss:$8 sps:$4 sm:$0xff]  }
  0xc8   : > { %4889 = vmatpush1.bf16.msra.mxu0 %v6665_v9  ;;  %4306 = vmatprep.subr.bf16.mxu1 %v6670_v16  ;;  %v6713_v9 = vld [vmem:[%s9061_s1 + $0xb80] ss:$8 sps:$4 sm:$0xff]  }
  0xc9   : > { %4890 = vmatprep.subr.bf16.mxu0 %v6673_v17  ;;  %4273 = vmatprep.mubr.bf16.mxu1 %v5487_v18  ;;  %v6722_v16 = vld [vmem:[%s9061_s1 + $0x3a0] ss:$8 sps:$4 sm:$0xff]   ;;  %v6730_v18 = vld [vmem:[%s9061_s1 + $0x3b4] ss:$8 sps:$4 sm:$0xff]  }
  0xca   : > { %4857 = vmatprep.mubr.bf16.mxu0 %v5503_v19  ;;  %v6725_v17 = vld [vmem:[%s9061_s1 + $0xba0] ss:$8 sps:$4 sm:$0xff]   ;;  %v6733_v19 = vld [vmem:[%s9061_s1 + $0xbb4] ss:$8 sps:$4 sm:$0xff]  }
  0xcb   : > { %4307 = vmatpush1.bf16.msra.mxu1 %v6668_v20  ;;  %v6728_v20 = vld [vmem:[%s9061_s1 + $0x3b0] ss:$8 sps:$4 sm:$0xff]  }
  0xcc   : > { %4891 = vmatpush1.bf16.msra.mxu0 %v6671_v21  ;;  %4308 = vmatprep.subr.bf16.mxu1 %v6676_v22  ;;  %v6731_v21 = vld [vmem:[%s9061_s1 + $0xbb0] ss:$8 sps:$4 sm:$0xff]   ;;  %v6736_v22 = vld [vmem:[%s9061_s1 + $0x3c4] ss:$8 sps:$4 sm:$0xff]  }
  0xcd   : > { %4892 = vmatprep.subr.bf16.mxu0 %v6679_v23  ;;  %v6739_v23 = vld [vmem:[%s9061_s1 + $0xbc4] ss:$8 sps:$4 sm:$0xff]  }
  0xce   : > { %4274 = vmatmul.mubr.bf16.gmra.mrb[4].mxu1 %v5486_v28  ;;  %v6740_v28 = vld [vmem:[%s9061_s1 + $0x3d0] ss:$8 sps:$4 sm:$0xff]  }
  0xcf   : > { %4858 = vmatmul.mubr.bf16.gmra.mrb[4].mxu0 %v5502_v29  ;;  %4309 = vmatpush1.bf16.msra.mxu1 %v6674_v24  ;;  %v6734_v24 = vld [vmem:[%s9061_s1 + $0x3c0] ss:$8 sps:$4 sm:$0xff]   ;;  %v6743_v29 = vld [vmem:[%s9061_s1 + $0xbd0] ss:$8 sps:$4 sm:$0xff]  }
  0xd0   : > { %4893 = vmatpush1.bf16.msra.mxu0 %v6677_v25  ;;  %4310 = vmatprep.subr.bf16.mxu1 %v6682_v32  ;;  %v6737_v25 = vld [vmem:[%s9061_s1 + $0xbc0] ss:$8 sps:$4 sm:$0xff]  }
  0xd1   : > { %4894 = vmatprep.subr.bf16.mxu0 %v6685_v33  ;;  %4283 = vmatprep.mubr.bf16.mxu1 %v5519_v34  ;;  %v6746_v32 = vld [vmem:[%s9061_s1 + $0x3e0] ss:$8 sps:$4 sm:$0xff]   ;;  %v6754_v34 = vld [vmem:[%s9061_s1 + $0x3f4] ss:$8 sps:$4 sm:$0xff]  }
  0xd2   : > { %4867 = vmatprep.mubr.bf16.mxu0 %v5535_v35  ;;  %v6749_v33 = vld [vmem:[%s9061_s1 + $0xbe0] ss:$8 sps:$4 sm:$0xff]   ;;  %v6757_v35 = vld [vmem:[%s9061_s1 + $0xbf4] ss:$8 sps:$4 sm:$0xff]  }
  0xd3   : > { %4311 = vmatpush1.bf16.msra.mxu1 %v6680_v36  ;;  %v6752_v36 = vld [vmem:[%s9061_s1 + $0x3f0] ss:$8 sps:$4 sm:$0xff]  }
  0xd4   : > { %4895 = vmatpush1.bf16.msra.mxu0 %v6683_v37  ;;  %4312 = vmatprep.subr.bf16.mxu1 %v6688_v38  ;;  %v6755_v37 = vld [vmem:[%s9061_s1 + $0xbf0] ss:$8 sps:$4 sm:$0xff]   ;;  %v6760_v38 = vld [vmem:[%s9061_s1 + $0x404] ss:$8 sps:$4 sm:$0xff]  }
  0xd5   : > { %4896 = vmatprep.subr.bf16.mxu0 %v6691_v39  ;;  %v6763_v39 = vld [vmem:[%s9061_s1 + $0xc04] ss:$8 sps:$4 sm:$0xff]  }
  0xd6   : > { %4284 = vmatmul.mubr.bf16.gmra.mrb[8].mxu1 %v5518_v44  ;;  %v5456_v44 = vcombine.low %v7933_v56, %v7936_v57  ;;  %v300_v56 = vld [vmem:[%s7328_s19 + $0x218] sm:$0xff] }
  0xd7   : > { %4868 = vmatmul.mubr.bf16.gmra.mrb[8].mxu0 %v5534_v45  ;;  %4313 = vmatpush1.bf16.msra.mxu1 %v6686_v40  ;;  %v6758_v40 = vld [vmem:[%s9061_s1 + $0x400] ss:$8 sps:$4 sm:$0xff]   ;;  %v5472_v45 = vcombine.low %v7939_v58, %v7942_v61  ;;  %v316_v57 = vld [vmem:[%s7328_s19 + $0x298] sm:$0xff] }
  0xd8   : > { %4897 = vmatpush1.bf16.msra.mxu0 %v6689_v41  ;;  %4314 = vmatprep.subr.bf16.mxu1 %v6694_v48  ;;  %v6761_v41 = vld [vmem:[%s9061_s1 + $0xc00] ss:$8 sps:$4 sm:$0xff]   ;;  %v6766_v48 = vld [vmem:[%s9061_s1 + $0x414] ss:$8 sps:$4 sm:$0xff]  }
  0xd9   : > { %4898 = vmatprep.subr.bf16.mxu0 %v6697_v49  ;;  %4293 = vmatprep.mubr.bf16.mxu1 %v5551_v50  ;;  %v6769_v49 = vld [vmem:[%s9061_s1 + $0xc14] ss:$8 sps:$4 sm:$0xff]   ;;  %v5489_v50 = vcombine.high %v268_v42, %v284_v43 }
  0xda   : > { %4877 = vmatprep.mubr.bf16.mxu0 %v5567_v51  ;;  %v5505_v51 = vcombine.high %v276_v46, %v292_v47  ;;  %v308_v58 = vld [vmem:[%s7328_s19 + $0x258] sm:$0xff] }
  0xdb   : > { %4315 = vmatpush1.bf16.msra.mxu1 %v6692_v52  ;;  %v6764_v52 = vld [vmem:[%s9061_s1 + $0x410] ss:$8 sps:$4 sm:$0xff]  }
  0xdc   : > { %4899 = vmatpush1.bf16.msra.mxu0 %v6695_v53  ;;  %4316 = vmatprep.subr.bf16.mxu1 %v6700_v54  ;;  %v6767_v53 = vld [vmem:[%s9061_s1 + $0xc10] ss:$8 sps:$4 sm:$0xff]   ;;  %v6772_v54 = vld [vmem:[%s9061_s1 + $0x424] ss:$8 sps:$4 sm:$0xff]  }
  0xdd   : > { %4900 = vmatprep.subr.bf16.mxu0 %v6703_v55  ;;  %v6775_v55 = vld [vmem:[%s9061_s1 + $0xc24] ss:$8 sps:$4 sm:$0xff]   ;;  %v324_v61 = vld [vmem:[%s7328_s19 + $0x2d8] sm:$0xff] }
  0xde   : > { %4294 = vmatmul.mubr.bf16.gmra.mrb[12].mxu1 %v5550_v59  ;;  %v5488_v59 = vcombine.low %v268_v42, %v284_v43  ;;  %v6814_v42 = vld [vmem:[%s9061_s1 + $0x494] ss:$8 sps:$4 sm:$0xff]  }
  0xdf   : > { %4878 = vmatmul.mubr.bf16.gmra.mrb[12].mxu0 %v5566_v60  ;;  %4317 = vmatpush1.bf16.msra.mxu1 %v6698_v62  ;;  %v5504_v60 = vcombine.low %v276_v46, %v292_v47  ;;  %v6770_v62 = vld [vmem:[%s9061_s1 + $0x420] ss:$8 sps:$4 sm:$0xff]   ;;  %v6817_v43 = vld [vmem:[%s9061_s1 + $0xc94] ss:$8 sps:$4 sm:$0xff]   ;;  %v6820_v46 = vld [vmem:[%s9061_s1 + $0x4a4] ss:$8 sps:$4 sm:$0xff]  }
  0xe0   : > { %4901 = vmatpush1.bf16.msra.mxu0 %v6701_v63  ;;  %4318 = vmatprep.subr.bf16.mxu1 %v6706_v0  ;;  %v6773_v63 = vld [vmem:[%s9061_s1 + $0xc20] ss:$8 sps:$4 sm:$0xff]   ;;  %v6778_v0 = vld [vmem:[%s9061_s1 + $0x434] ss:$8 sps:$4 sm:$0xff]   ;;  %v6823_v47 = vld [vmem:[%s9061_s1 + $0xca4] ss:$8 sps:$4 sm:$0xff]  }
  0xe1   : > { %4902 = vmatprep.subr.bf16.mxu0 %v6709_v1  ;;  %4336 = vmatprep.mubr.bf16.mxu1 %v5457_v2  ;;  %v6781_v1 = vld [vmem:[%s9061_s1 + $0xc34] ss:$8 sps:$4 sm:$0xff]   ;;  %v5521_v2 = vcombine.high %v300_v56, %v316_v57 }
  0xe2   : > { %4920 = vmatprep.mubr.bf16.mxu0 %v5473_v3  ;;  %v5537_v3 = vcombine.high %v308_v58, %v324_v61 }
  0xe3   : > { %4319 = vmatpush1.bf16.msra.mxu1 %v6704_v4  ;;  %v6776_v4 = vld [vmem:[%s9061_s1 + $0x430] ss:$8 sps:$4 sm:$0xff]  }
  0xe4   : > { %4903 = vmatpush1.bf16.msra.mxu0 %v6707_v5  ;;  %4320 = vmatprep.subr.bf16.mxu1 %v6712_v6  ;;  %v6779_v5 = vld [vmem:[%s9061_s1 + $0xc30] ss:$8 sps:$4 sm:$0xff]   ;;  %v6784_v6 = vld [vmem:[%s9061_s1 + $0x444] ss:$8 sps:$4 sm:$0xff]  }
  0xe5   : > { %4904 = vmatprep.subr.bf16.mxu0 %v6715_v7  ;;  %v6787_v7 = vld [vmem:[%s9061_s1 + $0xc44] ss:$8 sps:$4 sm:$0xff]  }
  0xe7   : > { %4321 = vmatpush1.bf16.msra.mxu1 %v6710_v8  ;;  %v6782_v8 = vld [vmem:[%s9061_s1 + $0x440] ss:$8 sps:$4 sm:$0xff]  }
  0xe8   : > { %4905 = vmatpush1.bf16.msra.mxu0 %v6713_v9  ;;  %4322 = vmatprep.subr.bf16.mxu1 %v6718_v10  ;;  %v6785_v9 = vld [vmem:[%s9061_s1 + $0xc40] ss:$8 sps:$4 sm:$0xff]   ;;  %v332_v10 = vld [vmem:[%s7328_s19 + $0x318] sm:$0xff] }
  0xe9   : > { %4906 = vmatprep.subr.bf16.mxu0 %v6721_v11  ;;  %v5520_v11 = vcombine.low %v300_v56, %v316_v57  ;;  %v6830_v56 = vld [vmem:[%s9061_s1 + $0x4c0] ss:$8 sps:$4 sm:$0xff]  }
  0xea   : > { %v6833_v57 = vld [vmem:[%s9061_s1 + $0xcc0] ss:$8 sps:$4 sm:$0xff]  }
  0xeb   : > { %4323 = vmatpush1.bf16.msra.mxu1 %v6716_v12  ;;  %v5536_v12 = vcombine.low %v308_v58, %v324_v61  ;;  %v6838_v58 = vld [vmem:[%s9061_s1 + $0x4d4] ss:$8 sps:$4 sm:$0xff]   ;;  %v6839_v61 = vld [vmem:[%s9061_s1 + $0xcd0] ss:$8 sps:$4 sm:$0xff]  }
  0xec   : > { %4907 = vmatpush1.bf16.msra.mxu0 %v6719_v13  ;;  %4324 = vmatprep.subr.bf16.mxu1 %v6724_v14  ;;  %v348_v13 = vld [vmem:[%s7328_s19 + $0x398] sm:$0xff] }
  0xed   : > { %4908 = vmatprep.subr.bf16.mxu0 %v6727_v15  ;;  %v340_v14 = vld [vmem:[%s7328_s19 + $0x358] sm:$0xff] }
  0xee   : > { %v356_v15 = vld [vmem:[%s7328_s19 + $0x3d8] sm:$0xff] }
  0xef   : > { %4325 = vmatpush1.bf16.msra.mxu1 %v6722_v16  ;;  %v6790_v16 = vld [vmem:[%s9061_s1 + $0x454] ss:$8 sps:$4 sm:$0xff]  }
  0xf0   : > { %4909 = vmatpush1.bf16.msra.mxu0 %v6725_v17  ;;  %4326 = vmatprep.subr.bf16.mxu1 %v6730_v18  ;;  %v6793_v17 = vld [vmem:[%s9061_s1 + $0xc54] ss:$8 sps:$4 sm:$0xff]   ;;  %v5553_v18 = vcombine.high %v332_v10, %v348_v13 }
  0xf1   : > { %4910 = vmatprep.subr.bf16.mxu0 %v6733_v19  ;;  %v5569_v19 = vcombine.high %v340_v14, %v356_v15 }
  0xf3   : > { %4327 = vmatpush1.bf16.msra.mxu1 %v6728_v20  ;;  %v6788_v20 = vld [vmem:[%s9061_s1 + $0x450] ss:$8 sps:$4 sm:$0xff]  }
  0xf4   : > { %4911 = vmatpush1.bf16.msra.mxu0 %v6731_v21  ;;  %4328 = vmatprep.subr.bf16.mxu1 %v6736_v22  ;;  %v6791_v21 = vld [vmem:[%s9061_s1 + $0xc50] ss:$8 sps:$4 sm:$0xff]   ;;  %v6796_v22 = vld [vmem:[%s9061_s1 + $0x464] ss:$8 sps:$4 sm:$0xff]  }
  0xf5   : > { %4912 = vmatprep.subr.bf16.mxu0 %v6739_v23  ;;  %v6799_v23 = vld [vmem:[%s9061_s1 + $0xc64] ss:$8 sps:$4 sm:$0xff]  }
  0xf7   : > { %4329 = vmatpush1.bf16.msra.mxu1 %v6734_v24  ;;  %v6794_v24 = vld [vmem:[%s9061_s1 + $0x460] ss:$8 sps:$4 sm:$0xff]  }
  0xf8   : > { %4913 = vmatpush1.bf16.msra.mxu0 %v6737_v25  ;;  %4330 = vmatprep.subr.bf16.mxu1 %v6742_v26  ;;  %v6797_v25 = vld [vmem:[%s9061_s1 + $0xc60] ss:$8 sps:$4 sm:$0xff]  }
  0xf9   : > { %4914 = vmatprep.subr.bf16.mxu0 %v6745_v27  ;;  %v8163_v26 = vld [vmem:[%s7328_s19 + $0x20] sm:$0xff] }
  0xfa   : > { %v8166_v27 = vld [vmem:[%s7328_s19 + $0xa0] sm:$0xff] }
  0xfb   : > { %4331 = vmatpush1.bf16.msra.mxu1 %v6740_v28  ;;  %v5552_v28 = vcombine.low %v332_v10, %v348_v13  ;;  %v269_v10 = vld [vmem:[%s7328_s19 + $0x120] sm:$0xff] }
  0xfc   : > { %4915 = vmatpush1.bf16.msra.mxu0 %v6743_v29  ;;  %4332 = vmatprep.subr.bf16.mxu1 %v6748_v30  ;;  %v5568_v29 = vcombine.low %v340_v14, %v356_v15  ;;  %v8169_v30 = vld [vmem:[%s7328_s19 + $0x60] sm:$0xff] }
  0xfd   : > { %4916 = vmatprep.subr.bf16.mxu0 %v6751_v31  ;;  %v8172_v31 = vld [vmem:[%s7328_s19 + $0xe0] sm:$0xff] }
  0xfe   : > { %v285_v13 = vld [vmem:[%s7328_s19 + $0x1a0] sm:$0xff] }
  0xff   : > { %4333 = vmatpush1.bf16.msra.mxu1 %v6746_v32  ;;  %v6802_v32 = vld [vmem:[%s9061_s1 + $0x474] ss:$8 sps:$4 sm:$0xff]   ;;  %v277_v14 = vld [vmem:[%s7328_s19 + $0x160] sm:$0xff] }
 0x100   : > { %4917 = vmatpush1.bf16.msra.mxu0 %v6749_v33  ;;  %4334 = vmatprep.subr.bf16.mxu1 %v6754_v34  ;;  %v6805_v33 = vld [vmem:[%s9061_s1 + $0xc74] ss:$8 sps:$4 sm:$0xff]   ;;  %v5459_v34 = vcombine.high %v8163_v26, %v8166_v27  ;;  %v293_v15 = vld [vmem:[%s7328_s19 + $0x1e0] sm:$0xff] }
 0x101   : > { %4918 = vmatprep.subr.bf16.mxu0 %v6757_v35  ;;  %v5475_v35 = vcombine.high %v8169_v30, %v8172_v31 }
 0x103   : > { %4335 = vmatpush1.bf16.msra.mxu1 %v6752_v36  ;;  %v6800_v36 = vld [vmem:[%s9061_s1 + $0x470] ss:$8 sps:$4 sm:$0xff]  }
 0x104   : > { %4919 = vmatpush1.bf16.msra.mxu0 %v6755_v37  ;;  %4377 = vmatprep.subr.bf16.mxu1 %v6760_v38  ;;  %v6803_v37 = vld [vmem:[%s9061_s1 + $0xc70] ss:$8 sps:$4 sm:$0xff]   ;;  %v6808_v38 = vld [vmem:[%s9061_s1 + $0x484] ss:$8 sps:$4 sm:$0xff]  }
 0x105   : > { %4961 = vmatprep.subr.bf16.mxu0 %v6763_v39  ;;  %v6811_v39 = vld [vmem:[%s9061_s1 + $0xc84] ss:$8 sps:$4 sm:$0xff]  }
 0x106   : > { %4337 = vmatmul.mubr.bf16.vlgmr.msra.gmra.mrb[0].mxu1 %v5456_v44  ;;  %v6812_v44 = vld [vmem:[%s9061_s1 + $0x490] ss:$8 sps:$4 sm:$0xff]  }
 0x107   : > { %4921 = vmatmul.mubr.bf16.vlgmr.msra.gmra.mrb[0].mxu0 %v5472_v45  ;;  %4378 = vmatpush1.bf16.msra.mxu1 %v6758_v40  ;;  %v6806_v40 = vld [vmem:[%s9061_s1 + $0x480] ss:$8 sps:$4 sm:$0xff]   ;;  %v6815_v45 = vld [vmem:[%s9061_s1 + $0xc90] ss:$8 sps:$4 sm:$0xff]  }
 0x108   : > { %4962 = vmatpush1.bf16.msra.mxu0 %v6761_v41  ;;  %4379 = vmatprep.subr.bf16.mxu1 %v6766_v48  ;;  %v6809_v41 = vld [vmem:[%s9061_s1 + $0xc80] ss:$8 sps:$4 sm:$0xff]  }
 0x109   : > { %4963 = vmatprep.subr.bf16.mxu0 %v6769_v49  ;;  %4346 = vmatprep.mubr.bf16.mxu1 %v5489_v50  ;;  %v6818_v48 = vld [vmem:[%s9061_s1 + $0x4a0] ss:$8 sps:$4 sm:$0xff]   ;;  %v6826_v50 = vld [vmem:[%s9061_s1 + $0x4b4] ss:$8 sps:$4 sm:$0xff]  }
 0x10a   : > { %4930 = vmatprep.mubr.bf16.mxu0 %v5505_v51  ;;  %v6821_v49 = vld [vmem:[%s9061_s1 + $0xca0] ss:$8 sps:$4 sm:$0xff]   ;;  %v6829_v51 = vld [vmem:[%s9061_s1 + $0xcb4] ss:$8 sps:$4 sm:$0xff]  }
 0x10b   : > { %4380 = vmatpush1.bf16.msra.mxu1 %v6764_v52  ;;  %v6824_v52 = vld [vmem:[%s9061_s1 + $0x4b0] ss:$8 sps:$4 sm:$0xff]  }
 0x10c   : > { %4964 = vmatpush1.bf16.msra.mxu0 %v6767_v53  ;;  %4381 = vmatprep.subr.bf16.mxu1 %v6772_v54  ;;  %v6827_v53 = vld [vmem:[%s9061_s1 + $0xcb0] ss:$8 sps:$4 sm:$0xff]   ;;  %v6832_v54 = vld [vmem:[%s9061_s1 + $0x4c4] ss:$8 sps:$4 sm:$0xff]  }
 0x10d   : > { %4965 = vmatprep.subr.bf16.mxu0 %v6775_v55  ;;  %v6835_v55 = vld [vmem:[%s9061_s1 + $0xcc4] ss:$8 sps:$4 sm:$0xff]  }
 0x10e   : > { %4347 = vmatmul.mubr.bf16.gmra.mrb[4].mxu1 %v5488_v59  ;;  %v6841_v59 = vld [vmem:[%s9061_s1 + $0xcd4] ss:$8 sps:$4 sm:$0xff]  }
 0x10f   : > { %4931 = vmatmul.mubr.bf16.gmra.mrb[4].mxu0 %v5504_v60  ;;  %4382 = vmatpush1.bf16.msra.mxu1 %v6770_v62  ;;  %v6836_v60 = vld [vmem:[%s9061_s1 + $0x4d0] ss:$8 sps:$4 sm:$0xff]   ;;  %v6844_v62 = vld [vmem:[%s9061_s1 + $0x4e4] ss:$8 sps:$4 sm:$0xff]  }
 0x110   : > { %4966 = vmatpush1.bf16.msra.mxu0 %v6773_v63  ;;  %4383 = vmatprep.subr.bf16.mxu1 %v6778_v0  ;;  %v6847_v63 = vld [vmem:[%s9061_s1 + $0xce4] ss:$8 sps:$4 sm:$0xff]   ;;  %v6842_v0 = vld [vmem:[%s9061_s1 + $0x4e0] ss:$8 sps:$4 sm:$0xff]  }
 0x111   : > { %4967 = vmatprep.subr.bf16.mxu0 %v6781_v1  ;;  %4356 = vmatprep.mubr.bf16.mxu1 %v5521_v2  ;;  %v6845_v1 = vld [vmem:[%s9061_s1 + $0xce0] ss:$8 sps:$4 sm:$0xff]   ;;  %v6850_v2 = vld [vmem:[%s9061_s1 + $0x4f4] ss:$8 sps:$4 sm:$0xff]  }
 0x112   : > { %4940 = vmatprep.mubr.bf16.mxu0 %v5537_v3  ;;  %v6853_v3 = vld [vmem:[%s9061_s1 + $0xcf4] ss:$8 sps:$4 sm:$0xff]  }
 0x113   : > { %4384 = vmatpush1.bf16.msra.mxu1 %v6776_v4  ;;  %v6848_v4 = vld [vmem:[%s9061_s1 + $0x4f0] ss:$8 sps:$4 sm:$0xff]  }
 0x114   : > { %4968 = vmatpush1.bf16.msra.mxu0 %v6779_v5  ;;  %4385 = vmatprep.subr.bf16.mxu1 %v6784_v6  ;;  %v6851_v5 = vld [vmem:[%s9061_s1 + $0xcf0] ss:$8 sps:$4 sm:$0xff]   ;;  %v6856_v6 = vld [vmem:[%s9061_s1 + $0x504] ss:$8 sps:$4 sm:$0xff]  }
 0x115   : > { %4969 = vmatprep.subr.bf16.mxu0 %v6787_v7  ;;  %v6859_v7 = vld [vmem:[%s9061_s1 + $0xd04] ss:$8 sps:$4 sm:$0xff]  }
 0x116   : > { %4357 = vmatmul.mubr.bf16.gmra.mrb[8].mxu1 %v5520_v11  ;;  %v5458_v11 = vcombine.low %v8163_v26, %v8166_v27  ;;  %v301_v26 = vld [vmem:[%s7328_s19 + $0x220] sm:$0xff] }
 0x117   : > { %4941 = vmatmul.mubr.bf16.gmra.mrb[8].mxu0 %v5536_v12  ;;  %4386 = vmatpush1.bf16.msra.mxu1 %v6782_v8  ;;  %v6854_v8 = vld [vmem:[%s9061_s1 + $0x500] ss:$8 sps:$4 sm:$0xff]   ;;  %v5474_v12 = vcombine.low %v8169_v30, %v8172_v31 }
 0x118   : > { %4970 = vmatpush1.bf16.msra.mxu0 %v6785_v9  ;;  %4387 = vmatprep.subr.bf16.mxu1 %v6790_v16  ;;  %v6857_v9 = vld [vmem:[%s9061_s1 + $0xd00] ss:$8 sps:$4 sm:$0xff]   ;;  %v6862_v16 = vld [vmem:[%s9061_s1 + $0x514] ss:$8 sps:$4 sm:$0xff]  }
 0x119   : > { %4971 = vmatprep.subr.bf16.mxu0 %v6793_v17  ;;  %4366 = vmatprep.mubr.bf16.mxu1 %v5553_v18  ;;  %v6865_v17 = vld [vmem:[%s9061_s1 + $0xd14] ss:$8 sps:$4 sm:$0xff]   ;;  %v5491_v18 = vcombine.high %v269_v10, %v285_v13  ;;  %v317_v27 = vld [vmem:[%s7328_s19 + $0x2a0] sm:$0xff] }
 0x11a   : > { %4950 = vmatprep.mubr.bf16.mxu0 %v5569_v19  ;;  %v5507_v19 = vcombine.high %v277_v14, %v293_v15  ;;  %v309_v30 = vld [vmem:[%s7328_s19 + $0x260] sm:$0xff] }
 0x11b   : > { %4388 = vmatpush1.bf16.msra.mxu1 %v6788_v20  ;;  %v6860_v20 = vld [vmem:[%s9061_s1 + $0x510] ss:$8 sps:$4 sm:$0xff]   ;;  %v325_v31 = vld [vmem:[%s7328_s19 + $0x2e0] sm:$0xff] }
 0x11c   : > { %4972 = vmatpush1.bf16.msra.mxu0 %v6791_v21  ;;  %4389 = vmatprep.subr.bf16.mxu1 %v6796_v22  ;;  %v6863_v21 = vld [vmem:[%s9061_s1 + $0xd10] ss:$8 sps:$4 sm:$0xff]   ;;  %v6868_v22 = vld [vmem:[%s9061_s1 + $0x524] ss:$8 sps:$4 sm:$0xff]  }
 0x11d   : > { %4973 = vmatprep.subr.bf16.mxu0 %v6799_v23  ;;  %v6871_v23 = vld [vmem:[%s9061_s1 + $0xd24] ss:$8 sps:$4 sm:$0xff]  }
 0x11e   : > { %4367 = vmatmul.mubr.bf16.gmra.mrb[12].mxu1 %v5552_v28  ;;  %v5490_v28 = vcombine.low %v269_v10, %v285_v13  ;;  %v6910_v10 = vld [vmem:[%s9061_s1 + $0x594] ss:$8 sps:$4 sm:$0xff]   ;;  %v6911_v13 = vld [vmem:[%s9061_s1 + $0xd90] ss:$8 sps:$4 sm:$0xff]  }
 0x11f   : > { %4951 = vmatmul.mubr.bf16.gmra.mrb[12].mxu0 %v5568_v29  ;;  %4390 = vmatpush1.bf16.msra.mxu1 %v6794_v24  ;;  %v6866_v24 = vld [vmem:[%s9061_s1 + $0x520] ss:$8 sps:$4 sm:$0xff]   ;;  %v5506_v29 = vcombine.low %v277_v14, %v293_v15  ;;  %v6916_v14 = vld [vmem:[%s9061_s1 + $0x5a4] ss:$8 sps:$4 sm:$0xff]  }
 0x120   : > { %4974 = vmatpush1.bf16.msra.mxu0 %v6797_v25  ;;  %4391 = vmatprep.subr.bf16.mxu1 %v6802_v32  ;;  %v6869_v25 = vld [vmem:[%s9061_s1 + $0xd20] ss:$8 sps:$4 sm:$0xff]   ;;  %v6874_v32 = vld [vmem:[%s9061_s1 + $0x534] ss:$8 sps:$4 sm:$0xff]   ;;  %v6919_v15 = vld [vmem:[%s9061_s1 + $0xda4] ss:$8 sps:$4 sm:$0xff]  }
 0x121   : > { %4975 = vmatprep.subr.bf16.mxu0 %v6805_v33  ;;  %4409 = vmatprep.mubr.bf16.mxu1 %v5459_v34  ;;  %v6877_v33 = vld [vmem:[%s9061_s1 + $0xd34] ss:$8 sps:$4 sm:$0xff]   ;;  %v5523_v34 = vcombine.high %v301_v26, %v317_v27 }
 0x122   : > { %4993 = vmatprep.mubr.bf16.mxu0 %v5475_v35  ;;  %v5539_v35 = vcombine.high %v309_v30, %v325_v31 }
 0x123   : > { %4392 = vmatpush1.bf16.msra.mxu1 %v6800_v36  ;;  %v6872_v36 = vld [vmem:[%s9061_s1 + $0x530] ss:$8 sps:$4 sm:$0xff]  }
 0x124   : > { %4976 = vmatpush1.bf16.msra.mxu0 %v6803_v37  ;;  %4393 = vmatprep.subr.bf16.mxu1 %v6808_v38  ;;  %v6875_v37 = vld [vmem:[%s9061_s1 + $0xd30] ss:$8 sps:$4 sm:$0xff]   ;;  %v6880_v38 = vld [vmem:[%s9061_s1 + $0x544] ss:$8 sps:$4 sm:$0xff]  }
 0x125   : > { %4977 = vmatprep.subr.bf16.mxu0 %v6811_v39  ;;  %v6883_v39 = vld [vmem:[%s9061_s1 + $0xd44] ss:$8 sps:$4 sm:$0xff]  }
 0x127   : > { %4394 = vmatpush1.bf16.msra.mxu1 %v6806_v40  ;;  %v6878_v40 = vld [vmem:[%s9061_s1 + $0x540] ss:$8 sps:$4 sm:$0xff]  }
 0x128   : > { %4978 = vmatpush1.bf16.msra.mxu0 %v6809_v41  ;;  %4395 = vmatprep.subr.bf16.mxu1 %v6814_v42  ;;  %v6881_v41 = vld [vmem:[%s9061_s1 + $0xd40] ss:$8 sps:$4 sm:$0xff]  }
 0x129   : > { %4979 = vmatprep.subr.bf16.mxu0 %v6817_v43  ;;  %v333_v42 = vld [vmem:[%s7328_s19 + $0x320] sm:$0xff] }
 0x12a   : > { %v349_v43 = vld [vmem:[%s7328_s19 + $0x3a0] sm:$0xff] }
 0x12b   : > { %4396 = vmatpush1.bf16.msra.mxu1 %v6812_v44  ;;  %v5522_v44 = vcombine.low %v301_v26, %v317_v27  ;;  %v6934_v26 = vld [vmem:[%s9061_s1 + $0x5d4] ss:$8 sps:$4 sm:$0xff]  }
 0x12c   : > { %4980 = vmatpush1.bf16.msra.mxu0 %v6815_v45  ;;  %4397 = vmatprep.subr.bf16.mxu1 %v6820_v46  ;;  %v5538_v45 = vcombine.low %v309_v30, %v325_v31  ;;  %v341_v46 = vld [vmem:[%s7328_s19 + $0x360] sm:$0xff]  ;;  %v6937_v27 = vld [vmem:[%s9061_s1 + $0xdd4] ss:$8 sps:$4 sm:$0xff]  }
 0x12d   : > { %4981 = vmatprep.subr.bf16.mxu0 %v6823_v47  ;;  %v357_v47 = vld [vmem:[%s7328_s19 + $0x3e0] sm:$0xff] }
 0x12e   : > { %v6940_v30 = vld [vmem:[%s9061_s1 + $0x5e4] ss:$8 sps:$4 sm:$0xff]  }
 0x12f   : > { %4398 = vmatpush1.bf16.msra.mxu1 %v6818_v48  ;;  %v6886_v48 = vld [vmem:[%s9061_s1 + $0x554] ss:$8 sps:$4 sm:$0xff]   ;;  %v6943_v31 = vld [vmem:[%s9061_s1 + $0xde4] ss:$8 sps:$4 sm:$0xff]  }
 0x130   : > { %4982 = vmatpush1.bf16.msra.mxu0 %v6821_v49  ;;  %4399 = vmatprep.subr.bf16.mxu1 %v6826_v50  ;;  %v6889_v49 = vld [vmem:[%s9061_s1 + $0xd54] ss:$8 sps:$4 sm:$0xff]   ;;  %v5555_v50 = vcombine.high %v333_v42, %v349_v43 }
 0x131   : > { %4983 = vmatprep.subr.bf16.mxu0 %v6829_v51  ;;  %v5571_v51 = vcombine.high %v341_v46, %v357_v47 }
 0x133   : > { %4400 = vmatpush1.bf16.msra.mxu1 %v6824_v52  ;;  %v6884_v52 = vld [vmem:[%s9061_s1 + $0x550] ss:$8 sps:$4 sm:$0xff]  }
 0x134   : > { %4984 = vmatpush1.bf16.msra.mxu0 %v6827_v53  ;;  %4401 = vmatprep.subr.bf16.mxu1 %v6832_v54  ;;  %v6887_v53 = vld [vmem:[%s9061_s1 + $0xd50] ss:$8 sps:$4 sm:$0xff]   ;;  %v6892_v54 = vld [vmem:[%s9061_s1 + $0x564] ss:$8 sps:$4 sm:$0xff]  }
 0x135   : > { %4985 = vmatprep.subr.bf16.mxu0 %v6835_v55  ;;  %v6895_v55 = vld [vmem:[%s9061_s1 + $0xd64] ss:$8 sps:$4 sm:$0xff]  }
 0x137   : > { %4402 = vmatpush1.bf16.msra.mxu1 %v6830_v56  ;;  %v6890_v56 = vld [vmem:[%s9061_s1 + $0x560] ss:$8 sps:$4 sm:$0xff]  }
 0x138   : > { %4986 = vmatpush1.bf16.msra.mxu0 %v6833_v57  ;;  %4403 = vmatprep.subr.bf16.mxu1 %v6838_v58  ;;  %v6893_v57 = vld [vmem:[%s9061_s1 + $0xd60] ss:$8 sps:$4 sm:$0xff]  }
 0x139   : > { %4987 = vmatprep.subr.bf16.mxu0 %v6841_v59  ;;  %v8387_v58 = vld [vmem:[%s7328_s19 + $0x28] sm:$0xff] }
 0x13a   : > { %v8390_v59 = vld [vmem:[%s7328_s19 + $0xa8] sm:$0xff] }
 0x13b   : > { %4404 = vmatpush1.bf16.msra.mxu1 %v6836_v60  ;;  %v5554_v60 = vcombine.low %v333_v42, %v349_v43  ;;  %v286_v43 = vld [vmem:[%s7328_s19 + $0x1a8] sm:$0xff] }
 0x13c   : > { %4988 = vmatpush1.bf16.msra.mxu0 %v6839_v61  ;;  %4405 = vmatprep.subr.bf16.mxu1 %v6844_v62  ;;  %v5570_v61 = vcombine.low %v341_v46, %v357_v47  ;;  %v8393_v62 = vld [vmem:[%s7328_s19 + $0x68] sm:$0xff] }
 0x13d   : > { %4989 = vmatprep.subr.bf16.mxu0 %v6847_v63  ;;  %v8396_v63 = vld [vmem:[%s7328_s19 + $0xe8] sm:$0xff] }
 0x13e   : > { %v5476_v42 = vcombine.low %v8393_v62, %v8396_v63  ;;  %v6950_v46 = vld [vmem:[%s9061_s1 + $0x600] ss:$8 sps:$4 sm:$0xff]  }
 0x13f   : > { %4406 = vmatpush1.bf16.msra.mxu1 %v6842_v0  ;;  %v6898_v0 = vld [vmem:[%s9061_s1 + $0x574] ss:$8 sps:$4 sm:$0xff]   ;;  %v6953_v47 = vld [vmem:[%s9061_s1 + $0xe00] ss:$8 sps:$4 sm:$0xff]  }
 0x140   : > { %4990 = vmatpush1.bf16.msra.mxu0 %v6845_v1  ;;  %4407 = vmatprep.subr.bf16.mxu1 %v6850_v2  ;;  %v6901_v1 = vld [vmem:[%s9061_s1 + $0xd74] ss:$8 sps:$4 sm:$0xff]   ;;  %v5461_v2 = vcombine.high %v8387_v58, %v8390_v59 }
 0x141   : > { %4991 = vmatprep.subr.bf16.mxu0 %v6853_v3  ;;  %v5477_v3 = vcombine.high %v8393_v62, %v8396_v63  ;;  %v6962_v62 = vld [vmem:[%s9061_s1 + $0x620] ss:$8 sps:$4 sm:$0xff]  }
 0x142   : > { %v6965_v63 = vld [vmem:[%s9061_s1 + $0xe20] ss:$8 sps:$4 sm:$0xff]  }
 0x143   : > { %4408 = vmatpush1.bf16.msra.mxu1 %v6848_v4  ;;  %v6896_v4 = vld [vmem:[%s9061_s1 + $0x570] ss:$8 sps:$4 sm:$0xff]  }
 0x144   : > { %4992 = vmatpush1.bf16.msra.mxu0 %v6851_v5  ;;  %4450 = vmatprep.subr.bf16.mxu1 %v6856_v6  ;;  %v6899_v5 = vld [vmem:[%s9061_s1 + $0xd70] ss:$8 sps:$4 sm:$0xff]   ;;  %v6904_v6 = vld [vmem:[%s9061_s1 + $0x584] ss:$8 sps:$4 sm:$0xff]  }
 0x145   : > { %5034 = vmatprep.subr.bf16.mxu0 %v6859_v7  ;;  %v6907_v7 = vld [vmem:[%s9061_s1 + $0xd84] ss:$8 sps:$4 sm:$0xff]  }
 0x146   : > { %4410 = vmatmul.mubr.bf16.vlgmr.msra.gmra.mrb[0].mxu1 %v5458_v11  ;;  %v6913_v11 = vld [vmem:[%s9061_s1 + $0xd94] ss:$8 sps:$4 sm:$0xff]  }
 0x147   : > { %4994 = vmatmul.mubr.bf16.vlgmr.msra.gmra.mrb[0].mxu0 %v5474_v12  ;;  %4451 = vmatpush1.bf16.msra.mxu1 %v6854_v8  ;;  %v6902_v8 = vld [vmem:[%s9061_s1 + $0x580] ss:$8 sps:$4 sm:$0xff]   ;;  %v6908_v12 = vld [vmem:[%s9061_s1 + $0x590] ss:$8 sps:$4 sm:$0xff]  }
 0x148   : > { %5035 = vmatpush1.bf16.msra.mxu0 %v6857_v9  ;;  %4452 = vmatprep.subr.bf16.mxu1 %v6862_v16  ;;  %v6905_v9 = vld [vmem:[%s9061_s1 + $0xd80] ss:$8 sps:$4 sm:$0xff]  }
 0x149   : > { %5036 = vmatprep.subr.bf16.mxu0 %v6865_v17  ;;  %4419 = vmatprep.mubr.bf16.mxu1 %v5491_v18  ;;  %v6914_v16 = vld [vmem:[%s9061_s1 + $0x5a0] ss:$8 sps:$4 sm:$0xff]   ;;  %v6922_v18 = vld [vmem:[%s9061_s1 + $0x5b4] ss:$8 sps:$4 sm:$0xff]  }
 0x14a   : > { %5003 = vmatprep.mubr.bf16.mxu0 %v5507_v19  ;;  %v6917_v17 = vld [vmem:[%s9061_s1 + $0xda0] ss:$8 sps:$4 sm:$0xff]   ;;  %v6925_v19 = vld [vmem:[%s9061_s1 + $0xdb4] ss:$8 sps:$4 sm:$0xff]  }
 0x14b   : > { %4453 = vmatpush1.bf16.msra.mxu1 %v6860_v20  ;;  %v6920_v20 = vld [vmem:[%s9061_s1 + $0x5b0] ss:$8 sps:$4 sm:$0xff]  }
 0x14c   : > { %5037 = vmatpush1.bf16.msra.mxu0 %v6863_v21  ;;  %4454 = vmatprep.subr.bf16.mxu1 %v6868_v22  ;;  %v6923_v21 = vld [vmem:[%s9061_s1 + $0xdb0] ss:$8 sps:$4 sm:$0xff]   ;;  %v6928_v22 = vld [vmem:[%s9061_s1 + $0x5c4] ss:$8 sps:$4 sm:$0xff]  }
 0x14d   : > { %5038 = vmatprep.subr.bf16.mxu0 %v6871_v23  ;;  %v6931_v23 = vld [vmem:[%s9061_s1 + $0xdc4] ss:$8 sps:$4 sm:$0xff]  }
 0x14e   : > { %4420 = vmatmul.mubr.bf16.gmra.mrb[4].mxu1 %v5490_v28  ;;  %v6932_v28 = vld [vmem:[%s9061_s1 + $0x5d0] ss:$8 sps:$4 sm:$0xff]  }
 0x14f   : > { %5004 = vmatmul.mubr.bf16.gmra.mrb[4].mxu0 %v5506_v29  ;;  %4455 = vmatpush1.bf16.msra.mxu1 %v6866_v24  ;;  %v6926_v24 = vld [vmem:[%s9061_s1 + $0x5c0] ss:$8 sps:$4 sm:$0xff]   ;;  %v6935_v29 = vld [vmem:[%s9061_s1 + $0xdd0] ss:$8 sps:$4 sm:$0xff]  }
 0x150   : > { %5039 = vmatpush1.bf16.msra.mxu0 %v6869_v25  ;;  %4456 = vmatprep.subr.bf16.mxu1 %v6874_v32  ;;  %v6929_v25 = vld [vmem:[%s9061_s1 + $0xdc0] ss:$8 sps:$4 sm:$0xff]  }
 0x151   : > { %5040 = vmatprep.subr.bf16.mxu0 %v6877_v33  ;;  %4429 = vmatprep.mubr.bf16.mxu1 %v5523_v34  ;;  %v6938_v32 = vld [vmem:[%s9061_s1 + $0x5e0] ss:$8 sps:$4 sm:$0xff]   ;;  %v6946_v34 = vld [vmem:[%s9061_s1 + $0x5f4] ss:$8 sps:$4 sm:$0xff]  }
 0x152   : > { %5013 = vmatprep.mubr.bf16.mxu0 %v5539_v35  ;;  %v6941_v33 = vld [vmem:[%s9061_s1 + $0xde0] ss:$8 sps:$4 sm:$0xff]   ;;  %v6949_v35 = vld [vmem:[%s9061_s1 + $0xdf4] ss:$8 sps:$4 sm:$0xff]  }
 0x153   : > { %4457 = vmatpush1.bf16.msra.mxu1 %v6872_v36  ;;  %v6944_v36 = vld [vmem:[%s9061_s1 + $0x5f0] ss:$8 sps:$4 sm:$0xff]  }
 0x154   : > { %5041 = vmatpush1.bf16.msra.mxu0 %v6875_v37  ;;  %4458 = vmatprep.subr.bf16.mxu1 %v6880_v38  ;;  %v6947_v37 = vld [vmem:[%s9061_s1 + $0xdf0] ss:$8 sps:$4 sm:$0xff]   ;;  %v6952_v38 = vld [vmem:[%s9061_s1 + $0x604] ss:$8 sps:$4 sm:$0xff]  }
 0x155   : > { %5042 = vmatprep.subr.bf16.mxu0 %v6883_v39  ;;  %v6955_v39 = vld [vmem:[%s9061_s1 + $0xe04] ss:$8 sps:$4 sm:$0xff]  }
 0x156   : > { %4430 = vmatmul.mubr.bf16.gmra.mrb[8].mxu1 %v5522_v44  ;;  %v278_v44 = vld [vmem:[%s7328_s19 + $0x168] sm:$0xff] }
 0x157   : > { %5014 = vmatmul.mubr.bf16.gmra.mrb[8].mxu0 %v5538_v45  ;;  %4459 = vmatpush1.bf16.msra.mxu1 %v6878_v40  ;;  %v270_v40 = vld [vmem:[%s7328_s19 + $0x128] sm:$0xff] }
 0x158   : > { %5043 = vmatpush1.bf16.msra.mxu0 %v6881_v41  ;;  %4460 = vmatprep.subr.bf16.mxu1 %v6886_v48  ;;  %v5460_v41 = vcombine.low %v8387_v58, %v8390_v59  ;;  %v294_v45 = vld [vmem:[%s7328_s19 + $0x1e8] sm:$0xff]  ;;  %v6958_v48 = vld [vmem:[%s9061_s1 + $0x614] ss:$8 sps:$4 sm:$0xff]  }
 0x159   : > { %5044 = vmatprep.subr.bf16.mxu0 %v6889_v49  ;;  %4439 = vmatprep.mubr.bf16.mxu1 %v5555_v50  ;;  %v6961_v49 = vld [vmem:[%s9061_s1 + $0xe14] ss:$8 sps:$4 sm:$0xff]   ;;  %v5493_v50 = vcombine.high %v270_v40, %v286_v43  ;;  %v5508_v58 = vcombine.low %v278_v44, %v294_v45  ;;  %v318_v59 = vld [vmem:[%s7328_s19 + $0x2a8] sm:$0xff] }
 0x15a   : > { %5023 = vmatprep.mubr.bf16.mxu0 %v5571_v51  ;;  %v5509_v51 = vcombine.high %v278_v44, %v294_v45  ;;  %v7004_v44 = vld [vmem:[%s9061_s1 + $0x690] ss:$8 sps:$4 sm:$0xff]  }
 0x15b   : > { %4461 = vmatpush1.bf16.msra.mxu1 %v6884_v52  ;;  %v6956_v52 = vld [vmem:[%s9061_s1 + $0x610] ss:$8 sps:$4 sm:$0xff]  }
 0x15c   : > { %5045 = vmatpush1.bf16.msra.mxu0 %v6887_v53  ;;  %4462 = vmatprep.subr.bf16.mxu1 %v6892_v54  ;;  %v6959_v53 = vld [vmem:[%s9061_s1 + $0xe10] ss:$8 sps:$4 sm:$0xff]   ;;  %v6964_v54 = vld [vmem:[%s9061_s1 + $0x624] ss:$8 sps:$4 sm:$0xff]  }
 0x15d   : > { %5046 = vmatprep.subr.bf16.mxu0 %v6895_v55  ;;  %v6967_v55 = vld [vmem:[%s9061_s1 + $0xe24] ss:$8 sps:$4 sm:$0xff]   ;;  %v7007_v45 = vld [vmem:[%s9061_s1 + $0xe90] ss:$8 sps:$4 sm:$0xff]  }
 0x15e   : > { %4440 = vmatmul.mubr.bf16.gmra.mrb[12].mxu1 %v5554_v60  ;;  %v310_v60 = vld [vmem:[%s7328_s19 + $0x268] sm:$0xff] }
 0x15f   : > { %5024 = vmatmul.mubr.bf16.gmra.mrb[12].mxu0 %v5570_v61  ;;  %4463 = vmatpush1.bf16.msra.mxu1 %v6890_v56  ;;  %v302_v56 = vld [vmem:[%s7328_s19 + $0x228] sm:$0xff] }
 0x160   : > { %5047 = vmatpush1.bf16.msra.mxu0 %v6893_v57  ;;  %4464 = vmatprep.subr.bf16.mxu1 %v6898_v0  ;;  %v5492_v57 = vcombine.low %v270_v40, %v286_v43  ;;  %v326_v61 = vld [vmem:[%s7328_s19 + $0x2e8] sm:$0xff]  ;;  %v6970_v0 = vld [vmem:[%s9061_s1 + $0x634] ss:$8 sps:$4 sm:$0xff]  }
 0x161   : > { %5048 = vmatprep.subr.bf16.mxu0 %v6901_v1  ;;  %4482 = vmatprep.mubr.bf16.mxu1 %v5461_v2  ;;  %v6973_v1 = vld [vmem:[%s9061_s1 + $0xe34] ss:$8 sps:$4 sm:$0xff]   ;;  %v5525_v2 = vcombine.high %v302_v56, %v318_v59  ;;  %v6998_v40 = vld [vmem:[%s9061_s1 + $0x680] ss:$8 sps:$4 sm:$0xff]  }
 0x162   : > { %5066 = vmatprep.mubr.bf16.mxu0 %v5477_v3  ;;  %v5541_v3 = vcombine.high %v310_v60, %v326_v61  ;;  %v7009_v43 = vld [vmem:[%s9061_s1 + $0xe94] ss:$8 sps:$4 sm:$0xff]  }
 0x163   : > { %4465 = vmatpush1.bf16.msra.mxu1 %v6896_v4  ;;  %v6968_v4 = vld [vmem:[%s9061_s1 + $0x630] ss:$8 sps:$4 sm:$0xff]  }
 0x164   : > { %5049 = vmatpush1.bf16.msra.mxu0 %v6899_v5  ;;  %4466 = vmatprep.subr.bf16.mxu1 %v6904_v6  ;;  %v6971_v5 = vld [vmem:[%s9061_s1 + $0xe30] ss:$8 sps:$4 sm:$0xff]   ;;  %v6976_v6 = vld [vmem:[%s9061_s1 + $0x644] ss:$8 sps:$4 sm:$0xff]  }
 0x165   : > { %5050 = vmatprep.subr.bf16.mxu0 %v6907_v7  ;;  %v6979_v7 = vld [vmem:[%s9061_s1 + $0xe44] ss:$8 sps:$4 sm:$0xff]  }
 0x167   : > { %4467 = vmatpush1.bf16.msra.mxu1 %v6902_v8  ;;  %v334_v8 = vld [vmem:[%s7328_s19 + $0x328] sm:$0xff] }
 0x168   : > { %5051 = vmatpush1.bf16.msra.mxu0 %v6905_v9  ;;  %4468 = vmatprep.subr.bf16.mxu1 %v6910_v10  ;;  %v5524_v9 = vcombine.low %v302_v56, %v318_v59  ;;  %v5540_v10 = vcombine.low %v310_v60, %v326_v61  ;;  %v7022_v56 = vld [vmem:[%s9061_s1 + $0x6c0] ss:$8 sps:$4 sm:$0xff]   ;;  %v7033_v59 = vld [vmem:[%s9061_s1 + $0xed4] ss:$8 sps:$4 sm:$0xff]   ;;  %v7028_v60 = vld [vmem:[%s9061_s1 + $0x6d0] ss:$8 sps:$4 sm:$0xff]  }
 0x169   : > { %5052 = vmatprep.subr.bf16.mxu0 %v6913_v11  ;;  %v350_v11 = vld [vmem:[%s7328_s19 + $0x3a8] sm:$0xff]  ;;  %v7031_v61 = vld [vmem:[%s9061_s1 + $0xed0] ss:$8 sps:$4 sm:$0xff]  }
 0x16b   : > { %4469 = vmatpush1.bf16.msra.mxu1 %v6908_v12  ;;  %v342_v12 = vld [vmem:[%s7328_s19 + $0x368] sm:$0xff] }
 0x16c   : > { %5053 = vmatpush1.bf16.msra.mxu0 %v6911_v13  ;;  %4470 = vmatprep.subr.bf16.mxu1 %v6916_v14  ;;  %v358_v13 = vld [vmem:[%s7328_s19 + $0x3e8] sm:$0xff] }
 0x16d   : > { %5054 = vmatprep.subr.bf16.mxu0 %v6919_v15  ;;  %v6974_v14 = vld [vmem:[%s9061_s1 + $0x640] ss:$8 sps:$4 sm:$0xff]  }
 0x16e   : > { %v6977_v15 = vld [vmem:[%s9061_s1 + $0xe40] ss:$8 sps:$4 sm:$0xff]  }
 0x16f   : > { %4471 = vmatpush1.bf16.msra.mxu1 %v6914_v16  ;;  %v6982_v16 = vld [vmem:[%s9061_s1 + $0x654] ss:$8 sps:$4 sm:$0xff]  }
 0x170   : > { %5055 = vmatpush1.bf16.msra.mxu0 %v6917_v17  ;;  %4472 = vmatprep.subr.bf16.mxu1 %v6922_v18  ;;  %v6985_v17 = vld [vmem:[%s9061_s1 + $0xe54] ss:$8 sps:$4 sm:$0xff]   ;;  %v5557_v18 = vcombine.high %v334_v8, %v350_v11 }
 0x171   : > { %5056 = vmatprep.subr.bf16.mxu0 %v6925_v19  ;;  %v5573_v19 = vcombine.high %v342_v12, %v358_v13 }
 0x173   : > { %4473 = vmatpush1.bf16.msra.mxu1 %v6920_v20  ;;  %v6980_v20 = vld [vmem:[%s9061_s1 + $0x650] ss:$8 sps:$4 sm:$0xff]  }
 0x174   : > { %5057 = vmatpush1.bf16.msra.mxu0 %v6923_v21  ;;  %4474 = vmatprep.subr.bf16.mxu1 %v6928_v22  ;;  %v6983_v21 = vld [vmem:[%s9061_s1 + $0xe50] ss:$8 sps:$4 sm:$0xff]   ;;  %v6988_v22 = vld [vmem:[%s9061_s1 + $0x664] ss:$8 sps:$4 sm:$0xff]  }
 0x175   : > { %5058 = vmatprep.subr.bf16.mxu0 %v6931_v23  ;;  %v6991_v23 = vld [vmem:[%s9061_s1 + $0xe64] ss:$8 sps:$4 sm:$0xff]  }
 0x177   : > { %4475 = vmatpush1.bf16.msra.mxu1 %v6926_v24  ;;  %v8605_v24 = vld [vmem:[%s7328_s19 + $0x30] sm:$0xff] }
 0x178   : > { %5059 = vmatpush1.bf16.msra.mxu0 %v6929_v25  ;;  %4476 = vmatprep.subr.bf16.mxu1 %v6934_v26  ;;  %v5556_v25 = vcombine.low %v334_v8, %v350_v11  ;;  %v5572_v26 = vcombine.low %v342_v12, %v358_v13  ;;  %v271_v8 = vld [vmem:[%s7328_s19 + $0x130] sm:$0xff] }
 0x179   : > { %5060 = vmatprep.subr.bf16.mxu0 %v6937_v27  ;;  %v8608_v27 = vld [vmem:[%s7328_s19 + $0xb0] sm:$0xff] }
 0x17a   : > { %v287_v11 = vld [vmem:[%s7328_s19 + $0x1b0] sm:$0xff] }
 0x17b   : > { %4477 = vmatpush1.bf16.msra.mxu1 %v6932_v28  ;;  %v8611_v28 = vld [vmem:[%s7328_s19 + $0x70] sm:$0xff] }
 0x17c   : > { %5061 = vmatpush1.bf16.msra.mxu0 %v6935_v29  ;;  %4478 = vmatprep.subr.bf16.mxu1 %v6940_v30  ;;  %v8614_v29 = vld [vmem:[%s7328_s19 + $0xf0] sm:$0xff]  ;;  %v6986_v30 = vld [vmem:[%s9061_s1 + $0x660] ss:$8 sps:$4 sm:$0xff]  }
 0x17d   : > { %5062 = vmatprep.subr.bf16.mxu0 %v6943_v31  ;;  %v6989_v31 = vld [vmem:[%s9061_s1 + $0xe60] ss:$8 sps:$4 sm:$0xff]   ;;  %v279_v12 = vld [vmem:[%s7328_s19 + $0x170] sm:$0xff] }
 0x17e   : > { %v295_v13 = vld [vmem:[%s7328_s19 + $0x1f0] sm:$0xff] }
 0x17f   : > { %4479 = vmatpush1.bf16.msra.mxu1 %v6938_v32  ;;  %v6994_v32 = vld [vmem:[%s9061_s1 + $0x674] ss:$8 sps:$4 sm:$0xff]  }
 0x180   : > { %5063 = vmatpush1.bf16.msra.mxu0 %v6941_v33  ;;  %4480 = vmatprep.subr.bf16.mxu1 %v6946_v34  ;;  %v6997_v33 = vld [vmem:[%s9061_s1 + $0xe74] ss:$8 sps:$4 sm:$0xff]   ;;  %v5463_v34 = vcombine.high %v8605_v24, %v8608_v27 }
 0x181   : > { %5064 = vmatprep.subr.bf16.mxu0 %v6949_v35  ;;  %v5479_v35 = vcombine.high %v8611_v28, %v8614_v29 }
 0x183   : > { %4481 = vmatpush1.bf16.msra.mxu1 %v6944_v36  ;;  %v6992_v36 = vld [vmem:[%s9061_s1 + $0x670] ss:$8 sps:$4 sm:$0xff]  }
 0x184   : > { %5065 = vmatpush1.bf16.msra.mxu0 %v6947_v37  ;;  %4523 = vmatprep.subr.bf16.mxu1 %v6952_v38  ;;  %v6995_v37 = vld [vmem:[%s9061_s1 + $0xe70] ss:$8 sps:$4 sm:$0xff]   ;;  %v7000_v38 = vld [vmem:[%s9061_s1 + $0x684] ss:$8 sps:$4 sm:$0xff]  }
 0x185   : > { %5107 = vmatprep.subr.bf16.mxu0 %v6955_v39  ;;  %v7003_v39 = vld [vmem:[%s9061_s1 + $0xe84] ss:$8 sps:$4 sm:$0xff]  }
 0x186   : > { %4483 = vmatmul.mubr.bf16.vlgmr.msra.gmra.mrb[0].mxu1 %v5460_v41  ;;  %v7001_v41 = vld [vmem:[%s9061_s1 + $0xe80] ss:$8 sps:$4 sm:$0xff]  }
 0x187   : > { %5067 = vmatmul.mubr.bf16.vlgmr.msra.gmra.mrb[0].mxu0 %v5476_v42  ;;  %4524 = vmatpush1.bf16.msra.mxu1 %v6950_v46  ;;  %v7006_v42 = vld [vmem:[%s9061_s1 + $0x694] ss:$8 sps:$4 sm:$0xff]   ;;  %v7012_v46 = vld [vmem:[%s9061_s1 + $0x6a4] ss:$8 sps:$4 sm:$0xff]  }
 0x188   : > { %5108 = vmatpush1.bf16.msra.mxu0 %v6953_v47  ;;  %4525 = vmatprep.subr.bf16.mxu1 %v6958_v48  ;;  %v7015_v47 = vld [vmem:[%s9061_s1 + $0xea4] ss:$8 sps:$4 sm:$0xff]   ;;  %v7010_v48 = vld [vmem:[%s9061_s1 + $0x6a0] ss:$8 sps:$4 sm:$0xff]  }
 0x189   : > { %5109 = vmatprep.subr.bf16.mxu0 %v6961_v49  ;;  %4492 = vmatprep.mubr.bf16.mxu1 %v5493_v50  ;;  %v7013_v49 = vld [vmem:[%s9061_s1 + $0xea0] ss:$8 sps:$4 sm:$0xff]   ;;  %v7018_v50 = vld [vmem:[%s9061_s1 + $0x6b4] ss:$8 sps:$4 sm:$0xff]  }
 0x18a   : > { %5076 = vmatprep.mubr.bf16.mxu0 %v5509_v51  ;;  %v7021_v51 = vld [vmem:[%s9061_s1 + $0xeb4] ss:$8 sps:$4 sm:$0xff]  }
 0x18b   : > { %4526 = vmatpush1.bf16.msra.mxu1 %v6956_v52  ;;  %v7016_v52 = vld [vmem:[%s9061_s1 + $0x6b0] ss:$8 sps:$4 sm:$0xff]  }
 0x18c   : > { %5110 = vmatpush1.bf16.msra.mxu0 %v6959_v53  ;;  %4527 = vmatprep.subr.bf16.mxu1 %v6964_v54  ;;  %v7019_v53 = vld [vmem:[%s9061_s1 + $0xeb0] ss:$8 sps:$4 sm:$0xff]   ;;  %v7024_v54 = vld [vmem:[%s9061_s1 + $0x6c4] ss:$8 sps:$4 sm:$0xff]  }
 0x18d   : > { %5111 = vmatprep.subr.bf16.mxu0 %v6967_v55  ;;  %v7027_v55 = vld [vmem:[%s9061_s1 + $0xec4] ss:$8 sps:$4 sm:$0xff]  }
 0x18e   : > { %4493 = vmatmul.mubr.bf16.gmra.mrb[4].mxu1 %v5492_v57  ;;  %v7025_v57 = vld [vmem:[%s9061_s1 + $0xec0] ss:$8 sps:$4 sm:$0xff]  }
 0x18f   : > { %5077 = vmatmul.mubr.bf16.gmra.mrb[4].mxu0 %v5508_v58  ;;  %4528 = vmatpush1.bf16.msra.mxu1 %v6962_v62  ;;  %v7030_v58 = vld [vmem:[%s9061_s1 + $0x6d4] ss:$8 sps:$4 sm:$0xff]   ;;  %v7036_v62 = vld [vmem:[%s9061_s1 + $0x6e4] ss:$8 sps:$4 sm:$0xff]  }
 0x190   : > { %5112 = vmatpush1.bf16.msra.mxu0 %v6965_v63  ;;  %4529 = vmatprep.subr.bf16.mxu1 %v6970_v0  ;;  %v7039_v63 = vld [vmem:[%s9061_s1 + $0xee4] ss:$8 sps:$4 sm:$0xff]   ;;  %v7034_v0 = vld [vmem:[%s9061_s1 + $0x6e0] ss:$8 sps:$4 sm:$0xff]  }
 0x191   : > { %5113 = vmatprep.subr.bf16.mxu0 %v6973_v1  ;;  %4502 = vmatprep.mubr.bf16.mxu1 %v5525_v2  ;;  %v7037_v1 = vld [vmem:[%s9061_s1 + $0xee0] ss:$8 sps:$4 sm:$0xff]   ;;  %v7042_v2 = vld [vmem:[%s9061_s1 + $0x6f4] ss:$8 sps:$4 sm:$0xff]  }
 0x192   : > { %5086 = vmatprep.mubr.bf16.mxu0 %v5541_v3  ;;  %v7045_v3 = vld [vmem:[%s9061_s1 + $0xef4] ss:$8 sps:$4 sm:$0xff]  }
 0x193   : > { %4530 = vmatpush1.bf16.msra.mxu1 %v6968_v4  ;;  %v7040_v4 = vld [vmem:[%s9061_s1 + $0x6f0] ss:$8 sps:$4 sm:$0xff]  }
 0x194   : > { %5114 = vmatpush1.bf16.msra.mxu0 %v6971_v5  ;;  %4531 = vmatprep.subr.bf16.mxu1 %v6976_v6  ;;  %v7043_v5 = vld [vmem:[%s9061_s1 + $0xef0] ss:$8 sps:$4 sm:$0xff]   ;;  %v7048_v6 = vld [vmem:[%s9061_s1 + $0x704] ss:$8 sps:$4 sm:$0xff]  }
 0x195   : > { %5115 = vmatprep.subr.bf16.mxu0 %v6979_v7  ;;  %v7051_v7 = vld [vmem:[%s9061_s1 + $0xf04] ss:$8 sps:$4 sm:$0xff]  }
 0x196   : > { %4503 = vmatmul.mubr.bf16.gmra.mrb[8].mxu1 %v5524_v9  ;;  %v5462_v9 = vcombine.low %v8605_v24, %v8608_v27  ;;  %v303_v24 = vld [vmem:[%s7328_s19 + $0x230] sm:$0xff] }
 0x197   : > { %5087 = vmatmul.mubr.bf16.gmra.mrb[8].mxu0 %v5540_v10  ;;  %4532 = vmatpush1.bf16.msra.mxu1 %v6974_v14  ;;  %v5478_v10 = vcombine.low %v8611_v28, %v8614_v29  ;;  %v7046_v14 = vld [vmem:[%s9061_s1 + $0x700] ss:$8 sps:$4 sm:$0xff]   ;;  %v319_v27 = vld [vmem:[%s7328_s19 + $0x2b0] sm:$0xff] }
 0x198   : > { %5116 = vmatpush1.bf16.msra.mxu0 %v6977_v15  ;;  %4533 = vmatprep.subr.bf16.mxu1 %v6982_v16  ;;  %v7049_v15 = vld [vmem:[%s9061_s1 + $0xf00] ss:$8 sps:$4 sm:$0xff]   ;;  %v7054_v16 = vld [vmem:[%s9061_s1 + $0x714] ss:$8 sps:$4 sm:$0xff]  }
 0x199   : > { %5117 = vmatprep.subr.bf16.mxu0 %v6985_v17  ;;  %4512 = vmatprep.mubr.bf16.mxu1 %v5557_v18  ;;  %v7057_v17 = vld [vmem:[%s9061_s1 + $0xf14] ss:$8 sps:$4 sm:$0xff]   ;;  %v5495_v18 = vcombine.high %v271_v8, %v287_v11 }
 0x19a   : > { %5096 = vmatprep.mubr.bf16.mxu0 %v5573_v19  ;;  %v5511_v19 = vcombine.high %v279_v12, %v295_v13  ;;  %v311_v28 = vld [vmem:[%s7328_s19 + $0x270] sm:$0xff] }
 0x19b   : > { %4534 = vmatpush1.bf16.msra.mxu1 %v6980_v20  ;;  %v7052_v20 = vld [vmem:[%s9061_s1 + $0x710] ss:$8 sps:$4 sm:$0xff]  }
 0x19c   : > { %5118 = vmatpush1.bf16.msra.mxu0 %v6983_v21  ;;  %4535 = vmatprep.subr.bf16.mxu1 %v6988_v22  ;;  %v7055_v21 = vld [vmem:[%s9061_s1 + $0xf10] ss:$8 sps:$4 sm:$0xff]   ;;  %v7060_v22 = vld [vmem:[%s9061_s1 + $0x724] ss:$8 sps:$4 sm:$0xff]  }
 0x19d   : > { %5119 = vmatprep.subr.bf16.mxu0 %v6991_v23  ;;  %v7063_v23 = vld [vmem:[%s9061_s1 + $0xf24] ss:$8 sps:$4 sm:$0xff]   ;;  %v327_v29 = vld [vmem:[%s7328_s19 + $0x2f0] sm:$0xff] }
 0x19e   : > { %4513 = vmatmul.mubr.bf16.gmra.mrb[12].mxu1 %v5556_v25  ;;  %v5494_v25 = vcombine.low %v271_v8, %v287_v11  ;;  %v7094_v8 = vld [vmem:[%s9061_s1 + $0x780] ss:$8 sps:$4 sm:$0xff]   ;;  %v7105_v11 = vld [vmem:[%s9061_s1 + $0xf94] ss:$8 sps:$4 sm:$0xff]  }
 0x19f   : > { %5097 = vmatmul.mubr.bf16.gmra.mrb[12].mxu0 %v5572_v26  ;;  %4536 = vmatpush1.bf16.msra.mxu1 %v6986_v30  ;;  %v5510_v26 = vcombine.low %v279_v12, %v295_v13  ;;  %v7058_v30 = vld [vmem:[%s9061_s1 + $0x720] ss:$8 sps:$4 sm:$0xff]   ;;  %v7100_v12 = vld [vmem:[%s9061_s1 + $0x790] ss:$8 sps:$4 sm:$0xff]  }
 0x1a0   : > { %5120 = vmatpush1.bf16.msra.mxu0 %v6989_v31  ;;  %4537 = vmatprep.subr.bf16.mxu1 %v6994_v32  ;;  %v7061_v31 = vld [vmem:[%s9061_s1 + $0xf20] ss:$8 sps:$4 sm:$0xff]   ;;  %v7066_v32 = vld [vmem:[%s9061_s1 + $0x734] ss:$8 sps:$4 sm:$0xff]   ;;  %v7103_v13 = vld [vmem:[%s9061_s1 + $0xf90] ss:$8 sps:$4 sm:$0xff]  }
 0x1a1   : > { %5121 = vmatprep.subr.bf16.mxu0 %v6997_v33  ;;  %4555 = vmatprep.mubr.bf16.mxu1 %v5463_v34  ;;  %v7069_v33 = vld [vmem:[%s9061_s1 + $0xf34] ss:$8 sps:$4 sm:$0xff]   ;;  %v5527_v34 = vcombine.high %v303_v24, %v319_v27 }
 0x1a2   : > { %5139 = vmatprep.mubr.bf16.mxu0 %v5479_v35  ;;  %v5543_v35 = vcombine.high %v311_v28, %v327_v29 }
 0x1a3   : > { %4538 = vmatpush1.bf16.msra.mxu1 %v6992_v36  ;;  %v7064_v36 = vld [vmem:[%s9061_s1 + $0x730] ss:$8 sps:$4 sm:$0xff]  }
 0x1a4   : > { %5122 = vmatpush1.bf16.msra.mxu0 %v6995_v37  ;;  %4539 = vmatprep.subr.bf16.mxu1 %v7000_v38  ;;  %v7067_v37 = vld [vmem:[%s9061_s1 + $0xf30] ss:$8 sps:$4 sm:$0xff]   ;;  %v7072_v38 = vld [vmem:[%s9061_s1 + $0x744] ss:$8 sps:$4 sm:$0xff]  }
 0x1a5   : > { %5123 = vmatprep.subr.bf16.mxu0 %v7003_v39  ;;  %v7075_v39 = vld [vmem:[%s9061_s1 + $0xf44] ss:$8 sps:$4 sm:$0xff]  }
 0x1a7   : > { %4540 = vmatpush1.bf16.msra.mxu1 %v6998_v40  ;;  %v335_v40 = vld [vmem:[%s7328_s19 + $0x330] sm:$0xff] }
 0x1a8   : > { %5124 = vmatpush1.bf16.msra.mxu0 %v7001_v41  ;;  %4541 = vmatprep.subr.bf16.mxu1 %v7006_v42  ;;  %v5526_v41 = vcombine.low %v303_v24, %v319_v27  ;;  %v5542_v42 = vcombine.low %v311_v28, %v327_v29  ;;  %v7118_v24 = vld [vmem:[%s9061_s1 + $0x7c0] ss:$8 sps:$4 sm:$0xff]   ;;  %v7129_v27 = vld [vmem:[%s9061_s1 + $0xfd4] ss:$8 sps:$4 sm:$0xff]   ;;  %v7124_v28 = vld [vmem:[%s9061_s1 + $0x7d0] ss:$8 sps:$4 sm:$0xff]  }
 0x1a9   : > { %5125 = vmatprep.subr.bf16.mxu0 %v7009_v43  ;;  %v351_v43 = vld [vmem:[%s7328_s19 + $0x3b0] sm:$0xff] }
 0x1aa   : > { %v7127_v29 = vld [vmem:[%s9061_s1 + $0xfd0] ss:$8 sps:$4 sm:$0xff]  }
 0x1ab   : > { %4542 = vmatpush1.bf16.msra.mxu1 %v7004_v44  ;;  %v343_v44 = vld [vmem:[%s7328_s19 + $0x370] sm:$0xff] }
 0x1ac   : > { %5126 = vmatpush1.bf16.msra.mxu0 %v7007_v45  ;;  %4543 = vmatprep.subr.bf16.mxu1 %v7012_v46  ;;  %v359_v45 = vld [vmem:[%s7328_s19 + $0x3f0] sm:$0xff]  ;;  %v7070_v46 = vld [vmem:[%s9061_s1 + $0x740] ss:$8 sps:$4 sm:$0xff]  }
 0x1ad   : > { %5127 = vmatprep.subr.bf16.mxu0 %v7015_v47  ;;  %v7073_v47 = vld [vmem:[%s9061_s1 + $0xf40] ss:$8 sps:$4 sm:$0xff]  }
 0x1af   : > { %4544 = vmatpush1.bf16.msra.mxu1 %v7010_v48  ;;  %v7078_v48 = vld [vmem:[%s9061_s1 + $0x754] ss:$8 sps:$4 sm:$0xff]  }
 0x1b0   : > { %5128 = vmatpush1.bf16.msra.mxu0 %v7013_v49  ;;  %4545 = vmatprep.subr.bf16.mxu1 %v7018_v50  ;;  %v7081_v49 = vld [vmem:[%s9061_s1 + $0xf54] ss:$8 sps:$4 sm:$0xff]   ;;  %v5559_v50 = vcombine.high %v335_v40, %v351_v43 }
 0x1b1   : > { %5129 = vmatprep.subr.bf16.mxu0 %v7021_v51  ;;  %v5575_v51 = vcombine.high %v343_v44, %v359_v45 }
 0x1b3   : > { %4546 = vmatpush1.bf16.msra.mxu1 %v7016_v52  ;;  %v7076_v52 = vld [vmem:[%s9061_s1 + $0x750] ss:$8 sps:$4 sm:$0xff]  }
 0x1b4   : > { %5130 = vmatpush1.bf16.msra.mxu0 %v7019_v53  ;;  %4547 = vmatprep.subr.bf16.mxu1 %v7024_v54  ;;  %v7079_v53 = vld [vmem:[%s9061_s1 + $0xf50] ss:$8 sps:$4 sm:$0xff]   ;;  %v7084_v54 = vld [vmem:[%s9061_s1 + $0x764] ss:$8 sps:$4 sm:$0xff]  }
 0x1b5   : > { %5131 = vmatprep.subr.bf16.mxu0 %v7027_v55  ;;  %v7087_v55 = vld [vmem:[%s9061_s1 + $0xf64] ss:$8 sps:$4 sm:$0xff]  }
 0x1b7   : > { %4548 = vmatpush1.bf16.msra.mxu1 %v7022_v56  ;;  %v8829_v56 = vld [vmem:[%s7328_s19 + $0x38] sm:$0xff] }
 0x1b8   : > { %5132 = vmatpush1.bf16.msra.mxu0 %v7025_v57  ;;  %4549 = vmatprep.subr.bf16.mxu1 %v7030_v58  ;;  %v5558_v57 = vcombine.low %v335_v40, %v351_v43  ;;  %v5574_v58 = vcombine.low %v343_v44, %v359_v45  ;;  %v280_v40 = vld [vmem:[%s7328_s19 + $0x178] sm:$0xff] }
 0x1b9   : > { %5133 = vmatprep.subr.bf16.mxu0 %v7033_v59  ;;  %v8832_v59 = vld [vmem:[%s7328_s19 + $0xb8] sm:$0xff] }
 0x1bb   : > { %4550 = vmatpush1.bf16.msra.mxu1 %v7028_v60  ;;  %v8835_v60 = vld [vmem:[%s7328_s19 + $0x78] sm:$0xff] }
 0x1bc   : > { %5134 = vmatpush1.bf16.msra.mxu0 %v7031_v61  ;;  %4551 = vmatprep.subr.bf16.mxu1 %v7036_v62  ;;  %v8838_v61 = vld [vmem:[%s7328_s19 + $0xf8] sm:$0xff]  ;;  %v7082_v62 = vld [vmem:[%s9061_s1 + $0x760] ss:$8 sps:$4 sm:$0xff]  }
 0x1bd   : > { %5135 = vmatprep.subr.bf16.mxu0 %v7039_v63  ;;  %v7085_v63 = vld [vmem:[%s9061_s1 + $0xf60] ss:$8 sps:$4 sm:$0xff]   ;;  %v5480_v43 = vcombine.low %v8835_v60, %v8838_v61 }
 0x1bf   : > { %4552 = vmatpush1.bf16.msra.mxu1 %v7034_v0  ;;  %v7090_v0 = vld [vmem:[%s9061_s1 + $0x774] ss:$8 sps:$4 sm:$0xff]  }
 0x1c0   : > { %5136 = vmatpush1.bf16.msra.mxu0 %v7037_v1  ;;  %4553 = vmatprep.subr.bf16.mxu1 %v7042_v2  ;;  %v7093_v1 = vld [vmem:[%s9061_s1 + $0xf74] ss:$8 sps:$4 sm:$0xff]   ;;  %v5465_v2 = vcombine.high %v8829_v56, %v8832_v59 }
 0x1c1   : > { %5137 = vmatprep.subr.bf16.mxu0 %v7045_v3  ;;  %v5481_v3 = vcombine.high %v8835_v60, %v8838_v61 }
 0x1c3   : > { %4554 = vmatpush1.bf16.msra.mxu1 %v7040_v4  ;;  %v7088_v4 = vld [vmem:[%s9061_s1 + $0x770] ss:$8 sps:$4 sm:$0xff]  }
 0x1c4   : > { %5138 = vmatpush1.bf16.msra.mxu0 %v7043_v5  ;;  %4596 = vmatprep.subr.bf16.mxu1 %v7048_v6  ;;  %v7091_v5 = vld [vmem:[%s9061_s1 + $0xf70] ss:$8 sps:$4 sm:$0xff]   ;;  %v7096_v6 = vld [vmem:[%s9061_s1 + $0x784] ss:$8 sps:$4 sm:$0xff]  }
 0x1c5   : > { %5180 = vmatprep.subr.bf16.mxu0 %v7051_v7  ;;  %v7099_v7 = vld [vmem:[%s9061_s1 + $0xf84] ss:$8 sps:$4 sm:$0xff]  }
 0x1c6   : > { %4556 = vmatmul.mubr.bf16.vlgmr.msra.gmra.mrb[0].mxu1 %v5462_v9  ;;  %v7097_v9 = vld [vmem:[%s9061_s1 + $0xf80] ss:$8 sps:$4 sm:$0xff]  }
 0x1c7   : > { %5140 = vmatmul.mubr.bf16.vlgmr.msra.gmra.mrb[0].mxu0 %v5478_v10  ;;  %4597 = vmatpush1.bf16.msra.mxu1 %v7046_v14  ;;  %v7102_v10 = vld [vmem:[%s9061_s1 + $0x794] ss:$8 sps:$4 sm:$0xff]   ;;  %v7108_v14 = vld [vmem:[%s9061_s1 + $0x7a4] ss:$8 sps:$4 sm:$0xff]  }
 0x1c8   : > { %5181 = vmatpush1.bf16.msra.mxu0 %v7049_v15  ;;  %4598 = vmatprep.subr.bf16.mxu1 %v7054_v16  ;;  %v7111_v15 = vld [vmem:[%s9061_s1 + $0xfa4] ss:$8 sps:$4 sm:$0xff]   ;;  %v7106_v16 = vld [vmem:[%s9061_s1 + $0x7a0] ss:$8 sps:$4 sm:$0xff]  }
 0x1c9   : > { %5182 = vmatprep.subr.bf16.mxu0 %v7057_v17  ;;  %4565 = vmatprep.mubr.bf16.mxu1 %v5495_v18  ;;  %v7109_v17 = vld [vmem:[%s9061_s1 + $0xfa0] ss:$8 sps:$4 sm:$0xff]   ;;  %v7114_v18 = vld [vmem:[%s9061_s1 + $0x7b4] ss:$8 sps:$4 sm:$0xff]  }
 0x1ca   : > { %5149 = vmatprep.mubr.bf16.mxu0 %v5511_v19  ;;  %v7117_v19 = vld [vmem:[%s9061_s1 + $0xfb4] ss:$8 sps:$4 sm:$0xff]  }
 0x1cb   : > { %4599 = vmatpush1.bf16.msra.mxu1 %v7052_v20  ;;  %v7112_v20 = vld [vmem:[%s9061_s1 + $0x7b0] ss:$8 sps:$4 sm:$0xff]  }
 0x1cc   : > { %5183 = vmatpush1.bf16.msra.mxu0 %v7055_v21  ;;  %4600 = vmatprep.subr.bf16.mxu1 %v7060_v22  ;;  %v7115_v21 = vld [vmem:[%s9061_s1 + $0xfb0] ss:$8 sps:$4 sm:$0xff]   ;;  %v7120_v22 = vld [vmem:[%s9061_s1 + $0x7c4] ss:$8 sps:$4 sm:$0xff]  }
 0x1cd   : > { %5184 = vmatprep.subr.bf16.mxu0 %v7063_v23  ;;  %v7123_v23 = vld [vmem:[%s9061_s1 + $0xfc4] ss:$8 sps:$4 sm:$0xff]  }
 0x1ce   : > { %4566 = vmatmul.mubr.bf16.gmra.mrb[4].mxu1 %v5494_v25  ;;  %v7121_v25 = vld [vmem:[%s9061_s1 + $0xfc0] ss:$8 sps:$4 sm:$0xff]  }
 0x1cf   : > { %5150 = vmatmul.mubr.bf16.gmra.mrb[4].mxu0 %v5510_v26  ;;  %4601 = vmatpush1.bf16.msra.mxu1 %v7058_v30  ;;  %v7126_v26 = vld [vmem:[%s9061_s1 + $0x7d4] ss:$8 sps:$4 sm:$0xff]   ;;  %v7132_v30 = vld [vmem:[%s9061_s1 + $0x7e4] ss:$8 sps:$4 sm:$0xff]  }
 0x1d0   : > { %5185 = vmatpush1.bf16.msra.mxu0 %v7061_v31  ;;  %4602 = vmatprep.subr.bf16.mxu1 %v7066_v32  ;;  %v7135_v31 = vld [vmem:[%s9061_s1 + $0xfe4] ss:$8 sps:$4 sm:$0xff]   ;;  %v7130_v32 = vld [vmem:[%s9061_s1 + $0x7e0] ss:$8 sps:$4 sm:$0xff]  }
 0x1d1   : > { %5186 = vmatprep.subr.bf16.mxu0 %v7069_v33  ;;  %4575 = vmatprep.mubr.bf16.mxu1 %v5527_v34  ;;  %v7133_v33 = vld [vmem:[%s9061_s1 + $0xfe0] ss:$8 sps:$4 sm:$0xff]   ;;  %v7138_v34 = vld [vmem:[%s9061_s1 + $0x7f4] ss:$8 sps:$4 sm:$0xff]  }
 0x1d2   : > { %5159 = vmatprep.mubr.bf16.mxu0 %v5543_v35  ;;  %v7141_v35 = vld [vmem:[%s9061_s1 + $0xff4] ss:$8 sps:$4 sm:$0xff]  }
 0x1d3   : > { %4603 = vmatpush1.bf16.msra.mxu1 %v7064_v36  ;;  %v7136_v36 = vld [vmem:[%s9061_s1 + $0x7f0] ss:$8 sps:$4 sm:$0xff]  }
 0x1d4   : > { %5187 = vmatpush1.bf16.msra.mxu0 %v7067_v37  ;;  %4604 = vmatprep.subr.bf16.mxu1 %v7072_v38  ;;  %v7139_v37 = vld [vmem:[%s9061_s1 + $0xff0] ss:$8 sps:$4 sm:$0xff]  }
 0x1d5   : > { %5188 = vmatprep.subr.bf16.mxu0 %v7075_v39  ;;  %v272_v38 = vld [vmem:[%s7328_s19 + $0x138] sm:$0xff] }
 0x1d6   : > { %4576 = vmatmul.mubr.bf16.gmra.mrb[8].mxu1 %v5526_v41  ;;  %v288_v39 = vld [vmem:[%s7328_s19 + $0x1b8] sm:$0xff] }
 0x1d7   : > { %5160 = vmatmul.mubr.bf16.gmra.mrb[8].mxu0 %v5542_v42  ;;  %4605 = vmatpush1.bf16.msra.mxu1 %v7070_v46  ;;  %v296_v41 = vld [vmem:[%s7328_s19 + $0x1f8] sm:$0xff]  ;;  %v5464_v42 = vcombine.low %v8829_v56, %v8832_v59  ;;  %v5497_v44 = vcombine.high %v272_v38, %v288_v39 }
 0x1d8   : > { %5189 = vmatpush1.bf16.msra.mxu0 %v7073_v47  ;;  %4606 = vmatprep.subr.bf16.mxu1 %v7078_v48  ;;  %v5513_v45 = vcombine.high %v280_v40, %v296_v41  ;;  %v304_v46 = vld [vmem:[%s7328_s19 + $0x238] sm:$0xff] }
 0x1d9   : > { %5190 = vmatprep.subr.bf16.mxu0 %v7081_v49  ;;  %4585 = vmatprep.mubr.bf16.mxu1 %v5559_v50  ;;  %v320_v47 = vld [vmem:[%s7328_s19 + $0x2b8] sm:$0xff]  ;;  %v5496_v50 = vcombine.low %v272_v38, %v288_v39 }
 0x1da   : > { %5169 = vmatprep.mubr.bf16.mxu0 %v5575_v51  ;;  %v312_v48 = vld [vmem:[%s7328_s19 + $0x278] sm:$0xff]  ;;  %v5512_v51 = vcombine.low %v280_v40, %v296_v41 }
 0x1db   : > { %4607 = vmatpush1.bf16.msra.mxu1 %v7076_v52  ;;  %v328_v49 = vld [vmem:[%s7328_s19 + $0x2f8] sm:$0xff]  ;;  %v5529_v52 = vcombine.high %v304_v46, %v320_v47 }
 0x1dc   : > { %5191 = vmatpush1.bf16.msra.mxu0 %v7079_v53  ;;  %4608 = vmatprep.subr.bf16.mxu1 %v7084_v54  ;;  %v5545_v53 = vcombine.high %v312_v48, %v328_v49  ;;  %v336_v54 = vld [vmem:[%s7328_s19 + $0x338] sm:$0xff]  ;;  %v5544_v59 = vcombine.low %v312_v48, %v328_v49 }
 0x1dd   : > { %5192 = vmatprep.subr.bf16.mxu0 %v7087_v55  ;;  %v352_v55 = vld [vmem:[%s7328_s19 + $0x3b8] sm:$0xff] }
 0x1de   : > { %4586 = vmatmul.mubr.bf16.gmra.mrb[12].mxu1 %v5558_v57  ;;  %v344_v56 = vld [vmem:[%s7328_s19 + $0x378] sm:$0xff]  ;;  %v5561_v60 = vcombine.high %v336_v54, %v352_v55 }
 0x1df   : > { %5170 = vmatmul.mubr.bf16.gmra.mrb[12].mxu0 %v5574_v58  ;;  %4609 = vmatpush1.bf16.msra.mxu1 %v7082_v62  ;;  %v360_v57 = vld [vmem:[%s7328_s19 + $0x3f8] sm:$0xff]  ;;  %v5528_v58 = vcombine.low %v304_v46, %v320_v47  ;;  %v5560_v62 = vcombine.low %v336_v54, %v352_v55 }
 0x1e0   : > { %5193 = vmatpush1.bf16.msra.mxu0 %v7085_v63  ;;  %4610 = vmatprep.subr.bf16.mxu1 %v7090_v0  ;;  %v5577_v61 = vcombine.high %v344_v56, %v360_v57  ;;  %v5576_v63 = vcombine.low %v344_v56, %v360_v57  ;;  %v875_v0 = vlaneseq }
 0x1e1   : > { %5194 = vmatprep.subr.bf16.mxu0 %v7093_v1  ;;  %4628 = vmatprep.mubr.bf16.mxu1 %v5465_v2 }
 0x1e2   : > { %5212 = vmatprep.mubr.bf16.mxu0 %v5481_v3  ;;  %v876_v1 = vshrl.u32 %v875_v0, 7  ;;  %v873_v3 = vld [vmem:[%s9062_s2] sm:$0x3] }
 0x1e3   : > { %4611 = vmatpush1.bf16.msra.mxu1 %v7088_v4 }
 0x1e4   : > { %5195 = vmatpush1.bf16.msra.mxu0 %v7091_v5  ;;  %4612 = vmatprep.subr.bf16.mxu1 %v7096_v6  ;;  %v877_v2 = vsub.s32 0, %v876_v1  ;;  %v881_v4 = vsub.s32 1, %v876_v1 }
 0x1e5   : > { %5196 = vmatprep.subr.bf16.mxu0 %v7099_v7 }
 0x1e6   : > { %v8977_v5 = vrot.slane %v873_v3, %v877_v2  ;;  %v8979_v6 = vrot.slane %v873_v3, %v881_v4 }
 0x1e7   : > { %4613 = vmatpush1.bf16.msra.mxu1 %v7094_v8 }
 0x1e8   : > { %5197 = vmatpush1.bf16.msra.mxu0 %v7097_v9  ;;  %4614 = vmatprep.subr.bf16.mxu1 %v7102_v10  ;;  %v5269_v9 = vld [vmem:[%s9063_s3] sm:$0x3] }
 0x1e9   : > { %5198 = vmatprep.subr.bf16.mxu0 %v7105_v11 }
 0x1eb   : > { %4615 = vmatpush1.bf16.msra.mxu1 %v7100_v12 }
 0x1ec   : > { %5199 = vmatpush1.bf16.msra.mxu0 %v7103_v13  ;;  %4616 = vmatprep.subr.bf16.mxu1 %v7108_v14  ;;  %v5297_v13 = vld [vmem:[%s9064_s4] sm:$0x3] }
 0x1ed   : > { %5200 = vmatprep.subr.bf16.mxu0 %v7111_v15 }
 0x1ef   : > { %4617 = vmatpush1.bf16.msra.mxu1 %v7106_v16 }
 0x1f0   : > { %5201 = vmatpush1.bf16.msra.mxu0 %v7109_v17  ;;  %4618 = vmatprep.subr.bf16.mxu1 %v7114_v18  ;;  %v8989_v18 = vrot.slane %v5269_v9, %v877_v2 }
 0x1f1   : > { %5202 = vmatprep.subr.bf16.mxu0 %v7117_v19 }
 0x1f3   : > { %4619 = vmatpush1.bf16.msra.mxu1 %v7112_v20 }
 0x1f4   : > { %5203 = vmatpush1.bf16.msra.mxu0 %v7115_v21  ;;  %4620 = vmatprep.subr.bf16.mxu1 %v7120_v22 }
 0x1f5   : > { %5204 = vmatprep.subr.bf16.mxu0 %v7123_v23  ;;  %v8992_v23 = vrot.slane %v5269_v9, %v881_v4 }
 0x1f7   : > { %4621 = vmatpush1.bf16.msra.mxu1 %v7118_v24 }
 0x1f8   : > { %5205 = vmatpush1.bf16.msra.mxu0 %v7121_v25  ;;  %4622 = vmatprep.subr.bf16.mxu1 %v7126_v26  ;;  %v8995_v26 = vrot.slane %v5297_v13, %v877_v2 }
 0x1f9   : > { %5206 = vmatprep.subr.bf16.mxu0 %v7129_v27 }
 0x1fb   : > { %4623 = vmatpush1.bf16.msra.mxu1 %v7124_v28 }
 0x1fc   : > { %5207 = vmatpush1.bf16.msra.mxu0 %v7127_v29  ;;  %4624 = vmatprep.subr.bf16.mxu1 %v7132_v30  ;;  %v8997_v29 = vrot.slane %v5297_v13, %v881_v4 }
 0x1fd   : > { %5208 = vmatprep.subr.bf16.mxu0 %v7135_v31 }
 0x1ff   : > { %4625 = vmatpush1.bf16.msra.mxu1 %v7130_v32 }
 0x200   : > { %5209 = vmatpush1.bf16.msra.mxu0 %v7133_v33  ;;  %4626 = vmatprep.subr.bf16.mxu1 %v7138_v34 }
 0x201   : > { %5210 = vmatprep.subr.bf16.mxu0 %v7141_v35 }
 0x203   : > { %4627 = vmatpush1.bf16.msra.mxu1 %v7136_v36 }
 0x204   : > { %5211 = vmatpush1.bf16.msra.mxu0 %v7139_v37 }
 0x206   : > { %4629 = vmatmul.mubr.bf16.vlgmr.msra.gmra.mrb[0].mxu1 %v5464_v42 }
 0x207   : > { %5213 = vmatmul.mubr.bf16.vlgmr.msra.gmra.mrb[0].mxu0 %v5480_v43  ;;  %4638 = vmatprep.mubr.bf16.mxu1 %v5497_v44 }
 0x208   : > { %5222 = vmatprep.mubr.bf16.mxu0 %v5513_v45 }
 0x20e   : > { %4639 = vmatmul.mubr.bf16.gmra.mrb[4].mxu1 %v5496_v50 }
 0x20f   : > { %5223 = vmatmul.mubr.bf16.gmra.mrb[4].mxu0 %v5512_v51  ;;  %4648 = vmatprep.mubr.bf16.mxu1 %v5529_v52 }
 0x210   : > { %5232 = vmatprep.mubr.bf16.mxu0 %v5545_v53 }
 0x216   : > { %4649 = vmatmul.mubr.bf16.gmra.mrb[8].mxu1 %v5528_v58 }
 0x217   : > { %5233 = vmatmul.mubr.bf16.gmra.mrb[8].mxu0 %v5544_v59  ;;  %4658 = vmatprep.mubr.bf16.mxu1 %v5561_v60 }
 0x218   : > { %5242 = vmatprep.mubr.bf16.mxu0 %v5577_v61 }
 0x21e   : > { %4659 = vmatmul.mubr.bf16.gmra.mrb[12].mxu1 %v5560_v62 }
 0x21f   : > { %5243 = vmatmul.mubr.bf16.gmra.mrb[12].mxu0 %v5576_v63 }
 0x2d9   : > { %v4630_v7 = vpop.f32.mrb[0].mxu1 }
 0x2da   : > { %v5214_v8 = vpop.f32.mrb[0].mxu0  ;;  %v6110_v10 = vadd.f32 %v4630_v7, %v8977_v5  ;;  %v4632_v11 = vpop.f32.mrb[1].mxu1 }
 0x2db   : > { %v5216_v12 = vpop.f32.mrb[1].mxu0  ;;  %v6112_v14 = vadd.f32 %v4632_v11, %v8979_v6  ;;  %v4634_v15 = vpop.f32.mrb[2].mxu1 }
 0x2dc   : > { %v5218_v16 = vpop.f32.mrb[2].mxu0  ;;  %v6111_v17 = vadd.f32 %v6110_v10, %v5214_v8  ;;  %v6114_v19 = vadd.f32 %v4634_v15, %v8977_v5  ;;  %v4636_v20 = vpop.f32.mrb[3].mxu1 }
 0x2dd   : > { %v5220_v21 = vpop.f32.mrb[3].mxu0  ;;  %v6113_v22 = vadd.f32 %v6112_v14, %v5216_v12  ;;  %v6116_v24 = vadd.f32 %v4636_v20, %v8979_v6 }
 0x2de   : > { %v5253_v25 = vmax.f32 %v6111_v17, 0.0  ;;  %v6115_v27 = vadd.f32 %v6114_v19, %v5218_v16 }
 0x2df   : > { %v5254_v28 = vmax.f32 %v6113_v22, 0.0  ;;  %v6117_v30 = vadd.f32 %v6116_v24, %v5220_v21 }
 0x2e0   : > { %v5281_v31 = vmul.f32 %v8989_v18, %v5253_v25  ;;  %v5255_v32 = vmax.f32 %v6115_v27, 0.0 }
 0x2e1   : > { %v5282_v33 = vmul.f32 %v8992_v23, %v5254_v28  ;;  %v5256_v34 = vmax.f32 %v6117_v30, 0.0  ;;  %v4640_v35 = vpop.f32.mrb[4].mxu1 }
 0x2e2   : > { %v5224_v36 = vpop.f32.mrb[4].mxu0  ;;  %v5309_v37 = vadd.f32 %v8995_v26, %v5281_v31  ;;  %v5283_v38 = vmul.f32 %v8989_v18, %v5255_v32  ;;  %v6118_v39 = vadd.f32 %v4640_v35, %v8977_v5  ;;  %v4642_v40 = vpop.f32.mrb[5].mxu1 }
 0x2e3   : > { %v5226_v41 = vpop.f32.mrb[5].mxu0  ;;  %v5310_v42 = vadd.f32 %v8997_v29, %v5282_v33  ;;  %v5284_v43 = vmul.f32 %v8992_v23, %v5256_v34  ;;  %v6120_v44 = vadd.f32 %v4642_v40, %v8979_v6  ;;  %v4644_v45 = vpop.f32.mrb[6].mxu1 }
 0x2e4   : > { %v5228_v46 = vpop.f32.mrb[6].mxu0  ;;  %v5311_v47 = vadd.f32 %v8995_v26, %v5283_v38  ;;  %v6119_v48 = vadd.f32 %v6118_v39, %v5224_v36  ;;  %v6122_v49 = vadd.f32 %v4644_v45, %v8977_v5  ;;  %v4646_v50 = vpop.f32.mrb[7].mxu1 }
 0x2e5   : > { %v5230_v51 = vpop.f32.mrb[7].mxu0  ;;  %v6102_v52 = vpack.c.bf16 %v5310_v42, %v5309_v37  ;;  %v5312_v53 = vadd.f32 %v8997_v29, %v5284_v43  ;;  %v6121_v54 = vadd.f32 %v6120_v44, %v5226_v41  ;;  %v6124_v55 = vadd.f32 %v4646_v50, %v8979_v6 }
 0x2e6   : > { %v5257_v56 = vmax.f32 %v6119_v48, 0.0  ;;  %v6123_v57 = vadd.f32 %v6122_v49, %v5228_v46 }
 0x2e7   : > { %5373 = vst [vmem:[%s9011_s15] sm:$0xff] %v6102_v52  ;;  %v6103_v58 = vpack.c.bf16 %v5312_v53, %v5311_v47  ;;  %v5258_v59 = vmax.f32 %v6121_v54, 0.0  ;;  %v6125_v60 = vadd.f32 %v6124_v55, %v5230_v51 }
 0x2e8   : > { %v5285_v61 = vmul.f32 %v8989_v18, %v5257_v56  ;;  %v5259_v62 = vmax.f32 %v6123_v57, 0.0 }
 0x2e9   : > { %5374 = vst [vmem:[%s9011_s15 + $0x8] sm:$0xff] %v6103_v58  ;;  %v5286_v63 = vmul.f32 %v8992_v23, %v5258_v59  ;;  %v5260_v0 = vmax.f32 %v6125_v60, 0.0  ;;  %v4650_v1 = vpop.f32.mrb[8].mxu1 }
 0x2ea   : > { %v5234_v2 = vpop.f32.mrb[8].mxu0  ;;  %v5313_v3 = vadd.f32 %v8995_v26, %v5285_v61  ;;  %v5287_v4 = vmul.f32 %v8989_v18, %v5259_v62  ;;  %v6126_v7 = vadd.f32 %v4650_v1, %v8977_v5  ;;  %v4652_v8 = vpop.f32.mrb[9].mxu1 }
 0x2eb   : > { %v5236_v9 = vpop.f32.mrb[9].mxu0  ;;  %v5314_v10 = vadd.f32 %v8997_v29, %v5286_v63  ;;  %v5288_v11 = vmul.f32 %v8992_v23, %v5260_v0  ;;  %v6128_v12 = vadd.f32 %v4652_v8, %v8979_v6  ;;  %v4654_v13 = vpop.f32.mrb[10].mxu1 }
 0x2ec   : > { %v5238_v14 = vpop.f32.mrb[10].mxu0  ;;  %v5315_v15 = vadd.f32 %v8995_v26, %v5287_v4  ;;  %v6127_v16 = vadd.f32 %v6126_v7, %v5234_v2  ;;  %v6130_v17 = vadd.f32 %v4654_v13, %v8977_v5  ;;  %v4656_v19 = vpop.f32.mrb[11].mxu1 }
 0x2ed   : > { %v5240_v20 = vpop.f32.mrb[11].mxu0  ;;  %v6104_v21 = vpack.c.bf16 %v5314_v10, %v5313_v3  ;;  %v5316_v22 = vadd.f32 %v8997_v29, %v5288_v11  ;;  %v6129_v24 = vadd.f32 %v6128_v12, %v5236_v9  ;;  %v6132_v25 = vadd.f32 %v4656_v19, %v8979_v6 }
 0x2ee   : > { %v5261_v27 = vmax.f32 %v6127_v16, 0.0  ;;  %v6131_v28 = vadd.f32 %v6130_v17, %v5238_v14 }
 0x2ef   : > { %5375 = vst [vmem:[%s9011_s15 + $0x10] sm:$0xff] %v6104_v21  ;;  %v6105_v30 = vpack.c.bf16 %v5316_v22, %v5315_v15  ;;  %v5262_v31 = vmax.f32 %v6129_v24, 0.0  ;;  %v6133_v32 = vadd.f32 %v6132_v25, %v5240_v20 }
 0x2f0   : > { %v5289_v33 = vmul.f32 %v8989_v18, %v5261_v27  ;;  %v5263_v34 = vmax.f32 %v6131_v28, 0.0 }
 0x2f1   : > { %5376 = vst [vmem:[%s9011_s15 + $0x18] sm:$0xff] %v6105_v30  ;;  %v5290_v35 = vmul.f32 %v8992_v23, %v5262_v31  ;;  %v5264_v36 = vmax.f32 %v6133_v32, 0.0  ;;  %v4660_v37 = vpop.f32.mrb[12].mxu1 }
 0x2f2   : > { %v5244_v38 = vpop.f32.mrb[12].mxu0  ;;  %v5317_v39 = vadd.f32 %v8995_v26, %v5289_v33  ;;  %v5291_v40 = vmul.f32 %v8989_v18, %v5263_v34  ;;  %v6134_v41 = vadd.f32 %v4660_v37, %v8977_v5  ;;  %v4662_v42 = vpop.f32.mrb[13].mxu1 }
 0x2f3   : > { %v5246_v43 = vpop.f32.mrb[13].mxu0  ;;  %v5318_v44 = vadd.f32 %v8997_v29, %v5290_v35  ;;  %v5292_v45 = vmul.f32 %v8992_v23, %v5264_v36  ;;  %v6136_v46 = vadd.f32 %v4662_v42, %v8979_v6  ;;  %v4664_v47 = vpop.f32.mrb[14].mxu1 }
 0x2f4   : > { %v5248_v48 = vpop.f32.mrb[14].mxu0  ;;  %v5319_v49 = vadd.f32 %v8995_v26, %v5291_v40  ;;  %v6135_v50 = vadd.f32 %v6134_v41, %v5244_v38  ;;  %v6138_v51 = vadd.f32 %v4664_v47, %v8977_v5  ;;  %v4666_v52 = vpop.f32.mrb[15].mxu1 }
 0x2f5   : > { %v5250_v53 = vpop.f32.mrb[15].mxu0  ;;  %v6106_v54 = vpack.c.bf16 %v5318_v44, %v5317_v39  ;;  %v5320_v55 = vadd.f32 %v8997_v29, %v5292_v45  ;;  %v6137_v56 = vadd.f32 %v6136_v46, %v5246_v43  ;;  %v6140_v57 = vadd.f32 %v4666_v52, %v8979_v6 }
 0x2f6   : > { %v5265_v58 = vmax.f32 %v6135_v50, 0.0  ;;  %v6139_v59 = vadd.f32 %v6138_v51, %v5248_v48 }
 0x2f7   : > { %5377 = vst [vmem:[%s9011_s15 + $0x20] sm:$0xff] %v6106_v54  ;;  %v6107_v60 = vpack.c.bf16 %v5320_v55, %v5319_v49  ;;  %v5266_v61 = vmax.f32 %v6137_v56, 0.0  ;;  %v6141_v62 = vadd.f32 %v6140_v57, %v5250_v53 }
 0x2f8   : > { %v5293_v63 = vmul.f32 %v8989_v18, %v5265_v58  ;;  %v5267_v0 = vmax.f32 %v6139_v59, 0.0 }
 0x2f9   : > { %5378 = vst [vmem:[%s9011_s15 + $0x28] sm:$0xff] %v6107_v60  ;;  %v5294_v5 = vmul.f32 %v8992_v23, %v5266_v61  ;;  %v5268_v1 = vmax.f32 %v6141_v62, 0.0 }
 0x2fa   : > { %v5321_v2 = vadd.f32 %v8995_v26, %v5293_v63  ;;  %v5295_v3 = vmul.f32 %v8989_v18, %v5267_v0 }
 0x2fb   : > { %v5322_v6 = vadd.f32 %v8997_v29, %v5294_v5  ;;  %v5296_v4 = vmul.f32 %v8992_v23, %v5268_v1 }
 0x2fc   : > { %v5323_v7 = vadd.f32 %v8995_v26, %v5295_v3 }
 0x2fd   : > { %v6108_v8 = vpack.c.bf16 %v5322_v6, %v5321_v2  ;;  %v5324_v9 = vadd.f32 %v8997_v29, %v5296_v4 }
 0x2ff   : > { %5379 = vst [vmem:[%s9011_s15 + $0x30] sm:$0xff] %v6108_v8  ;;  %v6109_v10 = vpack.c.bf16 %v5324_v9, %v5323_v7 }
 0x301   : > { %5380 = vst [vmem:[%s9011_s15 + $0x38] sm:$0xff] %v6109_v10 }
 0x302 PF: > { %s15_s18 = sadd.s32 1, %s7148_s18  }
 0x303   : > { %p12_p4 = scmp.ge.s32.totalorder %s15_s18, 4  }
 0x305   :  { %14 = sbr.rel (!%p12_p4) target bundleno = 1 (0x1), region = 70 }

// kernel: squeeze.1
= control target key start
LH: loop header
LB: loop body
LE: loop exit
PB: predicated region body
PF: predicated region fallthrough
CT: control target
= control target key end

     0   :  { %vm7_vm0 = vcmask 15360   ;;  %s43_s8 = smov 122   ;;  %s44_s9 = smov 124   ;;  %s68_s0 = inlined_call_operand.vmem [shape: s32[8], index: 0, kind: input, shape index: {}]   ;;  %s69_s1 = inlined_call_operand.vmem [shape: s32[2,2,2], index: 1, kind: output, shape index: {}]  }
   0x1   :  { %v4_v0 = vld [vmem:[%s68_s0] sm:$0x1]  ;;  %s42_s0 = smov 126  }
   0x2   :  { %5 = vst [vmem:[#allocation1] sm:$0x1] %v4_v0 }
   0x9   :  { %v9_v1 = vld [vmem:[#allocation1] sm:$0x1]  }
   0xa   :  { %v21_v2 = vld [vmem:[#allocation1] sm:$0x1]   ;;  %10 = vrot.lane.b32.xlu0 %v9_v1, %s42_s0 }
   0xb   :  { %22 = vrot.lane.b32.xlu1 %v21_v2, %s43_s8  ;;  %v6_v3 = vld [vmem:[#allocation1] sm:$0x1]  }
   0xc   :  { %v15_v4 = vld [vmem:[#allocation1] sm:$0x1]   ;;  %8 = vst.msk [vmem:[#allocation0] sm:$0x1] %vm7_vm0, %v6_v3  }
   0xe   :  { %16 = vrot.lane.b32.xlu0 %v15_v4, %s44_s9 }
  0x7c   :  { %v11_v5 = vpop.permute.xlu0 %10  }
  0x7d   :  { %v23_v6 = vpop.permute.xlu1 %22   ;;  %14 = vst.msk [vmem:[#allocation0 + $0x1] sm:$0x1] %vm7_vm0, %v11_v5  }
  0x7e   :  { %26 = vst.msk [vmem:[#allocation0 + $0x9] sm:$0x1] %vm7_vm0, %v23_v6  }
  0x80   :  { %v17_v7 = vpop.permute.xlu0 %16  }
  0x81   :  { %20 = vst.msk [vmem:[#allocation0 + $0x8] sm:$0x1] %vm7_vm0, %v17_v7  }
  0x84   :  { %v30_v8 = vld [vmem:[#allocation0] sm:$0x3] }
  0x85   :  { %32 = vst [vmem:[%s69_s1] sm:$0x3] %v30_v8 }
  0x88   :  { %v34_v9 = vld [vmem:[#allocation0 + $0x8] sm:$0x3] }
  0x89   :  { %38 = vst [vmem:[%s69_s1 + $0x2] sm:$0x3] %v34_v9 }

// kernel: encode.6
= control target key start
LH: loop header
LB: loop body
LE: loop exit
PB: predicated region body
PF: predicated region fallthrough
CT: control target
= control target key end

     0   :  { %s5746_s18 = smov 0   ;;  %s7460_s0 = inlined_call_operand.vmem [shape: bf16[32,4096], index: 0, kind: input, shape index: {}]   ;;  %s7461_s1 = inlined_call_operand.vmem [shape: bf16[4096,256], index: 1, kind: input, shape index: {}]   ;;  %s7462_s2 = inlined_call_operand.vmem [shape: f32[1,256], index: 2, kind: input, shape index: {}]   ;;  %s7463_s3 = inlined_call_operand.vmem [shape: f32[1,256], index: 3, kind: input, shape index: {}]   ;;  %s7464_s4 = inlined_call_operand.vmem [shape: f32[1,256], index: 4, kind: input, shape index: {}]   ;;  %s7465_s5 = inlined_call_operand.vmem [shape: bf16[32,256], index: 5, kind: output, shape index: {}]  }
   0x1 LB: > { %s4305_s19 = sadd.s32 4294967295, %s5714_s18   ;;  %p4309_p0 = scmp.ge.s32.totalorder %s5714_s18, 1  ;;  %s5714_s18 = sphi %s5746_s18, %s15_s18  }
   0x2   : > { %p189_p1 = scmp.lt.s32.totalorder %s5714_s18, 3 }
   0x4   : > { %p190_p2 = pnand %p4309_p0, %p189_p1 }
   0x5   : > { %v4940_v0 = vld [vmem:[%s7461_s1 + $0x4] ss:$8 sps:$4 sm:$0xff] (!%p190_p2)   ;;  %v4944_v2 = vld [vmem:[%s7461_s1] ss:$8 sps:$4 sm:$0xff] (!%p190_p2)   ;;  %v4946_v4 = vld [vmem:[%s7461_s1 + $0x14] ss:$8 sps:$4 sm:$0xff] (!%p190_p2)  }
   0x6   : > { %193 = sbr.rel (%p190_p2) target bundleno = 746 (0x2ea), region = 40  ;;  %v4942_v1 = vld [vmem:[%s7461_s1 + $0x804] ss:$8 sps:$4 sm:$0xff] (!%p190_p2)   ;;  %3509 = vmatprep.subr.bf16.mxu1 (!%p190_p2), %v4940_v0  ;;  %v4945_v3 = vld [vmem:[%s7461_s1 + $0x800] ss:$8 sps:$4 sm:$0xff] (!%p190_p2)   ;;  %s4310_s9 = sshll.u32 (!%p190_p2), %s4305_s19, 1 }
   0x7   : > { %3853 = vmatprep.subr.bf16.mxu0 (!%p190_p2), %v4942_v1  ;;  %3510 = vmatpush1.bf16.msra.mxu1 (!%p190_p2), %v4944_v2  ;;  %v4948_v5 = vld [vmem:[%s7461_s1 + $0x814] ss:$8 sps:$4 sm:$0xff] (!%p190_p2)   ;;  %v4950_v6 = vld [vmem:[%s7461_s1 + $0x10] ss:$8 sps:$4 sm:$0xff] (!%p190_p2)   ;;  %v4952_v8 = vld [vmem:[%s7461_s1 + $0x24] ss:$8 sps:$4 sm:$0xff] (!%p190_p2)  }
   0x8   : > { %3854 = vmatpush1.bf16.msra.mxu0 (!%p190_p2), %v4945_v3  ;;  %3511 = vmatprep.subr.bf16.mxu1 (!%p190_p2), %v4946_v4  ;;  %v4951_v7 = vld [vmem:[%s7461_s1 + $0x810] ss:$8 sps:$4 sm:$0xff] (!%p190_p2)   ;;  %v4954_v9 = vld [vmem:[%s7461_s1 + $0x824] ss:$8 sps:$4 sm:$0xff] (!%p190_p2)   ;;  %v4956_v10 = vld [vmem:[%s7461_s1 + $0x20] ss:$8 sps:$4 sm:$0xff] (!%p190_p2)  }
   0x9   : > { %3855 = vmatprep.subr.bf16.mxu0 (!%p190_p2), %v4948_v5  ;;  %v4957_v11 = vld [vmem:[%s7461_s1 + $0x820] ss:$8 sps:$4 sm:$0xff] (!%p190_p2)   ;;  %v4958_v12 = vld [vmem:[%s7461_s1 + $0x34] ss:$8 sps:$4 sm:$0xff] (!%p190_p2)   ;;  %v4962_v14 = vld [vmem:[%s7461_s1 + $0x30] ss:$8 sps:$4 sm:$0xff] (!%p190_p2)  }
   0xa   : > { %v4960_v13 = vld [vmem:[%s7461_s1 + $0x834] ss:$8 sps:$4 sm:$0xff] (!%p190_p2)   ;;  %v4963_v15 = vld [vmem:[%s7461_s1 + $0x830] ss:$8 sps:$4 sm:$0xff] (!%p190_p2)   ;;  %v4964_v16 = vld [vmem:[%s7461_s1 + $0x44] ss:$8 sps:$4 sm:$0xff] (!%p190_p2)  }
   0xb   : > { %3512 = vmatpush1.bf16.msra.mxu1 (!%p190_p2), %v4950_v6  ;;  %v4966_v17 = vld [vmem:[%s7461_s1 + $0x844] ss:$8 sps:$4 sm:$0xff] (!%p190_p2)   ;;  %v4968_v18 = vld [vmem:[%s7461_s1 + $0x40] ss:$8 sps:$4 sm:$0xff] (!%p190_p2)   ;;  %v4970_v20 = vld [vmem:[%s7461_s1 + $0x54] ss:$8 sps:$4 sm:$0xff] (!%p190_p2)  }
   0xc   : > { %3856 = vmatpush1.bf16.msra.mxu0 (!%p190_p2), %v4951_v7  ;;  %3513 = vmatprep.subr.bf16.mxu1 (!%p190_p2), %v4952_v8  ;;  %v4969_v19 = vld [vmem:[%s7461_s1 + $0x840] ss:$8 sps:$4 sm:$0xff] (!%p190_p2)   ;;  %v4972_v21 = vld [vmem:[%s7461_s1 + $0x854] ss:$8 sps:$4 sm:$0xff] (!%p190_p2)   ;;  %v4974_v22 = vld [vmem:[%s7461_s1 + $0x50] ss:$8 sps:$4 sm:$0xff] (!%p190_p2)  }
   0xd   : > { %3857 = vmatprep.subr.bf16.mxu0 %v4954_v9  ;;  %v4975_v23 = vld [vmem:[%s7461_s1 + $0x850] ss:$8 sps:$4 sm:$0xff]   ;;  %v4976_v24 = vld [vmem:[%s7461_s1 + $0x64] ss:$8 sps:$4 sm:$0xff]   ;;  %v4980_v26 = vld [vmem:[%s7461_s1 + $0x60] ss:$8 sps:$4 sm:$0xff]  }
   0xe   : > { %v4978_v25 = vld [vmem:[%s7461_s1 + $0x864] ss:$8 sps:$4 sm:$0xff]   ;;  %v4981_v27 = vld [vmem:[%s7461_s1 + $0x860] ss:$8 sps:$4 sm:$0xff]   ;;  %v4982_v28 = vld [vmem:[%s7461_s1 + $0x74] ss:$8 sps:$4 sm:$0xff]  }
   0xf   : > { %3514 = vmatpush1.bf16.msra.mxu1 %v4956_v10  ;;  %v4984_v29 = vld [vmem:[%s7461_s1 + $0x874] ss:$8 sps:$4 sm:$0xff]   ;;  %v4986_v30 = vld [vmem:[%s7461_s1 + $0x70] ss:$8 sps:$4 sm:$0xff]   ;;  %v4988_v32 = vld [vmem:[%s7461_s1 + $0x84] ss:$8 sps:$4 sm:$0xff]  }
  0x10   : > { %3858 = vmatpush1.bf16.msra.mxu0 %v4957_v11  ;;  %3515 = vmatprep.subr.bf16.mxu1 %v4958_v12  ;;  %v4987_v31 = vld [vmem:[%s7461_s1 + $0x870] ss:$8 sps:$4 sm:$0xff]   ;;  %p220_p3 = scmp.lt.s32.totalorder %s4310_s9, 3  ;;  %v4990_v33 = vld [vmem:[%s7461_s1 + $0x884] ss:$8 sps:$4 sm:$0xff]  }
  0x11   : > { %3859 = vmatprep.subr.bf16.mxu0 %v4960_v13  ;;  %v4992_v34 = vld [vmem:[%s7461_s1 + $0x80] ss:$8 sps:$4 sm:$0xff]   ;;  %v4994_v36 = vld [vmem:[%s7461_s1 + $0x94] ss:$8 sps:$4 sm:$0xff]   ;;  %v4998_v38 = vld [vmem:[%s7461_s1 + $0x90] ss:$8 sps:$4 sm:$0xff]  }
  0x12   : > { %v4993_v35 = vld [vmem:[%s7461_s1 + $0x880] ss:$8 sps:$4 sm:$0xff]   ;;  %s7467_s9 = smov (!%p220_p3, %s4310_s9), 3  ;;  %v4996_v37 = vld [vmem:[%s7461_s1 + $0x894] ss:$8 sps:$4 sm:$0xff]  }
  0x13   : > { %3516 = vmatpush1.bf16.msra.mxu1 %v4962_v14  ;;  %v4999_v39 = vld [vmem:[%s7461_s1 + $0x890] ss:$8 sps:$4 sm:$0xff]   ;;  %v5000_v40 = vld [vmem:[%s7461_s1 + $0xa4] ss:$8 sps:$4 sm:$0xff]   ;;  %s4864_s8 = sshll.u32 %s7467_s9, 7  ;;  %s4865_s7 = sshll.u32 %s7467_s9, 3 }
  0x14   : > { %3860 = vmatpush1.bf16.msra.mxu0 %v4963_v15  ;;  %3517 = vmatprep.subr.bf16.mxu1 %v4964_v16  ;;  %v5002_v41 = vld [vmem:[%s7461_s1 + $0x8a4] ss:$8 sps:$4 sm:$0xff]   ;;  %v5004_v42 = vld [vmem:[%s7461_s1 + $0xa0] ss:$8 sps:$4 sm:$0xff]   ;;  %s5894_s19 = scalar_lea.vmem %s7460_s0, %s4864_s8  ;;  %v5006_v44 = vld [vmem:[%s7461_s1 + $0xb4] ss:$8 sps:$4 sm:$0xff]   ;;  %s231_s11 = scalar_lea.vmem %s7465_s5, %s4865_s7 }
  0x15   : > { %3861 = vmatprep.subr.bf16.mxu0 %v4966_v17  ;;  %v5005_v43 = vld [vmem:[%s7461_s1 + $0x8a0] ss:$8 sps:$4 sm:$0xff]   ;;  %v5008_v45 = vld [vmem:[%s7461_s1 + $0x8b4] ss:$8 sps:$4 sm:$0xff]   ;;  %v5010_v46 = vld [vmem:[%s7461_s1 + $0xb0] ss:$8 sps:$4 sm:$0xff]  }
  0x16   : > { %v5011_v47 = vld [vmem:[%s7461_s1 + $0x8b0] ss:$8 sps:$4 sm:$0xff]   ;;  %v233_v48 = vld [vmem:[%s5894_s19] sm:$0xff]  ;;  %v5018_v58 = vld [vmem:[%s7461_s1 + $0xd4] ss:$8 sps:$4 sm:$0xff]  }
  0x17   : > { %3518 = vmatpush1.bf16.msra.mxu1 %v4968_v18  ;;  %v249_v49 = vld [vmem:[%s5894_s19 + $0x80] sm:$0xff]  ;;  %v5020_v59 = vld [vmem:[%s7461_s1 + $0x8d4] ss:$8 sps:$4 sm:$0xff]   ;;  %v5022_v60 = vld [vmem:[%s7461_s1 + $0xd0] ss:$8 sps:$4 sm:$0xff]  }
  0x18   : > { %3862 = vmatpush1.bf16.msra.mxu0 %v4969_v19  ;;  %3519 = vmatprep.subr.bf16.mxu1 %v4970_v20  ;;  %v5012_v50 = vld [vmem:[%s7461_s1 + $0xc4] ss:$8 sps:$4 sm:$0xff]   ;;  %v4317_v52 = vcombine.high %v233_v48, %v249_v49  ;;  %v5016_v56 = vld [vmem:[%s7461_s1 + $0xc0] ss:$8 sps:$4 sm:$0xff]   ;;  %v5023_v61 = vld [vmem:[%s7461_s1 + $0x8d0] ss:$8 sps:$4 sm:$0xff]   ;;  %v4316_v8 = vcombine.low %v233_v48, %v249_v49 }
  0x19   : > { %3863 = vmatprep.subr.bf16.mxu0 %v4972_v21  ;;  %v5014_v51 = vld [vmem:[%s7461_s1 + $0x8c4] ss:$8 sps:$4 sm:$0xff]   ;;  %v5017_v57 = vld [vmem:[%s7461_s1 + $0x8c0] ss:$8 sps:$4 sm:$0xff]   ;;  %v5030_v2 = vld [vmem:[%s7461_s1 + $0xf4] ss:$8 sps:$4 sm:$0xff]  }
  0x1a   : > { %v241_v53 = vld [vmem:[%s5894_s19 + $0x40] sm:$0xff]  ;;  %3541 = vmatprep.mubr.bf16.mxu1 %v4317_v52  ;;  %v5032_v3 = vld [vmem:[%s7461_s1 + $0x8f4] ss:$8 sps:$4 sm:$0xff]   ;;  %v5034_v4 = vld [vmem:[%s7461_s1 + $0xf0] ss:$8 sps:$4 sm:$0xff]  }
  0x1b   : > { %3520 = vmatpush1.bf16.msra.mxu1 %v4974_v22  ;;  %v257_v54 = vld [vmem:[%s5894_s19 + $0xc0] sm:$0xff]  ;;  %v5035_v5 = vld [vmem:[%s7461_s1 + $0x8f0] ss:$8 sps:$4 sm:$0xff]   ;;  %v5044_v12 = vld [vmem:[%s7461_s1 + $0x114] ss:$8 sps:$4 sm:$0xff]  }
  0x1c   : > { %3864 = vmatpush1.bf16.msra.mxu0 %v4975_v23  ;;  %3521 = vmatprep.subr.bf16.mxu1 %v4976_v24  ;;  %v4333_v55 = vcombine.high %v241_v53, %v257_v54  ;;  %v5024_v62 = vld [vmem:[%s7461_s1 + $0xe4] ss:$8 sps:$4 sm:$0xff]   ;;  %v5028_v0 = vld [vmem:[%s7461_s1 + $0xe0] ss:$8 sps:$4 sm:$0xff]   ;;  %v4332_v10 = vcombine.low %v241_v53, %v257_v54  ;;  %v5047_v13 = vld [vmem:[%s7461_s1 + $0x914] ss:$8 sps:$4 sm:$0xff]  }
  0x1d   : > { %3865 = vmatprep.subr.bf16.mxu0 %v4978_v25  ;;  %v5026_v63 = vld [vmem:[%s7461_s1 + $0x8e4] ss:$8 sps:$4 sm:$0xff]   ;;  %v5029_v1 = vld [vmem:[%s7461_s1 + $0x8e0] ss:$8 sps:$4 sm:$0xff]   ;;  %v5042_v14 = vld [vmem:[%s7461_s1 + $0x110] ss:$8 sps:$4 sm:$0xff]  }
  0x1e   : > { %3885 = vmatprep.mubr.bf16.mxu0 %v4333_v55  ;;  %v5038_v6 = vld [vmem:[%s7461_s1 + $0x104] ss:$8 sps:$4 sm:$0xff]   ;;  %v5036_v9 = vld [vmem:[%s7461_s1 + $0x100] ss:$8 sps:$4 sm:$0xff]   ;;  %v5045_v15 = vld [vmem:[%s7461_s1 + $0x910] ss:$8 sps:$4 sm:$0xff]  }
  0x1f   : > { %3522 = vmatpush1.bf16.msra.mxu1 %v4980_v26  ;;  %v5041_v7 = vld [vmem:[%s7461_s1 + $0x904] ss:$8 sps:$4 sm:$0xff]   ;;  %v5039_v11 = vld [vmem:[%s7461_s1 + $0x900] ss:$8 sps:$4 sm:$0xff]   ;;  %v5056_v20 = vld [vmem:[%s7461_s1 + $0x134] ss:$8 sps:$4 sm:$0xff]  }
  0x20   : > { %3866 = vmatpush1.bf16.msra.mxu0 %v4981_v27  ;;  %3523 = vmatprep.subr.bf16.mxu1 %v4982_v28  ;;  %v5050_v16 = vld [vmem:[%s7461_s1 + $0x124] ss:$8 sps:$4 sm:$0xff]   ;;  %v5048_v18 = vld [vmem:[%s7461_s1 + $0x120] ss:$8 sps:$4 sm:$0xff]   ;;  %v5059_v21 = vld [vmem:[%s7461_s1 + $0x934] ss:$8 sps:$4 sm:$0xff]  }
  0x21   : > { %3867 = vmatprep.subr.bf16.mxu0 %v4984_v29  ;;  %v5053_v17 = vld [vmem:[%s7461_s1 + $0x924] ss:$8 sps:$4 sm:$0xff]   ;;  %v5051_v19 = vld [vmem:[%s7461_s1 + $0x920] ss:$8 sps:$4 sm:$0xff]   ;;  %v5054_v22 = vld [vmem:[%s7461_s1 + $0x130] ss:$8 sps:$4 sm:$0xff]  }
  0x22   : > { %v5057_v23 = vld [vmem:[%s7461_s1 + $0x930] ss:$8 sps:$4 sm:$0xff]   ;;  %v5062_v24 = vld [vmem:[%s7461_s1 + $0x144] ss:$8 sps:$4 sm:$0xff]   ;;  %v5060_v26 = vld [vmem:[%s7461_s1 + $0x140] ss:$8 sps:$4 sm:$0xff]  }
  0x23   : > { %3524 = vmatpush1.bf16.msra.mxu1 %v4986_v30  ;;  %v5065_v25 = vld [vmem:[%s7461_s1 + $0x944] ss:$8 sps:$4 sm:$0xff]   ;;  %v5063_v27 = vld [vmem:[%s7461_s1 + $0x940] ss:$8 sps:$4 sm:$0xff]   ;;  %v5068_v28 = vld [vmem:[%s7461_s1 + $0x154] ss:$8 sps:$4 sm:$0xff]  }
  0x24   : > { %3868 = vmatpush1.bf16.msra.mxu0 %v4987_v31  ;;  %3525 = vmatprep.subr.bf16.mxu1 %v4988_v32  ;;  %v5071_v29 = vld [vmem:[%s7461_s1 + $0x954] ss:$8 sps:$4 sm:$0xff]   ;;  %v5066_v30 = vld [vmem:[%s7461_s1 + $0x150] ss:$8 sps:$4 sm:$0xff]   ;;  %v5074_v32 = vld [vmem:[%s7461_s1 + $0x164] ss:$8 sps:$4 sm:$0xff]  }
  0x25   : > { %3869 = vmatprep.subr.bf16.mxu0 %v4990_v33  ;;  %v5069_v31 = vld [vmem:[%s7461_s1 + $0x950] ss:$8 sps:$4 sm:$0xff]   ;;  %v5077_v33 = vld [vmem:[%s7461_s1 + $0x964] ss:$8 sps:$4 sm:$0xff]   ;;  %v5084_v48 = vld [vmem:[%s7461_s1 + $0x180] ss:$8 sps:$4 sm:$0xff]  }
  0x26   : > { %v5087_v49 = vld [vmem:[%s7461_s1 + $0x980] ss:$8 sps:$4 sm:$0xff]   ;;  %v5090_v52 = vld [vmem:[%s7461_s1 + $0x190] ss:$8 sps:$4 sm:$0xff]   ;;  %v5098_v54 = vld [vmem:[%s7461_s1 + $0x1a4] ss:$8 sps:$4 sm:$0xff]  }
  0x27   : > { %3526 = vmatpush1.bf16.msra.mxu1 %v4992_v34  ;;  %v5072_v34 = vld [vmem:[%s7461_s1 + $0x160] ss:$8 sps:$4 sm:$0xff]   ;;  %v5093_v53 = vld [vmem:[%s7461_s1 + $0x990] ss:$8 sps:$4 sm:$0xff]   ;;  %v5101_v55 = vld [vmem:[%s7461_s1 + $0x9a4] ss:$8 sps:$4 sm:$0xff]  }
  0x28   : > { %3870 = vmatpush1.bf16.msra.mxu0 %v4993_v35  ;;  %3527 = vmatprep.subr.bf16.mxu1 %v4994_v36  ;;  %v5075_v35 = vld [vmem:[%s7461_s1 + $0x960] ss:$8 sps:$4 sm:$0xff]  }
  0x29   : > { %3871 = vmatprep.subr.bf16.mxu0 %v4996_v37  ;;  %v6045_v36 = vld [vmem:[%s5894_s19 + $0x8] sm:$0xff] }
  0x2a   : > { %v6048_v37 = vld [vmem:[%s5894_s19 + $0x88] sm:$0xff] }
  0x2b   : > { %3528 = vmatpush1.bf16.msra.mxu1 %v4998_v38  ;;  %v5080_v38 = vld [vmem:[%s7461_s1 + $0x174] ss:$8 sps:$4 sm:$0xff]  }
  0x2c   : > { %3872 = vmatpush1.bf16.msra.mxu0 %v4999_v39  ;;  %3529 = vmatprep.subr.bf16.mxu1 %v5000_v40  ;;  %v5083_v39 = vld [vmem:[%s7461_s1 + $0x974] ss:$8 sps:$4 sm:$0xff]   ;;  %v4319_v40 = vcombine.high %v6045_v36, %v6048_v37 }
  0x2d   : > { %3873 = vmatprep.subr.bf16.mxu0 %v5002_v41  ;;  %v6059_v41 = vld [vmem:[%s5894_s19 + $0x48] sm:$0xff] }
  0x2f   : > { %3530 = vmatpush1.bf16.msra.mxu1 %v5004_v42  ;;  %v6062_v42 = vld [vmem:[%s5894_s19 + $0xc8] sm:$0xff] }
  0x30   : > { %3874 = vmatpush1.bf16.msra.mxu0 %v5005_v43  ;;  %3531 = vmatprep.subr.bf16.mxu1 %v5006_v44  ;;  %v4335_v43 = vcombine.high %v6059_v41, %v6062_v42  ;;  %v5078_v44 = vld [vmem:[%s7461_s1 + $0x170] ss:$8 sps:$4 sm:$0xff]  }
  0x31   : > { %3875 = vmatprep.subr.bf16.mxu0 %v5008_v45  ;;  %v5081_v45 = vld [vmem:[%s7461_s1 + $0x970] ss:$8 sps:$4 sm:$0xff]  }
  0x33   : > { %3532 = vmatpush1.bf16.msra.mxu1 %v5010_v46  ;;  %v5086_v46 = vld [vmem:[%s7461_s1 + $0x184] ss:$8 sps:$4 sm:$0xff]  }
  0x34   : > { %3876 = vmatpush1.bf16.msra.mxu0 %v5011_v47  ;;  %3533 = vmatprep.subr.bf16.mxu1 %v5012_v50  ;;  %v5089_v47 = vld [vmem:[%s7461_s1 + $0x984] ss:$8 sps:$4 sm:$0xff]   ;;  %v5092_v50 = vld [vmem:[%s7461_s1 + $0x194] ss:$8 sps:$4 sm:$0xff]  }
  0x35   : > { %3877 = vmatprep.subr.bf16.mxu0 %v5014_v51  ;;  %v5095_v51 = vld [vmem:[%s7461_s1 + $0x994] ss:$8 sps:$4 sm:$0xff]  }
  0x37   : > { %3534 = vmatpush1.bf16.msra.mxu1 %v5016_v56  ;;  %v5096_v56 = vld [vmem:[%s7461_s1 + $0x1a0] ss:$8 sps:$4 sm:$0xff]  }
  0x38   : > { %3878 = vmatpush1.bf16.msra.mxu0 %v5017_v57  ;;  %3535 = vmatprep.subr.bf16.mxu1 %v5018_v58  ;;  %v5099_v57 = vld [vmem:[%s7461_s1 + $0x9a0] ss:$8 sps:$4 sm:$0xff]   ;;  %v5104_v58 = vld [vmem:[%s7461_s1 + $0x1b4] ss:$8 sps:$4 sm:$0xff]  }
  0x39   : > { %3879 = vmatprep.subr.bf16.mxu0 %v5020_v59  ;;  %v5107_v59 = vld [vmem:[%s7461_s1 + $0x9b4] ss:$8 sps:$4 sm:$0xff]  }
  0x3b   : > { %3536 = vmatpush1.bf16.msra.mxu1 %v5022_v60  ;;  %v5102_v60 = vld [vmem:[%s7461_s1 + $0x1b0] ss:$8 sps:$4 sm:$0xff]  }
  0x3c   : > { %3880 = vmatpush1.bf16.msra.mxu0 %v5023_v61  ;;  %3537 = vmatprep.subr.bf16.mxu1 %v5024_v62  ;;  %v5105_v61 = vld [vmem:[%s7461_s1 + $0x9b0] ss:$8 sps:$4 sm:$0xff]   ;;  %v5110_v62 = vld [vmem:[%s7461_s1 + $0x1c4] ss:$8 sps:$4 sm:$0xff]  }
  0x3d   : > { %3881 = vmatprep.subr.bf16.mxu0 %v5026_v63  ;;  %v5113_v63 = vld [vmem:[%s7461_s1 + $0x9c4] ss:$8 sps:$4 sm:$0xff]  }
  0x3f   : > { %3538 = vmatpush1.bf16.msra.mxu1 %v5028_v0  ;;  %v5108_v0 = vld [vmem:[%s7461_s1 + $0x1c0] ss:$8 sps:$4 sm:$0xff]  }
  0x40   : > { %3882 = vmatpush1.bf16.msra.mxu0 %v5029_v1  ;;  %3539 = vmatprep.subr.bf16.mxu1 %v5030_v2  ;;  %v5111_v1 = vld [vmem:[%s7461_s1 + $0x9c0] ss:$8 sps:$4 sm:$0xff]   ;;  %v5116_v2 = vld [vmem:[%s7461_s1 + $0x1d4] ss:$8 sps:$4 sm:$0xff]  }
  0x41   : > { %3883 = vmatprep.subr.bf16.mxu0 %v5032_v3  ;;  %v5119_v3 = vld [vmem:[%s7461_s1 + $0x9d4] ss:$8 sps:$4 sm:$0xff]  }
  0x43   : > { %3540 = vmatpush1.bf16.msra.mxu1 %v5034_v4  ;;  %v5114_v4 = vld [vmem:[%s7461_s1 + $0x1d0] ss:$8 sps:$4 sm:$0xff]  }
  0x44   : > { %3884 = vmatpush1.bf16.msra.mxu0 %v5035_v5  ;;  %3552 = vmatprep.subr.bf16.mxu1 %v5038_v6  ;;  %v5117_v5 = vld [vmem:[%s7461_s1 + $0x9d0] ss:$8 sps:$4 sm:$0xff]   ;;  %v5122_v6 = vld [vmem:[%s7461_s1 + $0x1e4] ss:$8 sps:$4 sm:$0xff]  }
  0x45   : > { %3896 = vmatprep.subr.bf16.mxu0 %v5041_v7  ;;  %v5125_v7 = vld [vmem:[%s7461_s1 + $0x9e4] ss:$8 sps:$4 sm:$0xff]  }
  0x46   : > { %3542 = vmatmul.mubr.bf16.vlgmr.msra.gmra.mrb[0].mxu1 %v4316_v8  ;;  %v5120_v8 = vld [vmem:[%s7461_s1 + $0x1e0] ss:$8 sps:$4 sm:$0xff]  }
  0x47   : > { %3886 = vmatmul.mubr.bf16.vlgmr.msra.gmra.mrb[0].mxu0 %v4332_v10  ;;  %3553 = vmatpush1.bf16.msra.mxu1 %v5036_v9  ;;  %v5123_v9 = vld [vmem:[%s7461_s1 + $0x9e0] ss:$8 sps:$4 sm:$0xff]   ;;  %v5128_v10 = vld [vmem:[%s7461_s1 + $0x1f4] ss:$8 sps:$4 sm:$0xff]  }
  0x48   : > { %3897 = vmatpush1.bf16.msra.mxu0 %v5039_v11  ;;  %3554 = vmatprep.subr.bf16.mxu1 %v5044_v12  ;;  %v5131_v11 = vld [vmem:[%s7461_s1 + $0x9f4] ss:$8 sps:$4 sm:$0xff]   ;;  %v5126_v12 = vld [vmem:[%s7461_s1 + $0x1f0] ss:$8 sps:$4 sm:$0xff]  }
  0x49   : > { %3898 = vmatprep.subr.bf16.mxu0 %v5047_v13  ;;  %3584 = vmatprep.mubr.bf16.mxu1 %v4319_v40  ;;  %v5129_v13 = vld [vmem:[%s7461_s1 + $0x9f0] ss:$8 sps:$4 sm:$0xff]   ;;  %v5156_v40 = vld [vmem:[%s7461_s1 + $0x240] ss:$8 sps:$4 sm:$0xff]  }
  0x4a   : > { %3928 = vmatprep.mubr.bf16.mxu0 %v4335_v43  ;;  %v5167_v43 = vld [vmem:[%s7461_s1 + $0xa54] ss:$8 sps:$4 sm:$0xff]  }
  0x4b   : > { %3555 = vmatpush1.bf16.msra.mxu1 %v5042_v14  ;;  %v5134_v14 = vld [vmem:[%s7461_s1 + $0x204] ss:$8 sps:$4 sm:$0xff]  }
  0x4c   : > { %3899 = vmatpush1.bf16.msra.mxu0 %v5045_v15  ;;  %3556 = vmatprep.subr.bf16.mxu1 %v5050_v16  ;;  %v5137_v15 = vld [vmem:[%s7461_s1 + $0xa04] ss:$8 sps:$4 sm:$0xff]   ;;  %v4318_v16 = vcombine.low %v6045_v36, %v6048_v37  ;;  %v5150_v36 = vld [vmem:[%s7461_s1 + $0x230] ss:$8 sps:$4 sm:$0xff]  }
  0x4d   : > { %3900 = vmatprep.subr.bf16.mxu0 %v5053_v17  ;;  %v5132_v17 = vld [vmem:[%s7461_s1 + $0x200] ss:$8 sps:$4 sm:$0xff]   ;;  %v5153_v37 = vld [vmem:[%s7461_s1 + $0xa30] ss:$8 sps:$4 sm:$0xff]  }
  0x4f   : > { %3557 = vmatpush1.bf16.msra.mxu1 %v5048_v18  ;;  %v4334_v18 = vcombine.low %v6059_v41, %v6062_v42  ;;  %v5159_v41 = vld [vmem:[%s7461_s1 + $0xa40] ss:$8 sps:$4 sm:$0xff]   ;;  %v5164_v42 = vld [vmem:[%s7461_s1 + $0x254] ss:$8 sps:$4 sm:$0xff]  }
  0x50   : > { %3901 = vmatpush1.bf16.msra.mxu0 %v5051_v19  ;;  %3558 = vmatprep.subr.bf16.mxu1 %v5056_v20  ;;  %v5135_v19 = vld [vmem:[%s7461_s1 + $0xa00] ss:$8 sps:$4 sm:$0xff]   ;;  %v5140_v20 = vld [vmem:[%s7461_s1 + $0x214] ss:$8 sps:$4 sm:$0xff]  }
  0x51   : > { %3902 = vmatprep.subr.bf16.mxu0 %v5059_v21  ;;  %v5143_v21 = vld [vmem:[%s7461_s1 + $0xa14] ss:$8 sps:$4 sm:$0xff]  }
  0x53   : > { %3559 = vmatpush1.bf16.msra.mxu1 %v5054_v22  ;;  %v5138_v22 = vld [vmem:[%s7461_s1 + $0x210] ss:$8 sps:$4 sm:$0xff]  }
  0x54   : > { %3903 = vmatpush1.bf16.msra.mxu0 %v5057_v23  ;;  %3560 = vmatprep.subr.bf16.mxu1 %v5062_v24  ;;  %v5141_v23 = vld [vmem:[%s7461_s1 + $0xa10] ss:$8 sps:$4 sm:$0xff]  }
  0x55   : > { %3904 = vmatprep.subr.bf16.mxu0 %v5065_v25  ;;  %v6197_v24 = vld [vmem:[%s5894_s19 + $0x10] sm:$0xff] }
  0x56   : > { %v6200_v25 = vld [vmem:[%s5894_s19 + $0x90] sm:$0xff] }
  0x57   : > { %3561 = vmatpush1.bf16.msra.mxu1 %v5060_v26  ;;  %v5146_v26 = vld [vmem:[%s7461_s1 + $0x224] ss:$8 sps:$4 sm:$0xff]  }
  0x58   : > { %3905 = vmatpush1.bf16.msra.mxu0 %v5063_v27  ;;  %3562 = vmatprep.subr.bf16.mxu1 %v5068_v28  ;;  %v5149_v27 = vld [vmem:[%s7461_s1 + $0xa24] ss:$8 sps:$4 sm:$0xff]   ;;  %v4321_v28 = vcombine.high %v6197_v24, %v6200_v25 }
  0x59   : > { %3906 = vmatprep.subr.bf16.mxu0 %v5071_v29  ;;  %v6211_v29 = vld [vmem:[%s5894_s19 + $0x50] sm:$0xff] }
  0x5b   : > { %3563 = vmatpush1.bf16.msra.mxu1 %v5066_v30  ;;  %v6214_v30 = vld [vmem:[%s5894_s19 + $0xd0] sm:$0xff] }
  0x5c   : > { %3907 = vmatpush1.bf16.msra.mxu0 %v5069_v31  ;;  %3564 = vmatprep.subr.bf16.mxu1 %v5074_v32  ;;  %v4337_v31 = vcombine.high %v6211_v29, %v6214_v30  ;;  %v5144_v32 = vld [vmem:[%s7461_s1 + $0x220] ss:$8 sps:$4 sm:$0xff]  }
  0x5d   : > { %3908 = vmatprep.subr.bf16.mxu0 %v5077_v33  ;;  %v5147_v33 = vld [vmem:[%s7461_s1 + $0xa20] ss:$8 sps:$4 sm:$0xff]  }
  0x5f   : > { %3565 = vmatpush1.bf16.msra.mxu1 %v5072_v34  ;;  %v5152_v34 = vld [vmem:[%s7461_s1 + $0x234] ss:$8 sps:$4 sm:$0xff]  }
  0x60   : > { %3909 = vmatpush1.bf16.msra.mxu0 %v5075_v35  ;;  %3566 = vmatprep.subr.bf16.mxu1 %v5080_v38  ;;  %v5155_v35 = vld [vmem:[%s7461_s1 + $0xa34] ss:$8 sps:$4 sm:$0xff]   ;;  %v5158_v38 = vld [vmem:[%s7461_s1 + $0x244] ss:$8 sps:$4 sm:$0xff]  }
  0x61   : > { %3910 = vmatprep.subr.bf16.mxu0 %v5083_v39  ;;  %v5161_v39 = vld [vmem:[%s7461_s1 + $0xa44] ss:$8 sps:$4 sm:$0xff]  }
  0x63   : > { %3567 = vmatpush1.bf16.msra.mxu1 %v5078_v44  ;;  %v5162_v44 = vld [vmem:[%s7461_s1 + $0x250] ss:$8 sps:$4 sm:$0xff]  }
  0x64   : > { %3911 = vmatpush1.bf16.msra.mxu0 %v5081_v45  ;;  %3568 = vmatprep.subr.bf16.mxu1 %v5086_v46  ;;  %v5165_v45 = vld [vmem:[%s7461_s1 + $0xa50] ss:$8 sps:$4 sm:$0xff]   ;;  %v5170_v46 = vld [vmem:[%s7461_s1 + $0x264] ss:$8 sps:$4 sm:$0xff]  }
  0x65   : > { %3912 = vmatprep.subr.bf16.mxu0 %v5089_v47  ;;  %v5173_v47 = vld [vmem:[%s7461_s1 + $0xa64] ss:$8 sps:$4 sm:$0xff]  }
  0x67   : > { %3569 = vmatpush1.bf16.msra.mxu1 %v5084_v48  ;;  %v5168_v48 = vld [vmem:[%s7461_s1 + $0x260] ss:$8 sps:$4 sm:$0xff]  }
  0x68   : > { %3913 = vmatpush1.bf16.msra.mxu0 %v5087_v49  ;;  %3570 = vmatprep.subr.bf16.mxu1 %v5092_v50  ;;  %v5171_v49 = vld [vmem:[%s7461_s1 + $0xa60] ss:$8 sps:$4 sm:$0xff]   ;;  %v5176_v50 = vld [vmem:[%s7461_s1 + $0x274] ss:$8 sps:$4 sm:$0xff]  }
  0x69   : > { %3914 = vmatprep.subr.bf16.mxu0 %v5095_v51  ;;  %v5179_v51 = vld [vmem:[%s7461_s1 + $0xa74] ss:$8 sps:$4 sm:$0xff]  }
  0x6b   : > { %3571 = vmatpush1.bf16.msra.mxu1 %v5090_v52  ;;  %v5174_v52 = vld [vmem:[%s7461_s1 + $0x270] ss:$8 sps:$4 sm:$0xff]  }
  0x6c   : > { %3915 = vmatpush1.bf16.msra.mxu0 %v5093_v53  ;;  %3572 = vmatprep.subr.bf16.mxu1 %v5098_v54  ;;  %v5177_v53 = vld [vmem:[%s7461_s1 + $0xa70] ss:$8 sps:$4 sm:$0xff]   ;;  %v5182_v54 = vld [vmem:[%s7461_s1 + $0x284] ss:$8 sps:$4 sm:$0xff]  }
  0x6d   : > { %3916 = vmatprep.subr.bf16.mxu0 %v5101_v55  ;;  %v5185_v55 = vld [vmem:[%s7461_s1 + $0xa84] ss:$8 sps:$4 sm:$0xff]  }
  0x6f   : > { %3573 = vmatpush1.bf16.msra.mxu1 %v5096_v56  ;;  %v5180_v56 = vld [vmem:[%s7461_s1 + $0x280] ss:$8 sps:$4 sm:$0xff]  }
  0x70   : > { %3917 = vmatpush1.bf16.msra.mxu0 %v5099_v57  ;;  %3574 = vmatprep.subr.bf16.mxu1 %v5104_v58  ;;  %v5183_v57 = vld [vmem:[%s7461_s1 + $0xa80] ss:$8 sps:$4 sm:$0xff]   ;;  %v5188_v58 = vld [vmem:[%s7461_s1 + $0x294] ss:$8 sps:$4 sm:$0xff]  }
  0x71   : > { %3918 = vmatprep.subr.bf16.mxu0 %v5107_v59  ;;  %v5191_v59 = vld [vmem:[%s7461_s1 + $0xa94] ss:$8 sps:$4 sm:$0xff]  }
  0x73   : > { %3575 = vmatpush1.bf16.msra.mxu1 %v5102_v60  ;;  %v5186_v60 = vld [vmem:[%s7461_s1 + $0x290] ss:$8 sps:$4 sm:$0xff]  }
  0x74   : > { %3919 = vmatpush1.bf16.msra.mxu0 %v5105_v61  ;;  %3576 = vmatprep.subr.bf16.mxu1 %v5110_v62  ;;  %v5189_v61 = vld [vmem:[%s7461_s1 + $0xa90] ss:$8 sps:$4 sm:$0xff]   ;;  %v5194_v62 = vld [vmem:[%s7461_s1 + $0x2a4] ss:$8 sps:$4 sm:$0xff]  }
  0x75   : > { %3920 = vmatprep.subr.bf16.mxu0 %v5113_v63  ;;  %v5197_v63 = vld [vmem:[%s7461_s1 + $0xaa4] ss:$8 sps:$4 sm:$0xff]  }
  0x77   : > { %3577 = vmatpush1.bf16.msra.mxu1 %v5108_v0  ;;  %v5192_v0 = vld [vmem:[%s7461_s1 + $0x2a0] ss:$8 sps:$4 sm:$0xff]  }
  0x78   : > { %3921 = vmatpush1.bf16.msra.mxu0 %v5111_v1  ;;  %3578 = vmatprep.subr.bf16.mxu1 %v5116_v2  ;;  %v5195_v1 = vld [vmem:[%s7461_s1 + $0xaa0] ss:$8 sps:$4 sm:$0xff]   ;;  %v5200_v2 = vld [vmem:[%s7461_s1 + $0x2b4] ss:$8 sps:$4 sm:$0xff]  }
  0x79   : > { %3922 = vmatprep.subr.bf16.mxu0 %v5119_v3  ;;  %v5203_v3 = vld [vmem:[%s7461_s1 + $0xab4] ss:$8 sps:$4 sm:$0xff]  }
  0x7b   : > { %3579 = vmatpush1.bf16.msra.mxu1 %v5114_v4  ;;  %v5198_v4 = vld [vmem:[%s7461_s1 + $0x2b0] ss:$8 sps:$4 sm:$0xff]  }
  0x7c   : > { %3923 = vmatpush1.bf16.msra.mxu0 %v5117_v5  ;;  %3580 = vmatprep.subr.bf16.mxu1 %v5122_v6  ;;  %v5201_v5 = vld [vmem:[%s7461_s1 + $0xab0] ss:$8 sps:$4 sm:$0xff]   ;;  %v5206_v6 = vld [vmem:[%s7461_s1 + $0x2c4] ss:$8 sps:$4 sm:$0xff]  }
  0x7d   : > { %3924 = vmatprep.subr.bf16.mxu0 %v5125_v7  ;;  %v5209_v7 = vld [vmem:[%s7461_s1 + $0xac4] ss:$8 sps:$4 sm:$0xff]  }
  0x7f   : > { %3581 = vmatpush1.bf16.msra.mxu1 %v5120_v8  ;;  %v5204_v8 = vld [vmem:[%s7461_s1 + $0x2c0] ss:$8 sps:$4 sm:$0xff]  }
  0x80   : > { %3925 = vmatpush1.bf16.msra.mxu0 %v5123_v9  ;;  %3582 = vmatprep.subr.bf16.mxu1 %v5128_v10  ;;  %v5207_v9 = vld [vmem:[%s7461_s1 + $0xac0] ss:$8 sps:$4 sm:$0xff]   ;;  %v5212_v10 = vld [vmem:[%s7461_s1 + $0x2d4] ss:$8 sps:$4 sm:$0xff]  }
  0x81   : > { %3926 = vmatprep.subr.bf16.mxu0 %v5131_v11  ;;  %v5215_v11 = vld [vmem:[%s7461_s1 + $0xad4] ss:$8 sps:$4 sm:$0xff]  }
  0x83   : > { %3583 = vmatpush1.bf16.msra.mxu1 %v5126_v12  ;;  %v5210_v12 = vld [vmem:[%s7461_s1 + $0x2d0] ss:$8 sps:$4 sm:$0xff]  }
  0x84   : > { %3927 = vmatpush1.bf16.msra.mxu0 %v5129_v13  ;;  %3595 = vmatprep.subr.bf16.mxu1 %v5134_v14  ;;  %v5213_v13 = vld [vmem:[%s7461_s1 + $0xad0] ss:$8 sps:$4 sm:$0xff]   ;;  %v5218_v14 = vld [vmem:[%s7461_s1 + $0x2e4] ss:$8 sps:$4 sm:$0xff]  }
  0x85   : > { %3939 = vmatprep.subr.bf16.mxu0 %v5137_v15  ;;  %v5221_v15 = vld [vmem:[%s7461_s1 + $0xae4] ss:$8 sps:$4 sm:$0xff]  }
  0x86   : > { %3585 = vmatmul.mubr.bf16.vlgmr.msra.gmra.mrb[0].mxu1 %v4318_v16  ;;  %v5216_v16 = vld [vmem:[%s7461_s1 + $0x2e0] ss:$8 sps:$4 sm:$0xff]  }
  0x87   : > { %3929 = vmatmul.mubr.bf16.vlgmr.msra.gmra.mrb[0].mxu0 %v4334_v18  ;;  %3596 = vmatpush1.bf16.msra.mxu1 %v5132_v17  ;;  %v5219_v17 = vld [vmem:[%s7461_s1 + $0xae0] ss:$8 sps:$4 sm:$0xff]   ;;  %v5224_v18 = vld [vmem:[%s7461_s1 + $0x2f4] ss:$8 sps:$4 sm:$0xff]  }
  0x88   : > { %3940 = vmatpush1.bf16.msra.mxu0 %v5135_v19  ;;  %3597 = vmatprep.subr.bf16.mxu1 %v5140_v20  ;;  %v5227_v19 = vld [vmem:[%s7461_s1 + $0xaf4] ss:$8 sps:$4 sm:$0xff]   ;;  %v5222_v20 = vld [vmem:[%s7461_s1 + $0x2f0] ss:$8 sps:$4 sm:$0xff]  }
  0x89   : > { %3941 = vmatprep.subr.bf16.mxu0 %v5143_v21  ;;  %3627 = vmatprep.mubr.bf16.mxu1 %v4321_v28  ;;  %v5225_v21 = vld [vmem:[%s7461_s1 + $0xaf0] ss:$8 sps:$4 sm:$0xff]  }
  0x8a   : > { %3971 = vmatprep.mubr.bf16.mxu0 %v4337_v31  ;;  %v6393_v28 = vld [vmem:[%s5894_s19 + $0x18] sm:$0xff] }
  0x8b   : > { %3598 = vmatpush1.bf16.msra.mxu1 %v5138_v22  ;;  %v5230_v22 = vld [vmem:[%s7461_s1 + $0x304] ss:$8 sps:$4 sm:$0xff]   ;;  %v6396_v31 = vld [vmem:[%s5894_s19 + $0x98] sm:$0xff] }
  0x8c   : > { %3942 = vmatpush1.bf16.msra.mxu0 %v5141_v23  ;;  %3599 = vmatprep.subr.bf16.mxu1 %v5146_v26  ;;  %v5233_v23 = vld [vmem:[%s7461_s1 + $0xb04] ss:$8 sps:$4 sm:$0xff]   ;;  %v5228_v26 = vld [vmem:[%s7461_s1 + $0x300] ss:$8 sps:$4 sm:$0xff]  }
  0x8d   : > { %3943 = vmatprep.subr.bf16.mxu0 %v5149_v27  ;;  %v5231_v27 = vld [vmem:[%s7461_s1 + $0xb00] ss:$8 sps:$4 sm:$0xff]  }
  0x8f   : > { %3600 = vmatpush1.bf16.msra.mxu1 %v5144_v32  ;;  %v4320_v32 = vcombine.low %v6197_v24, %v6200_v25  ;;  %v4323_v24 = vcombine.high %v6393_v28, %v6396_v31 }
  0x90   : > { %3944 = vmatpush1.bf16.msra.mxu0 %v5147_v33  ;;  %3601 = vmatprep.subr.bf16.mxu1 %v5152_v34  ;;  %v4336_v33 = vcombine.low %v6211_v29, %v6214_v30  ;;  %v6403_v34 = vld [vmem:[%s5894_s19 + $0x58] sm:$0xff] }
  0x91   : > { %3945 = vmatprep.subr.bf16.mxu0 %v5155_v35  ;;  %v6406_v35 = vld [vmem:[%s5894_s19 + $0xd8] sm:$0xff] }
  0x92   : > { %v4339_v25 = vcombine.high %v6403_v34, %v6406_v35  ;;  %v5234_v29 = vld [vmem:[%s7461_s1 + $0x310] ss:$8 sps:$4 sm:$0xff]  }
  0x93   : > { %3602 = vmatpush1.bf16.msra.mxu1 %v5150_v36  ;;  %v5236_v36 = vld [vmem:[%s7461_s1 + $0x314] ss:$8 sps:$4 sm:$0xff]   ;;  %v5237_v30 = vld [vmem:[%s7461_s1 + $0xb10] ss:$8 sps:$4 sm:$0xff]  }
  0x94   : > { %3946 = vmatpush1.bf16.msra.mxu0 %v5153_v37  ;;  %3603 = vmatprep.subr.bf16.mxu1 %v5158_v38  ;;  %v5239_v37 = vld [vmem:[%s7461_s1 + $0xb14] ss:$8 sps:$4 sm:$0xff]   ;;  %v5242_v38 = vld [vmem:[%s7461_s1 + $0x324] ss:$8 sps:$4 sm:$0xff]  }
  0x95   : > { %3947 = vmatprep.subr.bf16.mxu0 %v5161_v39  ;;  %v5245_v39 = vld [vmem:[%s7461_s1 + $0xb24] ss:$8 sps:$4 sm:$0xff]  }
  0x97   : > { %3604 = vmatpush1.bf16.msra.mxu1 %v5156_v40  ;;  %v5240_v40 = vld [vmem:[%s7461_s1 + $0x320] ss:$8 sps:$4 sm:$0xff]  }
  0x98   : > { %3948 = vmatpush1.bf16.msra.mxu0 %v5159_v41  ;;  %3605 = vmatprep.subr.bf16.mxu1 %v5164_v42  ;;  %v5243_v41 = vld [vmem:[%s7461_s1 + $0xb20] ss:$8 sps:$4 sm:$0xff]   ;;  %v5248_v42 = vld [vmem:[%s7461_s1 + $0x334] ss:$8 sps:$4 sm:$0xff]  }
  0x99   : > { %3949 = vmatprep.subr.bf16.mxu0 %v5167_v43  ;;  %v5251_v43 = vld [vmem:[%s7461_s1 + $0xb34] ss:$8 sps:$4 sm:$0xff]  }
  0x9b   : > { %3606 = vmatpush1.bf16.msra.mxu1 %v5162_v44  ;;  %v5246_v44 = vld [vmem:[%s7461_s1 + $0x330] ss:$8 sps:$4 sm:$0xff]  }
  0x9c   : > { %3950 = vmatpush1.bf16.msra.mxu0 %v5165_v45  ;;  %3607 = vmatprep.subr.bf16.mxu1 %v5170_v46  ;;  %v5249_v45 = vld [vmem:[%s7461_s1 + $0xb30] ss:$8 sps:$4 sm:$0xff]   ;;  %v5254_v46 = vld [vmem:[%s7461_s1 + $0x344] ss:$8 sps:$4 sm:$0xff]  }
  0x9d   : > { %3951 = vmatprep.subr.bf16.mxu0 %v5173_v47  ;;  %v5257_v47 = vld [vmem:[%s7461_s1 + $0xb44] ss:$8 sps:$4 sm:$0xff]  }
  0x9f   : > { %3608 = vmatpush1.bf16.msra.mxu1 %v5168_v48  ;;  %v5252_v48 = vld [vmem:[%s7461_s1 + $0x340] ss:$8 sps:$4 sm:$0xff]  }
  0xa0   : > { %3952 = vmatpush1.bf16.msra.mxu0 %v5171_v49  ;;  %3609 = vmatprep.subr.bf16.mxu1 %v5176_v50  ;;  %v5255_v49 = vld [vmem:[%s7461_s1 + $0xb40] ss:$8 sps:$4 sm:$0xff]   ;;  %v5260_v50 = vld [vmem:[%s7461_s1 + $0x354] ss:$8 sps:$4 sm:$0xff]  }
  0xa1   : > { %3953 = vmatprep.subr.bf16.mxu0 %v5179_v51  ;;  %v5263_v51 = vld [vmem:[%s7461_s1 + $0xb54] ss:$8 sps:$4 sm:$0xff]  }
  0xa3   : > { %3610 = vmatpush1.bf16.msra.mxu1 %v5174_v52  ;;  %v5258_v52 = vld [vmem:[%s7461_s1 + $0x350] ss:$8 sps:$4 sm:$0xff]  }
  0xa4   : > { %3954 = vmatpush1.bf16.msra.mxu0 %v5177_v53  ;;  %3611 = vmatprep.subr.bf16.mxu1 %v5182_v54  ;;  %v5261_v53 = vld [vmem:[%s7461_s1 + $0xb50] ss:$8 sps:$4 sm:$0xff]   ;;  %v5266_v54 = vld [vmem:[%s7461_s1 + $0x364] ss:$8 sps:$4 sm:$0xff]  }
  0xa5   : > { %3955 = vmatprep.subr.bf16.mxu0 %v5185_v55  ;;  %v5269_v55 = vld [vmem:[%s7461_s1 + $0xb64] ss:$8 sps:$4 sm:$0xff]  }
  0xa7   : > { %3612 = vmatpush1.bf16.msra.mxu1 %v5180_v56  ;;  %v5264_v56 = vld [vmem:[%s7461_s1 + $0x360] ss:$8 sps:$4 sm:$0xff]  }
  0xa8   : > { %3956 = vmatpush1.bf16.msra.mxu0 %v5183_v57  ;;  %3613 = vmatprep.subr.bf16.mxu1 %v5188_v58  ;;  %v5267_v57 = vld [vmem:[%s7461_s1 + $0xb60] ss:$8 sps:$4 sm:$0xff]   ;;  %v5272_v58 = vld [vmem:[%s7461_s1 + $0x374] ss:$8 sps:$4 sm:$0xff]  }
  0xa9   : > { %3957 = vmatprep.subr.bf16.mxu0 %v5191_v59  ;;  %v5275_v59 = vld [vmem:[%s7461_s1 + $0xb74] ss:$8 sps:$4 sm:$0xff]  }
  0xab   : > { %3614 = vmatpush1.bf16.msra.mxu1 %v5186_v60  ;;  %v5270_v60 = vld [vmem:[%s7461_s1 + $0x370] ss:$8 sps:$4 sm:$0xff]  }
  0xac   : > { %3958 = vmatpush1.bf16.msra.mxu0 %v5189_v61  ;;  %3615 = vmatprep.subr.bf16.mxu1 %v5194_v62  ;;  %v5273_v61 = vld [vmem:[%s7461_s1 + $0xb70] ss:$8 sps:$4 sm:$0xff]   ;;  %v5278_v62 = vld [vmem:[%s7461_s1 + $0x384] ss:$8 sps:$4 sm:$0xff]  }
  0xad   : > { %3959 = vmatprep.subr.bf16.mxu0 %v5197_v63  ;;  %v5281_v63 = vld [vmem:[%s7461_s1 + $0xb84] ss:$8 sps:$4 sm:$0xff]  }
  0xaf   : > { %3616 = vmatpush1.bf16.msra.mxu1 %v5192_v0  ;;  %v5276_v0 = vld [vmem:[%s7461_s1 + $0x380] ss:$8 sps:$4 sm:$0xff]  }
  0xb0   : > { %3960 = vmatpush1.bf16.msra.mxu0 %v5195_v1  ;;  %3617 = vmatprep.subr.bf16.mxu1 %v5200_v2  ;;  %v5279_v1 = vld [vmem:[%s7461_s1 + $0xb80] ss:$8 sps:$4 sm:$0xff]   ;;  %v5284_v2 = vld [vmem:[%s7461_s1 + $0x394] ss:$8 sps:$4 sm:$0xff]  }
  0xb1   : > { %3961 = vmatprep.subr.bf16.mxu0 %v5203_v3  ;;  %v5287_v3 = vld [vmem:[%s7461_s1 + $0xb94] ss:$8 sps:$4 sm:$0xff]  }
  0xb3   : > { %3618 = vmatpush1.bf16.msra.mxu1 %v5198_v4  ;;  %v5282_v4 = vld [vmem:[%s7461_s1 + $0x390] ss:$8 sps:$4 sm:$0xff]  }
  0xb4   : > { %3962 = vmatpush1.bf16.msra.mxu0 %v5201_v5  ;;  %3619 = vmatprep.subr.bf16.mxu1 %v5206_v6  ;;  %v5285_v5 = vld [vmem:[%s7461_s1 + $0xb90] ss:$8 sps:$4 sm:$0xff]   ;;  %v5290_v6 = vld [vmem:[%s7461_s1 + $0x3a4] ss:$8 sps:$4 sm:$0xff]  }
  0xb5   : > { %3963 = vmatprep.subr.bf16.mxu0 %v5209_v7  ;;  %v5293_v7 = vld [vmem:[%s7461_s1 + $0xba4] ss:$8 sps:$4 sm:$0xff]  }
  0xb7   : > { %3620 = vmatpush1.bf16.msra.mxu1 %v5204_v8  ;;  %v5288_v8 = vld [vmem:[%s7461_s1 + $0x3a0] ss:$8 sps:$4 sm:$0xff]  }
  0xb8   : > { %3964 = vmatpush1.bf16.msra.mxu0 %v5207_v9  ;;  %3621 = vmatprep.subr.bf16.mxu1 %v5212_v10  ;;  %v5291_v9 = vld [vmem:[%s7461_s1 + $0xba0] ss:$8 sps:$4 sm:$0xff]   ;;  %v5296_v10 = vld [vmem:[%s7461_s1 + $0x3b4] ss:$8 sps:$4 sm:$0xff]  }
  0xb9   : > { %3965 = vmatprep.subr.bf16.mxu0 %v5215_v11  ;;  %v5299_v11 = vld [vmem:[%s7461_s1 + $0xbb4] ss:$8 sps:$4 sm:$0xff]  }
  0xbb   : > { %3622 = vmatpush1.bf16.msra.mxu1 %v5210_v12  ;;  %v5294_v12 = vld [vmem:[%s7461_s1 + $0x3b0] ss:$8 sps:$4 sm:$0xff]  }
  0xbc   : > { %3966 = vmatpush1.bf16.msra.mxu0 %v5213_v13  ;;  %3623 = vmatprep.subr.bf16.mxu1 %v5218_v14  ;;  %v5297_v13 = vld [vmem:[%s7461_s1 + $0xbb0] ss:$8 sps:$4 sm:$0xff]   ;;  %v5302_v14 = vld [vmem:[%s7461_s1 + $0x3c4] ss:$8 sps:$4 sm:$0xff]  }
  0xbd   : > { %3967 = vmatprep.subr.bf16.mxu0 %v5221_v15  ;;  %v5305_v15 = vld [vmem:[%s7461_s1 + $0xbc4] ss:$8 sps:$4 sm:$0xff]  }
  0xbf   : > { %3624 = vmatpush1.bf16.msra.mxu1 %v5216_v16  ;;  %v5300_v16 = vld [vmem:[%s7461_s1 + $0x3c0] ss:$8 sps:$4 sm:$0xff]  }
  0xc0   : > { %3968 = vmatpush1.bf16.msra.mxu0 %v5219_v17  ;;  %3625 = vmatprep.subr.bf16.mxu1 %v5224_v18  ;;  %v5303_v17 = vld [vmem:[%s7461_s1 + $0xbc0] ss:$8 sps:$4 sm:$0xff]   ;;  %v5308_v18 = vld [vmem:[%s7461_s1 + $0x3d4] ss:$8 sps:$4 sm:$0xff]  }
  0xc1   : > { %3969 = vmatprep.subr.bf16.mxu0 %v5227_v19  ;;  %v5311_v19 = vld [vmem:[%s7461_s1 + $0xbd4] ss:$8 sps:$4 sm:$0xff]  }
  0xc3   : > { %3626 = vmatpush1.bf16.msra.mxu1 %v5222_v20  ;;  %v5306_v20 = vld [vmem:[%s7461_s1 + $0x3d0] ss:$8 sps:$4 sm:$0xff]  }
  0xc4   : > { %3970 = vmatpush1.bf16.msra.mxu0 %v5225_v21  ;;  %3638 = vmatprep.subr.bf16.mxu1 %v5230_v22  ;;  %v5309_v21 = vld [vmem:[%s7461_s1 + $0xbd0] ss:$8 sps:$4 sm:$0xff]   ;;  %v5314_v22 = vld [vmem:[%s7461_s1 + $0x3e4] ss:$8 sps:$4 sm:$0xff]  }
  0xc5   : > { %3982 = vmatprep.subr.bf16.mxu0 %v5233_v23  ;;  %v5317_v23 = vld [vmem:[%s7461_s1 + $0xbe4] ss:$8 sps:$4 sm:$0xff]  }
  0xc6   : > { %3628 = vmatmul.mubr.bf16.vlgmr.msra.gmra.mrb[0].mxu1 %v4320_v32  ;;  %v5320_v32 = vld [vmem:[%s7461_s1 + $0x3f4] ss:$8 sps:$4 sm:$0xff]  }
  0xc7   : > { %3972 = vmatmul.mubr.bf16.vlgmr.msra.gmra.mrb[0].mxu0 %v4336_v33  ;;  %3639 = vmatpush1.bf16.msra.mxu1 %v5228_v26  ;;  %v5312_v26 = vld [vmem:[%s7461_s1 + $0x3e0] ss:$8 sps:$4 sm:$0xff]   ;;  %v5323_v33 = vld [vmem:[%s7461_s1 + $0xbf4] ss:$8 sps:$4 sm:$0xff]  }
  0xc8   : > { %3983 = vmatpush1.bf16.msra.mxu0 %v5231_v27  ;;  %3640 = vmatprep.subr.bf16.mxu1 %v5236_v36  ;;  %v5315_v27 = vld [vmem:[%s7461_s1 + $0xbe0] ss:$8 sps:$4 sm:$0xff]   ;;  %v5318_v36 = vld [vmem:[%s7461_s1 + $0x3f0] ss:$8 sps:$4 sm:$0xff]  }
  0xc9   : > { %3984 = vmatprep.subr.bf16.mxu0 %v5239_v37  ;;  %3670 = vmatprep.mubr.bf16.mxu1 %v4323_v24  ;;  %v5321_v37 = vld [vmem:[%s7461_s1 + $0xbf0] ss:$8 sps:$4 sm:$0xff]   ;;  %v5326_v24 = vld [vmem:[%s7461_s1 + $0x404] ss:$8 sps:$4 sm:$0xff]  }
  0xca   : > { %4014 = vmatprep.mubr.bf16.mxu0 %v4339_v25  ;;  %v5329_v25 = vld [vmem:[%s7461_s1 + $0xc04] ss:$8 sps:$4 sm:$0xff]  }
  0xcb   : > { %3641 = vmatpush1.bf16.msra.mxu1 %v5234_v29  ;;  %v5324_v29 = vld [vmem:[%s7461_s1 + $0x400] ss:$8 sps:$4 sm:$0xff]  }
  0xcc   : > { %3985 = vmatpush1.bf16.msra.mxu0 %v5237_v30  ;;  %3642 = vmatprep.subr.bf16.mxu1 %v5242_v38  ;;  %v5327_v30 = vld [vmem:[%s7461_s1 + $0xc00] ss:$8 sps:$4 sm:$0xff]  }
  0xcd   : > { %3986 = vmatprep.subr.bf16.mxu0 %v5245_v39  ;;  %v6605_v38 = vld [vmem:[%s5894_s19 + $0x20] sm:$0xff] }
  0xce   : > { %v6608_v39 = vld [vmem:[%s5894_s19 + $0xa0] sm:$0xff] }
  0xcf   : > { %3643 = vmatpush1.bf16.msra.mxu1 %v5240_v40  ;;  %v4322_v40 = vcombine.low %v6393_v28, %v6396_v31  ;;  %v4325_v28 = vcombine.high %v6605_v38, %v6608_v39 }
  0xd0   : > { %3987 = vmatpush1.bf16.msra.mxu0 %v5243_v41  ;;  %3644 = vmatprep.subr.bf16.mxu1 %v5248_v42  ;;  %v4338_v41 = vcombine.low %v6403_v34, %v6406_v35  ;;  %v6615_v42 = vld [vmem:[%s5894_s19 + $0x60] sm:$0xff]  ;;  %v5330_v34 = vld [vmem:[%s7461_s1 + $0x410] ss:$8 sps:$4 sm:$0xff]  }
  0xd1   : > { %3988 = vmatprep.subr.bf16.mxu0 %v5251_v43  ;;  %v6618_v43 = vld [vmem:[%s5894_s19 + $0xe0] sm:$0xff]  ;;  %v5333_v35 = vld [vmem:[%s7461_s1 + $0xc10] ss:$8 sps:$4 sm:$0xff]  }
  0xd2   : > { %v4341_v31 = vcombine.high %v6615_v42, %v6618_v43 }
  0xd3   : > { %3645 = vmatpush1.bf16.msra.mxu1 %v5246_v44  ;;  %v5332_v44 = vld [vmem:[%s7461_s1 + $0x414] ss:$8 sps:$4 sm:$0xff]  }
  0xd4   : > { %3989 = vmatpush1.bf16.msra.mxu0 %v5249_v45  ;;  %3646 = vmatprep.subr.bf16.mxu1 %v5254_v46  ;;  %v5335_v45 = vld [vmem:[%s7461_s1 + $0xc14] ss:$8 sps:$4 sm:$0xff]   ;;  %v5338_v46 = vld [vmem:[%s7461_s1 + $0x424] ss:$8 sps:$4 sm:$0xff]  }
  0xd5   : > { %3990 = vmatprep.subr.bf16.mxu0 %v5257_v47  ;;  %v5341_v47 = vld [vmem:[%s7461_s1 + $0xc24] ss:$8 sps:$4 sm:$0xff]  }
  0xd7   : > { %3647 = vmatpush1.bf16.msra.mxu1 %v5252_v48  ;;  %v5336_v48 = vld [vmem:[%s7461_s1 + $0x420] ss:$8 sps:$4 sm:$0xff]  }
  0xd8   : > { %3991 = vmatpush1.bf16.msra.mxu0 %v5255_v49  ;;  %3648 = vmatprep.subr.bf16.mxu1 %v5260_v50  ;;  %v5339_v49 = vld [vmem:[%s7461_s1 + $0xc20] ss:$8 sps:$4 sm:$0xff]   ;;  %v5344_v50 = vld [vmem:[%s7461_s1 + $0x434] ss:$8 sps:$4 sm:$0xff]  }
  0xd9   : > { %3992 = vmatprep.subr.bf16.mxu0 %v5263_v51  ;;  %v5347_v51 = vld [vmem:[%s7461_s1 + $0xc34] ss:$8 sps:$4 sm:$0xff]  }
  0xdb   : > { %3649 = vmatpush1.bf16.msra.mxu1 %v5258_v52  ;;  %v5342_v52 = vld [vmem:[%s7461_s1 + $0x430] ss:$8 sps:$4 sm:$0xff]  }
  0xdc   : > { %3993 = vmatpush1.bf16.msra.mxu0 %v5261_v53  ;;  %3650 = vmatprep.subr.bf16.mxu1 %v5266_v54  ;;  %v5345_v53 = vld [vmem:[%s7461_s1 + $0xc30] ss:$8 sps:$4 sm:$0xff]   ;;  %v5350_v54 = vld [vmem:[%s7461_s1 + $0x444] ss:$8 sps:$4 sm:$0xff]  }
  0xdd   : > { %3994 = vmatprep.subr.bf16.mxu0 %v5269_v55  ;;  %v5353_v55 = vld [vmem:[%s7461_s1 + $0xc44] ss:$8 sps:$4 sm:$0xff]  }
  0xdf   : > { %3651 = vmatpush1.bf16.msra.mxu1 %v5264_v56  ;;  %v5348_v56 = vld [vmem:[%s7461_s1 + $0x440] ss:$8 sps:$4 sm:$0xff]  }
  0xe0   : > { %3995 = vmatpush1.bf16.msra.mxu0 %v5267_v57  ;;  %3652 = vmatprep.subr.bf16.mxu1 %v5272_v58  ;;  %v5351_v57 = vld [vmem:[%s7461_s1 + $0xc40] ss:$8 sps:$4 sm:$0xff]   ;;  %v5356_v58 = vld [vmem:[%s7461_s1 + $0x454] ss:$8 sps:$4 sm:$0xff]  }
  0xe1   : > { %3996 = vmatprep.subr.bf16.mxu0 %v5275_v59  ;;  %v5359_v59 = vld [vmem:[%s7461_s1 + $0xc54] ss:$8 sps:$4 sm:$0xff]  }
  0xe3   : > { %3653 = vmatpush1.bf16.msra.mxu1 %v5270_v60  ;;  %v5354_v60 = vld [vmem:[%s7461_s1 + $0x450] ss:$8 sps:$4 sm:$0xff]  }
  0xe4   : > { %3997 = vmatpush1.bf16.msra.mxu0 %v5273_v61  ;;  %3654 = vmatprep.subr.bf16.mxu1 %v5278_v62  ;;  %v5357_v61 = vld [vmem:[%s7461_s1 + $0xc50] ss:$8 sps:$4 sm:$0xff]   ;;  %v5362_v62 = vld [vmem:[%s7461_s1 + $0x464] ss:$8 sps:$4 sm:$0xff]  }
  0xe5   : > { %3998 = vmatprep.subr.bf16.mxu0 %v5281_v63  ;;  %v5365_v63 = vld [vmem:[%s7461_s1 + $0xc64] ss:$8 sps:$4 sm:$0xff]  }
  0xe7   : > { %3655 = vmatpush1.bf16.msra.mxu1 %v5276_v0  ;;  %v5360_v0 = vld [vmem:[%s7461_s1 + $0x460] ss:$8 sps:$4 sm:$0xff]  }
  0xe8   : > { %3999 = vmatpush1.bf16.msra.mxu0 %v5279_v1  ;;  %3656 = vmatprep.subr.bf16.mxu1 %v5284_v2  ;;  %v5363_v1 = vld [vmem:[%s7461_s1 + $0xc60] ss:$8 sps:$4 sm:$0xff]   ;;  %v5368_v2 = vld [vmem:[%s7461_s1 + $0x474] ss:$8 sps:$4 sm:$0xff]  }
  0xe9   : > { %4000 = vmatprep.subr.bf16.mxu0 %v5287_v3  ;;  %v5371_v3 = vld [vmem:[%s7461_s1 + $0xc74] ss:$8 sps:$4 sm:$0xff]  }
  0xeb   : > { %3657 = vmatpush1.bf16.msra.mxu1 %v5282_v4  ;;  %v5366_v4 = vld [vmem:[%s7461_s1 + $0x470] ss:$8 sps:$4 sm:$0xff]  }
  0xec   : > { %4001 = vmatpush1.bf16.msra.mxu0 %v5285_v5  ;;  %3658 = vmatprep.subr.bf16.mxu1 %v5290_v6  ;;  %v5369_v5 = vld [vmem:[%s7461_s1 + $0xc70] ss:$8 sps:$4 sm:$0xff]   ;;  %v5374_v6 = vld [vmem:[%s7461_s1 + $0x484] ss:$8 sps:$4 sm:$0xff]  }
  0xed   : > { %4002 = vmatprep.subr.bf16.mxu0 %v5293_v7  ;;  %v5377_v7 = vld [vmem:[%s7461_s1 + $0xc84] ss:$8 sps:$4 sm:$0xff]  }
  0xef   : > { %3659 = vmatpush1.bf16.msra.mxu1 %v5288_v8  ;;  %v5372_v8 = vld [vmem:[%s7461_s1 + $0x480] ss:$8 sps:$4 sm:$0xff]  }
  0xf0   : > { %4003 = vmatpush1.bf16.msra.mxu0 %v5291_v9  ;;  %3660 = vmatprep.subr.bf16.mxu1 %v5296_v10  ;;  %v5375_v9 = vld [vmem:[%s7461_s1 + $0xc80] ss:$8 sps:$4 sm:$0xff]   ;;  %v5380_v10 = vld [vmem:[%s7461_s1 + $0x494] ss:$8 sps:$4 sm:$0xff]  }
  0xf1   : > { %4004 = vmatprep.subr.bf16.mxu0 %v5299_v11  ;;  %v5383_v11 = vld [vmem:[%s7461_s1 + $0xc94] ss:$8 sps:$4 sm:$0xff]  }
  0xf3   : > { %3661 = vmatpush1.bf16.msra.mxu1 %v5294_v12  ;;  %v5378_v12 = vld [vmem:[%s7461_s1 + $0x490] ss:$8 sps:$4 sm:$0xff]  }
  0xf4   : > { %4005 = vmatpush1.bf16.msra.mxu0 %v5297_v13  ;;  %3662 = vmatprep.subr.bf16.mxu1 %v5302_v14  ;;  %v5381_v13 = vld [vmem:[%s7461_s1 + $0xc90] ss:$8 sps:$4 sm:$0xff]   ;;  %v5386_v14 = vld [vmem:[%s7461_s1 + $0x4a4] ss:$8 sps:$4 sm:$0xff]  }
  0xf5   : > { %4006 = vmatprep.subr.bf16.mxu0 %v5305_v15  ;;  %v5389_v15 = vld [vmem:[%s7461_s1 + $0xca4] ss:$8 sps:$4 sm:$0xff]  }
  0xf7   : > { %3663 = vmatpush1.bf16.msra.mxu1 %v5300_v16  ;;  %v5384_v16 = vld [vmem:[%s7461_s1 + $0x4a0] ss:$8 sps:$4 sm:$0xff]  }
  0xf8   : > { %4007 = vmatpush1.bf16.msra.mxu0 %v5303_v17  ;;  %3664 = vmatprep.subr.bf16.mxu1 %v5308_v18  ;;  %v5387_v17 = vld [vmem:[%s7461_s1 + $0xca0] ss:$8 sps:$4 sm:$0xff]   ;;  %v5392_v18 = vld [vmem:[%s7461_s1 + $0x4b4] ss:$8 sps:$4 sm:$0xff]  }
  0xf9   : > { %4008 = vmatprep.subr.bf16.mxu0 %v5311_v19  ;;  %v5395_v19 = vld [vmem:[%s7461_s1 + $0xcb4] ss:$8 sps:$4 sm:$0xff]  }
  0xfb   : > { %3665 = vmatpush1.bf16.msra.mxu1 %v5306_v20  ;;  %v5390_v20 = vld [vmem:[%s7461_s1 + $0x4b0] ss:$8 sps:$4 sm:$0xff]  }
  0xfc   : > { %4009 = vmatpush1.bf16.msra.mxu0 %v5309_v21  ;;  %3666 = vmatprep.subr.bf16.mxu1 %v5314_v22  ;;  %v5393_v21 = vld [vmem:[%s7461_s1 + $0xcb0] ss:$8 sps:$4 sm:$0xff]   ;;  %v5398_v22 = vld [vmem:[%s7461_s1 + $0x4c4] ss:$8 sps:$4 sm:$0xff]  }
  0xfd   : > { %4010 = vmatprep.subr.bf16.mxu0 %v5317_v23  ;;  %v5401_v23 = vld [vmem:[%s7461_s1 + $0xcc4] ss:$8 sps:$4 sm:$0xff]  }
  0xff   : > { %3667 = vmatpush1.bf16.msra.mxu1 %v5312_v26  ;;  %v5396_v26 = vld [vmem:[%s7461_s1 + $0x4c0] ss:$8 sps:$4 sm:$0xff]  }
 0x100   : > { %4011 = vmatpush1.bf16.msra.mxu0 %v5315_v27  ;;  %3668 = vmatprep.subr.bf16.mxu1 %v5320_v32  ;;  %v5399_v27 = vld [vmem:[%s7461_s1 + $0xcc0] ss:$8 sps:$4 sm:$0xff]   ;;  %v5404_v32 = vld [vmem:[%s7461_s1 + $0x4d4] ss:$8 sps:$4 sm:$0xff]  }
 0x101   : > { %4012 = vmatprep.subr.bf16.mxu0 %v5323_v33  ;;  %v5407_v33 = vld [vmem:[%s7461_s1 + $0xcd4] ss:$8 sps:$4 sm:$0xff]  }
 0x103   : > { %3669 = vmatpush1.bf16.msra.mxu1 %v5318_v36  ;;  %v5402_v36 = vld [vmem:[%s7461_s1 + $0x4d0] ss:$8 sps:$4 sm:$0xff]  }
 0x104   : > { %4013 = vmatpush1.bf16.msra.mxu0 %v5321_v37  ;;  %3681 = vmatprep.subr.bf16.mxu1 %v5326_v24  ;;  %v5405_v37 = vld [vmem:[%s7461_s1 + $0xcd0] ss:$8 sps:$4 sm:$0xff]   ;;  %v5410_v24 = vld [vmem:[%s7461_s1 + $0x4e4] ss:$8 sps:$4 sm:$0xff]  }
 0x105   : > { %4025 = vmatprep.subr.bf16.mxu0 %v5329_v25  ;;  %v5413_v25 = vld [vmem:[%s7461_s1 + $0xce4] ss:$8 sps:$4 sm:$0xff]  }
 0x106   : > { %3671 = vmatmul.mubr.bf16.vlgmr.msra.gmra.mrb[0].mxu1 %v4322_v40  ;;  %v5416_v40 = vld [vmem:[%s7461_s1 + $0x4f4] ss:$8 sps:$4 sm:$0xff]  }
 0x107   : > { %4015 = vmatmul.mubr.bf16.vlgmr.msra.gmra.mrb[0].mxu0 %v4338_v41  ;;  %3682 = vmatpush1.bf16.msra.mxu1 %v5324_v29  ;;  %v5408_v29 = vld [vmem:[%s7461_s1 + $0x4e0] ss:$8 sps:$4 sm:$0xff]   ;;  %v5419_v41 = vld [vmem:[%s7461_s1 + $0xcf4] ss:$8 sps:$4 sm:$0xff]  }
 0x108   : > { %4026 = vmatpush1.bf16.msra.mxu0 %v5327_v30  ;;  %3683 = vmatprep.subr.bf16.mxu1 %v5332_v44  ;;  %v5411_v30 = vld [vmem:[%s7461_s1 + $0xce0] ss:$8 sps:$4 sm:$0xff]   ;;  %v5414_v44 = vld [vmem:[%s7461_s1 + $0x4f0] ss:$8 sps:$4 sm:$0xff]  }
 0x109   : > { %4027 = vmatprep.subr.bf16.mxu0 %v5335_v45  ;;  %3713 = vmatprep.mubr.bf16.mxu1 %v4325_v28  ;;  %v5417_v45 = vld [vmem:[%s7461_s1 + $0xcf0] ss:$8 sps:$4 sm:$0xff]   ;;  %v5422_v28 = vld [vmem:[%s7461_s1 + $0x504] ss:$8 sps:$4 sm:$0xff]  }
 0x10a   : > { %4057 = vmatprep.mubr.bf16.mxu0 %v4341_v31  ;;  %v5425_v31 = vld [vmem:[%s7461_s1 + $0xd04] ss:$8 sps:$4 sm:$0xff]  }
 0x10b   : > { %3684 = vmatpush1.bf16.msra.mxu1 %v5330_v34  ;;  %v6811_v34 = vld [vmem:[%s5894_s19 + $0x28] sm:$0xff] }
 0x10c   : > { %4028 = vmatpush1.bf16.msra.mxu0 %v5333_v35  ;;  %3685 = vmatprep.subr.bf16.mxu1 %v5338_v46  ;;  %v6814_v35 = vld [vmem:[%s5894_s19 + $0xa8] sm:$0xff] }
 0x10d   : > { %4029 = vmatprep.subr.bf16.mxu0 %v5341_v47  ;;  %v6817_v46 = vld [vmem:[%s5894_s19 + $0x68] sm:$0xff] }
 0x10e   : > { %v6820_v47 = vld [vmem:[%s5894_s19 + $0xe8] sm:$0xff] }
 0x10f   : > { %3686 = vmatpush1.bf16.msra.mxu1 %v5336_v48  ;;  %v4324_v48 = vcombine.low %v6605_v38, %v6608_v39  ;;  %v5431_v38 = vld [vmem:[%s7461_s1 + $0xd14] ss:$8 sps:$4 sm:$0xff]   ;;  %v4327_v39 = vcombine.high %v6811_v34, %v6814_v35 }
 0x110   : > { %4030 = vmatpush1.bf16.msra.mxu0 %v5339_v49  ;;  %3687 = vmatprep.subr.bf16.mxu1 %v5344_v50  ;;  %v4340_v49 = vcombine.low %v6615_v42, %v6618_v43  ;;  %v5420_v50 = vld [vmem:[%s7461_s1 + $0x500] ss:$8 sps:$4 sm:$0xff]   ;;  %v4343_v42 = vcombine.high %v6817_v46, %v6820_v47  ;;  %v5426_v43 = vld [vmem:[%s7461_s1 + $0x510] ss:$8 sps:$4 sm:$0xff]  }
 0x111   : > { %4031 = vmatprep.subr.bf16.mxu0 %v5347_v51  ;;  %v5423_v51 = vld [vmem:[%s7461_s1 + $0xd00] ss:$8 sps:$4 sm:$0xff]  }
 0x113   : > { %3688 = vmatpush1.bf16.msra.mxu1 %v5342_v52  ;;  %v5428_v52 = vld [vmem:[%s7461_s1 + $0x514] ss:$8 sps:$4 sm:$0xff]  }
 0x114   : > { %4032 = vmatpush1.bf16.msra.mxu0 %v5345_v53  ;;  %3689 = vmatprep.subr.bf16.mxu1 %v5350_v54  ;;  %v5429_v53 = vld [vmem:[%s7461_s1 + $0xd10] ss:$8 sps:$4 sm:$0xff]   ;;  %v5434_v54 = vld [vmem:[%s7461_s1 + $0x524] ss:$8 sps:$4 sm:$0xff]  }
 0x115   : > { %4033 = vmatprep.subr.bf16.mxu0 %v5353_v55  ;;  %v5437_v55 = vld [vmem:[%s7461_s1 + $0xd24] ss:$8 sps:$4 sm:$0xff]  }
 0x117   : > { %3690 = vmatpush1.bf16.msra.mxu1 %v5348_v56  ;;  %v5432_v56 = vld [vmem:[%s7461_s1 + $0x520] ss:$8 sps:$4 sm:$0xff]  }
 0x118   : > { %4034 = vmatpush1.bf16.msra.mxu0 %v5351_v57  ;;  %3691 = vmatprep.subr.bf16.mxu1 %v5356_v58  ;;  %v5435_v57 = vld [vmem:[%s7461_s1 + $0xd20] ss:$8 sps:$4 sm:$0xff]   ;;  %v5440_v58 = vld [vmem:[%s7461_s1 + $0x534] ss:$8 sps:$4 sm:$0xff]  }
 0x119   : > { %4035 = vmatprep.subr.bf16.mxu0 %v5359_v59  ;;  %v5443_v59 = vld [vmem:[%s7461_s1 + $0xd34] ss:$8 sps:$4 sm:$0xff]  }
 0x11b   : > { %3692 = vmatpush1.bf16.msra.mxu1 %v5354_v60  ;;  %v5438_v60 = vld [vmem:[%s7461_s1 + $0x530] ss:$8 sps:$4 sm:$0xff]  }
 0x11c   : > { %4036 = vmatpush1.bf16.msra.mxu0 %v5357_v61  ;;  %3693 = vmatprep.subr.bf16.mxu1 %v5362_v62  ;;  %v5441_v61 = vld [vmem:[%s7461_s1 + $0xd30] ss:$8 sps:$4 sm:$0xff]   ;;  %v5446_v62 = vld [vmem:[%s7461_s1 + $0x544] ss:$8 sps:$4 sm:$0xff]  }
 0x11d   : > { %4037 = vmatprep.subr.bf16.mxu0 %v5365_v63  ;;  %v5449_v63 = vld [vmem:[%s7461_s1 + $0xd44] ss:$8 sps:$4 sm:$0xff]  }
 0x11f   : > { %3694 = vmatpush1.bf16.msra.mxu1 %v5360_v0  ;;  %v5444_v0 = vld [vmem:[%s7461_s1 + $0x540] ss:$8 sps:$4 sm:$0xff]  }
 0x120   : > { %4038 = vmatpush1.bf16.msra.mxu0 %v5363_v1  ;;  %3695 = vmatprep.subr.bf16.mxu1 %v5368_v2  ;;  %v5447_v1 = vld [vmem:[%s7461_s1 + $0xd40] ss:$8 sps:$4 sm:$0xff]   ;;  %v5452_v2 = vld [vmem:[%s7461_s1 + $0x554] ss:$8 sps:$4 sm:$0xff]  }
 0x121   : > { %4039 = vmatprep.subr.bf16.mxu0 %v5371_v3  ;;  %v5455_v3 = vld [vmem:[%s7461_s1 + $0xd54] ss:$8 sps:$4 sm:$0xff]  }
 0x123   : > { %3696 = vmatpush1.bf16.msra.mxu1 %v5366_v4  ;;  %v5450_v4 = vld [vmem:[%s7461_s1 + $0x550] ss:$8 sps:$4 sm:$0xff]  }
 0x124   : > { %4040 = vmatpush1.bf16.msra.mxu0 %v5369_v5  ;;  %3697 = vmatprep.subr.bf16.mxu1 %v5374_v6  ;;  %v5453_v5 = vld [vmem:[%s7461_s1 + $0xd50] ss:$8 sps:$4 sm:$0xff]   ;;  %v5458_v6 = vld [vmem:[%s7461_s1 + $0x564] ss:$8 sps:$4 sm:$0xff]  }
 0x125   : > { %4041 = vmatprep.subr.bf16.mxu0 %v5377_v7  ;;  %v5461_v7 = vld [vmem:[%s7461_s1 + $0xd64] ss:$8 sps:$4 sm:$0xff]  }
 0x127   : > { %3698 = vmatpush1.bf16.msra.mxu1 %v5372_v8  ;;  %v5456_v8 = vld [vmem:[%s7461_s1 + $0x560] ss:$8 sps:$4 sm:$0xff]  }
 0x128   : > { %4042 = vmatpush1.bf16.msra.mxu0 %v5375_v9  ;;  %3699 = vmatprep.subr.bf16.mxu1 %v5380_v10  ;;  %v5459_v9 = vld [vmem:[%s7461_s1 + $0xd60] ss:$8 sps:$4 sm:$0xff]   ;;  %v5464_v10 = vld [vmem:[%s7461_s1 + $0x574] ss:$8 sps:$4 sm:$0xff]  }
 0x129   : > { %4043 = vmatprep.subr.bf16.mxu0 %v5383_v11  ;;  %v5467_v11 = vld [vmem:[%s7461_s1 + $0xd74] ss:$8 sps:$4 sm:$0xff]  }
 0x12b   : > { %3700 = vmatpush1.bf16.msra.mxu1 %v5378_v12  ;;  %v5462_v12 = vld [vmem:[%s7461_s1 + $0x570] ss:$8 sps:$4 sm:$0xff]  }
 0x12c   : > { %4044 = vmatpush1.bf16.msra.mxu0 %v5381_v13  ;;  %3701 = vmatprep.subr.bf16.mxu1 %v5386_v14  ;;  %v5465_v13 = vld [vmem:[%s7461_s1 + $0xd70] ss:$8 sps:$4 sm:$0xff]   ;;  %v5470_v14 = vld [vmem:[%s7461_s1 + $0x584] ss:$8 sps:$4 sm:$0xff]  }
 0x12d   : > { %4045 = vmatprep.subr.bf16.mxu0 %v5389_v15  ;;  %v5473_v15 = vld [vmem:[%s7461_s1 + $0xd84] ss:$8 sps:$4 sm:$0xff]  }
 0x12f   : > { %3702 = vmatpush1.bf16.msra.mxu1 %v5384_v16  ;;  %v5468_v16 = vld [vmem:[%s7461_s1 + $0x580] ss:$8 sps:$4 sm:$0xff]  }
 0x130   : > { %4046 = vmatpush1.bf16.msra.mxu0 %v5387_v17  ;;  %3703 = vmatprep.subr.bf16.mxu1 %v5392_v18  ;;  %v5471_v17 = vld [vmem:[%s7461_s1 + $0xd80] ss:$8 sps:$4 sm:$0xff]   ;;  %v5476_v18 = vld [vmem:[%s7461_s1 + $0x594] ss:$8 sps:$4 sm:$0xff]  }
 0x131   : > { %4047 = vmatprep.subr.bf16.mxu0 %v5395_v19  ;;  %v5479_v19 = vld [vmem:[%s7461_s1 + $0xd94] ss:$8 sps:$4 sm:$0xff]  }
 0x133   : > { %3704 = vmatpush1.bf16.msra.mxu1 %v5390_v20  ;;  %v5474_v20 = vld [vmem:[%s7461_s1 + $0x590] ss:$8 sps:$4 sm:$0xff]  }
 0x134   : > { %4048 = vmatpush1.bf16.msra.mxu0 %v5393_v21  ;;  %3705 = vmatprep.subr.bf16.mxu1 %v5398_v22  ;;  %v5477_v21 = vld [vmem:[%s7461_s1 + $0xd90] ss:$8 sps:$4 sm:$0xff]   ;;  %v5482_v22 = vld [vmem:[%s7461_s1 + $0x5a4] ss:$8 sps:$4 sm:$0xff]  }
 0x135   : > { %4049 = vmatprep.subr.bf16.mxu0 %v5401_v23  ;;  %v5485_v23 = vld [vmem:[%s7461_s1 + $0xda4] ss:$8 sps:$4 sm:$0xff]  }
 0x137   : > { %3706 = vmatpush1.bf16.msra.mxu1 %v5396_v26  ;;  %v5480_v26 = vld [vmem:[%s7461_s1 + $0x5a0] ss:$8 sps:$4 sm:$0xff]  }
 0x138   : > { %4050 = vmatpush1.bf16.msra.mxu0 %v5399_v27  ;;  %3707 = vmatprep.subr.bf16.mxu1 %v5404_v32  ;;  %v5483_v27 = vld [vmem:[%s7461_s1 + $0xda0] ss:$8 sps:$4 sm:$0xff]   ;;  %v5488_v32 = vld [vmem:[%s7461_s1 + $0x5b4] ss:$8 sps:$4 sm:$0xff]  }
 0x139   : > { %4051 = vmatprep.subr.bf16.mxu0 %v5407_v33  ;;  %v5491_v33 = vld [vmem:[%s7461_s1 + $0xdb4] ss:$8 sps:$4 sm:$0xff]  }
 0x13b   : > { %3708 = vmatpush1.bf16.msra.mxu1 %v5402_v36  ;;  %v5486_v36 = vld [vmem:[%s7461_s1 + $0x5b0] ss:$8 sps:$4 sm:$0xff]  }
 0x13c   : > { %4052 = vmatpush1.bf16.msra.mxu0 %v5405_v37  ;;  %3709 = vmatprep.subr.bf16.mxu1 %v5410_v24  ;;  %v5489_v37 = vld [vmem:[%s7461_s1 + $0xdb0] ss:$8 sps:$4 sm:$0xff]   ;;  %v5494_v24 = vld [vmem:[%s7461_s1 + $0x5c4] ss:$8 sps:$4 sm:$0xff]  }
 0x13d   : > { %4053 = vmatprep.subr.bf16.mxu0 %v5413_v25  ;;  %v5497_v25 = vld [vmem:[%s7461_s1 + $0xdc4] ss:$8 sps:$4 sm:$0xff]  }
 0x13f   : > { %3710 = vmatpush1.bf16.msra.mxu1 %v5408_v29  ;;  %v5492_v29 = vld [vmem:[%s7461_s1 + $0x5c0] ss:$8 sps:$4 sm:$0xff]  }
 0x140   : > { %4054 = vmatpush1.bf16.msra.mxu0 %v5411_v30  ;;  %3711 = vmatprep.subr.bf16.mxu1 %v5416_v40  ;;  %v5495_v30 = vld [vmem:[%s7461_s1 + $0xdc0] ss:$8 sps:$4 sm:$0xff]   ;;  %v5500_v40 = vld [vmem:[%s7461_s1 + $0x5d4] ss:$8 sps:$4 sm:$0xff]  }
 0x141   : > { %4055 = vmatprep.subr.bf16.mxu0 %v5419_v41  ;;  %v5503_v41 = vld [vmem:[%s7461_s1 + $0xdd4] ss:$8 sps:$4 sm:$0xff]  }
 0x143   : > { %3712 = vmatpush1.bf16.msra.mxu1 %v5414_v44  ;;  %v5498_v44 = vld [vmem:[%s7461_s1 + $0x5d0] ss:$8 sps:$4 sm:$0xff]  }
 0x144   : > { %4056 = vmatpush1.bf16.msra.mxu0 %v5417_v45  ;;  %3724 = vmatprep.subr.bf16.mxu1 %v5422_v28  ;;  %v5501_v45 = vld [vmem:[%s7461_s1 + $0xdd0] ss:$8 sps:$4 sm:$0xff]   ;;  %v5506_v28 = vld [vmem:[%s7461_s1 + $0x5e4] ss:$8 sps:$4 sm:$0xff]  }
 0x145   : > { %4068 = vmatprep.subr.bf16.mxu0 %v5425_v31  ;;  %v5509_v31 = vld [vmem:[%s7461_s1 + $0xde4] ss:$8 sps:$4 sm:$0xff]  }
 0x146   : > { %3714 = vmatmul.mubr.bf16.vlgmr.msra.gmra.mrb[0].mxu1 %v4324_v48  ;;  %v5504_v48 = vld [vmem:[%s7461_s1 + $0x5e0] ss:$8 sps:$4 sm:$0xff]  }
 0x147   : > { %4058 = vmatmul.mubr.bf16.vlgmr.msra.gmra.mrb[0].mxu0 %v4340_v49  ;;  %3725 = vmatpush1.bf16.msra.mxu1 %v5420_v50  ;;  %v5507_v49 = vld [vmem:[%s7461_s1 + $0xde0] ss:$8 sps:$4 sm:$0xff]   ;;  %v5512_v50 = vld [vmem:[%s7461_s1 + $0x5f4] ss:$8 sps:$4 sm:$0xff]  }
 0x148   : > { %4069 = vmatpush1.bf16.msra.mxu0 %v5423_v51  ;;  %3726 = vmatprep.subr.bf16.mxu1 %v5428_v52  ;;  %v5515_v51 = vld [vmem:[%s7461_s1 + $0xdf4] ss:$8 sps:$4 sm:$0xff]   ;;  %v5510_v52 = vld [vmem:[%s7461_s1 + $0x5f0] ss:$8 sps:$4 sm:$0xff]  }
 0x149   : > { %4070 = vmatprep.subr.bf16.mxu0 %v5431_v38  ;;  %3756 = vmatprep.mubr.bf16.mxu1 %v4327_v39  ;;  %v5513_v38 = vld [vmem:[%s7461_s1 + $0xdf0] ss:$8 sps:$4 sm:$0xff]   ;;  %v5518_v39 = vld [vmem:[%s7461_s1 + $0x604] ss:$8 sps:$4 sm:$0xff]  }
 0x14a   : > { %4100 = vmatprep.mubr.bf16.mxu0 %v4343_v42  ;;  %v5521_v42 = vld [vmem:[%s7461_s1 + $0xe04] ss:$8 sps:$4 sm:$0xff]  }
 0x14b   : > { %3727 = vmatpush1.bf16.msra.mxu1 %v5426_v43  ;;  %v7023_v43 = vld [vmem:[%s5894_s19 + $0x30] sm:$0xff] }
 0x14c   : > { %4071 = vmatpush1.bf16.msra.mxu0 %v5429_v53  ;;  %3728 = vmatprep.subr.bf16.mxu1 %v5434_v54  ;;  %v4326_v53 = vcombine.low %v6811_v34, %v6814_v35  ;;  %v4342_v54 = vcombine.low %v6817_v46, %v6820_v47  ;;  %v5524_v34 = vld [vmem:[%s7461_s1 + $0x614] ss:$8 sps:$4 sm:$0xff]  }
 0x14d   : > { %4072 = vmatprep.subr.bf16.mxu0 %v5437_v55  ;;  %v7030_v55 = vld [vmem:[%s5894_s19 + $0xb0] sm:$0xff] }
 0x14e   : > { %v5527_v35 = vld [vmem:[%s7461_s1 + $0xe14] ss:$8 sps:$4 sm:$0xff]   ;;  %v4329_v46 = vcombine.high %v7023_v43, %v7030_v55 }
 0x14f   : > { %3729 = vmatpush1.bf16.msra.mxu1 %v5432_v56  ;;  %v7033_v56 = vld [vmem:[%s5894_s19 + $0x70] sm:$0xff] }
 0x150   : > { %4073 = vmatpush1.bf16.msra.mxu0 %v5435_v57  ;;  %3730 = vmatprep.subr.bf16.mxu1 %v5440_v58  ;;  %v7036_v57 = vld [vmem:[%s5894_s19 + $0xf0] sm:$0xff]  ;;  %v5516_v58 = vld [vmem:[%s7461_s1 + $0x600] ss:$8 sps:$4 sm:$0xff]  }
 0x151   : > { %4074 = vmatprep.subr.bf16.mxu0 %v5443_v59  ;;  %v5519_v59 = vld [vmem:[%s7461_s1 + $0xe00] ss:$8 sps:$4 sm:$0xff]   ;;  %v4345_v47 = vcombine.high %v7033_v56, %v7036_v57 }
 0x153   : > { %3731 = vmatpush1.bf16.msra.mxu1 %v5438_v60  ;;  %v5522_v60 = vld [vmem:[%s7461_s1 + $0x610] ss:$8 sps:$4 sm:$0xff]  }
 0x154   : > { %4075 = vmatpush1.bf16.msra.mxu0 %v5441_v61  ;;  %3732 = vmatprep.subr.bf16.mxu1 %v5446_v62  ;;  %v5525_v61 = vld [vmem:[%s7461_s1 + $0xe10] ss:$8 sps:$4 sm:$0xff]   ;;  %v5530_v62 = vld [vmem:[%s7461_s1 + $0x624] ss:$8 sps:$4 sm:$0xff]  }
 0x155   : > { %4076 = vmatprep.subr.bf16.mxu0 %v5449_v63  ;;  %v5533_v63 = vld [vmem:[%s7461_s1 + $0xe24] ss:$8 sps:$4 sm:$0xff]  }
 0x157   : > { %3733 = vmatpush1.bf16.msra.mxu1 %v5444_v0  ;;  %v5528_v0 = vld [vmem:[%s7461_s1 + $0x620] ss:$8 sps:$4 sm:$0xff]  }
 0x158   : > { %4077 = vmatpush1.bf16.msra.mxu0 %v5447_v1  ;;  %3734 = vmatprep.subr.bf16.mxu1 %v5452_v2  ;;  %v5531_v1 = vld [vmem:[%s7461_s1 + $0xe20] ss:$8 sps:$4 sm:$0xff]   ;;  %v5536_v2 = vld [vmem:[%s7461_s1 + $0x634] ss:$8 sps:$4 sm:$0xff]  }
 0x159   : > { %4078 = vmatprep.subr.bf16.mxu0 %v5455_v3  ;;  %v5539_v3 = vld [vmem:[%s7461_s1 + $0xe34] ss:$8 sps:$4 sm:$0xff]  }
 0x15b   : > { %3735 = vmatpush1.bf16.msra.mxu1 %v5450_v4  ;;  %v5534_v4 = vld [vmem:[%s7461_s1 + $0x630] ss:$8 sps:$4 sm:$0xff]  }
 0x15c   : > { %4079 = vmatpush1.bf16.msra.mxu0 %v5453_v5  ;;  %3736 = vmatprep.subr.bf16.mxu1 %v5458_v6  ;;  %v5537_v5 = vld [vmem:[%s7461_s1 + $0xe30] ss:$8 sps:$4 sm:$0xff]   ;;  %v5542_v6 = vld [vmem:[%s7461_s1 + $0x644] ss:$8 sps:$4 sm:$0xff]  }
 0x15d   : > { %4080 = vmatprep.subr.bf16.mxu0 %v5461_v7  ;;  %v5545_v7 = vld [vmem:[%s7461_s1 + $0xe44] ss:$8 sps:$4 sm:$0xff]  }
 0x15f   : > { %3737 = vmatpush1.bf16.msra.mxu1 %v5456_v8  ;;  %v5540_v8 = vld [vmem:[%s7461_s1 + $0x640] ss:$8 sps:$4 sm:$0xff]  }
 0x160   : > { %4081 = vmatpush1.bf16.msra.mxu0 %v5459_v9  ;;  %3738 = vmatprep.subr.bf16.mxu1 %v5464_v10  ;;  %v5543_v9 = vld [vmem:[%s7461_s1 + $0xe40] ss:$8 sps:$4 sm:$0xff]   ;;  %v5548_v10 = vld [vmem:[%s7461_s1 + $0x654] ss:$8 sps:$4 sm:$0xff]  }
 0x161   : > { %4082 = vmatprep.subr.bf16.mxu0 %v5467_v11  ;;  %v5551_v11 = vld [vmem:[%s7461_s1 + $0xe54] ss:$8 sps:$4 sm:$0xff]  }
 0x163   : > { %3739 = vmatpush1.bf16.msra.mxu1 %v5462_v12  ;;  %v5546_v12 = vld [vmem:[%s7461_s1 + $0x650] ss:$8 sps:$4 sm:$0xff]  }
 0x164   : > { %4083 = vmatpush1.bf16.msra.mxu0 %v5465_v13  ;;  %3740 = vmatprep.subr.bf16.mxu1 %v5470_v14  ;;  %v5549_v13 = vld [vmem:[%s7461_s1 + $0xe50] ss:$8 sps:$4 sm:$0xff]   ;;  %v5554_v14 = vld [vmem:[%s7461_s1 + $0x664] ss:$8 sps:$4 sm:$0xff]  }
 0x165   : > { %4084 = vmatprep.subr.bf16.mxu0 %v5473_v15  ;;  %v5557_v15 = vld [vmem:[%s7461_s1 + $0xe64] ss:$8 sps:$4 sm:$0xff]  }
 0x167   : > { %3741 = vmatpush1.bf16.msra.mxu1 %v5468_v16  ;;  %v5552_v16 = vld [vmem:[%s7461_s1 + $0x660] ss:$8 sps:$4 sm:$0xff]  }
 0x168   : > { %4085 = vmatpush1.bf16.msra.mxu0 %v5471_v17  ;;  %3742 = vmatprep.subr.bf16.mxu1 %v5476_v18  ;;  %v5555_v17 = vld [vmem:[%s7461_s1 + $0xe60] ss:$8 sps:$4 sm:$0xff]   ;;  %v5560_v18 = vld [vmem:[%s7461_s1 + $0x674] ss:$8 sps:$4 sm:$0xff]  }
 0x169   : > { %4086 = vmatprep.subr.bf16.mxu0 %v5479_v19  ;;  %v5563_v19 = vld [vmem:[%s7461_s1 + $0xe74] ss:$8 sps:$4 sm:$0xff]  }
 0x16b   : > { %3743 = vmatpush1.bf16.msra.mxu1 %v5474_v20  ;;  %v5558_v20 = vld [vmem:[%s7461_s1 + $0x670] ss:$8 sps:$4 sm:$0xff]  }
 0x16c   : > { %4087 = vmatpush1.bf16.msra.mxu0 %v5477_v21  ;;  %3744 = vmatprep.subr.bf16.mxu1 %v5482_v22  ;;  %v5561_v21 = vld [vmem:[%s7461_s1 + $0xe70] ss:$8 sps:$4 sm:$0xff]   ;;  %v5566_v22 = vld [vmem:[%s7461_s1 + $0x684] ss:$8 sps:$4 sm:$0xff]  }
 0x16d   : > { %4088 = vmatprep.subr.bf16.mxu0 %v5485_v23  ;;  %v5569_v23 = vld [vmem:[%s7461_s1 + $0xe84] ss:$8 sps:$4 sm:$0xff]  }
 0x16f   : > { %3745 = vmatpush1.bf16.msra.mxu1 %v5480_v26  ;;  %v5564_v26 = vld [vmem:[%s7461_s1 + $0x680] ss:$8 sps:$4 sm:$0xff]  }
 0x170   : > { %4089 = vmatpush1.bf16.msra.mxu0 %v5483_v27  ;;  %3746 = vmatprep.subr.bf16.mxu1 %v5488_v32  ;;  %v5567_v27 = vld [vmem:[%s7461_s1 + $0xe80] ss:$8 sps:$4 sm:$0xff]   ;;  %v5572_v32 = vld [vmem:[%s7461_s1 + $0x694] ss:$8 sps:$4 sm:$0xff]  }
 0x171   : > { %4090 = vmatprep.subr.bf16.mxu0 %v5491_v33  ;;  %v5575_v33 = vld [vmem:[%s7461_s1 + $0xe94] ss:$8 sps:$4 sm:$0xff]  }
 0x173   : > { %3747 = vmatpush1.bf16.msra.mxu1 %v5486_v36  ;;  %v5570_v36 = vld [vmem:[%s7461_s1 + $0x690] ss:$8 sps:$4 sm:$0xff]  }
 0x174   : > { %4091 = vmatpush1.bf16.msra.mxu0 %v5489_v37  ;;  %3748 = vmatprep.subr.bf16.mxu1 %v5494_v24  ;;  %v5573_v37 = vld [vmem:[%s7461_s1 + $0xe90] ss:$8 sps:$4 sm:$0xff]   ;;  %v5578_v24 = vld [vmem:[%s7461_s1 + $0x6a4] ss:$8 sps:$4 sm:$0xff]  }
 0x175   : > { %4092 = vmatprep.subr.bf16.mxu0 %v5497_v25  ;;  %v5581_v25 = vld [vmem:[%s7461_s1 + $0xea4] ss:$8 sps:$4 sm:$0xff]  }
 0x177   : > { %3749 = vmatpush1.bf16.msra.mxu1 %v5492_v29  ;;  %v5576_v29 = vld [vmem:[%s7461_s1 + $0x6a0] ss:$8 sps:$4 sm:$0xff]  }
 0x178   : > { %4093 = vmatpush1.bf16.msra.mxu0 %v5495_v30  ;;  %3750 = vmatprep.subr.bf16.mxu1 %v5500_v40  ;;  %v5579_v30 = vld [vmem:[%s7461_s1 + $0xea0] ss:$8 sps:$4 sm:$0xff]   ;;  %v5584_v40 = vld [vmem:[%s7461_s1 + $0x6b4] ss:$8 sps:$4 sm:$0xff]  }
 0x179   : > { %4094 = vmatprep.subr.bf16.mxu0 %v5503_v41  ;;  %v5587_v41 = vld [vmem:[%s7461_s1 + $0xeb4] ss:$8 sps:$4 sm:$0xff]  }
 0x17b   : > { %3751 = vmatpush1.bf16.msra.mxu1 %v5498_v44  ;;  %v5582_v44 = vld [vmem:[%s7461_s1 + $0x6b0] ss:$8 sps:$4 sm:$0xff]  }
 0x17c   : > { %4095 = vmatpush1.bf16.msra.mxu0 %v5501_v45  ;;  %3752 = vmatprep.subr.bf16.mxu1 %v5506_v28  ;;  %v5585_v45 = vld [vmem:[%s7461_s1 + $0xeb0] ss:$8 sps:$4 sm:$0xff]   ;;  %v5590_v28 = vld [vmem:[%s7461_s1 + $0x6c4] ss:$8 sps:$4 sm:$0xff]  }
 0x17d   : > { %4096 = vmatprep.subr.bf16.mxu0 %v5509_v31  ;;  %v5593_v31 = vld [vmem:[%s7461_s1 + $0xec4] ss:$8 sps:$4 sm:$0xff]  }
 0x17f   : > { %3753 = vmatpush1.bf16.msra.mxu1 %v5504_v48  ;;  %v5588_v48 = vld [vmem:[%s7461_s1 + $0x6c0] ss:$8 sps:$4 sm:$0xff]  }
 0x180   : > { %4097 = vmatpush1.bf16.msra.mxu0 %v5507_v49  ;;  %3754 = vmatprep.subr.bf16.mxu1 %v5512_v50  ;;  %v5591_v49 = vld [vmem:[%s7461_s1 + $0xec0] ss:$8 sps:$4 sm:$0xff]   ;;  %v5596_v50 = vld [vmem:[%s7461_s1 + $0x6d4] ss:$8 sps:$4 sm:$0xff]  }
 0x181   : > { %4098 = vmatprep.subr.bf16.mxu0 %v5515_v51  ;;  %v5599_v51 = vld [vmem:[%s7461_s1 + $0xed4] ss:$8 sps:$4 sm:$0xff]  }
 0x183   : > { %3755 = vmatpush1.bf16.msra.mxu1 %v5510_v52  ;;  %v5594_v52 = vld [vmem:[%s7461_s1 + $0x6d0] ss:$8 sps:$4 sm:$0xff]  }
 0x184   : > { %4099 = vmatpush1.bf16.msra.mxu0 %v5513_v38  ;;  %3767 = vmatprep.subr.bf16.mxu1 %v5518_v39  ;;  %v5597_v38 = vld [vmem:[%s7461_s1 + $0xed0] ss:$8 sps:$4 sm:$0xff]   ;;  %v5602_v39 = vld [vmem:[%s7461_s1 + $0x6e4] ss:$8 sps:$4 sm:$0xff]  }
 0x185   : > { %4111 = vmatprep.subr.bf16.mxu0 %v5521_v42  ;;  %v5605_v42 = vld [vmem:[%s7461_s1 + $0xee4] ss:$8 sps:$4 sm:$0xff]  }
 0x186   : > { %3757 = vmatmul.mubr.bf16.vlgmr.msra.gmra.mrb[0].mxu1 %v4326_v53  ;;  %v5600_v53 = vld [vmem:[%s7461_s1 + $0x6e0] ss:$8 sps:$4 sm:$0xff]  }
 0x187   : > { %4101 = vmatmul.mubr.bf16.vlgmr.msra.gmra.mrb[0].mxu0 %v4342_v54  ;;  %3768 = vmatpush1.bf16.msra.mxu1 %v5516_v58  ;;  %v5603_v54 = vld [vmem:[%s7461_s1 + $0xee0] ss:$8 sps:$4 sm:$0xff]   ;;  %v5608_v58 = vld [vmem:[%s7461_s1 + $0x6f4] ss:$8 sps:$4 sm:$0xff]  }
 0x188   : > { %4112 = vmatpush1.bf16.msra.mxu0 %v5519_v59  ;;  %3769 = vmatprep.subr.bf16.mxu1 %v5524_v34  ;;  %v5611_v59 = vld [vmem:[%s7461_s1 + $0xef4] ss:$8 sps:$4 sm:$0xff]   ;;  %v5606_v34 = vld [vmem:[%s7461_s1 + $0x6f0] ss:$8 sps:$4 sm:$0xff]  }
 0x189   : > { %4113 = vmatprep.subr.bf16.mxu0 %v5527_v35  ;;  %3799 = vmatprep.mubr.bf16.mxu1 %v4329_v46  ;;  %v5609_v35 = vld [vmem:[%s7461_s1 + $0xef0] ss:$8 sps:$4 sm:$0xff]   ;;  %v5614_v46 = vld [vmem:[%s7461_s1 + $0x704] ss:$8 sps:$4 sm:$0xff]  }
 0x18a   : > { %4143 = vmatprep.mubr.bf16.mxu0 %v4345_v47  ;;  %v5617_v47 = vld [vmem:[%s7461_s1 + $0xf04] ss:$8 sps:$4 sm:$0xff]  }
 0x18b   : > { %3770 = vmatpush1.bf16.msra.mxu1 %v5522_v60  ;;  %v7235_v60 = vld [vmem:[%s5894_s19 + $0x38] sm:$0xff] }
 0x18c   : > { %4114 = vmatpush1.bf16.msra.mxu0 %v5525_v61  ;;  %3771 = vmatprep.subr.bf16.mxu1 %v5530_v62  ;;  %v4328_v61 = vcombine.low %v7023_v43, %v7030_v55  ;;  %v4344_v62 = vcombine.low %v7033_v56, %v7036_v57  ;;  %v5620_v43 = vld [vmem:[%s7461_s1 + $0x714] ss:$8 sps:$4 sm:$0xff]  }
 0x18d   : > { %4115 = vmatprep.subr.bf16.mxu0 %v5533_v63  ;;  %v7242_v63 = vld [vmem:[%s5894_s19 + $0xb8] sm:$0xff] }
 0x18e   : > { %v5623_v55 = vld [vmem:[%s7461_s1 + $0xf14] ss:$8 sps:$4 sm:$0xff]   ;;  %v4331_v56 = vcombine.high %v7235_v60, %v7242_v63 }
 0x18f   : > { %3772 = vmatpush1.bf16.msra.mxu1 %v5528_v0  ;;  %v7245_v0 = vld [vmem:[%s5894_s19 + $0x78] sm:$0xff] }
 0x190   : > { %4116 = vmatpush1.bf16.msra.mxu0 %v5531_v1  ;;  %3773 = vmatprep.subr.bf16.mxu1 %v5536_v2  ;;  %v7248_v1 = vld [vmem:[%s5894_s19 + $0xf8] sm:$0xff]  ;;  %v5612_v2 = vld [vmem:[%s7461_s1 + $0x700] ss:$8 sps:$4 sm:$0xff]  }
 0x191   : > { %4117 = vmatprep.subr.bf16.mxu0 %v5539_v3  ;;  %v5615_v3 = vld [vmem:[%s7461_s1 + $0xf00] ss:$8 sps:$4 sm:$0xff]   ;;  %v4347_v57 = vcombine.high %v7245_v0, %v7248_v1 }
 0x193   : > { %3774 = vmatpush1.bf16.msra.mxu1 %v5534_v4  ;;  %v5618_v4 = vld [vmem:[%s7461_s1 + $0x710] ss:$8 sps:$4 sm:$0xff]  }
 0x194   : > { %4118 = vmatpush1.bf16.msra.mxu0 %v5537_v5  ;;  %3775 = vmatprep.subr.bf16.mxu1 %v5542_v6  ;;  %v5621_v5 = vld [vmem:[%s7461_s1 + $0xf10] ss:$8 sps:$4 sm:$0xff]   ;;  %v5626_v6 = vld [vmem:[%s7461_s1 + $0x724] ss:$8 sps:$4 sm:$0xff]  }
 0x195   : > { %4119 = vmatprep.subr.bf16.mxu0 %v5545_v7  ;;  %v5629_v7 = vld [vmem:[%s7461_s1 + $0xf24] ss:$8 sps:$4 sm:$0xff]  }
 0x197   : > { %3776 = vmatpush1.bf16.msra.mxu1 %v5540_v8  ;;  %v5624_v8 = vld [vmem:[%s7461_s1 + $0x720] ss:$8 sps:$4 sm:$0xff]  }
 0x198   : > { %4120 = vmatpush1.bf16.msra.mxu0 %v5543_v9  ;;  %3777 = vmatprep.subr.bf16.mxu1 %v5548_v10  ;;  %v5627_v9 = vld [vmem:[%s7461_s1 + $0xf20] ss:$8 sps:$4 sm:$0xff]   ;;  %v5632_v10 = vld [vmem:[%s7461_s1 + $0x734] ss:$8 sps:$4 sm:$0xff]  }
 0x199   : > { %4121 = vmatprep.subr.bf16.mxu0 %v5551_v11  ;;  %v5635_v11 = vld [vmem:[%s7461_s1 + $0xf34] ss:$8 sps:$4 sm:$0xff]  }
 0x19b   : > { %3778 = vmatpush1.bf16.msra.mxu1 %v5546_v12  ;;  %v5630_v12 = vld [vmem:[%s7461_s1 + $0x730] ss:$8 sps:$4 sm:$0xff]  }
 0x19c   : > { %4122 = vmatpush1.bf16.msra.mxu0 %v5549_v13  ;;  %3779 = vmatprep.subr.bf16.mxu1 %v5554_v14  ;;  %v5633_v13 = vld [vmem:[%s7461_s1 + $0xf30] ss:$8 sps:$4 sm:$0xff]   ;;  %v5638_v14 = vld [vmem:[%s7461_s1 + $0x744] ss:$8 sps:$4 sm:$0xff]  }
 0x19d   : > { %4123 = vmatprep.subr.bf16.mxu0 %v5557_v15  ;;  %v5641_v15 = vld [vmem:[%s7461_s1 + $0xf44] ss:$8 sps:$4 sm:$0xff]  }
 0x19f   : > { %3780 = vmatpush1.bf16.msra.mxu1 %v5552_v16  ;;  %v5636_v16 = vld [vmem:[%s7461_s1 + $0x740] ss:$8 sps:$4 sm:$0xff]  }
 0x1a0   : > { %4124 = vmatpush1.bf16.msra.mxu0 %v5555_v17  ;;  %3781 = vmatprep.subr.bf16.mxu1 %v5560_v18  ;;  %v5639_v17 = vld [vmem:[%s7461_s1 + $0xf40] ss:$8 sps:$4 sm:$0xff]   ;;  %v5644_v18 = vld [vmem:[%s7461_s1 + $0x754] ss:$8 sps:$4 sm:$0xff]  }
 0x1a1   : > { %4125 = vmatprep.subr.bf16.mxu0 %v5563_v19  ;;  %v5647_v19 = vld [vmem:[%s7461_s1 + $0xf54] ss:$8 sps:$4 sm:$0xff]  }
 0x1a3   : > { %3782 = vmatpush1.bf16.msra.mxu1 %v5558_v20  ;;  %v5642_v20 = vld [vmem:[%s7461_s1 + $0x750] ss:$8 sps:$4 sm:$0xff]  }
 0x1a4   : > { %4126 = vmatpush1.bf16.msra.mxu0 %v5561_v21  ;;  %3783 = vmatprep.subr.bf16.mxu1 %v5566_v22  ;;  %v5645_v21 = vld [vmem:[%s7461_s1 + $0xf50] ss:$8 sps:$4 sm:$0xff]   ;;  %v5650_v22 = vld [vmem:[%s7461_s1 + $0x764] ss:$8 sps:$4 sm:$0xff]  }
 0x1a5   : > { %4127 = vmatprep.subr.bf16.mxu0 %v5569_v23  ;;  %v5653_v23 = vld [vmem:[%s7461_s1 + $0xf64] ss:$8 sps:$4 sm:$0xff]  }
 0x1a7   : > { %3784 = vmatpush1.bf16.msra.mxu1 %v5564_v26  ;;  %v5648_v26 = vld [vmem:[%s7461_s1 + $0x760] ss:$8 sps:$4 sm:$0xff]  }
 0x1a8   : > { %4128 = vmatpush1.bf16.msra.mxu0 %v5567_v27  ;;  %3785 = vmatprep.subr.bf16.mxu1 %v5572_v32  ;;  %v5651_v27 = vld [vmem:[%s7461_s1 + $0xf60] ss:$8 sps:$4 sm:$0xff]   ;;  %v5656_v32 = vld [vmem:[%s7461_s1 + $0x774] ss:$8 sps:$4 sm:$0xff]  }
 0x1a9   : > { %4129 = vmatprep.subr.bf16.mxu0 %v5575_v33  ;;  %v5659_v33 = vld [vmem:[%s7461_s1 + $0xf74] ss:$8 sps:$4 sm:$0xff]  }
 0x1ab   : > { %3786 = vmatpush1.bf16.msra.mxu1 %v5570_v36  ;;  %v5654_v36 = vld [vmem:[%s7461_s1 + $0x770] ss:$8 sps:$4 sm:$0xff]  }
 0x1ac   : > { %4130 = vmatpush1.bf16.msra.mxu0 %v5573_v37  ;;  %3787 = vmatprep.subr.bf16.mxu1 %v5578_v24  ;;  %v5657_v37 = vld [vmem:[%s7461_s1 + $0xf70] ss:$8 sps:$4 sm:$0xff]   ;;  %v5662_v24 = vld [vmem:[%s7461_s1 + $0x784] ss:$8 sps:$4 sm:$0xff]  }
 0x1ad   : > { %4131 = vmatprep.subr.bf16.mxu0 %v5581_v25  ;;  %v5665_v25 = vld [vmem:[%s7461_s1 + $0xf84] ss:$8 sps:$4 sm:$0xff]  }
 0x1af   : > { %3788 = vmatpush1.bf16.msra.mxu1 %v5576_v29  ;;  %v5660_v29 = vld [vmem:[%s7461_s1 + $0x780] ss:$8 sps:$4 sm:$0xff]  }
 0x1b0   : > { %4132 = vmatpush1.bf16.msra.mxu0 %v5579_v30  ;;  %3789 = vmatprep.subr.bf16.mxu1 %v5584_v40  ;;  %v5663_v30 = vld [vmem:[%s7461_s1 + $0xf80] ss:$8 sps:$4 sm:$0xff]   ;;  %v5668_v40 = vld [vmem:[%s7461_s1 + $0x794] ss:$8 sps:$4 sm:$0xff]  }
 0x1b1   : > { %4133 = vmatprep.subr.bf16.mxu0 %v5587_v41  ;;  %v5671_v41 = vld [vmem:[%s7461_s1 + $0xf94] ss:$8 sps:$4 sm:$0xff]  }
 0x1b3   : > { %3790 = vmatpush1.bf16.msra.mxu1 %v5582_v44  ;;  %v5666_v44 = vld [vmem:[%s7461_s1 + $0x790] ss:$8 sps:$4 sm:$0xff]  }
 0x1b4   : > { %4134 = vmatpush1.bf16.msra.mxu0 %v5585_v45  ;;  %3791 = vmatprep.subr.bf16.mxu1 %v5590_v28  ;;  %v5669_v45 = vld [vmem:[%s7461_s1 + $0xf90] ss:$8 sps:$4 sm:$0xff]   ;;  %v5674_v28 = vld [vmem:[%s7461_s1 + $0x7a4] ss:$8 sps:$4 sm:$0xff]  }
 0x1b5   : > { %4135 = vmatprep.subr.bf16.mxu0 %v5593_v31  ;;  %v5677_v31 = vld [vmem:[%s7461_s1 + $0xfa4] ss:$8 sps:$4 sm:$0xff]  }
 0x1b7   : > { %3792 = vmatpush1.bf16.msra.mxu1 %v5588_v48  ;;  %v5672_v48 = vld [vmem:[%s7461_s1 + $0x7a0] ss:$8 sps:$4 sm:$0xff]  }
 0x1b8   : > { %4136 = vmatpush1.bf16.msra.mxu0 %v5591_v49  ;;  %3793 = vmatprep.subr.bf16.mxu1 %v5596_v50  ;;  %v5675_v49 = vld [vmem:[%s7461_s1 + $0xfa0] ss:$8 sps:$4 sm:$0xff]   ;;  %v5680_v50 = vld [vmem:[%s7461_s1 + $0x7b4] ss:$8 sps:$4 sm:$0xff]  }
 0x1b9   : > { %4137 = vmatprep.subr.bf16.mxu0 %v5599_v51  ;;  %v5683_v51 = vld [vmem:[%s7461_s1 + $0xfb4] ss:$8 sps:$4 sm:$0xff]  }
 0x1bb   : > { %3794 = vmatpush1.bf16.msra.mxu1 %v5594_v52  ;;  %v5678_v52 = vld [vmem:[%s7461_s1 + $0x7b0] ss:$8 sps:$4 sm:$0xff]  }
 0x1bc   : > { %4138 = vmatpush1.bf16.msra.mxu0 %v5597_v38  ;;  %3795 = vmatprep.subr.bf16.mxu1 %v5602_v39  ;;  %v5681_v38 = vld [vmem:[%s7461_s1 + $0xfb0] ss:$8 sps:$4 sm:$0xff]   ;;  %v5686_v39 = vld [vmem:[%s7461_s1 + $0x7c4] ss:$8 sps:$4 sm:$0xff]  }
 0x1bd   : > { %4139 = vmatprep.subr.bf16.mxu0 %v5605_v42  ;;  %v5689_v42 = vld [vmem:[%s7461_s1 + $0xfc4] ss:$8 sps:$4 sm:$0xff]  }
 0x1bf   : > { %3796 = vmatpush1.bf16.msra.mxu1 %v5600_v53  ;;  %v5684_v53 = vld [vmem:[%s7461_s1 + $0x7c0] ss:$8 sps:$4 sm:$0xff]  }
 0x1c0   : > { %4140 = vmatpush1.bf16.msra.mxu0 %v5603_v54  ;;  %3797 = vmatprep.subr.bf16.mxu1 %v5608_v58  ;;  %v5687_v54 = vld [vmem:[%s7461_s1 + $0xfc0] ss:$8 sps:$4 sm:$0xff]   ;;  %v5692_v58 = vld [vmem:[%s7461_s1 + $0x7d4] ss:$8 sps:$4 sm:$0xff]  }
 0x1c1   : > { %4141 = vmatprep.subr.bf16.mxu0 %v5611_v59  ;;  %v5695_v59 = vld [vmem:[%s7461_s1 + $0xfd4] ss:$8 sps:$4 sm:$0xff]  }
 0x1c3   : > { %3798 = vmatpush1.bf16.msra.mxu1 %v5606_v34  ;;  %v5690_v34 = vld [vmem:[%s7461_s1 + $0x7d0] ss:$8 sps:$4 sm:$0xff]  }
 0x1c4   : > { %4142 = vmatpush1.bf16.msra.mxu0 %v5609_v35  ;;  %3810 = vmatprep.subr.bf16.mxu1 %v5614_v46  ;;  %v5693_v35 = vld [vmem:[%s7461_s1 + $0xfd0] ss:$8 sps:$4 sm:$0xff]   ;;  %v5698_v46 = vld [vmem:[%s7461_s1 + $0x7e4] ss:$8 sps:$4 sm:$0xff]  }
 0x1c5   : > { %4154 = vmatprep.subr.bf16.mxu0 %v5617_v47  ;;  %v5701_v47 = vld [vmem:[%s7461_s1 + $0xfe4] ss:$8 sps:$4 sm:$0xff]  }
 0x1c6   : > { %3800 = vmatmul.mubr.bf16.vlgmr.msra.gmra.mrb[0].mxu1 %v4328_v61  ;;  %v5696_v61 = vld [vmem:[%s7461_s1 + $0x7e0] ss:$8 sps:$4 sm:$0xff]  }
 0x1c7   : > { %4144 = vmatmul.mubr.bf16.vlgmr.msra.gmra.mrb[0].mxu0 %v4344_v62  ;;  %3811 = vmatpush1.bf16.msra.mxu1 %v5612_v2  ;;  %v5699_v62 = vld [vmem:[%s7461_s1 + $0xfe0] ss:$8 sps:$4 sm:$0xff]   ;;  %v5704_v2 = vld [vmem:[%s7461_s1 + $0x7f4] ss:$8 sps:$4 sm:$0xff]  }
 0x1c8   : > { %4155 = vmatpush1.bf16.msra.mxu0 %v5615_v3  ;;  %3812 = vmatprep.subr.bf16.mxu1 %v5620_v43  ;;  %v5707_v3 = vld [vmem:[%s7461_s1 + $0xff4] ss:$8 sps:$4 sm:$0xff]   ;;  %v5702_v43 = vld [vmem:[%s7461_s1 + $0x7f0] ss:$8 sps:$4 sm:$0xff]  }
 0x1c9   : > { %4156 = vmatprep.subr.bf16.mxu0 %v5623_v55  ;;  %3842 = vmatprep.mubr.bf16.mxu1 %v4331_v56  ;;  %v5705_v55 = vld [vmem:[%s7461_s1 + $0xff0] ss:$8 sps:$4 sm:$0xff]   ;;  %v4330_v56 = vcombine.low %v7235_v60, %v7242_v63  ;;  %v4201_v60 = vld [vmem:[%s7463_s3] sm:$0x3] }
 0x1ca   : > { %4186 = vmatprep.mubr.bf16.mxu0 %v4347_v57  ;;  %v4346_v57 = vcombine.low %v7245_v0, %v7248_v1 }
 0x1cb   : > { %3813 = vmatpush1.bf16.msra.mxu1 %v5618_v4  ;;  %v779_v4 = vlaneseq }
 0x1cc   : > { %4157 = vmatpush1.bf16.msra.mxu0 %v5621_v5  ;;  %3814 = vmatprep.subr.bf16.mxu1 %v5626_v6 }
 0x1cd   : > { %4158 = vmatprep.subr.bf16.mxu0 %v5629_v7  ;;  %v780_v5 = vshrl.u32 %v779_v4, 7  ;;  %v777_v7 = vld [vmem:[%s7462_s2] sm:$0x3] }
 0x1cf   : > { %3815 = vmatpush1.bf16.msra.mxu1 %v5624_v8  ;;  %v781_v6 = vsub.s32 0, %v780_v5  ;;  %v785_v8 = vsub.s32 1, %v780_v5 }
 0x1d0   : > { %4159 = vmatpush1.bf16.msra.mxu0 %v5627_v9  ;;  %3816 = vmatprep.subr.bf16.mxu1 %v5632_v10 }
 0x1d1   : > { %4160 = vmatprep.subr.bf16.mxu0 %v5635_v11  ;;  %v782_v9 = vrot.slane %v777_v7, %v781_v6  ;;  %v786_v10 = vrot.slane %v777_v7, %v785_v8 }
 0x1d3   : > { %3817 = vmatpush1.bf16.msra.mxu1 %v5630_v12 }
 0x1d4   : > { %4161 = vmatpush1.bf16.msra.mxu0 %v5633_v13  ;;  %3818 = vmatprep.subr.bf16.mxu1 %v5638_v14  ;;  %v4217_v13 = vld [vmem:[%s7464_s4] sm:$0x3] }
 0x1d5   : > { %4162 = vmatprep.subr.bf16.mxu0 %v5641_v15 }
 0x1d7   : > { %3819 = vmatpush1.bf16.msra.mxu1 %v5636_v16 }
 0x1d8   : > { %4163 = vmatpush1.bf16.msra.mxu0 %v5639_v17  ;;  %3820 = vmatprep.subr.bf16.mxu1 %v5644_v18  ;;  %v4206_v18 = vrot.slane %v4201_v60, %v781_v6 }
 0x1d9   : > { %4164 = vmatprep.subr.bf16.mxu0 %v5647_v19 }
 0x1db   : > { %3821 = vmatpush1.bf16.msra.mxu1 %v5642_v20 }
 0x1dc   : > { %4165 = vmatpush1.bf16.msra.mxu0 %v5645_v21  ;;  %3822 = vmatprep.subr.bf16.mxu1 %v5650_v22 }
 0x1dd   : > { %4166 = vmatprep.subr.bf16.mxu0 %v5653_v23  ;;  %v4210_v23 = vrot.slane %v4201_v60, %v785_v8 }
 0x1df   : > { %3823 = vmatpush1.bf16.msra.mxu1 %v5648_v26 }
 0x1e0   : > { %4167 = vmatpush1.bf16.msra.mxu0 %v5651_v27  ;;  %3824 = vmatprep.subr.bf16.mxu1 %v5656_v32  ;;  %v4222_v32 = vrot.slane %v4217_v13, %v781_v6 }
 0x1e1   : > { %4168 = vmatprep.subr.bf16.mxu0 %v5659_v33 }
 0x1e3   : > { %3825 = vmatpush1.bf16.msra.mxu1 %v5654_v36 }
 0x1e4   : > { %4169 = vmatpush1.bf16.msra.mxu0 %v5657_v37  ;;  %3826 = vmatprep.subr.bf16.mxu1 %v5662_v24  ;;  %v4226_v37 = vrot.slane %v4217_v13, %v785_v8 }
 0x1e5   : > { %4170 = vmatprep.subr.bf16.mxu0 %v5665_v25 }
 0x1e7   : > { %3827 = vmatpush1.bf16.msra.mxu1 %v5660_v29 }
 0x1e8   : > { %4171 = vmatpush1.bf16.msra.mxu0 %v5663_v30  ;;  %3828 = vmatprep.subr.bf16.mxu1 %v5668_v40 }
 0x1e9   : > { %4172 = vmatprep.subr.bf16.mxu0 %v5671_v41 }
 0x1eb   : > { %3829 = vmatpush1.bf16.msra.mxu1 %v5666_v44 }
 0x1ec   : > { %4173 = vmatpush1.bf16.msra.mxu0 %v5669_v45  ;;  %3830 = vmatprep.subr.bf16.mxu1 %v5674_v28 }
 0x1ed   : > { %4174 = vmatprep.subr.bf16.mxu0 %v5677_v31 }
 0x1ef   : > { %3831 = vmatpush1.bf16.msra.mxu1 %v5672_v48 }
 0x1f0   : > { %4175 = vmatpush1.bf16.msra.mxu0 %v5675_v49  ;;  %3832 = vmatprep.subr.bf16.mxu1 %v5680_v50 }
 0x1f1   : > { %4176 = vmatprep.subr.bf16.mxu0 %v5683_v51 }
 0x1f3   : > { %3833 = vmatpush1.bf16.msra.mxu1 %v5678_v52 }
 0x1f4   : > { %4177 = vmatpush1.bf16.msra.mxu0 %v5681_v38  ;;  %3834 = vmatprep.subr.bf16.mxu1 %v5686_v39 }
 0x1f5   : > { %4178 = vmatprep.subr.bf16.mxu0 %v5689_v42 }
 0x1f7   : > { %3835 = vmatpush1.bf16.msra.mxu1 %v5684_v53 }
 0x1f8   : > { %4179 = vmatpush1.bf16.msra.mxu0 %v5687_v54  ;;  %3836 = vmatprep.subr.bf16.mxu1 %v5692_v58 }
 0x1f9   : > { %4180 = vmatprep.subr.bf16.mxu0 %v5695_v59 }
 0x1fb   : > { %3837 = vmatpush1.bf16.msra.mxu1 %v5690_v34 }
 0x1fc   : > { %4181 = vmatpush1.bf16.msra.mxu0 %v5693_v35  ;;  %3838 = vmatprep.subr.bf16.mxu1 %v5698_v46 }
 0x1fd   : > { %4182 = vmatprep.subr.bf16.mxu0 %v5701_v47 }
 0x1ff   : > { %3839 = vmatpush1.bf16.msra.mxu1 %v5696_v61 }
 0x200   : > { %4183 = vmatpush1.bf16.msra.mxu0 %v5699_v62  ;;  %3840 = vmatprep.subr.bf16.mxu1 %v5704_v2 }
 0x201   : > { %4184 = vmatprep.subr.bf16.mxu0 %v5707_v3 }
 0x203   : > { %3841 = vmatpush1.bf16.msra.mxu1 %v5702_v43 }
 0x204   : > { %4185 = vmatpush1.bf16.msra.mxu0 %v5705_v55 }
 0x206   : > { %3843 = vmatmul.mubr.bf16.vlgmr.msra.gmra.mrb[0].mxu1 %v4330_v56 }
 0x207   : > { %4187 = vmatmul.mubr.bf16.vlgmr.msra.gmra.mrb[0].mxu0 %v4346_v57 }
 0x2d9   : > { %v3844_v11 = vpop.f32.mrb[0].mxu1 }
 0x2da   : > { %v4188_v12 = vpop.f32.mrb[0].mxu0  ;;  %v4868_v63 = vadd.f32 %v3844_v11, %v782_v9  ;;  %v3846_v0 = vpop.f32.mrb[1].mxu1 }
 0x2db   : > { %v4190_v1 = vpop.f32.mrb[1].mxu0  ;;  %v4870_v14 = vadd.f32 %v3846_v0, %v786_v10  ;;  %v3848_v15 = vpop.f32.mrb[2].mxu1 }
 0x2dc   : > { %v4192_v16 = vpop.f32.mrb[2].mxu0  ;;  %v4869_v17 = vadd.f32 %v4868_v63, %v4188_v12  ;;  %v4872_v19 = vadd.f32 %v3848_v15, %v782_v9  ;;  %v3850_v20 = vpop.f32.mrb[3].mxu1 }
 0x2dd   : > { %v4194_v21 = vpop.f32.mrb[3].mxu0  ;;  %v4871_v22 = vadd.f32 %v4870_v14, %v4190_v1  ;;  %v4874_v26 = vadd.f32 %v3850_v20, %v786_v10 }
 0x2de   : > { %v4197_v27 = vmax.f32 %v4869_v17, 0.0  ;;  %v4873_v33 = vadd.f32 %v4872_v19, %v4192_v16 }
 0x2df   : > { %v4198_v36 = vmax.f32 %v4871_v22, 0.0  ;;  %v4875_v24 = vadd.f32 %v4874_v26, %v4194_v21 }
 0x2e0   : > { %v4213_v25 = vmul.f32 %v4206_v18, %v4197_v27  ;;  %v4199_v29 = vmax.f32 %v4873_v33, 0.0 }
 0x2e1   : > { %v4214_v30 = vmul.f32 %v4210_v23, %v4198_v36  ;;  %v4200_v40 = vmax.f32 %v4875_v24, 0.0 }
 0x2e2   : > { %v4229_v41 = vadd.f32 %v4222_v32, %v4213_v25  ;;  %v4215_v44 = vmul.f32 %v4206_v18, %v4199_v29 }
 0x2e3   : > { %v4230_v45 = vadd.f32 %v4226_v37, %v4214_v30  ;;  %v4216_v28 = vmul.f32 %v4210_v23, %v4200_v40 }
 0x2e4   : > { %v4231_v31 = vadd.f32 %v4222_v32, %v4215_v44 }
 0x2e5   : > { %v4866_v48 = vpack.c.bf16 %v4230_v45, %v4229_v41  ;;  %v4232_v49 = vadd.f32 %v4226_v37, %v4216_v28 }
 0x2e7   : > { %4245 = vst [vmem:[%s231_s11] sm:$0xff] %v4866_v48  ;;  %v4867_v50 = vpack.c.bf16 %v4232_v49, %v4231_v31 }
 0x2e9   : > { %4246 = vst [vmem:[%s231_s11 + $0x8] sm:$0xff] %v4867_v50 }
 0x2ea PF: > { %s15_s18 = sadd.s32 1, %s5714_s18  }
 0x2eb   : > { %p12_p4 = scmp.ge.s32.totalorder %s15_s18, 4  }
 0x2ed   :  { %14 = sbr.rel (!%p12_p4) target bundleno = 1 (0x1), region = 70 }

// kernel: encode.7
= control target key start
LH: loop header
LB: loop body
LE: loop exit
PB: predicated region body
PF: predicated region fallthrough
CT: control target
= control target key end

     0   :  { %s16874_s1 = inlined_call_operand.vmem [shape: bf16[4096,256], index: 1, kind: input, shape index: {}]   ;;  %s16875_s0 = inlined_call_operand.vmem [shape: bf16[8,4096], index: 0, kind: input, shape index: {}]   ;;  %s16876_s4 = inlined_call_operand.vmem [shape: bf16[9,256,256], index: 4, kind: input, shape index: {}]   ;;  %s16877_s2 = inlined_call_operand.vmem [shape: f32[1,256], index: 2, kind: input, shape index: {}]   ;;  %s16878_s3 = inlined_call_operand.vmem [shape: f32[6,256], index: 3, kind: input, shape index: {}]   ;;  %s16879_s5 = inlined_call_operand.vmem [shape: bf16[256,256], index: 5, kind: input, shape index: {}]   ;;  %s16880_s7 = inlined_call_operand.vmem [shape: bf16[9,256,256], index: 7, kind: input, shape index: {}]   ;;  %s16881_s6 = inlined_call_operand.vmem [shape: f32[6,256], index: 6, kind: input, shape index: {}]   ;;  %s16882_s8 = inlined_call_operand.vmem [shape: bf16[256,256], index: 8, kind: input, shape index: {}]   ;;  %s16883_s9 = inlined_call_operand.vmem [shape: f32[256,128], index: 9, kind: input, shape index: {}]   ;;  %s16884_s10 = inlined_call_operand.vmem [shape: f32[1,128], index: 10, kind: input, shape index: {}]   ;;  %s16885_s11 = inlined_call_operand.vmem [shape: s32[8,128], index: 11, kind: output, shape index: {}]  }
   0x1   :  { %v10968_v0 = vld [vmem:[%s16874_s1 + $0x4] ss:$8 sps:$4 sm:$0xff]   ;;  %v10970_v1 = vld [vmem:[%s16874_s1] ss:$8 sps:$4 sm:$0xff]   ;;  %v10971_v2 = vld [vmem:[%s16874_s1 + $0x14] ss:$8 sps:$4 sm:$0xff]  }
   0x2   :  { %3250 = vmatprep.subr.bf16.mxu0 %v10968_v0  ;;  %v10973_v3 = vld [vmem:[%s16874_s1 + $0x10] ss:$8 sps:$4 sm:$0xff]   ;;  %v10974_v4 = vld [vmem:[%s16874_s1 + $0x24] ss:$8 sps:$4 sm:$0xff]   ;;  %v10976_v5 = vld [vmem:[%s16874_s1 + $0x20] ss:$8 sps:$4 sm:$0xff]  }
   0x3   :  { %3251 = vmatpush1.bf16.msra.mxu0 %v10970_v1  ;;  %v10977_v6 = vld [vmem:[%s16874_s1 + $0x34] ss:$8 sps:$4 sm:$0xff]   ;;  %v10979_v7 = vld [vmem:[%s16874_s1 + $0x30] ss:$8 sps:$4 sm:$0xff]   ;;  %v10980_v8 = vld [vmem:[%s16874_s1 + $0x44] ss:$8 sps:$4 sm:$0xff]  }
   0x4   :  { %3252 = vmatprep.subr.bf16.mxu0 %v10971_v2  ;;  %v10982_v9 = vld [vmem:[%s16874_s1 + $0x40] ss:$8 sps:$4 sm:$0xff]   ;;  %v10983_v10 = vld [vmem:[%s16874_s1 + $0x54] ss:$8 sps:$4 sm:$0xff]   ;;  %v10985_v11 = vld [vmem:[%s16874_s1 + $0x50] ss:$8 sps:$4 sm:$0xff]  }
   0x5   :  { %v10986_v12 = vld [vmem:[%s16874_s1 + $0x64] ss:$8 sps:$4 sm:$0xff]   ;;  %v10988_v15 = vld [vmem:[%s16874_s1 + $0x60] ss:$8 sps:$4 sm:$0xff]   ;;  %v10989_v16 = vld [vmem:[%s16874_s1 + $0x74] ss:$8 sps:$4 sm:$0xff]  }
   0x6   :  { %v38_v13 = vld [vmem:[%s16875_s0] sm:$0xff]  ;;  %v10991_v17 = vld [vmem:[%s16874_s1 + $0x70] ss:$8 sps:$4 sm:$0xff]   ;;  %v10995_v20 = vld [vmem:[%s16874_s1 + $0x94] ss:$8 sps:$4 sm:$0xff]  }
   0x7   :  { %3253 = vmatpush1.bf16.msra.mxu0 %v10973_v3  ;;  %v9143_v14 = vcombine.high %v38_v13, %v38_v13  ;;  %v10992_v18 = vld [vmem:[%s16874_s1 + $0x84] ss:$8 sps:$4 sm:$0xff]   ;;  %v10994_v19 = vld [vmem:[%s16874_s1 + $0x80] ss:$8 sps:$4 sm:$0xff]   ;;  %v10997_v21 = vld [vmem:[%s16874_s1 + $0x90] ss:$8 sps:$4 sm:$0xff]   ;;  %v9142_v36 = vcombine.low %v38_v13, %v38_v13 }
   0x8   :  { %3254 = vmatprep.subr.bf16.mxu0 %v10974_v4  ;;  %v10998_v22 = vld [vmem:[%s16874_s1 + $0xa4] ss:$8 sps:$4 sm:$0xff]   ;;  %v11000_v23 = vld [vmem:[%s16874_s1 + $0xa0] ss:$8 sps:$4 sm:$0xff]   ;;  %v11001_v24 = vld [vmem:[%s16874_s1 + $0xb4] ss:$8 sps:$4 sm:$0xff]  }
   0x9   :  { %3282 = vmatprep.mubr.bf16.mxu0 %v9143_v14  ;;  %v11003_v25 = vld [vmem:[%s16874_s1 + $0xb0] ss:$8 sps:$4 sm:$0xff]   ;;  %v11004_v26 = vld [vmem:[%s16874_s1 + $0xc4] ss:$8 sps:$4 sm:$0xff]   ;;  %v11006_v27 = vld [vmem:[%s16874_s1 + $0xc0] ss:$8 sps:$4 sm:$0xff]  }
   0xa   :  { %v11007_v28 = vld [vmem:[%s16874_s1 + $0xd4] ss:$8 sps:$4 sm:$0xff]   ;;  %v11009_v29 = vld [vmem:[%s16874_s1 + $0xd0] ss:$8 sps:$4 sm:$0xff]   ;;  %v11010_v30 = vld [vmem:[%s16874_s1 + $0xe4] ss:$8 sps:$4 sm:$0xff]  }
   0xb   :  { %3255 = vmatpush1.bf16.msra.mxu0 %v10976_v5  ;;  %v11012_v31 = vld [vmem:[%s16874_s1 + $0xe0] ss:$8 sps:$4 sm:$0xff]   ;;  %v11013_v32 = vld [vmem:[%s16874_s1 + $0xf4] ss:$8 sps:$4 sm:$0xff]   ;;  %v11015_v33 = vld [vmem:[%s16874_s1 + $0xf0] ss:$8 sps:$4 sm:$0xff]  }
   0xc   :  { %3256 = vmatprep.subr.bf16.mxu0 %v10977_v6  ;;  %v11020_v34 = vld [vmem:[%s16874_s1 + $0x104] ss:$8 sps:$4 sm:$0xff]   ;;  %v11018_v37 = vld [vmem:[%s16874_s1 + $0x100] ss:$8 sps:$4 sm:$0xff]   ;;  %v11023_v39 = vld [vmem:[%s16874_s1 + $0x114] ss:$8 sps:$4 sm:$0xff]  }
   0xd   :  { %v12899_v35 = vld [vmem:[%s16875_s0 + $0x8] sm:$0xff]  ;;  %v11021_v40 = vld [vmem:[%s16874_s1 + $0x110] ss:$8 sps:$4 sm:$0xff]   ;;  %v11029_v43 = vld [vmem:[%s16874_s1 + $0x134] ss:$8 sps:$4 sm:$0xff]  }
   0xe   :  { %v9145_v38 = vcombine.high %v12899_v35, %v12899_v35  ;;  %v11026_v41 = vld [vmem:[%s16874_s1 + $0x124] ss:$8 sps:$4 sm:$0xff]   ;;  %v11024_v42 = vld [vmem:[%s16874_s1 + $0x120] ss:$8 sps:$4 sm:$0xff]   ;;  %v11027_v44 = vld [vmem:[%s16874_s1 + $0x130] ss:$8 sps:$4 sm:$0xff]  }
   0xf   :  { %3257 = vmatpush1.bf16.msra.mxu0 %v10979_v7  ;;  %v11032_v45 = vld [vmem:[%s16874_s1 + $0x144] ss:$8 sps:$4 sm:$0xff]   ;;  %v11030_v46 = vld [vmem:[%s16874_s1 + $0x140] ss:$8 sps:$4 sm:$0xff]   ;;  %v11035_v47 = vld [vmem:[%s16874_s1 + $0x154] ss:$8 sps:$4 sm:$0xff]   ;;  %v9144_v7 = vcombine.low %v12899_v35, %v12899_v35 }
  0x10   :  { %3258 = vmatprep.subr.bf16.mxu0 %v10980_v8  ;;  %v11033_v48 = vld [vmem:[%s16874_s1 + $0x150] ss:$8 sps:$4 sm:$0xff]   ;;  %v11038_v49 = vld [vmem:[%s16874_s1 + $0x164] ss:$8 sps:$4 sm:$0xff]   ;;  %v11036_v50 = vld [vmem:[%s16874_s1 + $0x160] ss:$8 sps:$4 sm:$0xff]  }
  0x11   :  { %v11041_v51 = vld [vmem:[%s16874_s1 + $0x174] ss:$8 sps:$4 sm:$0xff]   ;;  %v11039_v52 = vld [vmem:[%s16874_s1 + $0x170] ss:$8 sps:$4 sm:$0xff]   ;;  %v11044_v53 = vld [vmem:[%s16874_s1 + $0x184] ss:$8 sps:$4 sm:$0xff]  }
  0x12   :  { %v11042_v54 = vld [vmem:[%s16874_s1 + $0x180] ss:$8 sps:$4 sm:$0xff]   ;;  %v11047_v55 = vld [vmem:[%s16874_s1 + $0x194] ss:$8 sps:$4 sm:$0xff]   ;;  %v11045_v56 = vld [vmem:[%s16874_s1 + $0x190] ss:$8 sps:$4 sm:$0xff]  }
  0x13   :  { %3259 = vmatpush1.bf16.msra.mxu0 %v10982_v9  ;;  %v11050_v57 = vld [vmem:[%s16874_s1 + $0x1a4] ss:$8 sps:$4 sm:$0xff]   ;;  %v11048_v58 = vld [vmem:[%s16874_s1 + $0x1a0] ss:$8 sps:$4 sm:$0xff]   ;;  %v11053_v59 = vld [vmem:[%s16874_s1 + $0x1b4] ss:$8 sps:$4 sm:$0xff]  }
  0x14   :  { %3260 = vmatprep.subr.bf16.mxu0 %v10983_v10  ;;  %v11051_v60 = vld [vmem:[%s16874_s1 + $0x1b0] ss:$8 sps:$4 sm:$0xff]   ;;  %v11056_v61 = vld [vmem:[%s16874_s1 + $0x1c4] ss:$8 sps:$4 sm:$0xff]   ;;  %v11054_v62 = vld [vmem:[%s16874_s1 + $0x1c0] ss:$8 sps:$4 sm:$0xff]  }
  0x15   :  { %v11059_v63 = vld [vmem:[%s16874_s1 + $0x1d4] ss:$8 sps:$4 sm:$0xff]   ;;  %v11057_v0 = vld [vmem:[%s16874_s1 + $0x1d0] ss:$8 sps:$4 sm:$0xff]   ;;  %v11062_v1 = vld [vmem:[%s16874_s1 + $0x1e4] ss:$8 sps:$4 sm:$0xff]  }
  0x16   :  { %v11060_v2 = vld [vmem:[%s16874_s1 + $0x1e0] ss:$8 sps:$4 sm:$0xff]   ;;  %v11065_v3 = vld [vmem:[%s16874_s1 + $0x1f4] ss:$8 sps:$4 sm:$0xff]   ;;  %v11063_v4 = vld [vmem:[%s16874_s1 + $0x1f0] ss:$8 sps:$4 sm:$0xff]  }
  0x17   :  { %3261 = vmatpush1.bf16.msra.mxu0 %v10985_v11  ;;  %v11070_v5 = vld [vmem:[%s16874_s1 + $0x204] ss:$8 sps:$4 sm:$0xff]   ;;  %v13002_v6 = vld [vmem:[%s16875_s0 + $0x10] sm:$0xff]  ;;  %v11068_v8 = vld [vmem:[%s16874_s1 + $0x200] ss:$8 sps:$4 sm:$0xff]  }
  0x18   :  { %3262 = vmatprep.subr.bf16.mxu0 %v10986_v12  ;;  %v11073_v9 = vld [vmem:[%s16874_s1 + $0x214] ss:$8 sps:$4 sm:$0xff]   ;;  %v9147_v10 = vcombine.high %v13002_v6, %v13002_v6  ;;  %v11071_v11 = vld [vmem:[%s16874_s1 + $0x210] ss:$8 sps:$4 sm:$0xff]   ;;  %v11076_v12 = vld [vmem:[%s16874_s1 + $0x224] ss:$8 sps:$4 sm:$0xff]  }
  0x19   :  { %v11074_v13 = vld [vmem:[%s16874_s1 + $0x220] ss:$8 sps:$4 sm:$0xff]   ;;  %v11079_v14 = vld [vmem:[%s16874_s1 + $0x234] ss:$8 sps:$4 sm:$0xff]   ;;  %v11107_v35 = vld [vmem:[%s16874_s1 + $0x2d0] ss:$8 sps:$4 sm:$0xff]  }
  0x1b   :  { %3263 = vmatpush1.bf16.msra.mxu0 %v10988_v15  ;;  %v11077_v15 = vld [vmem:[%s16874_s1 + $0x230] ss:$8 sps:$4 sm:$0xff]  }
  0x1c   :  { %3264 = vmatprep.subr.bf16.mxu0 %v10989_v16  ;;  %v11082_v16 = vld [vmem:[%s16874_s1 + $0x244] ss:$8 sps:$4 sm:$0xff]  }
  0x1f   :  { %3265 = vmatpush1.bf16.msra.mxu0 %v10991_v17  ;;  %v11080_v17 = vld [vmem:[%s16874_s1 + $0x240] ss:$8 sps:$4 sm:$0xff]  }
  0x20   :  { %3266 = vmatprep.subr.bf16.mxu0 %v10992_v18  ;;  %v11085_v18 = vld [vmem:[%s16874_s1 + $0x254] ss:$8 sps:$4 sm:$0xff]  }
  0x23   :  { %3267 = vmatpush1.bf16.msra.mxu0 %v10994_v19  ;;  %v11083_v19 = vld [vmem:[%s16874_s1 + $0x250] ss:$8 sps:$4 sm:$0xff]  }
  0x24   :  { %3268 = vmatprep.subr.bf16.mxu0 %v10995_v20  ;;  %v11088_v20 = vld [vmem:[%s16874_s1 + $0x264] ss:$8 sps:$4 sm:$0xff]  }
  0x27   :  { %3269 = vmatpush1.bf16.msra.mxu0 %v10997_v21  ;;  %v11086_v21 = vld [vmem:[%s16874_s1 + $0x260] ss:$8 sps:$4 sm:$0xff]  }
  0x28   :  { %3270 = vmatprep.subr.bf16.mxu0 %v10998_v22  ;;  %v11091_v22 = vld [vmem:[%s16874_s1 + $0x274] ss:$8 sps:$4 sm:$0xff]  }
  0x2b   :  { %3271 = vmatpush1.bf16.msra.mxu0 %v11000_v23  ;;  %v11089_v23 = vld [vmem:[%s16874_s1 + $0x270] ss:$8 sps:$4 sm:$0xff]  }
  0x2c   :  { %3272 = vmatprep.subr.bf16.mxu0 %v11001_v24  ;;  %v11094_v24 = vld [vmem:[%s16874_s1 + $0x284] ss:$8 sps:$4 sm:$0xff]  }
  0x2f   :  { %3273 = vmatpush1.bf16.msra.mxu0 %v11003_v25  ;;  %v11092_v25 = vld [vmem:[%s16874_s1 + $0x280] ss:$8 sps:$4 sm:$0xff]  }
  0x30   :  { %3274 = vmatprep.subr.bf16.mxu0 %v11004_v26  ;;  %v11097_v26 = vld [vmem:[%s16874_s1 + $0x294] ss:$8 sps:$4 sm:$0xff]  }
  0x33   :  { %3275 = vmatpush1.bf16.msra.mxu0 %v11006_v27  ;;  %v11095_v27 = vld [vmem:[%s16874_s1 + $0x290] ss:$8 sps:$4 sm:$0xff]  }
  0x34   :  { %3276 = vmatprep.subr.bf16.mxu0 %v11007_v28  ;;  %v11100_v28 = vld [vmem:[%s16874_s1 + $0x2a4] ss:$8 sps:$4 sm:$0xff]  }
  0x37   :  { %3277 = vmatpush1.bf16.msra.mxu0 %v11009_v29  ;;  %v11098_v29 = vld [vmem:[%s16874_s1 + $0x2a0] ss:$8 sps:$4 sm:$0xff]  }
  0x38   :  { %3278 = vmatprep.subr.bf16.mxu0 %v11010_v30  ;;  %v11103_v30 = vld [vmem:[%s16874_s1 + $0x2b4] ss:$8 sps:$4 sm:$0xff]  }
  0x3b   :  { %3279 = vmatpush1.bf16.msra.mxu0 %v11012_v31  ;;  %v11101_v31 = vld [vmem:[%s16874_s1 + $0x2b0] ss:$8 sps:$4 sm:$0xff]  }
  0x3c   :  { %3280 = vmatprep.subr.bf16.mxu0 %v11013_v32  ;;  %v11106_v32 = vld [vmem:[%s16874_s1 + $0x2c4] ss:$8 sps:$4 sm:$0xff]  }
  0x3f   :  { %3281 = vmatpush1.bf16.msra.mxu0 %v11015_v33  ;;  %v11104_v33 = vld [vmem:[%s16874_s1 + $0x2c0] ss:$8 sps:$4 sm:$0xff]  }
  0x40   :  { %3291 = vmatprep.subr.bf16.mxu0 %v11020_v34  ;;  %v11109_v34 = vld [vmem:[%s16874_s1 + $0x2d4] ss:$8 sps:$4 sm:$0xff]  }
  0x42   :  { %3283 = vmatmul.mubr.bf16.vlgmr.msra.gmra.mrb[0].mxu0 %v9142_v36  ;;  %v11112_v36 = vld [vmem:[%s16874_s1 + $0x2e4] ss:$8 sps:$4 sm:$0xff]  }
  0x43   :  { %3292 = vmatpush1.bf16.msra.mxu0 %v11018_v37  ;;  %3323 = vmatprep.mubr.bf16.mxu0 %v9145_v38  ;;  %v11110_v37 = vld [vmem:[%s16874_s1 + $0x2e0] ss:$8 sps:$4 sm:$0xff]   ;;  %v11115_v38 = vld [vmem:[%s16874_s1 + $0x2f4] ss:$8 sps:$4 sm:$0xff]  }
  0x44   :  { %3293 = vmatprep.subr.bf16.mxu0 %v11023_v39  ;;  %v11113_v39 = vld [vmem:[%s16874_s1 + $0x2f0] ss:$8 sps:$4 sm:$0xff]  }
  0x47   :  { %3294 = vmatpush1.bf16.msra.mxu0 %v11021_v40  ;;  %v11120_v40 = vld [vmem:[%s16874_s1 + $0x304] ss:$8 sps:$4 sm:$0xff]  }
  0x48   :  { %3295 = vmatprep.subr.bf16.mxu0 %v11026_v41  ;;  %v13107_v41 = vld [vmem:[%s16875_s0 + $0x18] sm:$0xff] }
  0x4b   :  { %3296 = vmatpush1.bf16.msra.mxu0 %v11024_v42  ;;  %v9146_v42 = vcombine.low %v13002_v6, %v13002_v6  ;;  %v11157_v6 = vld [vmem:[%s16874_s1 + $0x3d0] ss:$8 sps:$4 sm:$0xff]  }
  0x4c   :  { %3297 = vmatprep.subr.bf16.mxu0 %v11029_v43  ;;  %v11118_v43 = vld [vmem:[%s16874_s1 + $0x300] ss:$8 sps:$4 sm:$0xff]  }
  0x4f   :  { %3298 = vmatpush1.bf16.msra.mxu0 %v11027_v44  ;;  %v11123_v44 = vld [vmem:[%s16874_s1 + $0x314] ss:$8 sps:$4 sm:$0xff]  }
  0x50   :  { %3299 = vmatprep.subr.bf16.mxu0 %v11032_v45  ;;  %v9149_v45 = vcombine.high %v13107_v41, %v13107_v41 }
  0x53   :  { %3300 = vmatpush1.bf16.msra.mxu0 %v11030_v46  ;;  %v11121_v46 = vld [vmem:[%s16874_s1 + $0x310] ss:$8 sps:$4 sm:$0xff]  }
  0x54   :  { %3301 = vmatprep.subr.bf16.mxu0 %v11035_v47  ;;  %v11126_v47 = vld [vmem:[%s16874_s1 + $0x324] ss:$8 sps:$4 sm:$0xff]  }
  0x57   :  { %3302 = vmatpush1.bf16.msra.mxu0 %v11033_v48  ;;  %v11124_v48 = vld [vmem:[%s16874_s1 + $0x320] ss:$8 sps:$4 sm:$0xff]  }
  0x58   :  { %3303 = vmatprep.subr.bf16.mxu0 %v11038_v49  ;;  %v11129_v49 = vld [vmem:[%s16874_s1 + $0x334] ss:$8 sps:$4 sm:$0xff]  }
  0x5b   :  { %3304 = vmatpush1.bf16.msra.mxu0 %v11036_v50  ;;  %v11127_v50 = vld [vmem:[%s16874_s1 + $0x330] ss:$8 sps:$4 sm:$0xff]  }
  0x5c   :  { %3305 = vmatprep.subr.bf16.mxu0 %v11041_v51  ;;  %v11132_v51 = vld [vmem:[%s16874_s1 + $0x344] ss:$8 sps:$4 sm:$0xff]  }
  0x5f   :  { %3306 = vmatpush1.bf16.msra.mxu0 %v11039_v52  ;;  %v11130_v52 = vld [vmem:[%s16874_s1 + $0x340] ss:$8 sps:$4 sm:$0xff]  }
  0x60   :  { %3307 = vmatprep.subr.bf16.mxu0 %v11044_v53  ;;  %v11135_v53 = vld [vmem:[%s16874_s1 + $0x354] ss:$8 sps:$4 sm:$0xff]  }
  0x63   :  { %3308 = vmatpush1.bf16.msra.mxu0 %v11042_v54  ;;  %v11133_v54 = vld [vmem:[%s16874_s1 + $0x350] ss:$8 sps:$4 sm:$0xff]  }
  0x64   :  { %3309 = vmatprep.subr.bf16.mxu0 %v11047_v55  ;;  %v11138_v55 = vld [vmem:[%s16874_s1 + $0x364] ss:$8 sps:$4 sm:$0xff]  }
  0x67   :  { %3310 = vmatpush1.bf16.msra.mxu0 %v11045_v56  ;;  %v11136_v56 = vld [vmem:[%s16874_s1 + $0x360] ss:$8 sps:$4 sm:$0xff]  }
  0x68   :  { %3311 = vmatprep.subr.bf16.mxu0 %v11050_v57  ;;  %v11141_v57 = vld [vmem:[%s16874_s1 + $0x374] ss:$8 sps:$4 sm:$0xff]  }
  0x6b   :  { %3312 = vmatpush1.bf16.msra.mxu0 %v11048_v58  ;;  %v11139_v58 = vld [vmem:[%s16874_s1 + $0x370] ss:$8 sps:$4 sm:$0xff]  }
  0x6c   :  { %3313 = vmatprep.subr.bf16.mxu0 %v11053_v59  ;;  %v11144_v59 = vld [vmem:[%s16874_s1 + $0x384] ss:$8 sps:$4 sm:$0xff]  }
  0x6f   :  { %3314 = vmatpush1.bf16.msra.mxu0 %v11051_v60  ;;  %v11142_v60 = vld [vmem:[%s16874_s1 + $0x380] ss:$8 sps:$4 sm:$0xff]  }
  0x70   :  { %3315 = vmatprep.subr.bf16.mxu0 %v11056_v61  ;;  %v11147_v61 = vld [vmem:[%s16874_s1 + $0x394] ss:$8 sps:$4 sm:$0xff]  }
  0x73   :  { %3316 = vmatpush1.bf16.msra.mxu0 %v11054_v62  ;;  %v11145_v62 = vld [vmem:[%s16874_s1 + $0x390] ss:$8 sps:$4 sm:$0xff]  }
  0x74   :  { %3317 = vmatprep.subr.bf16.mxu0 %v11059_v63  ;;  %v11150_v63 = vld [vmem:[%s16874_s1 + $0x3a4] ss:$8 sps:$4 sm:$0xff]  }
  0x77   :  { %3318 = vmatpush1.bf16.msra.mxu0 %v11057_v0  ;;  %v11148_v0 = vld [vmem:[%s16874_s1 + $0x3a0] ss:$8 sps:$4 sm:$0xff]  }
  0x78   :  { %3319 = vmatprep.subr.bf16.mxu0 %v11062_v1  ;;  %v11153_v1 = vld [vmem:[%s16874_s1 + $0x3b4] ss:$8 sps:$4 sm:$0xff]  }
  0x7b   :  { %3320 = vmatpush1.bf16.msra.mxu0 %v11060_v2  ;;  %v11151_v2 = vld [vmem:[%s16874_s1 + $0x3b0] ss:$8 sps:$4 sm:$0xff]  }
  0x7c   :  { %3321 = vmatprep.subr.bf16.mxu0 %v11065_v3  ;;  %v11156_v3 = vld [vmem:[%s16874_s1 + $0x3c4] ss:$8 sps:$4 sm:$0xff]  }
  0x7f   :  { %3322 = vmatpush1.bf16.msra.mxu0 %v11063_v4  ;;  %v11154_v4 = vld [vmem:[%s16874_s1 + $0x3c0] ss:$8 sps:$4 sm:$0xff]  }
  0x80   :  { %3332 = vmatprep.subr.bf16.mxu0 %v11070_v5  ;;  %v11159_v5 = vld [vmem:[%s16874_s1 + $0x3d4] ss:$8 sps:$4 sm:$0xff]  }
  0x82   :  { %3324 = vmatmul.mubr.bf16.vlgmr.msra.gmra.mrb[0].mxu0 %v9144_v7  ;;  %v11162_v7 = vld [vmem:[%s16874_s1 + $0x3e4] ss:$8 sps:$4 sm:$0xff]  }
  0x83   :  { %3333 = vmatpush1.bf16.msra.mxu0 %v11068_v8  ;;  %3364 = vmatprep.mubr.bf16.mxu0 %v9147_v10  ;;  %v11160_v8 = vld [vmem:[%s16874_s1 + $0x3e0] ss:$8 sps:$4 sm:$0xff]   ;;  %v11163_v10 = vld [vmem:[%s16874_s1 + $0x3f0] ss:$8 sps:$4 sm:$0xff]  }
  0x84   :  { %3334 = vmatprep.subr.bf16.mxu0 %v11073_v9  ;;  %v11165_v9 = vld [vmem:[%s16874_s1 + $0x3f4] ss:$8 sps:$4 sm:$0xff]  }
  0x87   :  { %3335 = vmatpush1.bf16.msra.mxu0 %v11071_v11  ;;  %v11170_v11 = vld [vmem:[%s16874_s1 + $0x404] ss:$8 sps:$4 sm:$0xff]  }
  0x88   :  { %3336 = vmatprep.subr.bf16.mxu0 %v11076_v12  ;;  %v13212_v12 = vld [vmem:[%s16875_s0 + $0x20] sm:$0xff] }
  0x8b   :  { %3337 = vmatpush1.bf16.msra.mxu0 %v11074_v13  ;;  %v9148_v13 = vcombine.low %v13107_v41, %v13107_v41  ;;  %v11207_v41 = vld [vmem:[%s16874_s1 + $0x4d0] ss:$8 sps:$4 sm:$0xff]  }
  0x8c   :  { %3338 = vmatprep.subr.bf16.mxu0 %v11079_v14  ;;  %v11168_v14 = vld [vmem:[%s16874_s1 + $0x400] ss:$8 sps:$4 sm:$0xff]  }
  0x8f   :  { %3339 = vmatpush1.bf16.msra.mxu0 %v11077_v15  ;;  %v9151_v15 = vcombine.high %v13212_v12, %v13212_v12 }
  0x90   :  { %3340 = vmatprep.subr.bf16.mxu0 %v11082_v16  ;;  %v11173_v16 = vld [vmem:[%s16874_s1 + $0x414] ss:$8 sps:$4 sm:$0xff]  }
  0x93   :  { %3341 = vmatpush1.bf16.msra.mxu0 %v11080_v17  ;;  %v11171_v17 = vld [vmem:[%s16874_s1 + $0x410] ss:$8 sps:$4 sm:$0xff]  }
  0x94   :  { %3342 = vmatprep.subr.bf16.mxu0 %v11085_v18  ;;  %v11176_v18 = vld [vmem:[%s16874_s1 + $0x424] ss:$8 sps:$4 sm:$0xff]  }
  0x97   :  { %3343 = vmatpush1.bf16.msra.mxu0 %v11083_v19  ;;  %v11174_v19 = vld [vmem:[%s16874_s1 + $0x420] ss:$8 sps:$4 sm:$0xff]  }
  0x98   :  { %3344 = vmatprep.subr.bf16.mxu0 %v11088_v20  ;;  %v11179_v20 = vld [vmem:[%s16874_s1 + $0x434] ss:$8 sps:$4 sm:$0xff]  }
  0x9b   :  { %3345 = vmatpush1.bf16.msra.mxu0 %v11086_v21  ;;  %v11177_v21 = vld [vmem:[%s16874_s1 + $0x430] ss:$8 sps:$4 sm:$0xff]  }
  0x9c   :  { %3346 = vmatprep.subr.bf16.mxu0 %v11091_v22  ;;  %v11182_v22 = vld [vmem:[%s16874_s1 + $0x444] ss:$8 sps:$4 sm:$0xff]  }
  0x9f   :  { %3347 = vmatpush1.bf16.msra.mxu0 %v11089_v23  ;;  %v11180_v23 = vld [vmem:[%s16874_s1 + $0x440] ss:$8 sps:$4 sm:$0xff]  }
  0xa0   :  { %3348 = vmatprep.subr.bf16.mxu0 %v11094_v24  ;;  %v11185_v24 = vld [vmem:[%s16874_s1 + $0x454] ss:$8 sps:$4 sm:$0xff]  }
  0xa3   :  { %3349 = vmatpush1.bf16.msra.mxu0 %v11092_v25  ;;  %v11183_v25 = vld [vmem:[%s16874_s1 + $0x450] ss:$8 sps:$4 sm:$0xff]  }
  0xa4   :  { %3350 = vmatprep.subr.bf16.mxu0 %v11097_v26  ;;  %v11188_v26 = vld [vmem:[%s16874_s1 + $0x464] ss:$8 sps:$4 sm:$0xff]  }
  0xa7   :  { %3351 = vmatpush1.bf16.msra.mxu0 %v11095_v27  ;;  %v11186_v27 = vld [vmem:[%s16874_s1 + $0x460] ss:$8 sps:$4 sm:$0xff]  }
  0xa8   :  { %3352 = vmatprep.subr.bf16.mxu0 %v11100_v28  ;;  %v11191_v28 = vld [vmem:[%s16874_s1 + $0x474] ss:$8 sps:$4 sm:$0xff]  }
  0xab   :  { %3353 = vmatpush1.bf16.msra.mxu0 %v11098_v29  ;;  %v11189_v29 = vld [vmem:[%s16874_s1 + $0x470] ss:$8 sps:$4 sm:$0xff]  }
  0xac   :  { %3354 = vmatprep.subr.bf16.mxu0 %v11103_v30  ;;  %v11194_v30 = vld [vmem:[%s16874_s1 + $0x484] ss:$8 sps:$4 sm:$0xff]  }
  0xaf   :  { %3355 = vmatpush1.bf16.msra.mxu0 %v11101_v31  ;;  %v11192_v31 = vld [vmem:[%s16874_s1 + $0x480] ss:$8 sps:$4 sm:$0xff]  }
  0xb0   :  { %3356 = vmatprep.subr.bf16.mxu0 %v11106_v32  ;;  %v11197_v32 = vld [vmem:[%s16874_s1 + $0x494] ss:$8 sps:$4 sm:$0xff]  }
  0xb3   :  { %3357 = vmatpush1.bf16.msra.mxu0 %v11104_v33  ;;  %v11195_v33 = vld [vmem:[%s16874_s1 + $0x490] ss:$8 sps:$4 sm:$0xff]  }
  0xb4   :  { %3358 = vmatprep.subr.bf16.mxu0 %v11109_v34  ;;  %v11200_v34 = vld [vmem:[%s16874_s1 + $0x4a4] ss:$8 sps:$4 sm:$0xff]  }
  0xb7   :  { %3359 = vmatpush1.bf16.msra.mxu0 %v11107_v35  ;;  %v11198_v35 = vld [vmem:[%s16874_s1 + $0x4a0] ss:$8 sps:$4 sm:$0xff]  }
  0xb8   :  { %3360 = vmatprep.subr.bf16.mxu0 %v11112_v36  ;;  %v11203_v36 = vld [vmem:[%s16874_s1 + $0x4b4] ss:$8 sps:$4 sm:$0xff]  }
  0xbb   :  { %3361 = vmatpush1.bf16.msra.mxu0 %v11110_v37  ;;  %v11201_v37 = vld [vmem:[%s16874_s1 + $0x4b0] ss:$8 sps:$4 sm:$0xff]  }
  0xbc   :  { %3362 = vmatprep.subr.bf16.mxu0 %v11115_v38  ;;  %v11206_v38 = vld [vmem:[%s16874_s1 + $0x4c4] ss:$8 sps:$4 sm:$0xff]  }
  0xbf   :  { %3363 = vmatpush1.bf16.msra.mxu0 %v11113_v39  ;;  %v11204_v39 = vld [vmem:[%s16874_s1 + $0x4c0] ss:$8 sps:$4 sm:$0xff]  }
  0xc0   :  { %3373 = vmatprep.subr.bf16.mxu0 %v11120_v40  ;;  %v11209_v40 = vld [vmem:[%s16874_s1 + $0x4d4] ss:$8 sps:$4 sm:$0xff]  }
  0xc2   :  { %3365 = vmatmul.mubr.bf16.vlgmr.msra.gmra.mrb[0].mxu0 %v9146_v42  ;;  %v11212_v42 = vld [vmem:[%s16874_s1 + $0x4e4] ss:$8 sps:$4 sm:$0xff]  }
  0xc3   :  { %3374 = vmatpush1.bf16.msra.mxu0 %v11118_v43  ;;  %3405 = vmatprep.mubr.bf16.mxu0 %v9149_v45  ;;  %v11210_v43 = vld [vmem:[%s16874_s1 + $0x4e0] ss:$8 sps:$4 sm:$0xff]   ;;  %v11213_v45 = vld [vmem:[%s16874_s1 + $0x4f0] ss:$8 sps:$4 sm:$0xff]  }
  0xc4   :  { %3375 = vmatprep.subr.bf16.mxu0 %v11123_v44  ;;  %v11215_v44 = vld [vmem:[%s16874_s1 + $0x4f4] ss:$8 sps:$4 sm:$0xff]  }
  0xc7   :  { %3376 = vmatpush1.bf16.msra.mxu0 %v11121_v46  ;;  %v11220_v46 = vld [vmem:[%s16874_s1 + $0x504] ss:$8 sps:$4 sm:$0xff]  }
  0xc8   :  { %3377 = vmatprep.subr.bf16.mxu0 %v11126_v47  ;;  %v13317_v47 = vld [vmem:[%s16875_s0 + $0x28] sm:$0xff] }
  0xcb   :  { %3378 = vmatpush1.bf16.msra.mxu0 %v11124_v48  ;;  %v9150_v48 = vcombine.low %v13212_v12, %v13212_v12  ;;  %v11257_v12 = vld [vmem:[%s16874_s1 + $0x5d0] ss:$8 sps:$4 sm:$0xff]  }
  0xcc   :  { %3379 = vmatprep.subr.bf16.mxu0 %v11129_v49  ;;  %v11218_v49 = vld [vmem:[%s16874_s1 + $0x500] ss:$8 sps:$4 sm:$0xff]  }
  0xcf   :  { %3380 = vmatpush1.bf16.msra.mxu0 %v11127_v50  ;;  %v9153_v50 = vcombine.high %v13317_v47, %v13317_v47 }
  0xd0   :  { %3381 = vmatprep.subr.bf16.mxu0 %v11132_v51  ;;  %v11223_v51 = vld [vmem:[%s16874_s1 + $0x514] ss:$8 sps:$4 sm:$0xff]  }
  0xd3   :  { %3382 = vmatpush1.bf16.msra.mxu0 %v11130_v52  ;;  %v11221_v52 = vld [vmem:[%s16874_s1 + $0x510] ss:$8 sps:$4 sm:$0xff]  }
  0xd4   :  { %3383 = vmatprep.subr.bf16.mxu0 %v11135_v53  ;;  %v11226_v53 = vld [vmem:[%s16874_s1 + $0x524] ss:$8 sps:$4 sm:$0xff]  }
  0xd7   :  { %3384 = vmatpush1.bf16.msra.mxu0 %v11133_v54  ;;  %v11224_v54 = vld [vmem:[%s16874_s1 + $0x520] ss:$8 sps:$4 sm:$0xff]  }
  0xd8   :  { %3385 = vmatprep.subr.bf16.mxu0 %v11138_v55  ;;  %v11229_v55 = vld [vmem:[%s16874_s1 + $0x534] ss:$8 sps:$4 sm:$0xff]  }
  0xdb   :  { %3386 = vmatpush1.bf16.msra.mxu0 %v11136_v56  ;;  %v11227_v56 = vld [vmem:[%s16874_s1 + $0x530] ss:$8 sps:$4 sm:$0xff]  }
  0xdc   :  { %3387 = vmatprep.subr.bf16.mxu0 %v11141_v57  ;;  %v11232_v57 = vld [vmem:[%s16874_s1 + $0x544] ss:$8 sps:$4 sm:$0xff]  }
  0xdf   :  { %3388 = vmatpush1.bf16.msra.mxu0 %v11139_v58  ;;  %v11230_v58 = vld [vmem:[%s16874_s1 + $0x540] ss:$8 sps:$4 sm:$0xff]  }
  0xe0   :  { %3389 = vmatprep.subr.bf16.mxu0 %v11144_v59  ;;  %v11235_v59 = vld [vmem:[%s16874_s1 + $0x554] ss:$8 sps:$4 sm:$0xff]  }
  0xe3   :  { %3390 = vmatpush1.bf16.msra.mxu0 %v11142_v60  ;;  %v11233_v60 = vld [vmem:[%s16874_s1 + $0x550] ss:$8 sps:$4 sm:$0xff]  }
  0xe4   :  { %3391 = vmatprep.subr.bf16.mxu0 %v11147_v61  ;;  %v11238_v61 = vld [vmem:[%s16874_s1 + $0x564] ss:$8 sps:$4 sm:$0xff]  }
  0xe7   :  { %3392 = vmatpush1.bf16.msra.mxu0 %v11145_v62  ;;  %v11236_v62 = vld [vmem:[%s16874_s1 + $0x560] ss:$8 sps:$4 sm:$0xff]  }
  0xe8   :  { %3393 = vmatprep.subr.bf16.mxu0 %v11150_v63  ;;  %v11241_v63 = vld [vmem:[%s16874_s1 + $0x574] ss:$8 sps:$4 sm:$0xff]  }
  0xeb   :  { %3394 = vmatpush1.bf16.msra.mxu0 %v11148_v0  ;;  %v11239_v0 = vld [vmem:[%s16874_s1 + $0x570] ss:$8 sps:$4 sm:$0xff]  }
  0xec   :  { %3395 = vmatprep.subr.bf16.mxu0 %v11153_v1  ;;  %v11244_v1 = vld [vmem:[%s16874_s1 + $0x584] ss:$8 sps:$4 sm:$0xff]  }
  0xef   :  { %3396 = vmatpush1.bf16.msra.mxu0 %v11151_v2  ;;  %v11242_v2 = vld [vmem:[%s16874_s1 + $0x580] ss:$8 sps:$4 sm:$0xff]  }
  0xf0   :  { %3397 = vmatprep.subr.bf16.mxu0 %v11156_v3  ;;  %v11247_v3 = vld [vmem:[%s16874_s1 + $0x594] ss:$8 sps:$4 sm:$0xff]  }
  0xf3   :  { %3398 = vmatpush1.bf16.msra.mxu0 %v11154_v4  ;;  %v11245_v4 = vld [vmem:[%s16874_s1 + $0x590] ss:$8 sps:$4 sm:$0xff]  }
  0xf4   :  { %3399 = vmatprep.subr.bf16.mxu0 %v11159_v5  ;;  %v11250_v5 = vld [vmem:[%s16874_s1 + $0x5a4] ss:$8 sps:$4 sm:$0xff]  }
  0xf7   :  { %3400 = vmatpush1.bf16.msra.mxu0 %v11157_v6  ;;  %v11248_v6 = vld [vmem:[%s16874_s1 + $0x5a0] ss:$8 sps:$4 sm:$0xff]  }
  0xf8   :  { %3401 = vmatprep.subr.bf16.mxu0 %v11162_v7  ;;  %v11253_v7 = vld [vmem:[%s16874_s1 + $0x5b4] ss:$8 sps:$4 sm:$0xff]  }
  0xfb   :  { %3402 = vmatpush1.bf16.msra.mxu0 %v11160_v8  ;;  %v11251_v8 = vld [vmem:[%s16874_s1 + $0x5b0] ss:$8 sps:$4 sm:$0xff]  }
  0xfc   :  { %3403 = vmatprep.subr.bf16.mxu0 %v11165_v9  ;;  %v11256_v9 = vld [vmem:[%s16874_s1 + $0x5c4] ss:$8 sps:$4 sm:$0xff]  }
  0xff   :  { %3404 = vmatpush1.bf16.msra.mxu0 %v11163_v10  ;;  %v11254_v10 = vld [vmem:[%s16874_s1 + $0x5c0] ss:$8 sps:$4 sm:$0xff]  }
 0x100   :  { %3414 = vmatprep.subr.bf16.mxu0 %v11170_v11  ;;  %v11259_v11 = vld [vmem:[%s16874_s1 + $0x5d4] ss:$8 sps:$4 sm:$0xff]  }
 0x102   :  { %3406 = vmatmul.mubr.bf16.vlgmr.msra.gmra.mrb[0].mxu0 %v9148_v13  ;;  %v11262_v13 = vld [vmem:[%s16874_s1 + $0x5e4] ss:$8 sps:$4 sm:$0xff]  }
 0x103   :  { %3415 = vmatpush1.bf16.msra.mxu0 %v11168_v14  ;;  %3446 = vmatprep.mubr.bf16.mxu0 %v9151_v15  ;;  %v11260_v14 = vld [vmem:[%s16874_s1 + $0x5e0] ss:$8 sps:$4 sm:$0xff]   ;;  %v11265_v15 = vld [vmem:[%s16874_s1 + $0x5f4] ss:$8 sps:$4 sm:$0xff]  }
 0x104   :  { %3416 = vmatprep.subr.bf16.mxu0 %v11173_v16  ;;  %v11263_v16 = vld [vmem:[%s16874_s1 + $0x5f0] ss:$8 sps:$4 sm:$0xff]  }
 0x107   :  { %3417 = vmatpush1.bf16.msra.mxu0 %v11171_v17  ;;  %v11270_v17 = vld [vmem:[%s16874_s1 + $0x604] ss:$8 sps:$4 sm:$0xff]  }
 0x108   :  { %3418 = vmatprep.subr.bf16.mxu0 %v11176_v18  ;;  %v13422_v18 = vld [vmem:[%s16875_s0 + $0x30] sm:$0xff] }
 0x10b   :  { %3419 = vmatpush1.bf16.msra.mxu0 %v11174_v19  ;;  %v9152_v19 = vcombine.low %v13317_v47, %v13317_v47  ;;  %v11307_v47 = vld [vmem:[%s16874_s1 + $0x6d0] ss:$8 sps:$4 sm:$0xff]  }
 0x10c   :  { %3420 = vmatprep.subr.bf16.mxu0 %v11179_v20  ;;  %v11268_v20 = vld [vmem:[%s16874_s1 + $0x600] ss:$8 sps:$4 sm:$0xff]  }
 0x10f   :  { %3421 = vmatpush1.bf16.msra.mxu0 %v11177_v21  ;;  %v9155_v21 = vcombine.high %v13422_v18, %v13422_v18 }
 0x110   :  { %3422 = vmatprep.subr.bf16.mxu0 %v11182_v22  ;;  %v11273_v22 = vld [vmem:[%s16874_s1 + $0x614] ss:$8 sps:$4 sm:$0xff]  }
 0x113   :  { %3423 = vmatpush1.bf16.msra.mxu0 %v11180_v23  ;;  %v11271_v23 = vld [vmem:[%s16874_s1 + $0x610] ss:$8 sps:$4 sm:$0xff]  }
 0x114   :  { %3424 = vmatprep.subr.bf16.mxu0 %v11185_v24  ;;  %v11276_v24 = vld [vmem:[%s16874_s1 + $0x624] ss:$8 sps:$4 sm:$0xff]  }
 0x117   :  { %3425 = vmatpush1.bf16.msra.mxu0 %v11183_v25  ;;  %v11274_v25 = vld [vmem:[%s16874_s1 + $0x620] ss:$8 sps:$4 sm:$0xff]  }
 0x118   :  { %3426 = vmatprep.subr.bf16.mxu0 %v11188_v26  ;;  %v11279_v26 = vld [vmem:[%s16874_s1 + $0x634] ss:$8 sps:$4 sm:$0xff]  }
 0x11b   :  { %3427 = vmatpush1.bf16.msra.mxu0 %v11186_v27  ;;  %v11277_v27 = vld [vmem:[%s16874_s1 + $0x630] ss:$8 sps:$4 sm:$0xff]  }
 0x11c   :  { %3428 = vmatprep.subr.bf16.mxu0 %v11191_v28  ;;  %v11282_v28 = vld [vmem:[%s16874_s1 + $0x644] ss:$8 sps:$4 sm:$0xff]  }
 0x11f   :  { %3429 = vmatpush1.bf16.msra.mxu0 %v11189_v29  ;;  %v11280_v29 = vld [vmem:[%s16874_s1 + $0x640] ss:$8 sps:$4 sm:$0xff]  }
 0x120   :  { %3430 = vmatprep.subr.bf16.mxu0 %v11194_v30  ;;  %v11285_v30 = vld [vmem:[%s16874_s1 + $0x654] ss:$8 sps:$4 sm:$0xff]  }
 0x123   :  { %3431 = vmatpush1.bf16.msra.mxu0 %v11192_v31  ;;  %v11283_v31 = vld [vmem:[%s16874_s1 + $0x650] ss:$8 sps:$4 sm:$0xff]  }
 0x124   :  { %3432 = vmatprep.subr.bf16.mxu0 %v11197_v32  ;;  %v11288_v32 = vld [vmem:[%s16874_s1 + $0x664] ss:$8 sps:$4 sm:$0xff]  }
 0x127   :  { %3433 = vmatpush1.bf16.msra.mxu0 %v11195_v33  ;;  %v11286_v33 = vld [vmem:[%s16874_s1 + $0x660] ss:$8 sps:$4 sm:$0xff]  }
 0x128   :  { %3434 = vmatprep.subr.bf16.mxu0 %v11200_v34  ;;  %v11291_v34 = vld [vmem:[%s16874_s1 + $0x674] ss:$8 sps:$4 sm:$0xff]  }
 0x12b   :  { %3435 = vmatpush1.bf16.msra.mxu0 %v11198_v35  ;;  %v11289_v35 = vld [vmem:[%s16874_s1 + $0x670] ss:$8 sps:$4 sm:$0xff]  }
 0x12c   :  { %3436 = vmatprep.subr.bf16.mxu0 %v11203_v36  ;;  %v11294_v36 = vld [vmem:[%s16874_s1 + $0x684] ss:$8 sps:$4 sm:$0xff]  }
 0x12f   :  { %3437 = vmatpush1.bf16.msra.mxu0 %v11201_v37  ;;  %v11292_v37 = vld [vmem:[%s16874_s1 + $0x680] ss:$8 sps:$4 sm:$0xff]  }
 0x130   :  { %3438 = vmatprep.subr.bf16.mxu0 %v11206_v38  ;;  %v11297_v38 = vld [vmem:[%s16874_s1 + $0x694] ss:$8 sps:$4 sm:$0xff]  }
 0x133   :  { %3439 = vmatpush1.bf16.msra.mxu0 %v11204_v39  ;;  %v11295_v39 = vld [vmem:[%s16874_s1 + $0x690] ss:$8 sps:$4 sm:$0xff]  }
 0x134   :  { %3440 = vmatprep.subr.bf16.mxu0 %v11209_v40  ;;  %v11300_v40 = vld [vmem:[%s16874_s1 + $0x6a4] ss:$8 sps:$4 sm:$0xff]  }
 0x137   :  { %3441 = vmatpush1.bf16.msra.mxu0 %v11207_v41  ;;  %v11298_v41 = vld [vmem:[%s16874_s1 + $0x6a0] ss:$8 sps:$4 sm:$0xff]  }
 0x138   :  { %3442 = vmatprep.subr.bf16.mxu0 %v11212_v42  ;;  %v11303_v42 = vld [vmem:[%s16874_s1 + $0x6b4] ss:$8 sps:$4 sm:$0xff]  }
 0x13b   :  { %3443 = vmatpush1.bf16.msra.mxu0 %v11210_v43  ;;  %v11301_v43 = vld [vmem:[%s16874_s1 + $0x6b0] ss:$8 sps:$4 sm:$0xff]  }
 0x13c   :  { %3444 = vmatprep.subr.bf16.mxu0 %v11215_v44  ;;  %v11306_v44 = vld [vmem:[%s16874_s1 + $0x6c4] ss:$8 sps:$4 sm:$0xff]  }
 0x13f   :  { %3445 = vmatpush1.bf16.msra.mxu0 %v11213_v45  ;;  %v11304_v45 = vld [vmem:[%s16874_s1 + $0x6c0] ss:$8 sps:$4 sm:$0xff]  }
 0x140   :  { %3455 = vmatprep.subr.bf16.mxu0 %v11220_v46  ;;  %v11309_v46 = vld [vmem:[%s16874_s1 + $0x6d4] ss:$8 sps:$4 sm:$0xff]  }
 0x142   :  { %3447 = vmatmul.mubr.bf16.vlgmr.msra.gmra.mrb[0].mxu0 %v9150_v48  ;;  %v11312_v48 = vld [vmem:[%s16874_s1 + $0x6e4] ss:$8 sps:$4 sm:$0xff]  }
 0x143   :  { %3456 = vmatpush1.bf16.msra.mxu0 %v11218_v49  ;;  %3487 = vmatprep.mubr.bf16.mxu0 %v9153_v50  ;;  %v11310_v49 = vld [vmem:[%s16874_s1 + $0x6e0] ss:$8 sps:$4 sm:$0xff]   ;;  %v11315_v50 = vld [vmem:[%s16874_s1 + $0x6f4] ss:$8 sps:$4 sm:$0xff]  }
 0x144   :  { %3457 = vmatprep.subr.bf16.mxu0 %v11223_v51  ;;  %v11313_v51 = vld [vmem:[%s16874_s1 + $0x6f0] ss:$8 sps:$4 sm:$0xff]  }
 0x147   :  { %3458 = vmatpush1.bf16.msra.mxu0 %v11221_v52  ;;  %v11320_v52 = vld [vmem:[%s16874_s1 + $0x704] ss:$8 sps:$4 sm:$0xff]  }
 0x148   :  { %3459 = vmatprep.subr.bf16.mxu0 %v11226_v53  ;;  %v13527_v53 = vld [vmem:[%s16875_s0 + $0x38] sm:$0xff] }
 0x14b   :  { %3460 = vmatpush1.bf16.msra.mxu0 %v11224_v54  ;;  %v9154_v54 = vcombine.low %v13422_v18, %v13422_v18  ;;  %v11357_v18 = vld [vmem:[%s16874_s1 + $0x7d0] ss:$8 sps:$4 sm:$0xff]  }
 0x14c   :  { %3461 = vmatprep.subr.bf16.mxu0 %v11229_v55  ;;  %v11318_v55 = vld [vmem:[%s16874_s1 + $0x700] ss:$8 sps:$4 sm:$0xff]  }
 0x14f   :  { %3462 = vmatpush1.bf16.msra.mxu0 %v11227_v56  ;;  %v9157_v56 = vcombine.high %v13527_v53, %v13527_v53 }
 0x150   :  { %3463 = vmatprep.subr.bf16.mxu0 %v11232_v57  ;;  %v11323_v57 = vld [vmem:[%s16874_s1 + $0x714] ss:$8 sps:$4 sm:$0xff]  }
 0x153   :  { %3464 = vmatpush1.bf16.msra.mxu0 %v11230_v58  ;;  %v11321_v58 = vld [vmem:[%s16874_s1 + $0x710] ss:$8 sps:$4 sm:$0xff]  }
 0x154   :  { %3465 = vmatprep.subr.bf16.mxu0 %v11235_v59  ;;  %v11326_v59 = vld [vmem:[%s16874_s1 + $0x724] ss:$8 sps:$4 sm:$0xff]  }
 0x157   :  { %3466 = vmatpush1.bf16.msra.mxu0 %v11233_v60  ;;  %v11324_v60 = vld [vmem:[%s16874_s1 + $0x720] ss:$8 sps:$4 sm:$0xff]  }
 0x158   :  { %3467 = vmatprep.subr.bf16.mxu0 %v11238_v61  ;;  %v11329_v61 = vld [vmem:[%s16874_s1 + $0x734] ss:$8 sps:$4 sm:$0xff]  }
 0x15b   :  { %3468 = vmatpush1.bf16.msra.mxu0 %v11236_v62  ;;  %v11327_v62 = vld [vmem:[%s16874_s1 + $0x730] ss:$8 sps:$4 sm:$0xff]  }
 0x15c   :  { %3469 = vmatprep.subr.bf16.mxu0 %v11241_v63  ;;  %v11332_v63 = vld [vmem:[%s16874_s1 + $0x744] ss:$8 sps:$4 sm:$0xff]  }
 0x15f   :  { %3470 = vmatpush1.bf16.msra.mxu0 %v11239_v0  ;;  %v11330_v0 = vld [vmem:[%s16874_s1 + $0x740] ss:$8 sps:$4 sm:$0xff]  }
 0x160   :  { %3471 = vmatprep.subr.bf16.mxu0 %v11244_v1  ;;  %v11335_v1 = vld [vmem:[%s16874_s1 + $0x754] ss:$8 sps:$4 sm:$0xff]  }
 0x163   :  { %3472 = vmatpush1.bf16.msra.mxu0 %v11242_v2  ;;  %v11333_v2 = vld [vmem:[%s16874_s1 + $0x750] ss:$8 sps:$4 sm:$0xff]  }
 0x164   :  { %3473 = vmatprep.subr.bf16.mxu0 %v11247_v3  ;;  %v11338_v3 = vld [vmem:[%s16874_s1 + $0x764] ss:$8 sps:$4 sm:$0xff]  }
 0x167   :  { %3474 = vmatpush1.bf16.msra.mxu0 %v11245_v4  ;;  %v11336_v4 = vld [vmem:[%s16874_s1 + $0x760] ss:$8 sps:$4 sm:$0xff]  }
 0x168   :  { %3475 = vmatprep.subr.bf16.mxu0 %v11250_v5  ;;  %v11341_v5 = vld [vmem:[%s16874_s1 + $0x774] ss:$8 sps:$4 sm:$0xff]  }
 0x16b   :  { %3476 = vmatpush1.bf16.msra.mxu0 %v11248_v6  ;;  %v11339_v6 = vld [vmem:[%s16874_s1 + $0x770] ss:$8 sps:$4 sm:$0xff]  }
 0x16c   :  { %3477 = vmatprep.subr.bf16.mxu0 %v11253_v7  ;;  %v11344_v7 = vld [vmem:[%s16874_s1 + $0x784] ss:$8 sps:$4 sm:$0xff]  }
 0x16f   :  { %3478 = vmatpush1.bf16.msra.mxu0 %v11251_v8  ;;  %v11342_v8 = vld [vmem:[%s16874_s1 + $0x780] ss:$8 sps:$4 sm:$0xff]  }
 0x170   :  { %3479 = vmatprep.subr.bf16.mxu0 %v11256_v9  ;;  %v11347_v9 = vld [vmem:[%s16874_s1 + $0x794] ss:$8 sps:$4 sm:$0xff]  }
 0x173   :  { %3480 = vmatpush1.bf16.msra.mxu0 %v11254_v10  ;;  %v11345_v10 = vld [vmem:[%s16874_s1 + $0x790] ss:$8 sps:$4 sm:$0xff]  }
 0x174   :  { %3481 = vmatprep.subr.bf16.mxu0 %v11259_v11  ;;  %v11350_v11 = vld [vmem:[%s16874_s1 + $0x7a4] ss:$8 sps:$4 sm:$0xff]  }
 0x177   :  { %3482 = vmatpush1.bf16.msra.mxu0 %v11257_v12  ;;  %v11348_v12 = vld [vmem:[%s16874_s1 + $0x7a0] ss:$8 sps:$4 sm:$0xff]  }
 0x178   :  { %3483 = vmatprep.subr.bf16.mxu0 %v11262_v13  ;;  %v11353_v13 = vld [vmem:[%s16874_s1 + $0x7b4] ss:$8 sps:$4 sm:$0xff]  }
 0x17b   :  { %3484 = vmatpush1.bf16.msra.mxu0 %v11260_v14  ;;  %v11351_v14 = vld [vmem:[%s16874_s1 + $0x7b0] ss:$8 sps:$4 sm:$0xff]  }
 0x17c   :  { %3485 = vmatprep.subr.bf16.mxu0 %v11265_v15  ;;  %v11356_v15 = vld [vmem:[%s16874_s1 + $0x7c4] ss:$8 sps:$4 sm:$0xff]  }
 0x17f   :  { %3486 = vmatpush1.bf16.msra.mxu0 %v11263_v16  ;;  %v11354_v16 = vld [vmem:[%s16874_s1 + $0x7c0] ss:$8 sps:$4 sm:$0xff]  }
 0x180   :  { %3496 = vmatprep.subr.bf16.mxu0 %v11270_v17  ;;  %v11359_v17 = vld [vmem:[%s16874_s1 + $0x7d4] ss:$8 sps:$4 sm:$0xff]  }
 0x182   :  { %3488 = vmatmul.mubr.bf16.vlgmr.msra.gmra.mrb[0].mxu0 %v9152_v19  ;;  %v11362_v19 = vld [vmem:[%s16874_s1 + $0x7e4] ss:$8 sps:$4 sm:$0xff]  }
 0x183   :  { %3497 = vmatpush1.bf16.msra.mxu0 %v11268_v20  ;;  %3528 = vmatprep.mubr.bf16.mxu0 %v9155_v21  ;;  %v11360_v20 = vld [vmem:[%s16874_s1 + $0x7e0] ss:$8 sps:$4 sm:$0xff]   ;;  %v11365_v21 = vld [vmem:[%s16874_s1 + $0x7f4] ss:$8 sps:$4 sm:$0xff]  }
 0x184   :  { %3498 = vmatprep.subr.bf16.mxu0 %v11273_v22  ;;  %v11363_v22 = vld [vmem:[%s16874_s1 + $0x7f0] ss:$8 sps:$4 sm:$0xff]  }
 0x187   :  { %3499 = vmatpush1.bf16.msra.mxu0 %v11271_v23  ;;  %v11370_v23 = vld [vmem:[%s16874_s1 + $0x804] ss:$8 sps:$4 sm:$0xff]  }
 0x188   :  { %3500 = vmatprep.subr.bf16.mxu0 %v11276_v24  ;;  %v13632_v24 = vld [vmem:[%s16875_s0 + $0x40] sm:$0xff] }
 0x18b   :  { %3501 = vmatpush1.bf16.msra.mxu0 %v11274_v25  ;;  %v9156_v25 = vcombine.low %v13527_v53, %v13527_v53  ;;  %v11407_v53 = vld [vmem:[%s16874_s1 + $0x8d0] ss:$8 sps:$4 sm:$0xff]  }
 0x18c   :  { %3502 = vmatprep.subr.bf16.mxu0 %v11279_v26  ;;  %v11368_v26 = vld [vmem:[%s16874_s1 + $0x800] ss:$8 sps:$4 sm:$0xff]  }
 0x18f   :  { %3503 = vmatpush1.bf16.msra.mxu0 %v11277_v27  ;;  %v9159_v27 = vcombine.high %v13632_v24, %v13632_v24 }
 0x190   :  { %3504 = vmatprep.subr.bf16.mxu0 %v11282_v28  ;;  %v11373_v28 = vld [vmem:[%s16874_s1 + $0x814] ss:$8 sps:$4 sm:$0xff]  }
 0x193   :  { %3505 = vmatpush1.bf16.msra.mxu0 %v11280_v29  ;;  %v11371_v29 = vld [vmem:[%s16874_s1 + $0x810] ss:$8 sps:$4 sm:$0xff]  }
 0x194   :  { %3506 = vmatprep.subr.bf16.mxu0 %v11285_v30  ;;  %v11376_v30 = vld [vmem:[%s16874_s1 + $0x824] ss:$8 sps:$4 sm:$0xff]  }
 0x197   :  { %3507 = vmatpush1.bf16.msra.mxu0 %v11283_v31  ;;  %v11374_v31 = vld [vmem:[%s16874_s1 + $0x820] ss:$8 sps:$4 sm:$0xff]  }
 0x198   :  { %3508 = vmatprep.subr.bf16.mxu0 %v11288_v32  ;;  %v11379_v32 = vld [vmem:[%s16874_s1 + $0x834] ss:$8 sps:$4 sm:$0xff]  }
 0x19b   :  { %3509 = vmatpush1.bf16.msra.mxu0 %v11286_v33  ;;  %v11377_v33 = vld [vmem:[%s16874_s1 + $0x830] ss:$8 sps:$4 sm:$0xff]  }
 0x19c   :  { %3510 = vmatprep.subr.bf16.mxu0 %v11291_v34  ;;  %v11382_v34 = vld [vmem:[%s16874_s1 + $0x844] ss:$8 sps:$4 sm:$0xff]  }
 0x19f   :  { %3511 = vmatpush1.bf16.msra.mxu0 %v11289_v35  ;;  %v11380_v35 = vld [vmem:[%s16874_s1 + $0x840] ss:$8 sps:$4 sm:$0xff]  }
 0x1a0   :  { %3512 = vmatprep.subr.bf16.mxu0 %v11294_v36  ;;  %v11385_v36 = vld [vmem:[%s16874_s1 + $0x854] ss:$8 sps:$4 sm:$0xff]  }
 0x1a3   :  { %3513 = vmatpush1.bf16.msra.mxu0 %v11292_v37  ;;  %v11383_v37 = vld [vmem:[%s16874_s1 + $0x850] ss:$8 sps:$4 sm:$0xff]  }
 0x1a4   :  { %3514 = vmatprep.subr.bf16.mxu0 %v11297_v38  ;;  %v11388_v38 = vld [vmem:[%s16874_s1 + $0x864] ss:$8 sps:$4 sm:$0xff]  }
 0x1a7   :  { %3515 = vmatpush1.bf16.msra.mxu0 %v11295_v39  ;;  %v11386_v39 = vld [vmem:[%s16874_s1 + $0x860] ss:$8 sps:$4 sm:$0xff]  }
 0x1a8   :  { %3516 = vmatprep.subr.bf16.mxu0 %v11300_v40  ;;  %v11391_v40 = vld [vmem:[%s16874_s1 + $0x874] ss:$8 sps:$4 sm:$0xff]  }
 0x1ab   :  { %3517 = vmatpush1.bf16.msra.mxu0 %v11298_v41  ;;  %v11389_v41 = vld [vmem:[%s16874_s1 + $0x870] ss:$8 sps:$4 sm:$0xff]  }
 0x1ac   :  { %3518 = vmatprep.subr.bf16.mxu0 %v11303_v42  ;;  %v11394_v42 = vld [vmem:[%s16874_s1 + $0x884] ss:$8 sps:$4 sm:$0xff]  }
 0x1af   :  { %3519 = vmatpush1.bf16.msra.mxu0 %v11301_v43  ;;  %v11392_v43 = vld [vmem:[%s16874_s1 + $0x880] ss:$8 sps:$4 sm:$0xff]  }
 0x1b0   :  { %3520 = vmatprep.subr.bf16.mxu0 %v11306_v44  ;;  %v11397_v44 = vld [vmem:[%s16874_s1 + $0x894] ss:$8 sps:$4 sm:$0xff]  }
 0x1b3   :  { %3521 = vmatpush1.bf16.msra.mxu0 %v11304_v45  ;;  %v11395_v45 = vld [vmem:[%s16874_s1 + $0x890] ss:$8 sps:$4 sm:$0xff]  }
 0x1b4   :  { %3522 = vmatprep.subr.bf16.mxu0 %v11309_v46  ;;  %v11400_v46 = vld [vmem:[%s16874_s1 + $0x8a4] ss:$8 sps:$4 sm:$0xff]  }
 0x1b7   :  { %3523 = vmatpush1.bf16.msra.mxu0 %v11307_v47  ;;  %v11398_v47 = vld [vmem:[%s16874_s1 + $0x8a0] ss:$8 sps:$4 sm:$0xff]  }
 0x1b8   :  { %3524 = vmatprep.subr.bf16.mxu0 %v11312_v48  ;;  %v11403_v48 = vld [vmem:[%s16874_s1 + $0x8b4] ss:$8 sps:$4 sm:$0xff]  }
 0x1bb   :  { %3525 = vmatpush1.bf16.msra.mxu0 %v11310_v49  ;;  %v11401_v49 = vld [vmem:[%s16874_s1 + $0x8b0] ss:$8 sps:$4 sm:$0xff]  }
 0x1bc   :  { %3526 = vmatprep.subr.bf16.mxu0 %v11315_v50  ;;  %v11406_v50 = vld [vmem:[%s16874_s1 + $0x8c4] ss:$8 sps:$4 sm:$0xff]  }
 0x1bf   :  { %3527 = vmatpush1.bf16.msra.mxu0 %v11313_v51  ;;  %v11404_v51 = vld [vmem:[%s16874_s1 + $0x8c0] ss:$8 sps:$4 sm:$0xff]  }
 0x1c0   :  { %3537 = vmatprep.subr.bf16.mxu0 %v11320_v52  ;;  %v11409_v52 = vld [vmem:[%s16874_s1 + $0x8d4] ss:$8 sps:$4 sm:$0xff]  }
 0x1c2   :  { %3529 = vmatmul.mubr.bf16.vlgmr.msra.gmra.mrb[0].mxu0 %v9154_v54  ;;  %v11412_v54 = vld [vmem:[%s16874_s1 + $0x8e4] ss:$8 sps:$4 sm:$0xff]  }
 0x1c3   :  { %3538 = vmatpush1.bf16.msra.mxu0 %v11318_v55  ;;  %3569 = vmatprep.mubr.bf16.mxu0 %v9157_v56  ;;  %v11410_v55 = vld [vmem:[%s16874_s1 + $0x8e0] ss:$8 sps:$4 sm:$0xff]   ;;  %v11415_v56 = vld [vmem:[%s16874_s1 + $0x8f4] ss:$8 sps:$4 sm:$0xff]  }
 0x1c4   :  { %3539 = vmatprep.subr.bf16.mxu0 %v11323_v57  ;;  %v11413_v57 = vld [vmem:[%s16874_s1 + $0x8f0] ss:$8 sps:$4 sm:$0xff]  }
 0x1c7   :  { %3540 = vmatpush1.bf16.msra.mxu0 %v11321_v58  ;;  %v11420_v58 = vld [vmem:[%s16874_s1 + $0x904] ss:$8 sps:$4 sm:$0xff]  }
 0x1c8   :  { %3541 = vmatprep.subr.bf16.mxu0 %v11326_v59  ;;  %v13737_v59 = vld [vmem:[%s16875_s0 + $0x48] sm:$0xff] }
 0x1cb   :  { %3542 = vmatpush1.bf16.msra.mxu0 %v11324_v60  ;;  %v9158_v60 = vcombine.low %v13632_v24, %v13632_v24  ;;  %v11457_v24 = vld [vmem:[%s16874_s1 + $0x9d0] ss:$8 sps:$4 sm:$0xff]  }
 0x1cc   :  { %3543 = vmatprep.subr.bf16.mxu0 %v11329_v61  ;;  %v11418_v61 = vld [vmem:[%s16874_s1 + $0x900] ss:$8 sps:$4 sm:$0xff]  }
 0x1cf   :  { %3544 = vmatpush1.bf16.msra.mxu0 %v11327_v62  ;;  %v9161_v62 = vcombine.high %v13737_v59, %v13737_v59 }
 0x1d0   :  { %3545 = vmatprep.subr.bf16.mxu0 %v11332_v63  ;;  %v11423_v63 = vld [vmem:[%s16874_s1 + $0x914] ss:$8 sps:$4 sm:$0xff]  }
 0x1d3   :  { %3546 = vmatpush1.bf16.msra.mxu0 %v11330_v0  ;;  %v11421_v0 = vld [vmem:[%s16874_s1 + $0x910] ss:$8 sps:$4 sm:$0xff]  }
 0x1d4   :  { %3547 = vmatprep.subr.bf16.mxu0 %v11335_v1  ;;  %v11426_v1 = vld [vmem:[%s16874_s1 + $0x924] ss:$8 sps:$4 sm:$0xff]  }
 0x1d7   :  { %3548 = vmatpush1.bf16.msra.mxu0 %v11333_v2  ;;  %v11424_v2 = vld [vmem:[%s16874_s1 + $0x920] ss:$8 sps:$4 sm:$0xff]  }
 0x1d8   :  { %3549 = vmatprep.subr.bf16.mxu0 %v11338_v3  ;;  %v11429_v3 = vld [vmem:[%s16874_s1 + $0x934] ss:$8 sps:$4 sm:$0xff]  }
 0x1db   :  { %3550 = vmatpush1.bf16.msra.mxu0 %v11336_v4  ;;  %v11427_v4 = vld [vmem:[%s16874_s1 + $0x930] ss:$8 sps:$4 sm:$0xff]  }
 0x1dc   :  { %3551 = vmatprep.subr.bf16.mxu0 %v11341_v5  ;;  %v11432_v5 = vld [vmem:[%s16874_s1 + $0x944] ss:$8 sps:$4 sm:$0xff]  }
 0x1df   :  { %3552 = vmatpush1.bf16.msra.mxu0 %v11339_v6  ;;  %v11430_v6 = vld [vmem:[%s16874_s1 + $0x940] ss:$8 sps:$4 sm:$0xff]  }
 0x1e0   :  { %3553 = vmatprep.subr.bf16.mxu0 %v11344_v7  ;;  %v11435_v7 = vld [vmem:[%s16874_s1 + $0x954] ss:$8 sps:$4 sm:$0xff]  }
 0x1e3   :  { %3554 = vmatpush1.bf16.msra.mxu0 %v11342_v8  ;;  %v11433_v8 = vld [vmem:[%s16874_s1 + $0x950] ss:$8 sps:$4 sm:$0xff]  }
 0x1e4   :  { %3555 = vmatprep.subr.bf16.mxu0 %v11347_v9  ;;  %v11438_v9 = vld [vmem:[%s16874_s1 + $0x964] ss:$8 sps:$4 sm:$0xff]  }
 0x1e7   :  { %3556 = vmatpush1.bf16.msra.mxu0 %v11345_v10  ;;  %v11436_v10 = vld [vmem:[%s16874_s1 + $0x960] ss:$8 sps:$4 sm:$0xff]  }
 0x1e8   :  { %3557 = vmatprep.subr.bf16.mxu0 %v11350_v11  ;;  %v11441_v11 = vld [vmem:[%s16874_s1 + $0x974] ss:$8 sps:$4 sm:$0xff]  }
 0x1eb   :  { %3558 = vmatpush1.bf16.msra.mxu0 %v11348_v12  ;;  %v11439_v12 = vld [vmem:[%s16874_s1 + $0x970] ss:$8 sps:$4 sm:$0xff]  }
 0x1ec   :  { %3559 = vmatprep.subr.bf16.mxu0 %v11353_v13  ;;  %v11444_v13 = vld [vmem:[%s16874_s1 + $0x984] ss:$8 sps:$4 sm:$0xff]  }
 0x1ef   :  { %3560 = vmatpush1.bf16.msra.mxu0 %v11351_v14  ;;  %v11442_v14 = vld [vmem:[%s16874_s1 + $0x980] ss:$8 sps:$4 sm:$0xff]  }
 0x1f0   :  { %3561 = vmatprep.subr.bf16.mxu0 %v11356_v15  ;;  %v11447_v15 = vld [vmem:[%s16874_s1 + $0x994] ss:$8 sps:$4 sm:$0xff]  }
 0x1f3   :  { %3562 = vmatpush1.bf16.msra.mxu0 %v11354_v16  ;;  %v11445_v16 = vld [vmem:[%s16874_s1 + $0x990] ss:$8 sps:$4 sm:$0xff]  }
 0x1f4   :  { %3563 = vmatprep.subr.bf16.mxu0 %v11359_v17  ;;  %v11450_v17 = vld [vmem:[%s16874_s1 + $0x9a4] ss:$8 sps:$4 sm:$0xff]  }
 0x1f7   :  { %3564 = vmatpush1.bf16.msra.mxu0 %v11357_v18  ;;  %v11448_v18 = vld [vmem:[%s16874_s1 + $0x9a0] ss:$8 sps:$4 sm:$0xff]  }
 0x1f8   :  { %3565 = vmatprep.subr.bf16.mxu0 %v11362_v19  ;;  %v11453_v19 = vld [vmem:[%s16874_s1 + $0x9b4] ss:$8 sps:$4 sm:$0xff]  }
 0x1fb   :  { %3566 = vmatpush1.bf16.msra.mxu0 %v11360_v20  ;;  %v11451_v20 = vld [vmem:[%s16874_s1 + $0x9b0] ss:$8 sps:$4 sm:$0xff]  }
 0x1fc   :  { %3567 = vmatprep.subr.bf16.mxu0 %v11365_v21  ;;  %v11456_v21 = vld [vmem:[%s16874_s1 + $0x9c4] ss:$8 sps:$4 sm:$0xff]  }
 0x1ff   :  { %3568 = vmatpush1.bf16.msra.mxu0 %v11363_v22  ;;  %v11454_v22 = vld [vmem:[%s16874_s1 + $0x9c0] ss:$8 sps:$4 sm:$0xff]  }
 0x200   :  { %3578 = vmatprep.subr.bf16.mxu0 %v11370_v23  ;;  %v11459_v23 = vld [vmem:[%s16874_s1 + $0x9d4] ss:$8 sps:$4 sm:$0xff]  }
 0x202   :  { %3570 = vmatmul.mubr.bf16.vlgmr.msra.gmra.mrb[0].mxu0 %v9156_v25  ;;  %v11462_v25 = vld [vmem:[%s16874_s1 + $0x9e4] ss:$8 sps:$4 sm:$0xff]  }
 0x203   :  { %3579 = vmatpush1.bf16.msra.mxu0 %v11368_v26  ;;  %3610 = vmatprep.mubr.bf16.mxu0 %v9159_v27  ;;  %v11460_v26 = vld [vmem:[%s16874_s1 + $0x9e0] ss:$8 sps:$4 sm:$0xff]   ;;  %v11465_v27 = vld [vmem:[%s16874_s1 + $0x9f4] ss:$8 sps:$4 sm:$0xff]  }
 0x204   :  { %3580 = vmatprep.subr.bf16.mxu0 %v11373_v28  ;;  %v11463_v28 = vld [vmem:[%s16874_s1 + $0x9f0] ss:$8 sps:$4 sm:$0xff]  }
 0x207   :  { %3581 = vmatpush1.bf16.msra.mxu0 %v11371_v29  ;;  %v11470_v29 = vld [vmem:[%s16874_s1 + $0xa04] ss:$8 sps:$4 sm:$0xff]  }
 0x208   :  { %3582 = vmatprep.subr.bf16.mxu0 %v11376_v30  ;;  %v13842_v30 = vld [vmem:[%s16875_s0 + $0x50] sm:$0xff] }
 0x20b   :  { %3583 = vmatpush1.bf16.msra.mxu0 %v11374_v31  ;;  %v9160_v31 = vcombine.low %v13737_v59, %v13737_v59  ;;  %v11507_v59 = vld [vmem:[%s16874_s1 + $0xad0] ss:$8 sps:$4 sm:$0xff]  }
 0x20c   :  { %3584 = vmatprep.subr.bf16.mxu0 %v11379_v32  ;;  %v11468_v32 = vld [vmem:[%s16874_s1 + $0xa00] ss:$8 sps:$4 sm:$0xff]  }
 0x20f   :  { %3585 = vmatpush1.bf16.msra.mxu0 %v11377_v33  ;;  %v9163_v33 = vcombine.high %v13842_v30, %v13842_v30 }
 0x210   :  { %3586 = vmatprep.subr.bf16.mxu0 %v11382_v34  ;;  %v11473_v34 = vld [vmem:[%s16874_s1 + $0xa14] ss:$8 sps:$4 sm:$0xff]  }
 0x213   :  { %3587 = vmatpush1.bf16.msra.mxu0 %v11380_v35  ;;  %v11471_v35 = vld [vmem:[%s16874_s1 + $0xa10] ss:$8 sps:$4 sm:$0xff]  }
 0x214   :  { %3588 = vmatprep.subr.bf16.mxu0 %v11385_v36  ;;  %v11476_v36 = vld [vmem:[%s16874_s1 + $0xa24] ss:$8 sps:$4 sm:$0xff]  }
 0x217   :  { %3589 = vmatpush1.bf16.msra.mxu0 %v11383_v37  ;;  %v11474_v37 = vld [vmem:[%s16874_s1 + $0xa20] ss:$8 sps:$4 sm:$0xff]  }
 0x218   :  { %3590 = vmatprep.subr.bf16.mxu0 %v11388_v38  ;;  %v11479_v38 = vld [vmem:[%s16874_s1 + $0xa34] ss:$8 sps:$4 sm:$0xff]  }
 0x21b   :  { %3591 = vmatpush1.bf16.msra.mxu0 %v11386_v39  ;;  %v11477_v39 = vld [vmem:[%s16874_s1 + $0xa30] ss:$8 sps:$4 sm:$0xff]  }
 0x21c   :  { %3592 = vmatprep.subr.bf16.mxu0 %v11391_v40  ;;  %v11482_v40 = vld [vmem:[%s16874_s1 + $0xa44] ss:$8 sps:$4 sm:$0xff]  }
 0x21f   :  { %3593 = vmatpush1.bf16.msra.mxu0 %v11389_v41  ;;  %v11480_v41 = vld [vmem:[%s16874_s1 + $0xa40] ss:$8 sps:$4 sm:$0xff]  }
 0x220   :  { %3594 = vmatprep.subr.bf16.mxu0 %v11394_v42  ;;  %v11485_v42 = vld [vmem:[%s16874_s1 + $0xa54] ss:$8 sps:$4 sm:$0xff]  }
 0x223   :  { %3595 = vmatpush1.bf16.msra.mxu0 %v11392_v43  ;;  %v11483_v43 = vld [vmem:[%s16874_s1 + $0xa50] ss:$8 sps:$4 sm:$0xff]  }
 0x224   :  { %3596 = vmatprep.subr.bf16.mxu0 %v11397_v44  ;;  %v11488_v44 = vld [vmem:[%s16874_s1 + $0xa64] ss:$8 sps:$4 sm:$0xff]  }
 0x227   :  { %3597 = vmatpush1.bf16.msra.mxu0 %v11395_v45  ;;  %v11486_v45 = vld [vmem:[%s16874_s1 + $0xa60] ss:$8 sps:$4 sm:$0xff]  }
 0x228   :  { %3598 = vmatprep.subr.bf16.mxu0 %v11400_v46  ;;  %v11491_v46 = vld [vmem:[%s16874_s1 + $0xa74] ss:$8 sps:$4 sm:$0xff]  }
 0x22b   :  { %3599 = vmatpush1.bf16.msra.mxu0 %v11398_v47  ;;  %v11489_v47 = vld [vmem:[%s16874_s1 + $0xa70] ss:$8 sps:$4 sm:$0xff]  }
 0x22c   :  { %3600 = vmatprep.subr.bf16.mxu0 %v11403_v48  ;;  %v11494_v48 = vld [vmem:[%s16874_s1 + $0xa84] ss:$8 sps:$4 sm:$0xff]  }
 0x22f   :  { %3601 = vmatpush1.bf16.msra.mxu0 %v11401_v49  ;;  %v11492_v49 = vld [vmem:[%s16874_s1 + $0xa80] ss:$8 sps:$4 sm:$0xff]  }
 0x230   :  { %3602 = vmatprep.subr.bf16.mxu0 %v11406_v50  ;;  %v11497_v50 = vld [vmem:[%s16874_s1 + $0xa94] ss:$8 sps:$4 sm:$0xff]  }
 0x233   :  { %3603 = vmatpush1.bf16.msra.mxu0 %v11404_v51  ;;  %v11495_v51 = vld [vmem:[%s16874_s1 + $0xa90] ss:$8 sps:$4 sm:$0xff]  }
 0x234   :  { %3604 = vmatprep.subr.bf16.mxu0 %v11409_v52  ;;  %v11500_v52 = vld [vmem:[%s16874_s1 + $0xaa4] ss:$8 sps:$4 sm:$0xff]  }
 0x237   :  { %3605 = vmatpush1.bf16.msra.mxu0 %v11407_v53  ;;  %v11498_v53 = vld [vmem:[%s16874_s1 + $0xaa0] ss:$8 sps:$4 sm:$0xff]  }
 0x238   :  { %3606 = vmatprep.subr.bf16.mxu0 %v11412_v54  ;;  %v11503_v54 = vld [vmem:[%s16874_s1 + $0xab4] ss:$8 sps:$4 sm:$0xff]  }
 0x23b   :  { %3607 = vmatpush1.bf16.msra.mxu0 %v11410_v55  ;;  %v11501_v55 = vld [vmem:[%s16874_s1 + $0xab0] ss:$8 sps:$4 sm:$0xff]  }
 0x23c   :  { %3608 = vmatprep.subr.bf16.mxu0 %v11415_v56  ;;  %v11506_v56 = vld [vmem:[%s16874_s1 + $0xac4] ss:$8 sps:$4 sm:$0xff]  }
 0x23f   :  { %3609 = vmatpush1.bf16.msra.mxu0 %v11413_v57  ;;  %v11504_v57 = vld [vmem:[%s16874_s1 + $0xac0] ss:$8 sps:$4 sm:$0xff]  }
 0x240   :  { %3619 = vmatprep.subr.bf16.mxu0 %v11420_v58  ;;  %v11509_v58 = vld [vmem:[%s16874_s1 + $0xad4] ss:$8 sps:$4 sm:$0xff]  }
 0x242   :  { %3611 = vmatmul.mubr.bf16.vlgmr.msra.gmra.mrb[0].mxu0 %v9158_v60  ;;  %v11512_v60 = vld [vmem:[%s16874_s1 + $0xae4] ss:$8 sps:$4 sm:$0xff]  }
 0x243   :  { %3620 = vmatpush1.bf16.msra.mxu0 %v11418_v61  ;;  %3651 = vmatprep.mubr.bf16.mxu0 %v9161_v62  ;;  %v11510_v61 = vld [vmem:[%s16874_s1 + $0xae0] ss:$8 sps:$4 sm:$0xff]   ;;  %v11515_v62 = vld [vmem:[%s16874_s1 + $0xaf4] ss:$8 sps:$4 sm:$0xff]  }
 0x244   :  { %3621 = vmatprep.subr.bf16.mxu0 %v11423_v63  ;;  %v11513_v63 = vld [vmem:[%s16874_s1 + $0xaf0] ss:$8 sps:$4 sm:$0xff]  }
 0x247   :  { %3622 = vmatpush1.bf16.msra.mxu0 %v11421_v0  ;;  %v11520_v0 = vld [vmem:[%s16874_s1 + $0xb04] ss:$8 sps:$4 sm:$0xff]  }
 0x248   :  { %3623 = vmatprep.subr.bf16.mxu0 %v11426_v1  ;;  %v13947_v1 = vld [vmem:[%s16875_s0 + $0x58] sm:$0xff] }
 0x24b   :  { %3624 = vmatpush1.bf16.msra.mxu0 %v11424_v2  ;;  %v9162_v2 = vcombine.low %v13842_v30, %v13842_v30  ;;  %v11557_v30 = vld [vmem:[%s16874_s1 + $0xbd0] ss:$8 sps:$4 sm:$0xff]  }
 0x24c   :  { %3625 = vmatprep.subr.bf16.mxu0 %v11429_v3  ;;  %v11518_v3 = vld [vmem:[%s16874_s1 + $0xb00] ss:$8 sps:$4 sm:$0xff]  }
 0x24f   :  { %3626 = vmatpush1.bf16.msra.mxu0 %v11427_v4  ;;  %v9165_v4 = vcombine.high %v13947_v1, %v13947_v1 }
 0x250   :  { %3627 = vmatprep.subr.bf16.mxu0 %v11432_v5  ;;  %v11523_v5 = vld [vmem:[%s16874_s1 + $0xb14] ss:$8 sps:$4 sm:$0xff]  }
 0x253   :  { %3628 = vmatpush1.bf16.msra.mxu0 %v11430_v6  ;;  %v11521_v6 = vld [vmem:[%s16874_s1 + $0xb10] ss:$8 sps:$4 sm:$0xff]  }
 0x254   :  { %3629 = vmatprep.subr.bf16.mxu0 %v11435_v7  ;;  %v11526_v7 = vld [vmem:[%s16874_s1 + $0xb24] ss:$8 sps:$4 sm:$0xff]  }
 0x257   :  { %3630 = vmatpush1.bf16.msra.mxu0 %v11433_v8  ;;  %v11524_v8 = vld [vmem:[%s16874_s1 + $0xb20] ss:$8 sps:$4 sm:$0xff]  }
 0x258   :  { %3631 = vmatprep.subr.bf16.mxu0 %v11438_v9  ;;  %v11529_v9 = vld [vmem:[%s16874_s1 + $0xb34] ss:$8 sps:$4 sm:$0xff]  }
 0x25b   :  { %3632 = vmatpush1.bf16.msra.mxu0 %v11436_v10  ;;  %v11527_v10 = vld [vmem:[%s16874_s1 + $0xb30] ss:$8 sps:$4 sm:$0xff]  }
 0x25c   :  { %3633 = vmatprep.subr.bf16.mxu0 %v11441_v11  ;;  %v11532_v11 = vld [vmem:[%s16874_s1 + $0xb44] ss:$8 sps:$4 sm:$0xff]  }
 0x25f   :  { %3634 = vmatpush1.bf16.msra.mxu0 %v11439_v12  ;;  %v11530_v12 = vld [vmem:[%s16874_s1 + $0xb40] ss:$8 sps:$4 sm:$0xff]  }
 0x260   :  { %3635 = vmatprep.subr.bf16.mxu0 %v11444_v13  ;;  %v11535_v13 = vld [vmem:[%s16874_s1 + $0xb54] ss:$8 sps:$4 sm:$0xff]  }
 0x263   :  { %3636 = vmatpush1.bf16.msra.mxu0 %v11442_v14  ;;  %v11533_v14 = vld [vmem:[%s16874_s1 + $0xb50] ss:$8 sps:$4 sm:$0xff]  }
 0x264   :  { %3637 = vmatprep.subr.bf16.mxu0 %v11447_v15  ;;  %v11538_v15 = vld [vmem:[%s16874_s1 + $0xb64] ss:$8 sps:$4 sm:$0xff]  }
 0x267   :  { %3638 = vmatpush1.bf16.msra.mxu0 %v11445_v16  ;;  %v11536_v16 = vld [vmem:[%s16874_s1 + $0xb60] ss:$8 sps:$4 sm:$0xff]  }
 0x268   :  { %3639 = vmatprep.subr.bf16.mxu0 %v11450_v17  ;;  %v11541_v17 = vld [vmem:[%s16874_s1 + $0xb74] ss:$8 sps:$4 sm:$0xff]  }
 0x26b   :  { %3640 = vmatpush1.bf16.msra.mxu0 %v11448_v18  ;;  %v11539_v18 = vld [vmem:[%s16874_s1 + $0xb70] ss:$8 sps:$4 sm:$0xff]  }
 0x26c   :  { %3641 = vmatprep.subr.bf16.mxu0 %v11453_v19  ;;  %v11544_v19 = vld [vmem:[%s16874_s1 + $0xb84] ss:$8 sps:$4 sm:$0xff]  }
 0x26f   :  { %3642 = vmatpush1.bf16.msra.mxu0 %v11451_v20  ;;  %v11542_v20 = vld [vmem:[%s16874_s1 + $0xb80] ss:$8 sps:$4 sm:$0xff]  }
 0x270   :  { %3643 = vmatprep.subr.bf16.mxu0 %v11456_v21  ;;  %v11547_v21 = vld [vmem:[%s16874_s1 + $0xb94] ss:$8 sps:$4 sm:$0xff]  }
 0x273   :  { %3644 = vmatpush1.bf16.msra.mxu0 %v11454_v22  ;;  %v11545_v22 = vld [vmem:[%s16874_s1 + $0xb90] ss:$8 sps:$4 sm:$0xff]  }
 0x274   :  { %3645 = vmatprep.subr.bf16.mxu0 %v11459_v23  ;;  %v11550_v23 = vld [vmem:[%s16874_s1 + $0xba4] ss:$8 sps:$4 sm:$0xff]  }
 0x277   :  { %3646 = vmatpush1.bf16.msra.mxu0 %v11457_v24  ;;  %v11548_v24 = vld [vmem:[%s16874_s1 + $0xba0] ss:$8 sps:$4 sm:$0xff]  }
 0x278   :  { %3647 = vmatprep.subr.bf16.mxu0 %v11462_v25  ;;  %v11553_v25 = vld [vmem:[%s16874_s1 + $0xbb4] ss:$8 sps:$4 sm:$0xff]  }
 0x27b   :  { %3648 = vmatpush1.bf16.msra.mxu0 %v11460_v26  ;;  %v11551_v26 = vld [vmem:[%s16874_s1 + $0xbb0] ss:$8 sps:$4 sm:$0xff]  }
 0x27c   :  { %3649 = vmatprep.subr.bf16.mxu0 %v11465_v27  ;;  %v11556_v27 = vld [vmem:[%s16874_s1 + $0xbc4] ss:$8 sps:$4 sm:$0xff]  }
 0x27f   :  { %3650 = vmatpush1.bf16.msra.mxu0 %v11463_v28  ;;  %v11554_v28 = vld [vmem:[%s16874_s1 + $0xbc0] ss:$8 sps:$4 sm:$0xff]  }
 0x280   :  { %3660 = vmatprep.subr.bf16.mxu0 %v11470_v29  ;;  %v11559_v29 = vld [vmem:[%s16874_s1 + $0xbd4] ss:$8 sps:$4 sm:$0xff]  }
 0x282   :  { %3652 = vmatmul.mubr.bf16.vlgmr.msra.gmra.mrb[0].mxu0 %v9160_v31  ;;  %v11562_v31 = vld [vmem:[%s16874_s1 + $0xbe4] ss:$8 sps:$4 sm:$0xff]  }
 0x283   :  { %3661 = vmatpush1.bf16.msra.mxu0 %v11468_v32  ;;  %3692 = vmatprep.mubr.bf16.mxu0 %v9163_v33  ;;  %v11560_v32 = vld [vmem:[%s16874_s1 + $0xbe0] ss:$8 sps:$4 sm:$0xff]   ;;  %v11565_v33 = vld [vmem:[%s16874_s1 + $0xbf4] ss:$8 sps:$4 sm:$0xff]  }
 0x284   :  { %3662 = vmatprep.subr.bf16.mxu0 %v11473_v34  ;;  %v11563_v34 = vld [vmem:[%s16874_s1 + $0xbf0] ss:$8 sps:$4 sm:$0xff]  }
 0x287   :  { %3663 = vmatpush1.bf16.msra.mxu0 %v11471_v35  ;;  %v11570_v35 = vld [vmem:[%s16874_s1 + $0xc04] ss:$8 sps:$4 sm:$0xff]  }
 0x288   :  { %3664 = vmatprep.subr.bf16.mxu0 %v11476_v36  ;;  %v14052_v36 = vld [vmem:[%s16875_s0 + $0x60] sm:$0xff] }
 0x28b   :  { %3665 = vmatpush1.bf16.msra.mxu0 %v11474_v37  ;;  %v9164_v37 = vcombine.low %v13947_v1, %v13947_v1  ;;  %v11607_v1 = vld [vmem:[%s16874_s1 + $0xcd0] ss:$8 sps:$4 sm:$0xff]  }
 0x28c   :  { %3666 = vmatprep.subr.bf16.mxu0 %v11479_v38  ;;  %v11568_v38 = vld [vmem:[%s16874_s1 + $0xc00] ss:$8 sps:$4 sm:$0xff]  }
 0x28f   :  { %3667 = vmatpush1.bf16.msra.mxu0 %v11477_v39  ;;  %v9167_v39 = vcombine.high %v14052_v36, %v14052_v36 }
 0x290   :  { %3668 = vmatprep.subr.bf16.mxu0 %v11482_v40  ;;  %v11573_v40 = vld [vmem:[%s16874_s1 + $0xc14] ss:$8 sps:$4 sm:$0xff]  }
 0x293   :  { %3669 = vmatpush1.bf16.msra.mxu0 %v11480_v41  ;;  %v11571_v41 = vld [vmem:[%s16874_s1 + $0xc10] ss:$8 sps:$4 sm:$0xff]  }
 0x294   :  { %3670 = vmatprep.subr.bf16.mxu0 %v11485_v42  ;;  %v11576_v42 = vld [vmem:[%s16874_s1 + $0xc24] ss:$8 sps:$4 sm:$0xff]  }
 0x297   :  { %3671 = vmatpush1.bf16.msra.mxu0 %v11483_v43  ;;  %v11574_v43 = vld [vmem:[%s16874_s1 + $0xc20] ss:$8 sps:$4 sm:$0xff]  }
 0x298   :  { %3672 = vmatprep.subr.bf16.mxu0 %v11488_v44  ;;  %v11579_v44 = vld [vmem:[%s16874_s1 + $0xc34] ss:$8 sps:$4 sm:$0xff]  }
 0x29b   :  { %3673 = vmatpush1.bf16.msra.mxu0 %v11486_v45  ;;  %v11577_v45 = vld [vmem:[%s16874_s1 + $0xc30] ss:$8 sps:$4 sm:$0xff]  }
 0x29c   :  { %3674 = vmatprep.subr.bf16.mxu0 %v11491_v46  ;;  %v11582_v46 = vld [vmem:[%s16874_s1 + $0xc44] ss:$8 sps:$4 sm:$0xff]  }
 0x29f   :  { %3675 = vmatpush1.bf16.msra.mxu0 %v11489_v47  ;;  %v11580_v47 = vld [vmem:[%s16874_s1 + $0xc40] ss:$8 sps:$4 sm:$0xff]  }
 0x2a0   :  { %3676 = vmatprep.subr.bf16.mxu0 %v11494_v48  ;;  %v11585_v48 = vld [vmem:[%s16874_s1 + $0xc54] ss:$8 sps:$4 sm:$0xff]  }
 0x2a3   :  { %3677 = vmatpush1.bf16.msra.mxu0 %v11492_v49  ;;  %v11583_v49 = vld [vmem:[%s16874_s1 + $0xc50] ss:$8 sps:$4 sm:$0xff]  }
 0x2a4   :  { %3678 = vmatprep.subr.bf16.mxu0 %v11497_v50  ;;  %v11588_v50 = vld [vmem:[%s16874_s1 + $0xc64] ss:$8 sps:$4 sm:$0xff]  }
 0x2a7   :  { %3679 = vmatpush1.bf16.msra.mxu0 %v11495_v51  ;;  %v11586_v51 = vld [vmem:[%s16874_s1 + $0xc60] ss:$8 sps:$4 sm:$0xff]  }
 0x2a8   :  { %3680 = vmatprep.subr.bf16.mxu0 %v11500_v52  ;;  %v11591_v52 = vld [vmem:[%s16874_s1 + $0xc74] ss:$8 sps:$4 sm:$0xff]  }
 0x2ab   :  { %3681 = vmatpush1.bf16.msra.mxu0 %v11498_v53  ;;  %v11589_v53 = vld [vmem:[%s16874_s1 + $0xc70] ss:$8 sps:$4 sm:$0xff]  }
 0x2ac   :  { %3682 = vmatprep.subr.bf16.mxu0 %v11503_v54  ;;  %v11594_v54 = vld [vmem:[%s16874_s1 + $0xc84] ss:$8 sps:$4 sm:$0xff]  }
 0x2af   :  { %3683 = vmatpush1.bf16.msra.mxu0 %v11501_v55  ;;  %v11592_v55 = vld [vmem:[%s16874_s1 + $0xc80] ss:$8 sps:$4 sm:$0xff]  }
 0x2b0   :  { %3684 = vmatprep.subr.bf16.mxu0 %v11506_v56  ;;  %v11597_v56 = vld [vmem:[%s16874_s1 + $0xc94] ss:$8 sps:$4 sm:$0xff]  }
 0x2b3   :  { %3685 = vmatpush1.bf16.msra.mxu0 %v11504_v57  ;;  %v11595_v57 = vld [vmem:[%s16874_s1 + $0xc90] ss:$8 sps:$4 sm:$0xff]  }
 0x2b4   :  { %3686 = vmatprep.subr.bf16.mxu0 %v11509_v58  ;;  %v11600_v58 = vld [vmem:[%s16874_s1 + $0xca4] ss:$8 sps:$4 sm:$0xff]  }
 0x2b7   :  { %3687 = vmatpush1.bf16.msra.mxu0 %v11507_v59  ;;  %v11598_v59 = vld [vmem:[%s16874_s1 + $0xca0] ss:$8 sps:$4 sm:$0xff]  }
 0x2b8   :  { %3688 = vmatprep.subr.bf16.mxu0 %v11512_v60  ;;  %v11603_v60 = vld [vmem:[%s16874_s1 + $0xcb4] ss:$8 sps:$4 sm:$0xff]  }
 0x2bb   :  { %3689 = vmatpush1.bf16.msra.mxu0 %v11510_v61  ;;  %v11601_v61 = vld [vmem:[%s16874_s1 + $0xcb0] ss:$8 sps:$4 sm:$0xff]  }
 0x2bc   :  { %3690 = vmatprep.subr.bf16.mxu0 %v11515_v62  ;;  %v11606_v62 = vld [vmem:[%s16874_s1 + $0xcc4] ss:$8 sps:$4 sm:$0xff]  }
 0x2bf   :  { %3691 = vmatpush1.bf16.msra.mxu0 %v11513_v63  ;;  %v11604_v63 = vld [vmem:[%s16874_s1 + $0xcc0] ss:$8 sps:$4 sm:$0xff]  }
 0x2c0   :  { %3701 = vmatprep.subr.bf16.mxu0 %v11520_v0  ;;  %v11609_v0 = vld [vmem:[%s16874_s1 + $0xcd4] ss:$8 sps:$4 sm:$0xff]  }
 0x2c2   :  { %3693 = vmatmul.mubr.bf16.vlgmr.msra.gmra.mrb[0].mxu0 %v9162_v2  ;;  %v11612_v2 = vld [vmem:[%s16874_s1 + $0xce4] ss:$8 sps:$4 sm:$0xff]  }
 0x2c3   :  { %3702 = vmatpush1.bf16.msra.mxu0 %v11518_v3  ;;  %3733 = vmatprep.mubr.bf16.mxu0 %v9165_v4  ;;  %v11610_v3 = vld [vmem:[%s16874_s1 + $0xce0] ss:$8 sps:$4 sm:$0xff]   ;;  %v11615_v4 = vld [vmem:[%s16874_s1 + $0xcf4] ss:$8 sps:$4 sm:$0xff]  }
 0x2c4   :  { %3703 = vmatprep.subr.bf16.mxu0 %v11523_v5  ;;  %v11613_v5 = vld [vmem:[%s16874_s1 + $0xcf0] ss:$8 sps:$4 sm:$0xff]  }
 0x2c7   :  { %3704 = vmatpush1.bf16.msra.mxu0 %v11521_v6  ;;  %v11620_v6 = vld [vmem:[%s16874_s1 + $0xd04] ss:$8 sps:$4 sm:$0xff]  }
 0x2c8   :  { %3705 = vmatprep.subr.bf16.mxu0 %v11526_v7  ;;  %v14157_v7 = vld [vmem:[%s16875_s0 + $0x68] sm:$0xff] }
 0x2cb   :  { %3706 = vmatpush1.bf16.msra.mxu0 %v11524_v8  ;;  %v9166_v8 = vcombine.low %v14052_v36, %v14052_v36  ;;  %v11657_v36 = vld [vmem:[%s16874_s1 + $0xdd0] ss:$8 sps:$4 sm:$0xff]  }
 0x2cc   :  { %3707 = vmatprep.subr.bf16.mxu0 %v11529_v9  ;;  %v11618_v9 = vld [vmem:[%s16874_s1 + $0xd00] ss:$8 sps:$4 sm:$0xff]  }
 0x2cf   :  { %3708 = vmatpush1.bf16.msra.mxu0 %v11527_v10  ;;  %v9169_v10 = vcombine.high %v14157_v7, %v14157_v7 }
 0x2d0   :  { %3709 = vmatprep.subr.bf16.mxu0 %v11532_v11  ;;  %v11623_v11 = vld [vmem:[%s16874_s1 + $0xd14] ss:$8 sps:$4 sm:$0xff]  }
 0x2d3   :  { %3710 = vmatpush1.bf16.msra.mxu0 %v11530_v12  ;;  %v11621_v12 = vld [vmem:[%s16874_s1 + $0xd10] ss:$8 sps:$4 sm:$0xff]  }
 0x2d4   :  { %3711 = vmatprep.subr.bf16.mxu0 %v11535_v13  ;;  %v11626_v13 = vld [vmem:[%s16874_s1 + $0xd24] ss:$8 sps:$4 sm:$0xff]  }
 0x2d7   :  { %3712 = vmatpush1.bf16.msra.mxu0 %v11533_v14  ;;  %v11624_v14 = vld [vmem:[%s16874_s1 + $0xd20] ss:$8 sps:$4 sm:$0xff]  }
 0x2d8   :  { %3713 = vmatprep.subr.bf16.mxu0 %v11538_v15  ;;  %v11629_v15 = vld [vmem:[%s16874_s1 + $0xd34] ss:$8 sps:$4 sm:$0xff]  }
 0x2db   :  { %3714 = vmatpush1.bf16.msra.mxu0 %v11536_v16  ;;  %v11627_v16 = vld [vmem:[%s16874_s1 + $0xd30] ss:$8 sps:$4 sm:$0xff]  }
 0x2dc   :  { %3715 = vmatprep.subr.bf16.mxu0 %v11541_v17  ;;  %v11632_v17 = vld [vmem:[%s16874_s1 + $0xd44] ss:$8 sps:$4 sm:$0xff]  }
 0x2df   :  { %3716 = vmatpush1.bf16.msra.mxu0 %v11539_v18  ;;  %v11630_v18 = vld [vmem:[%s16874_s1 + $0xd40] ss:$8 sps:$4 sm:$0xff]  }
 0x2e0   :  { %3717 = vmatprep.subr.bf16.mxu0 %v11544_v19  ;;  %v11635_v19 = vld [vmem:[%s16874_s1 + $0xd54] ss:$8 sps:$4 sm:$0xff]  }
 0x2e3   :  { %3718 = vmatpush1.bf16.msra.mxu0 %v11542_v20  ;;  %v11633_v20 = vld [vmem:[%s16874_s1 + $0xd50] ss:$8 sps:$4 sm:$0xff]  }
 0x2e4   :  { %3719 = vmatprep.subr.bf16.mxu0 %v11547_v21  ;;  %v11638_v21 = vld [vmem:[%s16874_s1 + $0xd64] ss:$8 sps:$4 sm:$0xff]  }
 0x2e7   :  { %3720 = vmatpush1.bf16.msra.mxu0 %v11545_v22  ;;  %v11636_v22 = vld [vmem:[%s16874_s1 + $0xd60] ss:$8 sps:$4 sm:$0xff]  }
 0x2e8   :  { %3721 = vmatprep.subr.bf16.mxu0 %v11550_v23  ;;  %v11641_v23 = vld [vmem:[%s16874_s1 + $0xd74] ss:$8 sps:$4 sm:$0xff]  }
 0x2eb   :  { %3722 = vmatpush1.bf16.msra.mxu0 %v11548_v24  ;;  %v11639_v24 = vld [vmem:[%s16874_s1 + $0xd70] ss:$8 sps:$4 sm:$0xff]  }
 0x2ec   :  { %3723 = vmatprep.subr.bf16.mxu0 %v11553_v25  ;;  %v11644_v25 = vld [vmem:[%s16874_s1 + $0xd84] ss:$8 sps:$4 sm:$0xff]  }
 0x2ef   :  { %3724 = vmatpush1.bf16.msra.mxu0 %v11551_v26  ;;  %v11642_v26 = vld [vmem:[%s16874_s1 + $0xd80] ss:$8 sps:$4 sm:$0xff]  }
 0x2f0   :  { %3725 = vmatprep.subr.bf16.mxu0 %v11556_v27  ;;  %v11647_v27 = vld [vmem:[%s16874_s1 + $0xd94] ss:$8 sps:$4 sm:$0xff]  }
 0x2f3   :  { %3726 = vmatpush1.bf16.msra.mxu0 %v11554_v28  ;;  %v11645_v28 = vld [vmem:[%s16874_s1 + $0xd90] ss:$8 sps:$4 sm:$0xff]  }
 0x2f4   :  { %3727 = vmatprep.subr.bf16.mxu0 %v11559_v29  ;;  %v11650_v29 = vld [vmem:[%s16874_s1 + $0xda4] ss:$8 sps:$4 sm:$0xff]  }
 0x2f7   :  { %3728 = vmatpush1.bf16.msra.mxu0 %v11557_v30  ;;  %v11648_v30 = vld [vmem:[%s16874_s1 + $0xda0] ss:$8 sps:$4 sm:$0xff]  }
 0x2f8   :  { %3729 = vmatprep.subr.bf16.mxu0 %v11562_v31  ;;  %v11653_v31 = vld [vmem:[%s16874_s1 + $0xdb4] ss:$8 sps:$4 sm:$0xff]  }
 0x2fb   :  { %3730 = vmatpush1.bf16.msra.mxu0 %v11560_v32  ;;  %v11651_v32 = vld [vmem:[%s16874_s1 + $0xdb0] ss:$8 sps:$4 sm:$0xff]  }
 0x2fc   :  { %3731 = vmatprep.subr.bf16.mxu0 %v11565_v33  ;;  %v11656_v33 = vld [vmem:[%s16874_s1 + $0xdc4] ss:$8 sps:$4 sm:$0xff]  }
 0x2ff   :  { %3732 = vmatpush1.bf16.msra.mxu0 %v11563_v34  ;;  %v11654_v34 = vld [vmem:[%s16874_s1 + $0xdc0] ss:$8 sps:$4 sm:$0xff]  }
 0x300   :  { %3742 = vmatprep.subr.bf16.mxu0 %v11570_v35  ;;  %v11659_v35 = vld [vmem:[%s16874_s1 + $0xdd4] ss:$8 sps:$4 sm:$0xff]  }
 0x302   :  { %3734 = vmatmul.mubr.bf16.vlgmr.msra.gmra.mrb[0].mxu0 %v9164_v37  ;;  %v11662_v37 = vld [vmem:[%s16874_s1 + $0xde4] ss:$8 sps:$4 sm:$0xff]  }
 0x303   :  { %3743 = vmatpush1.bf16.msra.mxu0 %v11568_v38  ;;  %3774 = vmatprep.mubr.bf16.mxu0 %v9167_v39  ;;  %v11660_v38 = vld [vmem:[%s16874_s1 + $0xde0] ss:$8 sps:$4 sm:$0xff]   ;;  %v11665_v39 = vld [vmem:[%s16874_s1 + $0xdf4] ss:$8 sps:$4 sm:$0xff]  }
 0x304   :  { %3744 = vmatprep.subr.bf16.mxu0 %v11573_v40  ;;  %v11663_v40 = vld [vmem:[%s16874_s1 + $0xdf0] ss:$8 sps:$4 sm:$0xff]  }
 0x307   :  { %3745 = vmatpush1.bf16.msra.mxu0 %v11571_v41  ;;  %v11670_v41 = vld [vmem:[%s16874_s1 + $0xe04] ss:$8 sps:$4 sm:$0xff]  }
 0x308   :  { %3746 = vmatprep.subr.bf16.mxu0 %v11576_v42  ;;  %v14262_v42 = vld [vmem:[%s16875_s0 + $0x70] sm:$0xff] }
 0x30b   :  { %3747 = vmatpush1.bf16.msra.mxu0 %v11574_v43  ;;  %v9168_v43 = vcombine.low %v14157_v7, %v14157_v7  ;;  %v11691_v7 = vld [vmem:[%s16874_s1 + $0xe74] ss:$8 sps:$4 sm:$0xff]  }
 0x30c   :  { %3748 = vmatprep.subr.bf16.mxu0 %v11579_v44  ;;  %v11668_v44 = vld [vmem:[%s16874_s1 + $0xe00] ss:$8 sps:$4 sm:$0xff]  }
 0x30f   :  { %3749 = vmatpush1.bf16.msra.mxu0 %v11577_v45  ;;  %v9171_v45 = vcombine.high %v14262_v42, %v14262_v42 }
 0x310   :  { %3750 = vmatprep.subr.bf16.mxu0 %v11582_v46  ;;  %v11673_v46 = vld [vmem:[%s16874_s1 + $0xe14] ss:$8 sps:$4 sm:$0xff]  }
 0x313   :  { %3751 = vmatpush1.bf16.msra.mxu0 %v11580_v47  ;;  %v11671_v47 = vld [vmem:[%s16874_s1 + $0xe10] ss:$8 sps:$4 sm:$0xff]  }
 0x314   :  { %3752 = vmatprep.subr.bf16.mxu0 %v11585_v48  ;;  %v11676_v48 = vld [vmem:[%s16874_s1 + $0xe24] ss:$8 sps:$4 sm:$0xff]  }
 0x317   :  { %3753 = vmatpush1.bf16.msra.mxu0 %v11583_v49  ;;  %v11768_v49 = vld [vmem:[%s16876_s4 + $0x4] ss:$8 sps:$4 sm:$0xff]  }
 0x318   :  { %3754 = vmatprep.subr.bf16.mxu0 %v11588_v50  ;;  %v11770_v50 = vld [vmem:[%s16876_s4] ss:$8 sps:$4 sm:$0xff]   ;;  %4124 = vmatprep.subr.bf16.mxu1 %v11768_v49  ;;  %v11732_v49 = vld [vmem:[%s16874_s1 + $0xf44] ss:$8 sps:$4 sm:$0xff]  }
 0x319   :  { %4125 = vmatpush1.bf16.msra.mxu1 %v11770_v50  ;;  %v11730_v50 = vld [vmem:[%s16874_s1 + $0xf40] ss:$8 sps:$4 sm:$0xff]  }
 0x31b   :  { %3755 = vmatpush1.bf16.msra.mxu0 %v11586_v51  ;;  %v11771_v51 = vld [vmem:[%s16876_s4 + $0x14] ss:$8 sps:$4 sm:$0xff]  }
 0x31c   :  { %3756 = vmatprep.subr.bf16.mxu0 %v11591_v52  ;;  %v11674_v52 = vld [vmem:[%s16874_s1 + $0xe20] ss:$8 sps:$4 sm:$0xff]   ;;  %4126 = vmatprep.subr.bf16.mxu1 %v11771_v51  ;;  %v11735_v51 = vld [vmem:[%s16874_s1 + $0xf54] ss:$8 sps:$4 sm:$0xff]  }
 0x31f   :  { %3757 = vmatpush1.bf16.msra.mxu0 %v11589_v53  ;;  %v11773_v53 = vld [vmem:[%s16876_s4 + $0x10] ss:$8 sps:$4 sm:$0xff]  }
 0x320   :  { %3758 = vmatprep.subr.bf16.mxu0 %v11594_v54  ;;  %v11774_v54 = vld [vmem:[%s16876_s4 + $0x24] ss:$8 sps:$4 sm:$0xff]   ;;  %4127 = vmatpush1.bf16.msra.mxu1 %v11773_v53 }
 0x321   :  { %4128 = vmatprep.subr.bf16.mxu1 %v11774_v54  ;;  %v11738_v53 = vld [vmem:[%s16874_s1 + $0xf64] ss:$8 sps:$4 sm:$0xff]   ;;  %v11736_v54 = vld [vmem:[%s16874_s1 + $0xf60] ss:$8 sps:$4 sm:$0xff]  }
 0x323   :  { %3759 = vmatpush1.bf16.msra.mxu0 %v11592_v55  ;;  %v11679_v55 = vld [vmem:[%s16874_s1 + $0xe34] ss:$8 sps:$4 sm:$0xff]  }
 0x324   :  { %3760 = vmatprep.subr.bf16.mxu0 %v11597_v56  ;;  %v11677_v56 = vld [vmem:[%s16874_s1 + $0xe30] ss:$8 sps:$4 sm:$0xff]  }
 0x327   :  { %3761 = vmatpush1.bf16.msra.mxu0 %v11595_v57  ;;  %v11776_v57 = vld [vmem:[%s16876_s4 + $0x20] ss:$8 sps:$4 sm:$0xff]  }
 0x328   :  { %3762 = vmatprep.subr.bf16.mxu0 %v11600_v58  ;;  %v11777_v58 = vld [vmem:[%s16876_s4 + $0x34] ss:$8 sps:$4 sm:$0xff]   ;;  %4129 = vmatpush1.bf16.msra.mxu1 %v11776_v57  ;;  %v11744_v57 = vld [vmem:[%s16874_s1 + $0xf84] ss:$8 sps:$4 sm:$0xff]  }
 0x329   :  { %4130 = vmatprep.subr.bf16.mxu1 %v11777_v58  ;;  %v11742_v58 = vld [vmem:[%s16874_s1 + $0xf80] ss:$8 sps:$4 sm:$0xff]  }
 0x32b   :  { %3763 = vmatpush1.bf16.msra.mxu0 %v11598_v59  ;;  %v11682_v59 = vld [vmem:[%s16874_s1 + $0xe44] ss:$8 sps:$4 sm:$0xff]  }
 0x32c   :  { %3764 = vmatprep.subr.bf16.mxu0 %v11603_v60  ;;  %v11680_v60 = vld [vmem:[%s16874_s1 + $0xe40] ss:$8 sps:$4 sm:$0xff]  }
 0x32f   :  { %3765 = vmatpush1.bf16.msra.mxu0 %v11601_v61  ;;  %v11779_v61 = vld [vmem:[%s16876_s4 + $0x30] ss:$8 sps:$4 sm:$0xff]  }
 0x330   :  { %3766 = vmatprep.subr.bf16.mxu0 %v11606_v62  ;;  %v11780_v62 = vld [vmem:[%s16876_s4 + $0x44] ss:$8 sps:$4 sm:$0xff]   ;;  %4131 = vmatpush1.bf16.msra.mxu1 %v11779_v61 }
 0x331   :  { %4132 = vmatprep.subr.bf16.mxu1 %v11780_v62  ;;  %v11750_v61 = vld [vmem:[%s16874_s1 + $0xfa4] ss:$8 sps:$4 sm:$0xff]   ;;  %v11748_v62 = vld [vmem:[%s16874_s1 + $0xfa0] ss:$8 sps:$4 sm:$0xff]  }
 0x333   :  { %3767 = vmatpush1.bf16.msra.mxu0 %v11604_v63  ;;  %v11685_v63 = vld [vmem:[%s16874_s1 + $0xe54] ss:$8 sps:$4 sm:$0xff]  }
 0x334   :  { %3768 = vmatprep.subr.bf16.mxu0 %v11609_v0  ;;  %v11683_v0 = vld [vmem:[%s16874_s1 + $0xe50] ss:$8 sps:$4 sm:$0xff]  }
 0x337   :  { %3769 = vmatpush1.bf16.msra.mxu0 %v11607_v1  ;;  %v11782_v1 = vld [vmem:[%s16876_s4 + $0x40] ss:$8 sps:$4 sm:$0xff]  }
 0x338   :  { %3770 = vmatprep.subr.bf16.mxu0 %v11612_v2  ;;  %v11783_v2 = vld [vmem:[%s16876_s4 + $0x54] ss:$8 sps:$4 sm:$0xff]   ;;  %4133 = vmatpush1.bf16.msra.mxu1 %v11782_v1  ;;  %v11756_v1 = vld [vmem:[%s16874_s1 + $0xfc4] ss:$8 sps:$4 sm:$0xff]  }
 0x339   :  { %4134 = vmatprep.subr.bf16.mxu1 %v11783_v2  ;;  %v11754_v2 = vld [vmem:[%s16874_s1 + $0xfc0] ss:$8 sps:$4 sm:$0xff]  }
 0x33b   :  { %3771 = vmatpush1.bf16.msra.mxu0 %v11610_v3  ;;  %v11688_v3 = vld [vmem:[%s16874_s1 + $0xe64] ss:$8 sps:$4 sm:$0xff]  }
 0x33c   :  { %3772 = vmatprep.subr.bf16.mxu0 %v11615_v4  ;;  %v11785_v4 = vld [vmem:[%s16876_s4 + $0x50] ss:$8 sps:$4 sm:$0xff]  }
 0x33d   :  { %4135 = vmatpush1.bf16.msra.mxu1 %v11785_v4  ;;  %v11757_v4 = vld [vmem:[%s16874_s1 + $0xfd0] ss:$8 sps:$4 sm:$0xff]  }
 0x33f   :  { %3773 = vmatpush1.bf16.msra.mxu0 %v11613_v5  ;;  %v11686_v5 = vld [vmem:[%s16874_s1 + $0xe60] ss:$8 sps:$4 sm:$0xff]  }
 0x340   :  { %3783 = vmatprep.subr.bf16.mxu0 %v11620_v6  ;;  %v11786_v6 = vld [vmem:[%s16876_s4 + $0x64] ss:$8 sps:$4 sm:$0xff]  }
 0x341   :  { %4136 = vmatprep.subr.bf16.mxu1 %v11786_v6  ;;  %v11760_v6 = vld [vmem:[%s16874_s1 + $0xfe0] ss:$8 sps:$4 sm:$0xff]  }
 0x342   :  { %3775 = vmatmul.mubr.bf16.vlgmr.msra.gmra.mrb[0].mxu0 %v9166_v8  ;;  %v11788_v8 = vld [vmem:[%s16876_s4 + $0x60] ss:$8 sps:$4 sm:$0xff]  }
 0x343   :  { %3784 = vmatpush1.bf16.msra.mxu0 %v11618_v9  ;;  %3815 = vmatprep.mubr.bf16.mxu0 %v9169_v10  ;;  %v11689_v9 = vld [vmem:[%s16874_s1 + $0xe70] ss:$8 sps:$4 sm:$0xff]   ;;  %v11789_v10 = vld [vmem:[%s16876_s4 + $0x74] ss:$8 sps:$4 sm:$0xff]  }
 0x344   :  { %3785 = vmatprep.subr.bf16.mxu0 %v11623_v11  ;;  %v11694_v11 = vld [vmem:[%s16874_s1 + $0xe84] ss:$8 sps:$4 sm:$0xff]   ;;  %4137 = vmatpush1.bf16.msra.mxu1 %v11788_v8  ;;  %v11763_v8 = vld [vmem:[%s16874_s1 + $0xff0] ss:$8 sps:$4 sm:$0xff]  }
 0x345   :  { %4138 = vmatprep.subr.bf16.mxu1 %v11789_v10  ;;  %v11807_v10 = vld [vmem:[%s16876_s4 + $0xd4] ss:$8 sps:$4 sm:$0xff]  }
 0x347   :  { %3786 = vmatpush1.bf16.msra.mxu0 %v11621_v12  ;;  %v11791_v12 = vld [vmem:[%s16876_s4 + $0x70] ss:$8 sps:$4 sm:$0xff]  }
 0x348   :  { %3787 = vmatprep.subr.bf16.mxu0 %v11626_v13  ;;  %v11692_v13 = vld [vmem:[%s16874_s1 + $0xe80] ss:$8 sps:$4 sm:$0xff]   ;;  %4139 = vmatpush1.bf16.msra.mxu1 %v11791_v12  ;;  %v11810_v12 = vld [vmem:[%s16876_s4 + $0xe4] ss:$8 sps:$4 sm:$0xff]  }
 0x34b   :  { %3788 = vmatpush1.bf16.msra.mxu0 %v11624_v14  ;;  %v11792_v14 = vld [vmem:[%s16876_s4 + $0x84] ss:$8 sps:$4 sm:$0xff]  }
 0x34c   :  { %3789 = vmatprep.subr.bf16.mxu0 %v11629_v15  ;;  %v11697_v15 = vld [vmem:[%s16874_s1 + $0xe94] ss:$8 sps:$4 sm:$0xff]   ;;  %4140 = vmatprep.subr.bf16.mxu1 %v11792_v14 }
 0x34d   :  { %v11813_v14 = vld [vmem:[%s16876_s4 + $0xf4] ss:$8 sps:$4 sm:$0xff]  }
 0x34f   :  { %3790 = vmatpush1.bf16.msra.mxu0 %v11627_v16  ;;  %v11794_v16 = vld [vmem:[%s16876_s4 + $0x80] ss:$8 sps:$4 sm:$0xff]  }
 0x350   :  { %3791 = vmatprep.subr.bf16.mxu0 %v11632_v17  ;;  %v11695_v17 = vld [vmem:[%s16874_s1 + $0xe90] ss:$8 sps:$4 sm:$0xff]   ;;  %4141 = vmatpush1.bf16.msra.mxu1 %v11794_v16  ;;  %v11818_v16 = vld [vmem:[%s16876_s4 + $0x104] ss:$8 sps:$4 sm:$0xff]  }
 0x353   :  { %3792 = vmatpush1.bf16.msra.mxu0 %v11630_v18  ;;  %v11795_v18 = vld [vmem:[%s16876_s4 + $0x94] ss:$8 sps:$4 sm:$0xff]  }
 0x354   :  { %3793 = vmatprep.subr.bf16.mxu0 %v11635_v19  ;;  %v11700_v19 = vld [vmem:[%s16874_s1 + $0xea4] ss:$8 sps:$4 sm:$0xff]   ;;  %4142 = vmatprep.subr.bf16.mxu1 %v11795_v18 }
 0x357   :  { %3794 = vmatpush1.bf16.msra.mxu0 %v11633_v20  ;;  %v11797_v20 = vld [vmem:[%s16876_s4 + $0x90] ss:$8 sps:$4 sm:$0xff]  }
 0x358   :  { %3795 = vmatprep.subr.bf16.mxu0 %v11638_v21  ;;  %v11698_v21 = vld [vmem:[%s16874_s1 + $0xea0] ss:$8 sps:$4 sm:$0xff]   ;;  %4143 = vmatpush1.bf16.msra.mxu1 %v11797_v20 }
 0x359   :  { %v566_v20 = vld [vmem:[%s16877_s2] sm:$0x3] }
 0x35b   :  { %3796 = vmatpush1.bf16.msra.mxu0 %v11636_v22  ;;  %v11798_v22 = vld [vmem:[%s16876_s4 + $0xa4] ss:$8 sps:$4 sm:$0xff]  }
 0x35c   :  { %3797 = vmatprep.subr.bf16.mxu0 %v11641_v23  ;;  %v11703_v23 = vld [vmem:[%s16874_s1 + $0xeb4] ss:$8 sps:$4 sm:$0xff]   ;;  %4144 = vmatprep.subr.bf16.mxu1 %v11798_v22  ;;  %v14582_v22 = vld [vmem:[%s16878_s3] sm:$0x3f] }
 0x35f   :  { %3798 = vmatpush1.bf16.msra.mxu0 %v11639_v24  ;;  %v11800_v24 = vld [vmem:[%s16876_s4 + $0xa0] ss:$8 sps:$4 sm:$0xff]  }
 0x360   :  { %3799 = vmatprep.subr.bf16.mxu0 %v11644_v25  ;;  %v11701_v25 = vld [vmem:[%s16874_s1 + $0xeb0] ss:$8 sps:$4 sm:$0xff]   ;;  %4145 = vmatpush1.bf16.msra.mxu1 %v11800_v24  ;;  %v14588_v24 = vld [vmem:[%s16878_s3 + $0x8] sm:$0x3f] }
 0x363   :  { %3800 = vmatpush1.bf16.msra.mxu0 %v11642_v26  ;;  %v11801_v26 = vld [vmem:[%s16876_s4 + $0xb4] ss:$8 sps:$4 sm:$0xff]  }
 0x364   :  { %3801 = vmatprep.subr.bf16.mxu0 %v11647_v27  ;;  %v11706_v27 = vld [vmem:[%s16874_s1 + $0xec4] ss:$8 sps:$4 sm:$0xff]   ;;  %4146 = vmatprep.subr.bf16.mxu1 %v11801_v26 }
 0x367   :  { %3802 = vmatpush1.bf16.msra.mxu0 %v11645_v28  ;;  %v11803_v28 = vld [vmem:[%s16876_s4 + $0xb0] ss:$8 sps:$4 sm:$0xff]  }
 0x368   :  { %3803 = vmatprep.subr.bf16.mxu0 %v11650_v29  ;;  %v11704_v29 = vld [vmem:[%s16874_s1 + $0xec0] ss:$8 sps:$4 sm:$0xff]   ;;  %4147 = vmatpush1.bf16.msra.mxu1 %v11803_v28 }
 0x36b   :  { %3804 = vmatpush1.bf16.msra.mxu0 %v11648_v30  ;;  %v11804_v30 = vld [vmem:[%s16876_s4 + $0xc4] ss:$8 sps:$4 sm:$0xff]  }
 0x36c   :  { %3805 = vmatprep.subr.bf16.mxu0 %v11653_v31  ;;  %v11709_v31 = vld [vmem:[%s16874_s1 + $0xed4] ss:$8 sps:$4 sm:$0xff]   ;;  %4148 = vmatprep.subr.bf16.mxu1 %v11804_v30 }
 0x36f   :  { %3806 = vmatpush1.bf16.msra.mxu0 %v11651_v32  ;;  %v11806_v32 = vld [vmem:[%s16876_s4 + $0xc0] ss:$8 sps:$4 sm:$0xff]  }
 0x370   :  { %3807 = vmatprep.subr.bf16.mxu0 %v11656_v33  ;;  %v11707_v33 = vld [vmem:[%s16874_s1 + $0xed0] ss:$8 sps:$4 sm:$0xff]   ;;  %4149 = vmatpush1.bf16.msra.mxu1 %v11806_v32 }
 0x371   :  { %4150 = vmatprep.subr.bf16.mxu1 %v11807_v10  ;;  %v11861_v10 = vld [vmem:[%s16876_s4 + $0x1f0] ss:$8 sps:$4 sm:$0xff]  }
 0x373   :  { %3808 = vmatpush1.bf16.msra.mxu0 %v11654_v34  ;;  %v11712_v34 = vld [vmem:[%s16874_s1 + $0xee4] ss:$8 sps:$4 sm:$0xff]  }
 0x374   :  { %3809 = vmatprep.subr.bf16.mxu0 %v11659_v35  ;;  %v11710_v35 = vld [vmem:[%s16874_s1 + $0xee0] ss:$8 sps:$4 sm:$0xff]  }
 0x377   :  { %3810 = vmatpush1.bf16.msra.mxu0 %v11657_v36  ;;  %v11715_v36 = vld [vmem:[%s16874_s1 + $0xef4] ss:$8 sps:$4 sm:$0xff]  }
 0x378   :  { %3811 = vmatprep.subr.bf16.mxu0 %v11662_v37  ;;  %v11713_v37 = vld [vmem:[%s16874_s1 + $0xef0] ss:$8 sps:$4 sm:$0xff]  }
 0x37b   :  { %3812 = vmatpush1.bf16.msra.mxu0 %v11660_v38  ;;  %v11720_v38 = vld [vmem:[%s16874_s1 + $0xf04] ss:$8 sps:$4 sm:$0xff]  }
 0x37c   :  { %3813 = vmatprep.subr.bf16.mxu0 %v11665_v39  ;;  %v14445_v39 = vld [vmem:[%s16875_s0 + $0x78] sm:$0xff] }
 0x37f   :  { %3814 = vmatpush1.bf16.msra.mxu0 %v11663_v40  ;;  %v11718_v40 = vld [vmem:[%s16874_s1 + $0xf00] ss:$8 sps:$4 sm:$0xff]  }
 0x380   :  { %3824 = vmatprep.subr.bf16.mxu0 %v11670_v41  ;;  %v9170_v41 = vcombine.low %v14262_v42, %v14262_v42  ;;  %v11724_v42 = vld [vmem:[%s16874_s1 + $0xf20] ss:$8 sps:$4 sm:$0xff]  }
 0x382   :  { %3816 = vmatmul.mubr.bf16.vlgmr.msra.gmra.mrb[0].mxu0 %v9168_v43  ;;  %v11723_v43 = vld [vmem:[%s16874_s1 + $0xf14] ss:$8 sps:$4 sm:$0xff]  }
 0x383   :  { %3825 = vmatpush1.bf16.msra.mxu0 %v11668_v44  ;;  %3856 = vmatprep.mubr.bf16.mxu0 %v9171_v45  ;;  %v9173_v44 = vcombine.high %v14445_v39, %v14445_v39  ;;  %v11721_v45 = vld [vmem:[%s16874_s1 + $0xf10] ss:$8 sps:$4 sm:$0xff]  }
 0x384   :  { %3826 = vmatprep.subr.bf16.mxu0 %v11673_v46  ;;  %v11726_v46 = vld [vmem:[%s16874_s1 + $0xf24] ss:$8 sps:$4 sm:$0xff]  }
 0x387   :  { %3827 = vmatpush1.bf16.msra.mxu0 %v11671_v47  ;;  %v11729_v47 = vld [vmem:[%s16874_s1 + $0xf34] ss:$8 sps:$4 sm:$0xff]  }
 0x388   :  { %3828 = vmatprep.subr.bf16.mxu0 %v11676_v48  ;;  %v11727_v48 = vld [vmem:[%s16874_s1 + $0xf30] ss:$8 sps:$4 sm:$0xff]  }
 0x38b   :  { %3829 = vmatpush1.bf16.msra.mxu0 %v11674_v52  ;;  %v11733_v52 = vld [vmem:[%s16874_s1 + $0xf50] ss:$8 sps:$4 sm:$0xff]  }
 0x38c   :  { %3830 = vmatprep.subr.bf16.mxu0 %v11679_v55  ;;  %v11741_v55 = vld [vmem:[%s16874_s1 + $0xf74] ss:$8 sps:$4 sm:$0xff]  }
 0x38f   :  { %3831 = vmatpush1.bf16.msra.mxu0 %v11677_v56  ;;  %v11739_v56 = vld [vmem:[%s16874_s1 + $0xf70] ss:$8 sps:$4 sm:$0xff]  }
 0x390   :  { %3832 = vmatprep.subr.bf16.mxu0 %v11682_v59  ;;  %v11747_v59 = vld [vmem:[%s16874_s1 + $0xf94] ss:$8 sps:$4 sm:$0xff]  }
 0x393   :  { %3833 = vmatpush1.bf16.msra.mxu0 %v11680_v60  ;;  %v11745_v60 = vld [vmem:[%s16874_s1 + $0xf90] ss:$8 sps:$4 sm:$0xff]  }
 0x394   :  { %3834 = vmatprep.subr.bf16.mxu0 %v11685_v63  ;;  %v11753_v63 = vld [vmem:[%s16874_s1 + $0xfb4] ss:$8 sps:$4 sm:$0xff]  }
 0x397   :  { %3835 = vmatpush1.bf16.msra.mxu0 %v11683_v0  ;;  %v11751_v0 = vld [vmem:[%s16874_s1 + $0xfb0] ss:$8 sps:$4 sm:$0xff]  }
 0x398   :  { %3836 = vmatprep.subr.bf16.mxu0 %v11688_v3  ;;  %v11759_v3 = vld [vmem:[%s16874_s1 + $0xfd4] ss:$8 sps:$4 sm:$0xff]  }
 0x39b   :  { %3837 = vmatpush1.bf16.msra.mxu0 %v11686_v5  ;;  %v11762_v5 = vld [vmem:[%s16874_s1 + $0xfe4] ss:$8 sps:$4 sm:$0xff]  }
 0x39c   :  { %3838 = vmatprep.subr.bf16.mxu0 %v11691_v7  ;;  %v11765_v7 = vld [vmem:[%s16874_s1 + $0xff4] ss:$8 sps:$4 sm:$0xff]  }
 0x39f   :  { %3839 = vmatpush1.bf16.msra.mxu0 %v11689_v9  ;;  %v9172_v9 = vcombine.low %v14445_v39, %v14445_v39 }
 0x3a0   :  { %3840 = vmatprep.subr.bf16.mxu0 %v11694_v11  ;;  %v11809_v11 = vld [vmem:[%s16876_s4 + $0xd0] ss:$8 sps:$4 sm:$0xff]  }
 0x3a1   :  { %4151 = vmatpush1.bf16.msra.mxu1 %v11809_v11  ;;  %v11866_v11 = vld [vmem:[%s16876_s4 + $0x204] ss:$8 sps:$4 sm:$0xff]  }
 0x3a2   :  { %4152 = vmatprep.subr.bf16.mxu1 %v11810_v12  ;;  %v11864_v12 = vld [vmem:[%s16876_s4 + $0x200] ss:$8 sps:$4 sm:$0xff]  }
 0x3a3   :  { %3841 = vmatpush1.bf16.msra.mxu0 %v11692_v13  ;;  %v11812_v13 = vld [vmem:[%s16876_s4 + $0xe0] ss:$8 sps:$4 sm:$0xff]  }
 0x3a4   :  { %3842 = vmatprep.subr.bf16.mxu0 %v11697_v15  ;;  %v11815_v15 = vld [vmem:[%s16876_s4 + $0xf0] ss:$8 sps:$4 sm:$0xff]  }
 0x3a5   :  { %4153 = vmatpush1.bf16.msra.mxu1 %v11812_v13  ;;  %v11869_v13 = vld [vmem:[%s16876_s4 + $0x214] ss:$8 sps:$4 sm:$0xff]  }
 0x3a6   :  { %4154 = vmatprep.subr.bf16.mxu1 %v11813_v14  ;;  %v11867_v14 = vld [vmem:[%s16876_s4 + $0x210] ss:$8 sps:$4 sm:$0xff]  }
 0x3a7   :  { %3843 = vmatpush1.bf16.msra.mxu0 %v11695_v17  ;;  %v568_v17 = vlaneseq }
 0x3a8   :  { %3844 = vmatprep.subr.bf16.mxu0 %v11700_v19 }
 0x3a9   :  { %4155 = vmatpush1.bf16.msra.mxu1 %v11815_v15  ;;  %v14568_v18 = vshrl.u32 %v568_v17, 7  ;;  %v11872_v15 = vld [vmem:[%s16876_s4 + $0x224] ss:$8 sps:$4 sm:$0xff]  }
 0x3aa   :  { %4358 = vmatprep.subr.bf16.mxu1 %v11818_v16  ;;  %v11870_v16 = vld [vmem:[%s16876_s4 + $0x220] ss:$8 sps:$4 sm:$0xff]  }
 0x3ab   :  { %3845 = vmatpush1.bf16.msra.mxu0 %v11698_v21  ;;  %v14571_v19 = vsub.s32 0, %v14568_v18  ;;  %v14577_v21 = vsub.s32 1, %v14568_v18 }
 0x3ac   :  { %3846 = vmatprep.subr.bf16.mxu0 %v11703_v23 }
 0x3ad   :  { %v571_v23 = vrot.slane %v566_v20, %v14571_v19  ;;  %v3911_v26 = vrot.slane %v14582_v22, %v14571_v19  ;;  %v3915_v28 = vrot.slane %v14588_v24, %v14571_v19  ;;  %v3921_v30 = vrot.slane %v14582_v22, %v14577_v21 }
 0x3af   :  { %3847 = vmatpush1.bf16.msra.mxu0 %v11701_v25  ;;  %v575_v25 = vrot.slane %v566_v20, %v14577_v21  ;;  %v11875_v20 = vld [vmem:[%s16876_s4 + $0x234] ss:$8 sps:$4 sm:$0xff]  }
 0x3b0   :  { %3848 = vmatprep.subr.bf16.mxu0 %v11706_v27 }
 0x3b3   :  { %3849 = vmatpush1.bf16.msra.mxu0 %v11704_v29 }
 0x3b4   :  { %3850 = vmatprep.subr.bf16.mxu0 %v11709_v31 }
 0x3b7   :  { %3851 = vmatpush1.bf16.msra.mxu0 %v11707_v33  ;;  %v3925_v33 = vrot.slane %v14588_v24, %v14577_v21 }
 0x3b8   :  { %3852 = vmatprep.subr.bf16.mxu0 %v11712_v34 }
 0x3bb   :  { %3853 = vmatpush1.bf16.msra.mxu0 %v11710_v35 }
 0x3bc   :  { %3854 = vmatprep.subr.bf16.mxu0 %v11715_v36 }
 0x3bf   :  { %3855 = vmatpush1.bf16.msra.mxu0 %v11713_v37 }
 0x3c0   :  { %3865 = vmatprep.subr.bf16.mxu0 %v11720_v38 }
 0x3c2   :  { %3857 = vmatmul.mubr.bf16.vlgmr.msra.gmra.mrb[0].mxu0 %v9170_v41 }
 0x3c3   :  { %3866 = vmatpush1.bf16.msra.mxu0 %v11718_v40  ;;  %3897 = vmatprep.mubr.bf16.mxu0 %v9173_v44  ;;  %v11816_v44 = vld [vmem:[%s16876_s4 + $0x100] ss:$8 sps:$4 sm:$0xff]  }
 0x3c4   :  { %3867 = vmatprep.subr.bf16.mxu0 %v11723_v43 }
 0x3c7   :  { %3868 = vmatpush1.bf16.msra.mxu0 %v11721_v45 }
 0x3c8   :  { %3869 = vmatprep.subr.bf16.mxu0 %v11726_v46  ;;  %v11821_v46 = vld [vmem:[%s16876_s4 + $0x114] ss:$8 sps:$4 sm:$0xff]  }
 0x3cb   :  { %3870 = vmatpush1.bf16.msra.mxu0 %v11724_v42  ;;  %v11819_v42 = vld [vmem:[%s16876_s4 + $0x110] ss:$8 sps:$4 sm:$0xff]  }
 0x3cc   :  { %3871 = vmatprep.subr.bf16.mxu0 %v11729_v47  ;;  %v11824_v47 = vld [vmem:[%s16876_s4 + $0x124] ss:$8 sps:$4 sm:$0xff]  }
 0x3cf   :  { %3872 = vmatpush1.bf16.msra.mxu0 %v11727_v48  ;;  %v11822_v48 = vld [vmem:[%s16876_s4 + $0x120] ss:$8 sps:$4 sm:$0xff]  }
 0x3d0   :  { %3873 = vmatprep.subr.bf16.mxu0 %v11732_v49  ;;  %v11827_v49 = vld [vmem:[%s16876_s4 + $0x134] ss:$8 sps:$4 sm:$0xff]  }
 0x3d3   :  { %3874 = vmatpush1.bf16.msra.mxu0 %v11730_v50  ;;  %v11825_v50 = vld [vmem:[%s16876_s4 + $0x130] ss:$8 sps:$4 sm:$0xff]  }
 0x3d4   :  { %3875 = vmatprep.subr.bf16.mxu0 %v11735_v51  ;;  %v11830_v51 = vld [vmem:[%s16876_s4 + $0x144] ss:$8 sps:$4 sm:$0xff]  }
 0x3d7   :  { %3876 = vmatpush1.bf16.msra.mxu0 %v11733_v52  ;;  %v11828_v52 = vld [vmem:[%s16876_s4 + $0x140] ss:$8 sps:$4 sm:$0xff]  }
 0x3d8   :  { %3877 = vmatprep.subr.bf16.mxu0 %v11738_v53  ;;  %v11833_v53 = vld [vmem:[%s16876_s4 + $0x154] ss:$8 sps:$4 sm:$0xff]  }
 0x3db   :  { %3878 = vmatpush1.bf16.msra.mxu0 %v11736_v54  ;;  %v11831_v54 = vld [vmem:[%s16876_s4 + $0x150] ss:$8 sps:$4 sm:$0xff]  }
 0x3dc   :  { %3879 = vmatprep.subr.bf16.mxu0 %v11741_v55  ;;  %v11836_v55 = vld [vmem:[%s16876_s4 + $0x164] ss:$8 sps:$4 sm:$0xff]  }
 0x3df   :  { %3880 = vmatpush1.bf16.msra.mxu0 %v11739_v56  ;;  %v11834_v56 = vld [vmem:[%s16876_s4 + $0x160] ss:$8 sps:$4 sm:$0xff]  }
 0x3e0   :  { %3881 = vmatprep.subr.bf16.mxu0 %v11744_v57  ;;  %v11839_v57 = vld [vmem:[%s16876_s4 + $0x174] ss:$8 sps:$4 sm:$0xff]  }
 0x3e3   :  { %3882 = vmatpush1.bf16.msra.mxu0 %v11742_v58  ;;  %v11837_v58 = vld [vmem:[%s16876_s4 + $0x170] ss:$8 sps:$4 sm:$0xff]  }
 0x3e4   :  { %3883 = vmatprep.subr.bf16.mxu0 %v11747_v59  ;;  %v11842_v59 = vld [vmem:[%s16876_s4 + $0x184] ss:$8 sps:$4 sm:$0xff]  }
 0x3e7   :  { %3884 = vmatpush1.bf16.msra.mxu0 %v11745_v60  ;;  %v11840_v60 = vld [vmem:[%s16876_s4 + $0x180] ss:$8 sps:$4 sm:$0xff]  }
 0x3e8   :  { %3885 = vmatprep.subr.bf16.mxu0 %v11750_v61  ;;  %v11845_v61 = vld [vmem:[%s16876_s4 + $0x194] ss:$8 sps:$4 sm:$0xff]  }
 0x3eb   :  { %3886 = vmatpush1.bf16.msra.mxu0 %v11748_v62  ;;  %v11843_v62 = vld [vmem:[%s16876_s4 + $0x190] ss:$8 sps:$4 sm:$0xff]  }
 0x3ec   :  { %3887 = vmatprep.subr.bf16.mxu0 %v11753_v63  ;;  %v11848_v63 = vld [vmem:[%s16876_s4 + $0x1a4] ss:$8 sps:$4 sm:$0xff]  }
 0x3ef   :  { %3888 = vmatpush1.bf16.msra.mxu0 %v11751_v0  ;;  %v11846_v0 = vld [vmem:[%s16876_s4 + $0x1a0] ss:$8 sps:$4 sm:$0xff]  }
 0x3f0   :  { %3889 = vmatprep.subr.bf16.mxu0 %v11756_v1  ;;  %v11851_v1 = vld [vmem:[%s16876_s4 + $0x1b4] ss:$8 sps:$4 sm:$0xff]  }
 0x3f3   :  { %3890 = vmatpush1.bf16.msra.mxu0 %v11754_v2  ;;  %v11849_v2 = vld [vmem:[%s16876_s4 + $0x1b0] ss:$8 sps:$4 sm:$0xff]  }
 0x3f4   :  { %3891 = vmatprep.subr.bf16.mxu0 %v11759_v3  ;;  %v11854_v3 = vld [vmem:[%s16876_s4 + $0x1c4] ss:$8 sps:$4 sm:$0xff]  }
 0x3f7   :  { %3892 = vmatpush1.bf16.msra.mxu0 %v11757_v4  ;;  %v11852_v4 = vld [vmem:[%s16876_s4 + $0x1c0] ss:$8 sps:$4 sm:$0xff]  }
 0x3f8   :  { %3893 = vmatprep.subr.bf16.mxu0 %v11762_v5  ;;  %v11857_v5 = vld [vmem:[%s16876_s4 + $0x1d4] ss:$8 sps:$4 sm:$0xff]  }
 0x3fb   :  { %3894 = vmatpush1.bf16.msra.mxu0 %v11760_v6  ;;  %v11855_v6 = vld [vmem:[%s16876_s4 + $0x1d0] ss:$8 sps:$4 sm:$0xff]  }
 0x3fc   :  { %3895 = vmatprep.subr.bf16.mxu0 %v11765_v7  ;;  %v11860_v7 = vld [vmem:[%s16876_s4 + $0x1e4] ss:$8 sps:$4 sm:$0xff]  }
 0x3ff   :  { %3896 = vmatpush1.bf16.msra.mxu0 %v11763_v8  ;;  %v11858_v8 = vld [vmem:[%s16876_s4 + $0x1e0] ss:$8 sps:$4 sm:$0xff]  }
 0x402   :  { %3898 = vmatmul.mubr.bf16.vlgmr.msra.gmra.mrb[0].mxu0 %v9172_v9  ;;  %v11863_v9 = vld [vmem:[%s16876_s4 + $0x1f4] ss:$8 sps:$4 sm:$0xff]  }
 0x4d5   :  { %v3899_v27 = vpop.f32.mrb[0].mxu0 }
 0x4d6   :  { %v14595_v29 = vadd.f32 %v3899_v27, %v571_v23  ;;  %v3901_v31 = vpop.f32.mrb[1].mxu0  ;;  %v11873_v23 = vld [vmem:[%s16876_s4 + $0x230] ss:$8 sps:$4 sm:$0xff]   ;;  %v11881_v27 = vld [vmem:[%s16876_s4 + $0x254] ss:$8 sps:$4 sm:$0xff]  }
 0x4d7   :  { %v14599_v32 = vadd.f32 %v3901_v31, %v575_v25  ;;  %v3903_v34 = vpop.f32.mrb[2].mxu0  ;;  %v11878_v25 = vld [vmem:[%s16876_s4 + $0x244] ss:$8 sps:$4 sm:$0xff]   ;;  %v11882_v31 = vld [vmem:[%s16876_s4 + $0x260] ss:$8 sps:$4 sm:$0xff]  }
 0x4d8   :  { %v3916_v35 = vmul.f32 %v14595_v29, %v3911_v26  ;;  %v3904_v36 = vpop.f32.mrb[3].mxu0  ;;  %v11876_v26 = vld [vmem:[%s16876_s4 + $0x240] ss:$8 sps:$4 sm:$0xff]   ;;  %v11885_v34 = vld [vmem:[%s16876_s4 + $0x270] ss:$8 sps:$4 sm:$0xff]  }
 0x4d9   :  { %v3917_v37 = vmul.f32 %v14599_v32, %v3915_v28  ;;  %v11879_v28 = vld [vmem:[%s16876_s4 + $0x250] ss:$8 sps:$4 sm:$0xff]   ;;  %v11888_v36 = vld [vmem:[%s16876_s4 + $0x280] ss:$8 sps:$4 sm:$0xff]  }
 0x4da   :  { %v3926_v38 = vadd.f32 %v3921_v30, %v3916_v35  ;;  %v11884_v30 = vld [vmem:[%s16876_s4 + $0x264] ss:$8 sps:$4 sm:$0xff]  }
 0x4db   :  { %v3927_v39 = vadd.f32 %v3925_v33, %v3917_v37  ;;  %v11887_v33 = vld [vmem:[%s16876_s4 + $0x274] ss:$8 sps:$4 sm:$0xff]   ;;  %v11890_v35 = vld [vmem:[%s16876_s4 + $0x284] ss:$8 sps:$4 sm:$0xff]  }
 0x4dc   :  { %v3928_v40 = vmax.f32 %v3926_v38, 0.0  ;;  %v11893_v37 = vld [vmem:[%s16876_s4 + $0x294] ss:$8 sps:$4 sm:$0xff]   ;;  %v11891_v38 = vld [vmem:[%s16876_s4 + $0x290] ss:$8 sps:$4 sm:$0xff]  }
 0x4dd   :  { %v3929_v41 = vmax.f32 %v3927_v39, 0.0  ;;  %v11896_v39 = vld [vmem:[%s16876_s4 + $0x2a4] ss:$8 sps:$4 sm:$0xff]  }
 0x4de   :  { %v14610_v45 = vpack.c.bf16 %v3928_v40, %v3928_v40  ;;  %v11894_v40 = vld [vmem:[%s16876_s4 + $0x2a0] ss:$8 sps:$4 sm:$0xff]  }
 0x4df   :  { %v14605_v43 = vpack.c.bf16 %v3929_v41, %v3929_v41  ;;  %v11899_v41 = vld [vmem:[%s16876_s4 + $0x2b4] ss:$8 sps:$4 sm:$0xff]  }
 0x4e1   :  { %4156 = vmatprep.mubr.bf16.mxu1 %v14605_v43 }
 0x4e2   :  { %4157 = vmatmul.mubr.bf16.vlgmr.msra.gmra.mrb[0].mxu1 %v14610_v45 }
 0x4e3   :  { %4359 = vmatpush1.bf16.msra.mxu1 %v11816_v44  ;;  %4390 = vmatprep.mubr.bf16.mxu1 %v14605_v43  ;;  %v11897_v44 = vld [vmem:[%s16876_s4 + $0x2b0] ss:$8 sps:$4 sm:$0xff]  }
 0x4e4   :  { %4360 = vmatprep.subr.bf16.mxu1 %v11821_v46  ;;  %v11902_v46 = vld [vmem:[%s16876_s4 + $0x2c4] ss:$8 sps:$4 sm:$0xff]  }
 0x4e7   :  { %4361 = vmatpush1.bf16.msra.mxu1 %v11819_v42  ;;  %v11900_v42 = vld [vmem:[%s16876_s4 + $0x2c0] ss:$8 sps:$4 sm:$0xff]  }
 0x4e8   :  { %4362 = vmatprep.subr.bf16.mxu1 %v11824_v47  ;;  %v11905_v47 = vld [vmem:[%s16876_s4 + $0x2d4] ss:$8 sps:$4 sm:$0xff]  }
 0x4eb   :  { %4363 = vmatpush1.bf16.msra.mxu1 %v11822_v48  ;;  %v11903_v48 = vld [vmem:[%s16876_s4 + $0x2d0] ss:$8 sps:$4 sm:$0xff]  }
 0x4ec   :  { %4364 = vmatprep.subr.bf16.mxu1 %v11827_v49  ;;  %v11908_v49 = vld [vmem:[%s16876_s4 + $0x2e4] ss:$8 sps:$4 sm:$0xff]  }
 0x4ef   :  { %4365 = vmatpush1.bf16.msra.mxu1 %v11825_v50  ;;  %v11906_v50 = vld [vmem:[%s16876_s4 + $0x2e0] ss:$8 sps:$4 sm:$0xff]  }
 0x4f0   :  { %4366 = vmatprep.subr.bf16.mxu1 %v11830_v51  ;;  %v11911_v51 = vld [vmem:[%s16876_s4 + $0x2f4] ss:$8 sps:$4 sm:$0xff]  }
 0x4f3   :  { %4367 = vmatpush1.bf16.msra.mxu1 %v11828_v52  ;;  %v11909_v52 = vld [vmem:[%s16876_s4 + $0x2f0] ss:$8 sps:$4 sm:$0xff]  }
 0x4f4   :  { %4368 = vmatprep.subr.bf16.mxu1 %v11833_v53  ;;  %v11914_v53 = vld [vmem:[%s16876_s4 + $0x304] ss:$8 sps:$4 sm:$0xff]  }
 0x4f7   :  { %4369 = vmatpush1.bf16.msra.mxu1 %v11831_v54  ;;  %v11912_v54 = vld [vmem:[%s16876_s4 + $0x300] ss:$8 sps:$4 sm:$0xff]  }
 0x4f8   :  { %4370 = vmatprep.subr.bf16.mxu1 %v11836_v55  ;;  %v11917_v55 = vld [vmem:[%s16876_s4 + $0x314] ss:$8 sps:$4 sm:$0xff]  }
 0x4fb   :  { %4371 = vmatpush1.bf16.msra.mxu1 %v11834_v56  ;;  %v11915_v56 = vld [vmem:[%s16876_s4 + $0x310] ss:$8 sps:$4 sm:$0xff]  }
 0x4fc   :  { %4372 = vmatprep.subr.bf16.mxu1 %v11839_v57  ;;  %v11920_v57 = vld [vmem:[%s16876_s4 + $0x324] ss:$8 sps:$4 sm:$0xff]  }
 0x4ff   :  { %4373 = vmatpush1.bf16.msra.mxu1 %v11837_v58  ;;  %v11918_v58 = vld [vmem:[%s16876_s4 + $0x320] ss:$8 sps:$4 sm:$0xff]  }
 0x500   :  { %4374 = vmatprep.subr.bf16.mxu1 %v11842_v59  ;;  %v11923_v59 = vld [vmem:[%s16876_s4 + $0x334] ss:$8 sps:$4 sm:$0xff]  }
 0x503   :  { %4375 = vmatpush1.bf16.msra.mxu1 %v11840_v60  ;;  %v11921_v60 = vld [vmem:[%s16876_s4 + $0x330] ss:$8 sps:$4 sm:$0xff]  }
 0x504   :  { %4376 = vmatprep.subr.bf16.mxu1 %v11845_v61  ;;  %v11926_v61 = vld [vmem:[%s16876_s4 + $0x344] ss:$8 sps:$4 sm:$0xff]  }
 0x507   :  { %4377 = vmatpush1.bf16.msra.mxu1 %v11843_v62  ;;  %v11924_v62 = vld [vmem:[%s16876_s4 + $0x340] ss:$8 sps:$4 sm:$0xff]  }
 0x508   :  { %4378 = vmatprep.subr.bf16.mxu1 %v11848_v63  ;;  %v11929_v63 = vld [vmem:[%s16876_s4 + $0x354] ss:$8 sps:$4 sm:$0xff]  }
 0x50b   :  { %4379 = vmatpush1.bf16.msra.mxu1 %v11846_v0  ;;  %v11927_v0 = vld [vmem:[%s16876_s4 + $0x350] ss:$8 sps:$4 sm:$0xff]  }
 0x50c   :  { %4380 = vmatprep.subr.bf16.mxu1 %v11851_v1  ;;  %v11932_v1 = vld [vmem:[%s16876_s4 + $0x364] ss:$8 sps:$4 sm:$0xff]  }
 0x50f   :  { %4381 = vmatpush1.bf16.msra.mxu1 %v11849_v2  ;;  %v11930_v2 = vld [vmem:[%s16876_s4 + $0x360] ss:$8 sps:$4 sm:$0xff]  }
 0x510   :  { %4382 = vmatprep.subr.bf16.mxu1 %v11854_v3  ;;  %v11935_v3 = vld [vmem:[%s16876_s4 + $0x374] ss:$8 sps:$4 sm:$0xff]  }
 0x513   :  { %4383 = vmatpush1.bf16.msra.mxu1 %v11852_v4  ;;  %v11933_v4 = vld [vmem:[%s16876_s4 + $0x370] ss:$8 sps:$4 sm:$0xff]  }
 0x514   :  { %4384 = vmatprep.subr.bf16.mxu1 %v11857_v5  ;;  %v11938_v5 = vld [vmem:[%s16876_s4 + $0x384] ss:$8 sps:$4 sm:$0xff]  }
 0x517   :  { %4385 = vmatpush1.bf16.msra.mxu1 %v11855_v6  ;;  %v11936_v6 = vld [vmem:[%s16876_s4 + $0x380] ss:$8 sps:$4 sm:$0xff]  }
 0x518   :  { %4386 = vmatprep.subr.bf16.mxu1 %v11860_v7  ;;  %v11941_v7 = vld [vmem:[%s16876_s4 + $0x394] ss:$8 sps:$4 sm:$0xff]  }
 0x51b   :  { %4387 = vmatpush1.bf16.msra.mxu1 %v11858_v8  ;;  %v11939_v8 = vld [vmem:[%s16876_s4 + $0x390] ss:$8 sps:$4 sm:$0xff]  }
 0x51c   :  { %4388 = vmatprep.subr.bf16.mxu1 %v11863_v9  ;;  %v11944_v9 = vld [vmem:[%s16876_s4 + $0x3a4] ss:$8 sps:$4 sm:$0xff]  }
 0x51f   :  { %4389 = vmatpush1.bf16.msra.mxu1 %v11861_v10  ;;  %v11942_v10 = vld [vmem:[%s16876_s4 + $0x3a0] ss:$8 sps:$4 sm:$0xff]  }
 0x520   :  { %4592 = vmatprep.subr.bf16.mxu1 %v11866_v11  ;;  %v11947_v11 = vld [vmem:[%s16876_s4 + $0x3b4] ss:$8 sps:$4 sm:$0xff]  }
 0x522   :  { %4391 = vmatmul.mubr.bf16.vlgmr.msra.gmra.mrb[4].mxu1 %v14610_v45 }
 0x523   :  { %4593 = vmatpush1.bf16.msra.mxu1 %v11864_v12  ;;  %4624 = vmatprep.mubr.bf16.mxu1 %v14605_v43  ;;  %v11945_v12 = vld [vmem:[%s16876_s4 + $0x3b0] ss:$8 sps:$4 sm:$0xff]  }
 0x524   :  { %4594 = vmatprep.subr.bf16.mxu1 %v11869_v13  ;;  %v11950_v13 = vld [vmem:[%s16876_s4 + $0x3c4] ss:$8 sps:$4 sm:$0xff]  }
 0x527   :  { %4595 = vmatpush1.bf16.msra.mxu1 %v11867_v14  ;;  %v11948_v14 = vld [vmem:[%s16876_s4 + $0x3c0] ss:$8 sps:$4 sm:$0xff]  }
 0x528   :  { %4596 = vmatprep.subr.bf16.mxu1 %v11872_v15  ;;  %v11953_v15 = vld [vmem:[%s16876_s4 + $0x3d4] ss:$8 sps:$4 sm:$0xff]  }
 0x52b   :  { %4597 = vmatpush1.bf16.msra.mxu1 %v11870_v16  ;;  %v11951_v16 = vld [vmem:[%s16876_s4 + $0x3d0] ss:$8 sps:$4 sm:$0xff]  }
 0x52c   :  { %4598 = vmatprep.subr.bf16.mxu1 %v11875_v20  ;;  %v11956_v20 = vld [vmem:[%s16876_s4 + $0x3e4] ss:$8 sps:$4 sm:$0xff]  }
 0x52f   :  { %4599 = vmatpush1.bf16.msra.mxu1 %v11873_v23  ;;  %v11954_v23 = vld [vmem:[%s16876_s4 + $0x3e0] ss:$8 sps:$4 sm:$0xff]  }
 0x530   :  { %4600 = vmatprep.subr.bf16.mxu1 %v11878_v25  ;;  %v11959_v25 = vld [vmem:[%s16876_s4 + $0x3f4] ss:$8 sps:$4 sm:$0xff]  }
 0x533   :  { %4601 = vmatpush1.bf16.msra.mxu1 %v11876_v26  ;;  %v11957_v26 = vld [vmem:[%s16876_s4 + $0x3f0] ss:$8 sps:$4 sm:$0xff]  }
 0x534   :  { %4602 = vmatprep.subr.bf16.mxu1 %v11881_v27  ;;  %v11962_v27 = vld [vmem:[%s16876_s4 + $0x404] ss:$8 sps:$4 sm:$0xff]  }
 0x537   :  { %4603 = vmatpush1.bf16.msra.mxu1 %v11879_v28  ;;  %v11960_v28 = vld [vmem:[%s16876_s4 + $0x400] ss:$8 sps:$4 sm:$0xff]  }
 0x538   :  { %4604 = vmatprep.subr.bf16.mxu1 %v11884_v30  ;;  %v11965_v30 = vld [vmem:[%s16876_s4 + $0x414] ss:$8 sps:$4 sm:$0xff]  }
 0x53b   :  { %4605 = vmatpush1.bf16.msra.mxu1 %v11882_v31  ;;  %v11963_v31 = vld [vmem:[%s16876_s4 + $0x410] ss:$8 sps:$4 sm:$0xff]  }
 0x53c   :  { %4606 = vmatprep.subr.bf16.mxu1 %v11887_v33  ;;  %v11968_v33 = vld [vmem:[%s16876_s4 + $0x424] ss:$8 sps:$4 sm:$0xff]  }
 0x53f   :  { %4607 = vmatpush1.bf16.msra.mxu1 %v11885_v34  ;;  %v11966_v34 = vld [vmem:[%s16876_s4 + $0x420] ss:$8 sps:$4 sm:$0xff]  }
 0x540   :  { %4608 = vmatprep.subr.bf16.mxu1 %v11890_v35  ;;  %v11971_v35 = vld [vmem:[%s16876_s4 + $0x434] ss:$8 sps:$4 sm:$0xff]  }
 0x543   :  { %4609 = vmatpush1.bf16.msra.mxu1 %v11888_v36  ;;  %v11969_v36 = vld [vmem:[%s16876_s4 + $0x430] ss:$8 sps:$4 sm:$0xff]  }
 0x544   :  { %4610 = vmatprep.subr.bf16.mxu1 %v11893_v37  ;;  %v11974_v37 = vld [vmem:[%s16876_s4 + $0x444] ss:$8 sps:$4 sm:$0xff]  }
 0x547   :  { %4611 = vmatpush1.bf16.msra.mxu1 %v11891_v38  ;;  %v11972_v38 = vld [vmem:[%s16876_s4 + $0x440] ss:$8 sps:$4 sm:$0xff]  }
 0x548   :  { %4612 = vmatprep.subr.bf16.mxu1 %v11896_v39  ;;  %v11977_v39 = vld [vmem:[%s16876_s4 + $0x454] ss:$8 sps:$4 sm:$0xff]  }
 0x54b   :  { %4613 = vmatpush1.bf16.msra.mxu1 %v11894_v40  ;;  %v11975_v40 = vld [vmem:[%s16876_s4 + $0x450] ss:$8 sps:$4 sm:$0xff]  }
 0x54c   :  { %4614 = vmatprep.subr.bf16.mxu1 %v11899_v41  ;;  %v11980_v41 = vld [vmem:[%s16876_s4 + $0x464] ss:$8 sps:$4 sm:$0xff]  }
 0x54f   :  { %4615 = vmatpush1.bf16.msra.mxu1 %v11897_v44 }
 0x550   :  { %4616 = vmatprep.subr.bf16.mxu1 %v11902_v46 }
 0x553   :  { %4617 = vmatpush1.bf16.msra.mxu1 %v11900_v42 }
 0x554   :  { %4618 = vmatprep.subr.bf16.mxu1 %v11905_v47  ;;  %v11978_v47 = vld [vmem:[%s16876_s4 + $0x460] ss:$8 sps:$4 sm:$0xff]  }
 0x557   :  { %4619 = vmatpush1.bf16.msra.mxu1 %v11903_v48 }
 0x558   :  { %4620 = vmatprep.subr.bf16.mxu1 %v11908_v49  ;;  %v11983_v49 = vld [vmem:[%s16876_s4 + $0x474] ss:$8 sps:$4 sm:$0xff]  }
 0x55b   :  { %4621 = vmatpush1.bf16.msra.mxu1 %v11906_v50  ;;  %v11981_v50 = vld [vmem:[%s16876_s4 + $0x470] ss:$8 sps:$4 sm:$0xff]  }
 0x55c   :  { %4622 = vmatprep.subr.bf16.mxu1 %v11911_v51  ;;  %v11986_v51 = vld [vmem:[%s16876_s4 + $0x484] ss:$8 sps:$4 sm:$0xff]  }
 0x55f   :  { %4623 = vmatpush1.bf16.msra.mxu1 %v11909_v52  ;;  %v11984_v52 = vld [vmem:[%s16876_s4 + $0x480] ss:$8 sps:$4 sm:$0xff]  }
 0x560   :  { %4826 = vmatprep.subr.bf16.mxu1 %v11914_v53  ;;  %v11989_v53 = vld [vmem:[%s16876_s4 + $0x494] ss:$8 sps:$4 sm:$0xff]  }
 0x562   :  { %4625 = vmatmul.mubr.bf16.vlgmr.msra.gmra.mrb[8].mxu1 %v14610_v45 }
 0x563   :  { %4827 = vmatpush1.bf16.msra.mxu1 %v11912_v54  ;;  %4858 = vmatprep.mubr.bf16.mxu1 %v14605_v43  ;;  %v11987_v54 = vld [vmem:[%s16876_s4 + $0x490] ss:$8 sps:$4 sm:$0xff]  }
 0x564   :  { %4828 = vmatprep.subr.bf16.mxu1 %v11917_v55  ;;  %v11992_v55 = vld [vmem:[%s16876_s4 + $0x4a4] ss:$8 sps:$4 sm:$0xff]  }
 0x567   :  { %4829 = vmatpush1.bf16.msra.mxu1 %v11915_v56  ;;  %v11990_v56 = vld [vmem:[%s16876_s4 + $0x4a0] ss:$8 sps:$4 sm:$0xff]  }
 0x568   :  { %4830 = vmatprep.subr.bf16.mxu1 %v11920_v57  ;;  %v11995_v57 = vld [vmem:[%s16876_s4 + $0x4b4] ss:$8 sps:$4 sm:$0xff]  }
 0x56b   :  { %4831 = vmatpush1.bf16.msra.mxu1 %v11918_v58  ;;  %v11993_v58 = vld [vmem:[%s16876_s4 + $0x4b0] ss:$8 sps:$4 sm:$0xff]  }
 0x56c   :  { %4832 = vmatprep.subr.bf16.mxu1 %v11923_v59  ;;  %v11998_v59 = vld [vmem:[%s16876_s4 + $0x4c4] ss:$8 sps:$4 sm:$0xff]  }
 0x56f   :  { %4833 = vmatpush1.bf16.msra.mxu1 %v11921_v60  ;;  %v11996_v60 = vld [vmem:[%s16876_s4 + $0x4c0] ss:$8 sps:$4 sm:$0xff]  }
 0x570   :  { %4834 = vmatprep.subr.bf16.mxu1 %v11926_v61  ;;  %v12001_v61 = vld [vmem:[%s16876_s4 + $0x4d4] ss:$8 sps:$4 sm:$0xff]  }
 0x573   :  { %4835 = vmatpush1.bf16.msra.mxu1 %v11924_v62  ;;  %v11999_v62 = vld [vmem:[%s16876_s4 + $0x4d0] ss:$8 sps:$4 sm:$0xff]  }
 0x574   :  { %4836 = vmatprep.subr.bf16.mxu1 %v11929_v63  ;;  %v12004_v63 = vld [vmem:[%s16876_s4 + $0x4e4] ss:$8 sps:$4 sm:$0xff]  }
 0x577   :  { %4837 = vmatpush1.bf16.msra.mxu1 %v11927_v0  ;;  %v12002_v0 = vld [vmem:[%s16876_s4 + $0x4e0] ss:$8 sps:$4 sm:$0xff]  }
 0x578   :  { %4838 = vmatprep.subr.bf16.mxu1 %v11932_v1  ;;  %v12007_v1 = vld [vmem:[%s16876_s4 + $0x4f4] ss:$8 sps:$4 sm:$0xff]  }
 0x57b   :  { %4839 = vmatpush1.bf16.msra.mxu1 %v11930_v2  ;;  %v12005_v2 = vld [vmem:[%s16876_s4 + $0x4f0] ss:$8 sps:$4 sm:$0xff]  }
 0x57c   :  { %4840 = vmatprep.subr.bf16.mxu1 %v11935_v3  ;;  %v12010_v3 = vld [vmem:[%s16876_s4 + $0x504] ss:$8 sps:$4 sm:$0xff]  }
 0x57f   :  { %4841 = vmatpush1.bf16.msra.mxu1 %v11933_v4  ;;  %v12008_v4 = vld [vmem:[%s16876_s4 + $0x500] ss:$8 sps:$4 sm:$0xff]  }
 0x580   :  { %4842 = vmatprep.subr.bf16.mxu1 %v11938_v5  ;;  %v12013_v5 = vld [vmem:[%s16876_s4 + $0x514] ss:$8 sps:$4 sm:$0xff]  }
 0x583   :  { %4843 = vmatpush1.bf16.msra.mxu1 %v11936_v6  ;;  %v12011_v6 = vld [vmem:[%s16876_s4 + $0x510] ss:$8 sps:$4 sm:$0xff]  }
 0x584   :  { %4844 = vmatprep.subr.bf16.mxu1 %v11941_v7  ;;  %v12016_v7 = vld [vmem:[%s16876_s4 + $0x524] ss:$8 sps:$4 sm:$0xff]  }
 0x587   :  { %4845 = vmatpush1.bf16.msra.mxu1 %v11939_v8  ;;  %v12014_v8 = vld [vmem:[%s16876_s4 + $0x520] ss:$8 sps:$4 sm:$0xff]  }
 0x588   :  { %4846 = vmatprep.subr.bf16.mxu1 %v11944_v9  ;;  %v12019_v9 = vld [vmem:[%s16876_s4 + $0x534] ss:$8 sps:$4 sm:$0xff]  }
 0x58b   :  { %4847 = vmatpush1.bf16.msra.mxu1 %v11942_v10  ;;  %v12017_v10 = vld [vmem:[%s16876_s4 + $0x530] ss:$8 sps:$4 sm:$0xff]  }
 0x58c   :  { %4848 = vmatprep.subr.bf16.mxu1 %v11947_v11  ;;  %v12022_v11 = vld [vmem:[%s16876_s4 + $0x544] ss:$8 sps:$4 sm:$0xff]  }
 0x58f   :  { %4849 = vmatpush1.bf16.msra.mxu1 %v11945_v12  ;;  %v15033_v12 = vsub.s32 2, %v14568_v18 }
 0x590   :  { %4850 = vmatprep.subr.bf16.mxu1 %v11950_v13  ;;  %v12020_v13 = vld [vmem:[%s16876_s4 + $0x540] ss:$8 sps:$4 sm:$0xff]  }
 0x593   :  { %4851 = vmatpush1.bf16.msra.mxu1 %v11948_v14  ;;  %v12025_v14 = vld [vmem:[%s16876_s4 + $0x554] ss:$8 sps:$4 sm:$0xff]  }
 0x594   :  { %4852 = vmatprep.subr.bf16.mxu1 %v11953_v15  ;;  %v15043_v15 = vrot.slane %v14582_v22, %v15033_v12 }
 0x597   :  { %4853 = vmatpush1.bf16.msra.mxu1 %v11951_v16  ;;  %v15047_v16 = vrot.slane %v14588_v24, %v15033_v12 }
 0x598   :  { %4854 = vmatprep.subr.bf16.mxu1 %v11956_v20  ;;  %v12023_v20 = vld [vmem:[%s16876_s4 + $0x550] ss:$8 sps:$4 sm:$0xff]  }
 0x59b   :  { %4855 = vmatpush1.bf16.msra.mxu1 %v11954_v23  ;;  %v12028_v23 = vld [vmem:[%s16876_s4 + $0x564] ss:$8 sps:$4 sm:$0xff]  }
 0x59c   :  { %4856 = vmatprep.subr.bf16.mxu1 %v11959_v25 }
 0x59f   :  { %4857 = vmatpush1.bf16.msra.mxu1 %v11957_v26 }
 0x5a0   :  { %5060 = vmatprep.subr.bf16.mxu1 %v11962_v27 }
 0x5a2   :  { %4859 = vmatmul.mubr.bf16.vlgmr.msra.gmra.mrb[12].mxu1 %v14610_v45 }
 0x5a3   :  { %5061 = vmatpush1.bf16.msra.mxu1 %v11960_v28  ;;  %5092 = vmatprep.mubr.bf16.mxu1 %v14605_v43 }
 0x5a4   :  { %5062 = vmatprep.subr.bf16.mxu1 %v11965_v30 }
 0x5a7   :  { %5063 = vmatpush1.bf16.msra.mxu1 %v11963_v31  ;;  %v12026_v31 = vld [vmem:[%s16876_s4 + $0x560] ss:$8 sps:$4 sm:$0xff]  }
 0x5a8   :  { %5064 = vmatprep.subr.bf16.mxu1 %v11968_v33 }
 0x5ab   :  { %5065 = vmatpush1.bf16.msra.mxu1 %v11966_v34 }
 0x5ac   :  { %5066 = vmatprep.subr.bf16.mxu1 %v11971_v35  ;;  %v12031_v35 = vld [vmem:[%s16876_s4 + $0x574] ss:$8 sps:$4 sm:$0xff]  }
 0x5af   :  { %5067 = vmatpush1.bf16.msra.mxu1 %v11969_v36 }
 0x5b0   :  { %5068 = vmatprep.subr.bf16.mxu1 %v11974_v37  ;;  %v12029_v37 = vld [vmem:[%s16876_s4 + $0x570] ss:$8 sps:$4 sm:$0xff]  }
 0x5b3   :  { %5069 = vmatpush1.bf16.msra.mxu1 %v11972_v38  ;;  %v12034_v38 = vld [vmem:[%s16876_s4 + $0x584] ss:$8 sps:$4 sm:$0xff]  }
 0x5b4   :  { %5070 = vmatprep.subr.bf16.mxu1 %v11977_v39  ;;  %v12032_v39 = vld [vmem:[%s16876_s4 + $0x580] ss:$8 sps:$4 sm:$0xff]  }
 0x5b5   :  { %v14942_v44 = vpop.f32.mrb[0].mxu1 }
 0x5b6   :  { %v14944_v46 = vpop.f32.mrb[1].mxu1  ;;  %v6169_v22 = vadd.f32 %v15043_v15, %v14942_v44  ;;  %v12040_v44 = vld [vmem:[%s16876_s4 + $0x5a4] ss:$8 sps:$4 sm:$0xff]  }
 0x5b7   :  { %5071 = vmatpush1.bf16.msra.mxu1 %v11975_v40  ;;  %v4162_v42 = vpop.f32.mrb[2].mxu1  ;;  %v6170_v24 = vadd.f32 %v15047_v16, %v14944_v46  ;;  %v12037_v40 = vld [vmem:[%s16876_s4 + $0x594] ss:$8 sps:$4 sm:$0xff]   ;;  %v12038_v46 = vld [vmem:[%s16876_s4 + $0x5a0] ss:$8 sps:$4 sm:$0xff]  }
 0x5b8   :  { %v4163_v48 = vpop.f32.mrb[3].mxu1  ;;  %5072 = vmatprep.subr.bf16.mxu1 %v11980_v41  ;;  %v12035_v41 = vld [vmem:[%s16876_s4 + $0x590] ss:$8 sps:$4 sm:$0xff]   ;;  %v12043_v42 = vld [vmem:[%s16876_s4 + $0x5b4] ss:$8 sps:$4 sm:$0xff]  }
 0x5b9   :  { %v12046_v48 = vld [vmem:[%s16876_s4 + $0x5c4] ss:$8 sps:$4 sm:$0xff]  }
 0x5bb   :  { %5073 = vmatpush1.bf16.msra.mxu1 %v11978_v47  ;;  %v12041_v47 = vld [vmem:[%s16876_s4 + $0x5b0] ss:$8 sps:$4 sm:$0xff]  }
 0x5bc   :  { %5074 = vmatprep.subr.bf16.mxu1 %v11983_v49  ;;  %v12044_v49 = vld [vmem:[%s16876_s4 + $0x5c0] ss:$8 sps:$4 sm:$0xff]  }
 0x5bf   :  { %5075 = vmatpush1.bf16.msra.mxu1 %v11981_v50  ;;  %v12049_v50 = vld [vmem:[%s16876_s4 + $0x5d4] ss:$8 sps:$4 sm:$0xff]  }
 0x5c0   :  { %5076 = vmatprep.subr.bf16.mxu1 %v11986_v51  ;;  %v12047_v51 = vld [vmem:[%s16876_s4 + $0x5d0] ss:$8 sps:$4 sm:$0xff]  }
 0x5c3   :  { %5077 = vmatpush1.bf16.msra.mxu1 %v11984_v52  ;;  %v12052_v52 = vld [vmem:[%s16876_s4 + $0x5e4] ss:$8 sps:$4 sm:$0xff]  }
 0x5c4   :  { %5078 = vmatprep.subr.bf16.mxu1 %v11989_v53  ;;  %v12050_v53 = vld [vmem:[%s16876_s4 + $0x5e0] ss:$8 sps:$4 sm:$0xff]  }
 0x5c7   :  { %5079 = vmatpush1.bf16.msra.mxu1 %v11987_v54  ;;  %v12055_v54 = vld [vmem:[%s16876_s4 + $0x5f4] ss:$8 sps:$4 sm:$0xff]  }
 0x5c8   :  { %5080 = vmatprep.subr.bf16.mxu1 %v11992_v55  ;;  %v12053_v55 = vld [vmem:[%s16876_s4 + $0x5f0] ss:$8 sps:$4 sm:$0xff]  }
 0x5cb   :  { %5081 = vmatpush1.bf16.msra.mxu1 %v11990_v56  ;;  %v12058_v56 = vld [vmem:[%s16876_s4 + $0x604] ss:$8 sps:$4 sm:$0xff]  }
 0x5cc   :  { %5082 = vmatprep.subr.bf16.mxu1 %v11995_v57  ;;  %v12056_v57 = vld [vmem:[%s16876_s4 + $0x600] ss:$8 sps:$4 sm:$0xff]  }
 0x5cf   :  { %5083 = vmatpush1.bf16.msra.mxu1 %v11993_v58  ;;  %v12061_v58 = vld [vmem:[%s16876_s4 + $0x614] ss:$8 sps:$4 sm:$0xff]  }
 0x5d0   :  { %5084 = vmatprep.subr.bf16.mxu1 %v11998_v59  ;;  %v12059_v59 = vld [vmem:[%s16876_s4 + $0x610] ss:$8 sps:$4 sm:$0xff]  }
 0x5d3   :  { %5085 = vmatpush1.bf16.msra.mxu1 %v11996_v60  ;;  %v12064_v60 = vld [vmem:[%s16876_s4 + $0x624] ss:$8 sps:$4 sm:$0xff]  }
 0x5d4   :  { %5086 = vmatprep.subr.bf16.mxu1 %v12001_v61  ;;  %v12062_v61 = vld [vmem:[%s16876_s4 + $0x620] ss:$8 sps:$4 sm:$0xff]  }
 0x5d7   :  { %5087 = vmatpush1.bf16.msra.mxu1 %v11999_v62  ;;  %v12067_v62 = vld [vmem:[%s16876_s4 + $0x634] ss:$8 sps:$4 sm:$0xff]  }
 0x5d8   :  { %5088 = vmatprep.subr.bf16.mxu1 %v12004_v63  ;;  %v12065_v63 = vld [vmem:[%s16876_s4 + $0x630] ss:$8 sps:$4 sm:$0xff]  }
 0x5db   :  { %5089 = vmatpush1.bf16.msra.mxu1 %v12002_v0  ;;  %v12070_v0 = vld [vmem:[%s16876_s4 + $0x644] ss:$8 sps:$4 sm:$0xff]  }
 0x5dc   :  { %5090 = vmatprep.subr.bf16.mxu1 %v12007_v1  ;;  %v12068_v1 = vld [vmem:[%s16876_s4 + $0x640] ss:$8 sps:$4 sm:$0xff]  }
 0x5df   :  { %5091 = vmatpush1.bf16.msra.mxu1 %v12005_v2  ;;  %v12073_v2 = vld [vmem:[%s16876_s4 + $0x654] ss:$8 sps:$4 sm:$0xff]  }
 0x5e0   :  { %5294 = vmatprep.subr.bf16.mxu1 %v12010_v3  ;;  %v12071_v3 = vld [vmem:[%s16876_s4 + $0x650] ss:$8 sps:$4 sm:$0xff]  }
 0x5e2   :  { %5093 = vmatmul.mubr.bf16.vlgmr.msra.gmra.mrb[16].mxu1 %v14610_v45 }
 0x5e3   :  { %5295 = vmatpush1.bf16.msra.mxu1 %v12008_v4  ;;  %5326 = vmatprep.mubr.bf16.mxu1 %v14605_v43  ;;  %v12076_v4 = vld [vmem:[%s16876_s4 + $0x664] ss:$8 sps:$4 sm:$0xff]  }
 0x5e4   :  { %5296 = vmatprep.subr.bf16.mxu1 %v12013_v5 }
 0x5e7   :  { %5297 = vmatpush1.bf16.msra.mxu1 %v12011_v6 }
 0x5e8   :  { %5298 = vmatprep.subr.bf16.mxu1 %v12016_v7 }
 0x5eb   :  { %5299 = vmatpush1.bf16.msra.mxu1 %v12014_v8 }
 0x5ec   :  { %5300 = vmatprep.subr.bf16.mxu1 %v12019_v9 }
 0x5ef   :  { %5301 = vmatpush1.bf16.msra.mxu1 %v12017_v10 }
 0x5f0   :  { %5302 = vmatprep.subr.bf16.mxu1 %v12022_v11 }
 0x5f3   :  { %5303 = vmatpush1.bf16.msra.mxu1 %v12020_v13  ;;  %v12074_v13 = vld [vmem:[%s16876_s4 + $0x660] ss:$8 sps:$4 sm:$0xff]  }
 0x5f4   :  { %5304 = vmatprep.subr.bf16.mxu1 %v12025_v14 }
 0x5f5   :  { %v15055_v25 = vpop.f32.mrb[4].mxu1 }
 0x5f6   :  { %v6173_v26 = vrot.slane %v15055_v25, 2  ;;  %v15060_v27 = vpop.f32.mrb[5].mxu1  ;;  %v6133_v6 = vadd.f32 %v15043_v15, %v15055_v25 }
 0x5f7   :  { %v6174_v28 = vrot.slane %v15060_v27, 2  ;;  %v4396_v30 = vpop.f32.mrb[6].mxu1  ;;  %5305 = vmatpush1.bf16.msra.mxu1 %v12023_v20  ;;  %v6134_v9 = vadd.f32 %v15047_v16, %v15060_v27  ;;  %v12080_v27 = vld [vmem:[%s16876_s4 + $0x680] ss:$8 sps:$4 sm:$0xff]  }
 0x5f8   :  { %v15068_v33 = vadd.f32 %v6173_v26, %v6169_v22  ;;  %v4397_v34 = vpop.f32.mrb[7].mxu1  ;;  %5306 = vmatprep.subr.bf16.mxu1 %v12028_v23  ;;  %v12079_v23 = vld [vmem:[%s16876_s4 + $0x674] ss:$8 sps:$4 sm:$0xff]   ;;  %v12077_v22 = vld [vmem:[%s16876_s4 + $0x670] ss:$8 sps:$4 sm:$0xff]  }
 0x5f9   :  { %v15073_v36 = vadd.f32 %v6174_v28, %v6170_v24  ;;  %v12082_v26 = vld [vmem:[%s16876_s4 + $0x684] ss:$8 sps:$4 sm:$0xff]   ;;  %v12085_v24 = vld [vmem:[%s16876_s4 + $0x694] ss:$8 sps:$4 sm:$0xff]   ;;  %v12083_v28 = vld [vmem:[%s16876_s4 + $0x690] ss:$8 sps:$4 sm:$0xff]  }
 0x5fa   :  { %v12088_v30 = vld [vmem:[%s16876_s4 + $0x6a4] ss:$8 sps:$4 sm:$0xff]   ;;  %v12091_v34 = vld [vmem:[%s16876_s4 + $0x6b4] ss:$8 sps:$4 sm:$0xff]  }
 0x5fb   :  { %5307 = vmatpush1.bf16.msra.mxu1 %v12026_v31  ;;  %v12086_v31 = vld [vmem:[%s16876_s4 + $0x6a0] ss:$8 sps:$4 sm:$0xff]  }
 0x5fc   :  { %5308 = vmatprep.subr.bf16.mxu1 %v12031_v35  ;;  %v12089_v35 = vld [vmem:[%s16876_s4 + $0x6b0] ss:$8 sps:$4 sm:$0xff]  }
 0x5ff   :  { %5309 = vmatpush1.bf16.msra.mxu1 %v12029_v37  ;;  %v12094_v37 = vld [vmem:[%s16876_s4 + $0x6c4] ss:$8 sps:$4 sm:$0xff]  }
 0x600   :  { %5310 = vmatprep.subr.bf16.mxu1 %v12034_v38  ;;  %v12092_v38 = vld [vmem:[%s16876_s4 + $0x6c0] ss:$8 sps:$4 sm:$0xff]  }
 0x603   :  { %5311 = vmatpush1.bf16.msra.mxu1 %v12032_v39  ;;  %v12097_v39 = vld [vmem:[%s16876_s4 + $0x6d4] ss:$8 sps:$4 sm:$0xff]  }
 0x604   :  { %5312 = vmatprep.subr.bf16.mxu1 %v12037_v40  ;;  %v12095_v40 = vld [vmem:[%s16876_s4 + $0x6d0] ss:$8 sps:$4 sm:$0xff]  }
 0x607   :  { %5313 = vmatpush1.bf16.msra.mxu1 %v12035_v41  ;;  %v12100_v41 = vld [vmem:[%s16876_s4 + $0x6e4] ss:$8 sps:$4 sm:$0xff]  }
 0x608   :  { %5314 = vmatprep.subr.bf16.mxu1 %v12040_v44  ;;  %v12098_v44 = vld [vmem:[%s16876_s4 + $0x6e0] ss:$8 sps:$4 sm:$0xff]  }
 0x60b   :  { %5315 = vmatpush1.bf16.msra.mxu1 %v12038_v46  ;;  %v12103_v46 = vld [vmem:[%s16876_s4 + $0x6f4] ss:$8 sps:$4 sm:$0xff]  }
 0x60c   :  { %5316 = vmatprep.subr.bf16.mxu1 %v12043_v42  ;;  %v12101_v42 = vld [vmem:[%s16876_s4 + $0x6f0] ss:$8 sps:$4 sm:$0xff]  }
 0x60f   :  { %5317 = vmatpush1.bf16.msra.mxu1 %v12041_v47  ;;  %v12106_v47 = vld [vmem:[%s16876_s4 + $0x704] ss:$8 sps:$4 sm:$0xff]  }
 0x610   :  { %5318 = vmatprep.subr.bf16.mxu1 %v12046_v48  ;;  %v12104_v48 = vld [vmem:[%s16876_s4 + $0x700] ss:$8 sps:$4 sm:$0xff]  }
 0x613   :  { %5319 = vmatpush1.bf16.msra.mxu1 %v12044_v49  ;;  %v12109_v49 = vld [vmem:[%s16876_s4 + $0x714] ss:$8 sps:$4 sm:$0xff]  }
 0x614   :  { %5320 = vmatprep.subr.bf16.mxu1 %v12049_v50  ;;  %v12107_v50 = vld [vmem:[%s16876_s4 + $0x710] ss:$8 sps:$4 sm:$0xff]  }
 0x617   :  { %5321 = vmatpush1.bf16.msra.mxu1 %v12047_v51  ;;  %v12112_v51 = vld [vmem:[%s16876_s4 + $0x724] ss:$8 sps:$4 sm:$0xff]  }
 0x618   :  { %5322 = vmatprep.subr.bf16.mxu1 %v12052_v52  ;;  %v12110_v52 = vld [vmem:[%s16876_s4 + $0x720] ss:$8 sps:$4 sm:$0xff]  }
 0x61b   :  { %5323 = vmatpush1.bf16.msra.mxu1 %v12050_v53  ;;  %v12115_v53 = vld [vmem:[%s16876_s4 + $0x734] ss:$8 sps:$4 sm:$0xff]  }
 0x61c   :  { %5324 = vmatprep.subr.bf16.mxu1 %v12055_v54  ;;  %v12113_v54 = vld [vmem:[%s16876_s4 + $0x730] ss:$8 sps:$4 sm:$0xff]  }
 0x61f   :  { %5325 = vmatpush1.bf16.msra.mxu1 %v12053_v55  ;;  %v12118_v55 = vld [vmem:[%s16876_s4 + $0x744] ss:$8 sps:$4 sm:$0xff]  }
 0x620   :  { %5528 = vmatprep.subr.bf16.mxu1 %v12058_v56  ;;  %v12116_v56 = vld [vmem:[%s16876_s4 + $0x740] ss:$8 sps:$4 sm:$0xff]  }
 0x622   :  { %5327 = vmatmul.mubr.bf16.vlgmr.msra.gmra.mrb[20].mxu1 %v14610_v45 }
 0x623   :  { %5529 = vmatpush1.bf16.msra.mxu1 %v12056_v57  ;;  %5560 = vmatprep.mubr.bf16.mxu1 %v14605_v43  ;;  %v12121_v57 = vld [vmem:[%s16876_s4 + $0x754] ss:$8 sps:$4 sm:$0xff]  }
 0x624   :  { %5530 = vmatprep.subr.bf16.mxu1 %v12061_v58  ;;  %v12119_v58 = vld [vmem:[%s16876_s4 + $0x750] ss:$8 sps:$4 sm:$0xff]  }
 0x627   :  { %5531 = vmatpush1.bf16.msra.mxu1 %v12059_v59  ;;  %v12124_v59 = vld [vmem:[%s16876_s4 + $0x764] ss:$8 sps:$4 sm:$0xff]  }
 0x628   :  { %5532 = vmatprep.subr.bf16.mxu1 %v12064_v60 }
 0x62b   :  { %5533 = vmatpush1.bf16.msra.mxu1 %v12062_v61 }
 0x62c   :  { %5534 = vmatprep.subr.bf16.mxu1 %v12067_v62 }
 0x62f   :  { %5535 = vmatpush1.bf16.msra.mxu1 %v12065_v63 }
 0x630   :  { %5536 = vmatprep.subr.bf16.mxu1 %v12070_v0 }
 0x633   :  { %5537 = vmatpush1.bf16.msra.mxu1 %v12068_v1  ;;  %v12122_v1 = vld [vmem:[%s16876_s4 + $0x760] ss:$8 sps:$4 sm:$0xff]  }
 0x634   :  { %5538 = vmatprep.subr.bf16.mxu1 %v12073_v2 }
 0x635   :  { %v4626_v5 = vpop.f32.mrb[8].mxu1 }
 0x636   :  { %v6137_v7 = vrot.slane %v4626_v5, 2  ;;  %v4628_v8 = vpop.f32.mrb[9].mxu1 }
 0x637   :  { %v6138_v10 = vrot.slane %v4628_v8, 2  ;;  %v4630_v11 = vpop.f32.mrb[10].mxu1  ;;  %5539 = vmatpush1.bf16.msra.mxu1 %v12071_v3  ;;  %v12131_v8 = vld [vmem:[%s16876_s4 + $0x790] ss:$8 sps:$4 sm:$0xff]  }
 0x638   :  { %v15174_v14 = vadd.f32 %v6137_v7, %v6133_v6  ;;  %v4631_v20 = vpop.f32.mrb[11].mxu1  ;;  %5540 = vmatprep.subr.bf16.mxu1 %v12076_v4  ;;  %v12127_v4 = vld [vmem:[%s16876_s4 + $0x774] ss:$8 sps:$4 sm:$0xff]   ;;  %v12125_v6 = vld [vmem:[%s16876_s4 + $0x770] ss:$8 sps:$4 sm:$0xff]  }
 0x639   :  { %v15179_v25 = vadd.f32 %v6138_v10, %v6134_v9  ;;  %v12128_v7 = vld [vmem:[%s16876_s4 + $0x780] ss:$8 sps:$4 sm:$0xff]   ;;  %v12136_v9 = vld [vmem:[%s16876_s4 + $0x7a4] ss:$8 sps:$4 sm:$0xff]   ;;  %v12139_v11 = vld [vmem:[%s16876_s4 + $0x7b4] ss:$8 sps:$4 sm:$0xff]  }
 0x63a   :  { %v12134_v10 = vld [vmem:[%s16876_s4 + $0x7a0] ss:$8 sps:$4 sm:$0xff]   ;;  %v12142_v20 = vld [vmem:[%s16876_s4 + $0x7c4] ss:$8 sps:$4 sm:$0xff]  }
 0x63b   :  { %5541 = vmatpush1.bf16.msra.mxu1 %v12074_v13  ;;  %v12137_v13 = vld [vmem:[%s16876_s4 + $0x7b0] ss:$8 sps:$4 sm:$0xff]  }
 0x63c   :  { %5542 = vmatprep.subr.bf16.mxu1 %v12079_v23  ;;  %v12140_v23 = vld [vmem:[%s16876_s4 + $0x7c0] ss:$8 sps:$4 sm:$0xff]  }
 0x63f   :  { %5543 = vmatpush1.bf16.msra.mxu1 %v12077_v22  ;;  %v12145_v22 = vld [vmem:[%s16876_s4 + $0x7d4] ss:$8 sps:$4 sm:$0xff]  }
 0x640   :  { %5544 = vmatprep.subr.bf16.mxu1 %v12082_v26  ;;  %v12143_v26 = vld [vmem:[%s16876_s4 + $0x7d0] ss:$8 sps:$4 sm:$0xff]  }
 0x643   :  { %5545 = vmatpush1.bf16.msra.mxu1 %v12080_v27  ;;  %v12148_v27 = vld [vmem:[%s16876_s4 + $0x7e4] ss:$8 sps:$4 sm:$0xff]  }
 0x644   :  { %5546 = vmatprep.subr.bf16.mxu1 %v12085_v24  ;;  %v12146_v24 = vld [vmem:[%s16876_s4 + $0x7e0] ss:$8 sps:$4 sm:$0xff]  }
 0x647   :  { %5547 = vmatpush1.bf16.msra.mxu1 %v12083_v28  ;;  %v12151_v28 = vld [vmem:[%s16876_s4 + $0x7f4] ss:$8 sps:$4 sm:$0xff]  }
 0x648   :  { %5548 = vmatprep.subr.bf16.mxu1 %v12088_v30  ;;  %v12149_v30 = vld [vmem:[%s16876_s4 + $0x7f0] ss:$8 sps:$4 sm:$0xff]  }
 0x64b   :  { %5549 = vmatpush1.bf16.msra.mxu1 %v12086_v31  ;;  %v12154_v31 = vld [vmem:[%s16876_s4 + $0x804] ss:$8 sps:$4 sm:$0xff]  }
 0x64c   :  { %5550 = vmatprep.subr.bf16.mxu1 %v12091_v34  ;;  %v12152_v34 = vld [vmem:[%s16876_s4 + $0x800] ss:$8 sps:$4 sm:$0xff]  }
 0x64f   :  { %5551 = vmatpush1.bf16.msra.mxu1 %v12089_v35  ;;  %v12157_v35 = vld [vmem:[%s16876_s4 + $0x814] ss:$8 sps:$4 sm:$0xff]  }
 0x650   :  { %5552 = vmatprep.subr.bf16.mxu1 %v12094_v37  ;;  %v12155_v37 = vld [vmem:[%s16876_s4 + $0x810] ss:$8 sps:$4 sm:$0xff]  }
 0x653   :  { %5553 = vmatpush1.bf16.msra.mxu1 %v12092_v38  ;;  %v12160_v38 = vld [vmem:[%s16876_s4 + $0x824] ss:$8 sps:$4 sm:$0xff]  }
 0x654   :  { %5554 = vmatprep.subr.bf16.mxu1 %v12097_v39  ;;  %v12158_v39 = vld [vmem:[%s16876_s4 + $0x820] ss:$8 sps:$4 sm:$0xff]  }
 0x657   :  { %5555 = vmatpush1.bf16.msra.mxu1 %v12095_v40  ;;  %v12163_v40 = vld [vmem:[%s16876_s4 + $0x834] ss:$8 sps:$4 sm:$0xff]  }
 0x658   :  { %5556 = vmatprep.subr.bf16.mxu1 %v12100_v41  ;;  %v12166_v41 = vld [vmem:[%s16876_s4 + $0x844] ss:$8 sps:$4 sm:$0xff]  }
 0x65b   :  { %5557 = vmatpush1.bf16.msra.mxu1 %v12098_v44  ;;  %v12164_v44 = vld [vmem:[%s16876_s4 + $0x840] ss:$8 sps:$4 sm:$0xff]  }
 0x65c   :  { %5558 = vmatprep.subr.bf16.mxu1 %v12103_v46  ;;  %v12169_v46 = vld [vmem:[%s16876_s4 + $0x854] ss:$8 sps:$4 sm:$0xff]  }
 0x65f   :  { %5559 = vmatpush1.bf16.msra.mxu1 %v12101_v42  ;;  %v15378_v42 = vsub.s32 3, %v14568_v18 }
 0x660   :  { %5762 = vmatprep.subr.bf16.mxu1 %v12106_v47  ;;  %v12167_v47 = vld [vmem:[%s16876_s4 + $0x850] ss:$8 sps:$4 sm:$0xff]  }
 0x662   :  { %5561 = vmatmul.mubr.bf16.vlgmr.msra.gmra.mrb[24].mxu1 %v14610_v45 }
 0x663   :  { %5763 = vmatpush1.bf16.msra.mxu1 %v12104_v48  ;;  %5794 = vmatprep.mubr.bf16.mxu1 %v14605_v43  ;;  %v15384_v48 = vsub.s32 4, %v14568_v18 }
 0x664   :  { %5764 = vmatprep.subr.bf16.mxu1 %v12109_v49  ;;  %v12172_v49 = vld [vmem:[%s16876_s4 + $0x864] ss:$8 sps:$4 sm:$0xff]  }
 0x667   :  { %5765 = vmatpush1.bf16.msra.mxu1 %v12107_v50 }
 0x668   :  { %5766 = vmatprep.subr.bf16.mxu1 %v12112_v51  ;;  %v12728_v51 = vld [vmem:[%s16878_s3] sm:$0x3f] }
 0x66b   :  { %5767 = vmatpush1.bf16.msra.mxu1 %v12110_v52  ;;  %v15395_v52 = vrot.slane %v12728_v51, %v15378_v42 }
 0x66c   :  { %5768 = vmatprep.subr.bf16.mxu1 %v12115_v53  ;;  %v12729_v53 = vld [vmem:[%s16878_s3 + $0x8] sm:$0x3f] }
 0x66f   :  { %5769 = vmatpush1.bf16.msra.mxu1 %v12113_v54  ;;  %v15401_v54 = vrot.slane %v12729_v53, %v15378_v42 }
 0x670   :  { %5770 = vmatprep.subr.bf16.mxu1 %v12118_v55 }
 0x673   :  { %5771 = vmatpush1.bf16.msra.mxu1 %v12116_v56 }
 0x674   :  { %5772 = vmatprep.subr.bf16.mxu1 %v12121_v57 }
 0x675   :  { %v15273_v60 = vpop.f32.mrb[12].mxu1 }
 0x676   :  { %v6181_v61 = vrot.slane %v15273_v60, 4  ;;  %v15276_v62 = vpop.f32.mrb[13].mxu1  ;;  %v6095_v55 = vadd.f32 %v15043_v15, %v15273_v60  ;;  %v12170_v60 = vld [vmem:[%s16876_s4 + $0x860] ss:$8 sps:$4 sm:$0xff]  }
 0x677   :  { %v6182_v63 = vrot.slane %v15276_v62, 4  ;;  %v4864_v0 = vpop.f32.mrb[14].mxu1  ;;  %5773 = vmatpush1.bf16.msra.mxu1 %v12119_v58 }
 0x678   :  { %v15283_v2 = vadd.f32 %v6181_v61, %v15068_v33  ;;  %v4865_v3 = vpop.f32.mrb[15].mxu1  ;;  %5774 = vmatprep.subr.bf16.mxu1 %v12124_v59  ;;  %v12130_v33 = vld [vmem:[%s16876_s4 + $0x784] ss:$8 sps:$4 sm:$0xff]   ;;  %v6096_v61 = vadd.f32 %v15047_v16, %v15276_v62  ;;  %v12175_v62 = vld [vmem:[%s16876_s4 + $0x874] ss:$8 sps:$4 sm:$0xff]  }
 0x679   :  { %v15289_v5 = vadd.f32 %v6182_v63, %v15073_v36  ;;  %v12133_v36 = vld [vmem:[%s16876_s4 + $0x794] ss:$8 sps:$4 sm:$0xff]  }
 0x67b   :  { %5775 = vmatpush1.bf16.msra.mxu1 %v12122_v1 }
 0x67c   :  { %5776 = vmatprep.subr.bf16.mxu1 %v12127_v4  ;;  %v15419_v4 = vrot.slane %v12728_v51, %v15384_v48 }
 0x67f   :  { %5777 = vmatpush1.bf16.msra.mxu1 %v12125_v6 }
 0x680   :  { %5778 = vmatprep.subr.bf16.mxu1 %v12130_v33 }
 0x683   :  { %5779 = vmatpush1.bf16.msra.mxu1 %v12128_v7 }
 0x684   :  { %5780 = vmatprep.subr.bf16.mxu1 %v12133_v36 }
 0x687   :  { %5781 = vmatpush1.bf16.msra.mxu1 %v12131_v8  ;;  %v15431_v8 = vrot.slane %v12729_v53, %v15384_v48 }
 0x688   :  { %5782 = vmatprep.subr.bf16.mxu1 %v12136_v9 }
 0x68b   :  { %5783 = vmatpush1.bf16.msra.mxu1 %v12134_v10 }
 0x68c   :  { %5784 = vmatprep.subr.bf16.mxu1 %v12139_v11 }
 0x68f   :  { %5785 = vmatpush1.bf16.msra.mxu1 %v12137_v13 }
 0x690   :  { %5786 = vmatprep.subr.bf16.mxu1 %v12142_v20 }
 0x693   :  { %5787 = vmatpush1.bf16.msra.mxu1 %v12140_v23 }
 0x694   :  { %5788 = vmatprep.subr.bf16.mxu1 %v12145_v22 }
 0x697   :  { %5789 = vmatpush1.bf16.msra.mxu1 %v12143_v26  ;;  %v12176_v26 = vld [vmem:[%s16876_s4 + $0x880] ss:$8 sps:$4 sm:$0xff]  }
 0x698   :  { %5790 = vmatprep.subr.bf16.mxu1 %v12148_v27 }
 0x69b   :  { %5791 = vmatpush1.bf16.msra.mxu1 %v12146_v24  ;;  %v12181_v24 = vld [vmem:[%s16876_s4 + $0x894] ss:$8 sps:$4 sm:$0xff]  }
 0x69c   :  { %5792 = vmatprep.subr.bf16.mxu1 %v12151_v28 }
 0x69f   :  { %5793 = vmatpush1.bf16.msra.mxu1 %v12149_v30  ;;  %v12179_v30 = vld [vmem:[%s16876_s4 + $0x890] ss:$8 sps:$4 sm:$0xff]  }
 0x6a0   :  { %5996 = vmatprep.subr.bf16.mxu1 %v12154_v31  ;;  %v12184_v31 = vld [vmem:[%s16876_s4 + $0x8a4] ss:$8 sps:$4 sm:$0xff]  }
 0x6a2   :  { %5795 = vmatmul.mubr.bf16.vlgmr.msra.gmra.mrb[28].mxu1 %v14610_v45 }
 0x6a3   :  { %5997 = vmatpush1.bf16.msra.mxu1 %v12152_v34  ;;  %6028 = vmatprep.mubr.bf16.mxu1 %v14605_v43  ;;  %v12161_v43 = vld [vmem:[%s16876_s4 + $0x830] ss:$8 sps:$4 sm:$0xff]   ;;  %v12182_v34 = vld [vmem:[%s16876_s4 + $0x8a0] ss:$8 sps:$4 sm:$0xff]  }
 0x6a4   :  { %5998 = vmatprep.subr.bf16.mxu1 %v12157_v35  ;;  %v12187_v35 = vld [vmem:[%s16876_s4 + $0x8b4] ss:$8 sps:$4 sm:$0xff]  }
 0x6a7   :  { %5999 = vmatpush1.bf16.msra.mxu1 %v12155_v37  ;;  %v12185_v37 = vld [vmem:[%s16876_s4 + $0x8b0] ss:$8 sps:$4 sm:$0xff]  }
 0x6a8   :  { %6000 = vmatprep.subr.bf16.mxu1 %v12160_v38  ;;  %v12190_v38 = vld [vmem:[%s16876_s4 + $0x8c4] ss:$8 sps:$4 sm:$0xff]  }
 0x6ab   :  { %6001 = vmatpush1.bf16.msra.mxu1 %v12158_v39  ;;  %v12188_v39 = vld [vmem:[%s16876_s4 + $0x8c0] ss:$8 sps:$4 sm:$0xff]  }
 0x6ac   :  { %6002 = vmatprep.subr.bf16.mxu1 %v12163_v40  ;;  %v12193_v40 = vld [vmem:[%s16876_s4 + $0x8d4] ss:$8 sps:$4 sm:$0xff]  }
 0x6af   :  { %6003 = vmatpush1.bf16.msra.mxu1 %v12161_v43  ;;  %v12191_v43 = vld [vmem:[%s16876_s4 + $0x8d0] ss:$8 sps:$4 sm:$0xff]  }
 0x6b0   :  { %6004 = vmatprep.subr.bf16.mxu1 %v12166_v41  ;;  %v12196_v41 = vld [vmem:[%s16876_s4 + $0x8e4] ss:$8 sps:$4 sm:$0xff]  }
 0x6b3   :  { %6005 = vmatpush1.bf16.msra.mxu1 %v12164_v44  ;;  %v12194_v44 = vld [vmem:[%s16876_s4 + $0x8e0] ss:$8 sps:$4 sm:$0xff]  }
 0x6b4   :  { %6006 = vmatprep.subr.bf16.mxu1 %v12169_v46  ;;  %v12199_v46 = vld [vmem:[%s16876_s4 + $0x8f4] ss:$8 sps:$4 sm:$0xff]  }
 0x6b5   :  { %v15389_v50 = vpop.f32.mrb[16].mxu1 }
 0x6b6   :  { %v6099_v56 = vrot.slane %v15389_v50, 2  ;;  %v6143_v57 = vrot.slane %v15389_v50, 4  ;;  %v6187_v58 = vrot.slane %v15389_v50, 6  ;;  %v15408_v59 = vpop.f32.mrb[17].mxu1  ;;  %v6045_v51 = vadd.f32 %v15043_v15, %v15389_v50 }
 0x6b7   :  { %v6100_v63 = vrot.slane %v15408_v59, 2  ;;  %v6144_v0 = vrot.slane %v15408_v59, 4  ;;  %v6188_v1 = vrot.slane %v15408_v59, 6  ;;  %v5098_v3 = vpop.f32.mrb[18].mxu1  ;;  %6007 = vmatpush1.bf16.msra.mxu1 %v12167_v47  ;;  %v12197_v47 = vld [vmem:[%s16876_s4 + $0x8f0] ss:$8 sps:$4 sm:$0xff]  }
 0x6b8   :  { %v6191_v6 = vadd.f32 %v6187_v58, %v15283_v2  ;;  %v5099_v33 = vpop.f32.mrb[19].mxu1  ;;  %6008 = vmatprep.subr.bf16.mxu1 %v12172_v49  ;;  %v15426_v7 = vadd.f32 %v6143_v57, %v15174_v14  ;;  %v15428_v36 = vadd.f32 %v6099_v56, %v6095_v55  ;;  %v12173_v14 = vld [vmem:[%s16876_s4 + $0x870] ss:$8 sps:$4 sm:$0xff]   ;;  %v6046_v57 = vadd.f32 %v15047_v16, %v15408_v59 }
 0x6b9   :  { %v6192_v9 = vadd.f32 %v6188_v1, %v15289_v5  ;;  %v6148_v10 = vadd.f32 %v6144_v0, %v15179_v25  ;;  %v15435_v11 = vadd.f32 %v6100_v63, %v6096_v61  ;;  %v12178_v5 = vld [vmem:[%s16876_s4 + $0x884] ss:$8 sps:$4 sm:$0xff]  }
 0x6ba   :  { %v6193_v2 = vmul.f32 %v6191_v6, %v15395_v52 }
 0x6bb   :  { %v6194_v13 = vmul.f32 %v6192_v9, %v15401_v54  ;;  %6009 = vmatpush1.bf16.msra.mxu1 %v12170_v60 }
 0x6bc   :  { %v6195_v20 = vadd.f32 %v6193_v2, %v15419_v4  ;;  %6010 = vmatprep.subr.bf16.mxu1 %v12175_v62  ;;  %v12205_v2 = vld [vmem:[%s16879_s5 + $0x14] ss:$8 sps:$4 sm:$0xff]  }
 0x6bd   :  { %v6196_v25 = vadd.f32 %v6194_v13, %v15431_v8  ;;  %v12203_v13 = vld [vmem:[%s16879_s5 + $0x10] ss:$8 sps:$4 sm:$0xff]  }
 0x6be   :  { %v6197_v23 = vmax.f32 %v6195_v20, 0.0  ;;  %v12206_v20 = vld [vmem:[%s16879_s5 + $0x20] ss:$8 sps:$4 sm:$0xff]  }
 0x6bf   :  { %v6198_v22 = vmax.f32 %v6196_v25, 0.0  ;;  %6011 = vmatpush1.bf16.msra.mxu1 %v12173_v14  ;;  %v12208_v14 = vld [vmem:[%s16879_s5 + $0x24] ss:$8 sps:$4 sm:$0xff]   ;;  %v12209_v25 = vld [vmem:[%s16879_s5 + $0x30] ss:$8 sps:$4 sm:$0xff]  }
 0x6c0   :  { %v6201_v27 = vrot.slane %v6197_v23, 2  ;;  %6012 = vmatprep.subr.bf16.mxu1 %v12178_v5  ;;  %v12211_v5 = vld [vmem:[%s16879_s5 + $0x34] ss:$8 sps:$4 sm:$0xff]   ;;  %v12214_v23 = vld [vmem:[%s16879_s5 + $0x44] ss:$8 sps:$4 sm:$0xff]  }
 0x6c1   :  { %v6202_v28 = vrot.slane %v6198_v22, 2  ;;  %v12212_v22 = vld [vmem:[%s16879_s5 + $0x40] ss:$8 sps:$4 sm:$0xff]  }
 0x6c2   :  { %6205 = vst [vmem:[#allocation2] sm:$0xc0] %v6201_v27  ;;  %v12215_v27 = vld [vmem:[%s16879_s5 + $0x50] ss:$8 sps:$4 sm:$0xff]  }
 0x6c3   :  { %6206 = vst [vmem:[#allocation2 + $0x8] sm:$0xc0] %v6202_v28  ;;  %6013 = vmatpush1.bf16.msra.mxu1 %v12176_v26  ;;  %v12217_v26 = vld [vmem:[%s16879_s5 + $0x54] ss:$8 sps:$4 sm:$0xff]   ;;  %v12218_v28 = vld [vmem:[%s16879_s5 + $0x60] ss:$8 sps:$4 sm:$0xff]  }
 0x6c4   :  { %6014 = vmatprep.subr.bf16.mxu1 %v12181_v24  ;;  %v12220_v24 = vld [vmem:[%s16879_s5 + $0x64] ss:$8 sps:$4 sm:$0xff]  }
 0x6c7   :  { %6015 = vmatpush1.bf16.msra.mxu1 %v12179_v30  ;;  %v12223_v30 = vld [vmem:[%s16879_s5 + $0x74] ss:$8 sps:$4 sm:$0xff]  }
 0x6c8   :  { %6016 = vmatprep.subr.bf16.mxu1 %v12184_v31  ;;  %v12221_v31 = vld [vmem:[%s16879_s5 + $0x70] ss:$8 sps:$4 sm:$0xff]  }
 0x6cb   :  { %6017 = vmatpush1.bf16.msra.mxu1 %v12182_v34  ;;  %v12226_v34 = vld [vmem:[%s16879_s5 + $0x84] ss:$8 sps:$4 sm:$0xff]  }
 0x6cc   :  { %6018 = vmatprep.subr.bf16.mxu1 %v12187_v35  ;;  %v12224_v35 = vld [vmem:[%s16879_s5 + $0x80] ss:$8 sps:$4 sm:$0xff]  }
 0x6cf   :  { %6019 = vmatpush1.bf16.msra.mxu1 %v12185_v37  ;;  %v12229_v37 = vld [vmem:[%s16879_s5 + $0x94] ss:$8 sps:$4 sm:$0xff]  }
 0x6d0   :  { %6020 = vmatprep.subr.bf16.mxu1 %v12190_v38  ;;  %v12227_v38 = vld [vmem:[%s16879_s5 + $0x90] ss:$8 sps:$4 sm:$0xff]  }
 0x6d3   :  { %6021 = vmatpush1.bf16.msra.mxu1 %v12188_v39  ;;  %v12232_v39 = vld [vmem:[%s16879_s5 + $0xa4] ss:$8 sps:$4 sm:$0xff]  }
 0x6d4   :  { %6022 = vmatprep.subr.bf16.mxu1 %v12193_v40  ;;  %v12230_v40 = vld [vmem:[%s16879_s5 + $0xa0] ss:$8 sps:$4 sm:$0xff]  }
 0x6d7   :  { %6023 = vmatpush1.bf16.msra.mxu1 %v12191_v43 }
 0x6d8   :  { %6024 = vmatprep.subr.bf16.mxu1 %v12196_v41 }
 0x6db   :  { %6025 = vmatpush1.bf16.msra.mxu1 %v12194_v44 }
 0x6dc   :  { %6026 = vmatprep.subr.bf16.mxu1 %v12199_v46  ;;  %v12235_v46 = vld [vmem:[%s16879_s5 + $0xb4] ss:$8 sps:$4 sm:$0xff]  }
 0x6df   :  { %6027 = vmatpush1.bf16.msra.mxu1 %v12197_v47 }
 0x6e2   :  { %6029 = vmatmul.mubr.bf16.vlgmr.msra.gmra.mrb[32].mxu1 %v14610_v45 }
 0x6f5   :  { %v5328_v49 = vpop.f32.mrb[20].mxu1 }
 0x6f6   :  { %v6049_v53 = vrot.slane %v5328_v49, 2  ;;  %v6149_v55 = vrot.slane %v5328_v49, 6  ;;  %v5330_v56 = vpop.f32.mrb[21].mxu1 }
 0x6f7   :  { %v6050_v58 = vrot.slane %v5330_v56, 2  ;;  %v6150_v61 = vrot.slane %v5330_v56, 6  ;;  %v5332_v63 = vpop.f32.mrb[22].mxu1 }
 0x6f8   :  { %v15497_v0 = vadd.f32 %v6049_v53, %v6045_v51  ;;  %v6153_v1 = vadd.f32 %v6149_v55, %v15426_v7  ;;  %v5333_v3 = vpop.f32.mrb[23].mxu1  ;;  %v12200_v7 = vld [vmem:[%s16879_s5] ss:$8 sps:$4 sm:$0xff]   ;;  %v12233_v51 = vld [vmem:[%s16879_s5 + $0xb0] ss:$8 sps:$4 sm:$0xff]  }
 0x6f9   :  { %v15500_v60 = vadd.f32 %v6050_v58, %v6046_v57  ;;  %v6154_v45 = vadd.f32 %v6150_v61, %v6148_v10  ;;  %v12202_v10 = vld [vmem:[%s16879_s5 + $0x4] ss:$8 sps:$4 sm:$0xff]   ;;  %v12236_v58 = vld [vmem:[%s16879_s5 + $0xc0] ss:$8 sps:$4 sm:$0xff]   ;;  %v12245_v3 = vld [vmem:[%s16879_s5 + $0xf0] ss:$8 sps:$4 sm:$0xff]  }
 0x6fa   :  { %v6155_v6 = vmul.f32 %v6153_v1, %v15395_v52  ;;  %6403 = vmatprep.subr.bf16.mxu1 %v12202_v10  ;;  %v12238_v57 = vld [vmem:[%s16879_s5 + $0xc4] ss:$8 sps:$4 sm:$0xff]   ;;  %v12242_v61 = vld [vmem:[%s16879_s5 + $0xe0] ss:$8 sps:$4 sm:$0xff]   ;;  %v12247_v1 = vld [vmem:[%s16879_s5 + $0xf4] ss:$8 sps:$4 sm:$0xff]  }
 0x6fb   :  { %v6156_v15 = vmul.f32 %v6154_v45, %v15401_v54  ;;  %6404 = vmatpush1.bf16.msra.mxu1 %v12200_v7  ;;  %v12244_v63 = vld [vmem:[%s16879_s5 + $0xe4] ss:$8 sps:$4 sm:$0xff]   ;;  %v12275_v10 = vld [vmem:[%s16880_s7 + $0x640] ss:$8 sps:$4 sm:$0xff]  }
 0x6fc   :  { %v6157_v50 = vadd.f32 %v6155_v6, %v15419_v4  ;;  %6405 = vmatprep.subr.bf16.mxu1 %v12205_v2  ;;  %v12250_v45 = vld [vmem:[%s16880_s7 + $0x4] ss:$8 sps:$4 sm:$0xff]   ;;  %v12251_v6 = vld [vmem:[%s16880_s7 + $0x600] ss:$8 sps:$4 sm:$0xff]   ;;  %v12283_v2 = vld [vmem:[%s16880_s7 + $0x654] ss:$8 sps:$4 sm:$0xff]  }
 0x6fd   :  { %v6158_v33 = vadd.f32 %v6156_v15, %v15431_v8  ;;  %v12253_v15 = vld [vmem:[%s16880_s7 + $0x604] ss:$8 sps:$4 sm:$0xff]  }
 0x6fe   :  { %v6159_v16 = vmax.f32 %v6157_v50, 0.0  ;;  %8078 = vmatprep.subr.bf16.mxu0 %v12253_v15  ;;  %v12257_v50 = vld [vmem:[%s16880_s7 + $0x610] ss:$8 sps:$4 sm:$0xff]   ;;  %v12277_v7 = vld [vmem:[%s16880_s7 + $0x644] ss:$8 sps:$4 sm:$0xff]  }
 0x6ff   :  { %v6160_v59 = vmax.f32 %v6158_v33, 0.0  ;;  %6406 = vmatpush1.bf16.msra.mxu1 %v12203_v13  ;;  %8079 = vmatpush1.bf16.msra.mxu0 %v12251_v6  ;;  %v12259_v33 = vld [vmem:[%s16880_s7 + $0x614] ss:$8 sps:$4 sm:$0xff]   ;;  %v12281_v13 = vld [vmem:[%s16880_s7 + $0x650] ss:$8 sps:$4 sm:$0xff]  }
 0x700   :  { %v6163_v62 = vrot.slane %v6159_v16, 4  ;;  %6407 = vmatprep.subr.bf16.mxu1 %v12208_v14  ;;  %8080 = vmatprep.subr.bf16.mxu0 %v12259_v33  ;;  %v12265_v16 = vld [vmem:[%s16880_s7 + $0x624] ss:$8 sps:$4 sm:$0xff]  }
 0x701   :  { %v6164_v9 = vrot.slane %v6160_v59, 4  ;;  %v12263_v59 = vld [vmem:[%s16880_s7 + $0x620] ss:$8 sps:$4 sm:$0xff]   ;;  %v12289_v14 = vld [vmem:[%s16880_s7 + $0x664] ss:$8 sps:$4 sm:$0xff]  }
 0x702   :  { %6167 = vst [vmem:[#allocation2] sm:$0x30] %v6163_v62  ;;  %v12271_v62 = vld [vmem:[%s16880_s7 + $0x634] ss:$8 sps:$4 sm:$0xff]  }
 0x703   :  { %6168 = vst [vmem:[#allocation2 + $0x8] sm:$0x30] %v6164_v9  ;;  %6408 = vmatpush1.bf16.msra.mxu1 %v12206_v20  ;;  %8081 = vmatpush1.bf16.msra.mxu0 %v12257_v50  ;;  %v12269_v9 = vld [vmem:[%s16880_s7 + $0x630] ss:$8 sps:$4 sm:$0xff]   ;;  %v12287_v20 = vld [vmem:[%s16880_s7 + $0x660] ss:$8 sps:$4 sm:$0xff]  }
 0x704   :  { %6409 = vmatprep.subr.bf16.mxu1 %v12211_v5  ;;  %8082 = vmatprep.subr.bf16.mxu0 %v12265_v16  ;;  %v12295_v5 = vld [vmem:[%s16880_s7 + $0x674] ss:$8 sps:$4 sm:$0xff]  }
 0x707   :  { %6410 = vmatpush1.bf16.msra.mxu1 %v12209_v25  ;;  %8083 = vmatpush1.bf16.msra.mxu0 %v12263_v59  ;;  %v12293_v25 = vld [vmem:[%s16880_s7 + $0x670] ss:$8 sps:$4 sm:$0xff]  }
 0x708   :  { %6411 = vmatprep.subr.bf16.mxu1 %v12214_v23  ;;  %8084 = vmatprep.subr.bf16.mxu0 %v12271_v62  ;;  %v12301_v23 = vld [vmem:[%s16880_s7 + $0x684] ss:$8 sps:$4 sm:$0xff]  }
 0x70b   :  { %6412 = vmatpush1.bf16.msra.mxu1 %v12212_v22  ;;  %8085 = vmatpush1.bf16.msra.mxu0 %v12269_v9  ;;  %v12299_v22 = vld [vmem:[%s16880_s7 + $0x680] ss:$8 sps:$4 sm:$0xff]  }
 0x70c   :  { %6413 = vmatprep.subr.bf16.mxu1 %v12217_v26  ;;  %8086 = vmatprep.subr.bf16.mxu0 %v12277_v7  ;;  %v12307_v26 = vld [vmem:[%s16880_s7 + $0x694] ss:$8 sps:$4 sm:$0xff]  }
 0x70f   :  { %6414 = vmatpush1.bf16.msra.mxu1 %v12215_v27  ;;  %8087 = vmatpush1.bf16.msra.mxu0 %v12275_v10  ;;  %v12305_v27 = vld [vmem:[%s16880_s7 + $0x690] ss:$8 sps:$4 sm:$0xff]  }
 0x710   :  { %6415 = vmatprep.subr.bf16.mxu1 %v12220_v24  ;;  %8088 = vmatprep.subr.bf16.mxu0 %v12283_v2  ;;  %v12313_v24 = vld [vmem:[%s16880_s7 + $0x6a4] ss:$8 sps:$4 sm:$0xff]  }
 0x713   :  { %6416 = vmatpush1.bf16.msra.mxu1 %v12218_v28  ;;  %8089 = vmatpush1.bf16.msra.mxu0 %v12281_v13 }
 0x714   :  { %6417 = vmatprep.subr.bf16.mxu1 %v12223_v30  ;;  %8090 = vmatprep.subr.bf16.mxu0 %v12289_v14  ;;  %v12248_v14 = vld [vmem:[%s16880_s7] ss:$8 sps:$4 sm:$0xff]  }
 0x717   :  { %6418 = vmatpush1.bf16.msra.mxu1 %v12221_v31  ;;  %8091 = vmatpush1.bf16.msra.mxu0 %v12287_v20 }
 0x718   :  { %6419 = vmatprep.subr.bf16.mxu1 %v12226_v34  ;;  %8092 = vmatprep.subr.bf16.mxu0 %v12295_v5  ;;  %v12268_v5 = vld [vmem:[%s16880_s7 + $0x34] ss:$8 sps:$4 sm:$0xff]  }
 0x71b   :  { %6420 = vmatpush1.bf16.msra.mxu1 %v12224_v35  ;;  %8093 = vmatpush1.bf16.msra.mxu0 %v12293_v25  ;;  %v12311_v35 = vld [vmem:[%s16880_s7 + $0x6a0] ss:$8 sps:$4 sm:$0xff]   ;;  %v12266_v25 = vld [vmem:[%s16880_s7 + $0x30] ss:$8 sps:$4 sm:$0xff]  }
 0x71c   :  { %6421 = vmatprep.subr.bf16.mxu1 %v12229_v37  ;;  %8094 = vmatprep.subr.bf16.mxu0 %v12301_v23  ;;  %v12274_v23 = vld [vmem:[%s16880_s7 + $0x44] ss:$8 sps:$4 sm:$0xff]  }
 0x71f   :  { %6422 = vmatpush1.bf16.msra.mxu1 %v12227_v38  ;;  %8095 = vmatpush1.bf16.msra.mxu0 %v12299_v22  ;;  %v12272_v22 = vld [vmem:[%s16880_s7 + $0x40] ss:$8 sps:$4 sm:$0xff]  }
 0x720   :  { %6423 = vmatprep.subr.bf16.mxu1 %v12232_v39  ;;  %8096 = vmatprep.subr.bf16.mxu0 %v12307_v26  ;;  %v12280_v26 = vld [vmem:[%s16880_s7 + $0x54] ss:$8 sps:$4 sm:$0xff]  }
 0x723   :  { %6424 = vmatpush1.bf16.msra.mxu1 %v12230_v40  ;;  %8097 = vmatpush1.bf16.msra.mxu0 %v12305_v27  ;;  %v12319_v40 = vld [vmem:[%s16880_s7 + $0x6b4] ss:$8 sps:$4 sm:$0xff]   ;;  %v12278_v27 = vld [vmem:[%s16880_s7 + $0x50] ss:$8 sps:$4 sm:$0xff]  }
 0x724   :  { %6425 = vmatprep.subr.bf16.mxu1 %v12235_v46  ;;  %8098 = vmatprep.subr.bf16.mxu0 %v12313_v24  ;;  %v12286_v24 = vld [vmem:[%s16880_s7 + $0x64] ss:$8 sps:$4 sm:$0xff]  }
 0x727   :  { %6426 = vmatpush1.bf16.msra.mxu1 %v12233_v51  ;;  %8099 = vmatpush1.bf16.msra.mxu0 %v12311_v35  ;;  %v12317_v51 = vld [vmem:[%s16880_s7 + $0x6b0] ss:$8 sps:$4 sm:$0xff]   ;;  %v12296_v35 = vld [vmem:[%s16880_s7 + $0x80] ss:$8 sps:$4 sm:$0xff]  }
 0x728   :  { %6427 = vmatprep.subr.bf16.mxu1 %v12238_v57  ;;  %8100 = vmatprep.subr.bf16.mxu0 %v12319_v40  ;;  %v12308_v40 = vld [vmem:[%s16880_s7 + $0xa0] ss:$8 sps:$4 sm:$0xff]  }
 0x72b   :  { %6428 = vmatpush1.bf16.msra.mxu1 %v12236_v58  ;;  %8101 = vmatpush1.bf16.msra.mxu0 %v12317_v51  ;;  %v12326_v51 = vld [vmem:[%s16880_s7 + $0xd0] ss:$8 sps:$4 sm:$0xff]  }
 0x735   :  { %v5562_v43 = vpop.f32.mrb[24].mxu1 }
 0x736   :  { %v6107_v41 = vrot.slane %v5562_v43, 4  ;;  %v5564_v44 = vpop.f32.mrb[25].mxu1 }
 0x737   :  { %v6108_v47 = vrot.slane %v5564_v44, 4  ;;  %v5566_v49 = vpop.f32.mrb[26].mxu1 }
 0x738   :  { %v15579_v53 = vadd.f32 %v6107_v41, %v15428_v36  ;;  %v5567_v55 = vpop.f32.mrb[27].mxu1  ;;  %v12241_v36 = vld [vmem:[%s16879_s5 + $0xd4] ss:$8 sps:$4 sm:$0xff]  }
 0x739   :  { %v15582_v56 = vadd.f32 %v6108_v47, %v15435_v11  ;;  %v12239_v11 = vld [vmem:[%s16879_s5 + $0xd0] ss:$8 sps:$4 sm:$0xff]   ;;  %6429 = vmatprep.subr.bf16.mxu1 %v12241_v36  ;;  %v12325_v55 = vld [vmem:[%s16880_s7 + $0x6c4] ss:$8 sps:$4 sm:$0xff]  }
 0x73a   :  { %6430 = vmatpush1.bf16.msra.mxu1 %v12239_v11  ;;  %8102 = vmatprep.subr.bf16.mxu0 %v12325_v55  ;;  %v12329_v55 = vld [vmem:[%s16880_s7 + $0x6d0] ss:$8 sps:$4 sm:$0xff]  }
 0x73b   :  { %6431 = vmatprep.subr.bf16.mxu1 %v12244_v63 }
 0x73e   :  { %6432 = vmatpush1.bf16.msra.mxu1 %v12242_v61 }
 0x73f   :  { %6433 = vmatprep.subr.bf16.mxu1 %v12247_v1 }
 0x742   :  { %6434 = vmatpush1.bf16.msra.mxu1 %v12245_v3 }
 0x743   :  { %6674 = vmatprep.subr.bf16.mxu1 %v12250_v45 }
 0x775   :  { %v5796_v28 = vpop.f32.mrb[28].mxu1 }
 0x776   :  { %v6057_v30 = vrot.slane %v5796_v28, 4  ;;  %v6113_v31 = vrot.slane %v5796_v28, 6  ;;  %v5798_v34 = vpop.f32.mrb[29].mxu1  ;;  %v12284_v28 = vld [vmem:[%s16880_s7 + $0x60] ss:$8 sps:$4 sm:$0xff]  }
 0x777   :  { %v6058_v37 = vrot.slane %v5798_v34, 4  ;;  %v6114_v38 = vrot.slane %v5798_v34, 6  ;;  %v5800_v39 = vpop.f32.mrb[30].mxu1  ;;  %v12298_v34 = vld [vmem:[%s16880_s7 + $0x84] ss:$8 sps:$4 sm:$0xff]  }
 0x778   :  { %v6061_v43 = vadd.f32 %v6057_v30, %v15497_v0  ;;  %v6117_v41 = vadd.f32 %v6113_v31, %v15579_v53  ;;  %v5801_v44 = vpop.f32.mrb[31].mxu1  ;;  %v12292_v30 = vld [vmem:[%s16880_s7 + $0x74] ss:$8 sps:$4 sm:$0xff]   ;;  %v12290_v31 = vld [vmem:[%s16880_s7 + $0x70] ss:$8 sps:$4 sm:$0xff]  }
 0x779   :  { %v6062_v46 = vadd.f32 %v6058_v37, %v15500_v60  ;;  %v6118_v47 = vadd.f32 %v6114_v38, %v15582_v56  ;;  %v12323_v60 = vld [vmem:[%s16880_s7 + $0x6c0] ss:$8 sps:$4 sm:$0xff]   ;;  %v12304_v37 = vld [vmem:[%s16880_s7 + $0x94] ss:$8 sps:$4 sm:$0xff]   ;;  %v12302_v38 = vld [vmem:[%s16880_s7 + $0x90] ss:$8 sps:$4 sm:$0xff]  }
 0x77a   :  { %v6119_v49 = vmul.f32 %v6117_v41, %v15395_v52  ;;  %8103 = vmatpush1.bf16.msra.mxu0 %v12323_v60  ;;  %v12310_v39 = vld [vmem:[%s16880_s7 + $0xa4] ss:$8 sps:$4 sm:$0xff]   ;;  %v12314_v41 = vld [vmem:[%s16880_s7 + $0xb0] ss:$8 sps:$4 sm:$0xff]   ;;  %v12332_v60 = vld [vmem:[%s16880_s7 + $0xe0] ss:$8 sps:$4 sm:$0xff]  }
 0x77b   :  { %v6120_v0 = vmul.f32 %v6118_v47, %v15401_v54  ;;  %v12322_v44 = vld [vmem:[%s16880_s7 + $0xc4] ss:$8 sps:$4 sm:$0xff]   ;;  %v12328_v47 = vld [vmem:[%s16880_s7 + $0xd4] ss:$8 sps:$4 sm:$0xff]  }
 0x77c   :  { %v6121_v53 = vadd.f32 %v6119_v49, %v15419_v4  ;;  %v12331_v49 = vld [vmem:[%s16880_s7 + $0x6d4] ss:$8 sps:$4 sm:$0xff]  }
 0x77d   :  { %v6122_v56 = vadd.f32 %v6120_v0, %v15431_v8  ;;  %8104 = vmatprep.subr.bf16.mxu0 %v12331_v49  ;;  %v12334_v0 = vld [vmem:[%s16880_s7 + $0xe4] ss:$8 sps:$4 sm:$0xff]   ;;  %v12374_v49 = vld [vmem:[%s16880_s7 + $0x150] ss:$8 sps:$4 sm:$0xff]  }
 0x77e   :  { %v6123_v57 = vmax.f32 %v6121_v53, 0.0  ;;  %8105 = vmatpush1.bf16.msra.mxu0 %v12329_v55  ;;  %v12337_v53 = vld [vmem:[%s16880_s7 + $0x6e4] ss:$8 sps:$4 sm:$0xff]  }
 0x77f   :  { %v6124_v58 = vmax.f32 %v6122_v56, 0.0  ;;  %v12335_v56 = vld [vmem:[%s16880_s7 + $0x6e0] ss:$8 sps:$4 sm:$0xff]   ;;  %8106 = vmatprep.subr.bf16.mxu0 %v12337_v53  ;;  %v12382_v55 = vld [vmem:[%s16880_s7 + $0x164] ss:$8 sps:$4 sm:$0xff]  }
 0x780   :  { %v6127_v36 = vrot.slane %v6123_v57, 6  ;;  %v12340_v57 = vld [vmem:[%s16880_s7 + $0xf4] ss:$8 sps:$4 sm:$0xff]   ;;  %v12380_v53 = vld [vmem:[%s16880_s7 + $0x160] ss:$8 sps:$4 sm:$0xff]  }
 0x781   :  { %v6128_v11 = vrot.slane %v6124_v58, 6  ;;  %v12343_v58 = vld [vmem:[%s16880_s7 + $0x6f4] ss:$8 sps:$4 sm:$0xff]  }
 0x782   :  { %6131 = vst [vmem:[#allocation2] sm:$0xc] %v6127_v36  ;;  %8107 = vmatpush1.bf16.msra.mxu0 %v12335_v56  ;;  %v12338_v36 = vld [vmem:[%s16880_s7 + $0xf0] ss:$8 sps:$4 sm:$0xff]   ;;  %v12388_v56 = vld [vmem:[%s16880_s7 + $0x174] ss:$8 sps:$4 sm:$0xff]  }
 0x783   :  { %6132 = vst [vmem:[#allocation2 + $0x8] sm:$0xc] %v6128_v11  ;;  %v12341_v11 = vld [vmem:[%s16880_s7 + $0x6f0] ss:$8 sps:$4 sm:$0xff]   ;;  %8108 = vmatprep.subr.bf16.mxu0 %v12343_v58 }
 0x784   :  { %v12386_v58 = vld [vmem:[%s16880_s7 + $0x170] ss:$8 sps:$4 sm:$0xff]  }
 0x786   :  { %8109 = vmatpush1.bf16.msra.mxu0 %v12341_v11  ;;  %v12394_v11 = vld [vmem:[%s16880_s7 + $0x184] ss:$8 sps:$4 sm:$0xff]  }
 0x7b5   :  { %v6030_v61 = vpop.f32.mrb[32].mxu1 }
 0x7b6   :  { %v6065_v63 = vrot.slane %v6030_v61, 6  ;;  %v6032_v1 = vpop.f32.mrb[33].mxu1  ;;  %v12346_v61 = vld [vmem:[%s16880_s7 + $0x104] ss:$8 sps:$4 sm:$0xff]  }
 0x7b7   :  { %v6066_v3 = vrot.slane %v6032_v1, 6  ;;  %v6034_v45 = vpop.f32.mrb[34].mxu1  ;;  %v15819_v1 = vsub.s32 5, %v14568_v18  ;;  %v12731_v18 = vld [vmem:[%s16878_s3 + $0x8] sm:$0x3f] }
 0x7b8   :  { %v6069_v6 = vadd.f32 %v6065_v63, %v6061_v43  ;;  %v6035_v15 = vpop.f32.mrb[35].mxu1  ;;  %v12316_v43 = vld [vmem:[%s16880_s7 + $0xb4] ss:$8 sps:$4 sm:$0xff]   ;;  %v12349_v63 = vld [vmem:[%s16880_s7 + $0x804] ss:$8 sps:$4 sm:$0xff]  }
 0x7b9   :  { %v6070_v50 = vadd.f32 %v6066_v3, %v6062_v46  ;;  %v12320_v46 = vld [vmem:[%s16880_s7 + $0xc0] ss:$8 sps:$4 sm:$0xff]   ;;  %8546 = vmatprep.subr.bf16.mxu0 %v12349_v63 }
 0x7ba   :  { %v6079_v33 = vmul.f32 %v15395_v52, %v6069_v6  ;;  %v12256_v52 = vld [vmem:[%s16880_s7 + $0x14] ss:$8 sps:$4 sm:$0xff]   ;;  %v15824_v3 = vld [vmem:[%s16881_s6] sm:$0x3f]  ;;  %v15833_v15 = vld [vmem:[%s16881_s6 + $0x8] sm:$0x3f] }
 0x7bb   :  { %v6080_v16 = vmul.f32 %v15401_v54, %v6070_v50  ;;  %v12254_v54 = vld [vmem:[%s16880_s7 + $0x10] ss:$8 sps:$4 sm:$0xff]   ;;  %v12730_v45 = vld [vmem:[%s16878_s3] sm:$0x3f] }
 0x7bc   :  { %v6089_v59 = vadd.f32 %v15419_v4, %v6079_v33  ;;  %v12262_v4 = vld [vmem:[%s16880_s7 + $0x24] ss:$8 sps:$4 sm:$0xff]   ;;  %v6449_v6 = vrot.slane %v12730_v45, %v15819_v1  ;;  %v6453_v33 = vrot.slane %v12731_v18, %v15819_v1  ;;  %v12392_v63 = vld [vmem:[%s16880_s7 + $0x180] ss:$8 sps:$4 sm:$0xff]   ;;  %v12398_v18 = vld [vmem:[%s16880_s7 + $0x190] ss:$8 sps:$4 sm:$0xff]  }
 0x7bd   :  { %v6090_v62 = vadd.f32 %v15431_v8, %v6080_v16  ;;  %v12260_v8 = vld [vmem:[%s16880_s7 + $0x20] ss:$8 sps:$4 sm:$0xff]  }
 0x7be   :  { %v6091_v9 = vmax.f32 %v6089_v59, 0.0  ;;  %v6461_v59 = vrot.slane %v15824_v3, %v14571_v19  ;;  %v12395_v45 = vld [vmem:[%s16880_s7 + $0x880] ss:$8 sps:$4 sm:$0xff]  }
 0x7bf   :  { %v6092_v7 = vmax.f32 %v6090_v62, 0.0 }
 0x7c0   :  { %6093 = vst [vmem:[#allocation2] sm:$0x3] %v6091_v9 }
 0x7c1   :  { %6094 = vst [vmem:[#allocation2 + $0x8] sm:$0x3] %v6092_v7  ;;  %v6465_v7 = vrot.slane %v15833_v15, %v14571_v19 }
 0x7c7   :  { %v6207_v10 = vld [vmem:[#allocation2] sm:$0xff] }
 0x7c8   :  { %v6208_v2 = vld [vmem:[#allocation2 + $0x8] sm:$0xff]  ;;  %v6209_v20 = vpack.c.bf16 %v6207_v10, %v6207_v10 }
 0x7c9   :  { %v6210_v13 = vpack.c.bf16 %v6208_v2, %v6208_v2 }
 0x7cb   :  { %6435 = vmatprep.mubr.bf16.mxu1 %v6210_v13  ;;  %v6471_v13 = vrot.slane %v15824_v3, %v14577_v21 }
 0x7cc   :  { %6436 = vmatmul.mubr.bf16.vlgmr.msra.gmra.mrb[36].mxu1 %v6209_v20 }
 0x7cd   :  { %6675 = vmatpush1.bf16.msra.mxu1 %v12248_v14 }
 0x7ce   :  { %6676 = vmatprep.subr.bf16.mxu1 %v12256_v52 }
 0x7d1   :  { %6677 = vmatpush1.bf16.msra.mxu1 %v12254_v54 }
 0x7d2   :  { %6678 = vmatprep.subr.bf16.mxu1 %v12262_v4 }
 0x7d5   :  { %6679 = vmatpush1.bf16.msra.mxu1 %v12260_v8 }
 0x7d6   :  { %6680 = vmatprep.subr.bf16.mxu1 %v12268_v5 }
 0x7d9   :  { %6681 = vmatpush1.bf16.msra.mxu1 %v12266_v25  ;;  %v12344_v25 = vld [vmem:[%s16880_s7 + $0x100] ss:$8 sps:$4 sm:$0xff]  }
 0x7da   :  { %6682 = vmatprep.subr.bf16.mxu1 %v12274_v23  ;;  %v12347_v23 = vld [vmem:[%s16880_s7 + $0x800] ss:$8 sps:$4 sm:$0xff]  }
 0x7dd   :  { %6683 = vmatpush1.bf16.msra.mxu1 %v12272_v22 }
 0x7de   :  { %6684 = vmatprep.subr.bf16.mxu1 %v12280_v26  ;;  %v12355_v26 = vld [vmem:[%s16880_s7 + $0x814] ss:$8 sps:$4 sm:$0xff]  }
 0x7e1   :  { %6685 = vmatpush1.bf16.msra.mxu1 %v12278_v27  ;;  %v12350_v27 = vld [vmem:[%s16880_s7 + $0x110] ss:$8 sps:$4 sm:$0xff]  }
 0x7e2   :  { %6686 = vmatprep.subr.bf16.mxu1 %v12286_v24  ;;  %v12353_v24 = vld [vmem:[%s16880_s7 + $0x810] ss:$8 sps:$4 sm:$0xff]  }
 0x7e5   :  { %6687 = vmatpush1.bf16.msra.mxu1 %v12284_v28  ;;  %v12358_v28 = vld [vmem:[%s16880_s7 + $0x124] ss:$8 sps:$4 sm:$0xff]  }
 0x7e6   :  { %6688 = vmatprep.subr.bf16.mxu1 %v12292_v30  ;;  %v12361_v30 = vld [vmem:[%s16880_s7 + $0x824] ss:$8 sps:$4 sm:$0xff]  }
 0x7e9   :  { %6689 = vmatpush1.bf16.msra.mxu1 %v12290_v31  ;;  %v12356_v31 = vld [vmem:[%s16880_s7 + $0x120] ss:$8 sps:$4 sm:$0xff]  }
 0x7ea   :  { %6690 = vmatprep.subr.bf16.mxu1 %v12298_v34  ;;  %v12359_v34 = vld [vmem:[%s16880_s7 + $0x820] ss:$8 sps:$4 sm:$0xff]  }
 0x7ed   :  { %6691 = vmatpush1.bf16.msra.mxu1 %v12296_v35  ;;  %v12364_v35 = vld [vmem:[%s16880_s7 + $0x134] ss:$8 sps:$4 sm:$0xff]  }
 0x7ee   :  { %6692 = vmatprep.subr.bf16.mxu1 %v12304_v37  ;;  %v12367_v37 = vld [vmem:[%s16880_s7 + $0x834] ss:$8 sps:$4 sm:$0xff]  }
 0x7f1   :  { %6693 = vmatpush1.bf16.msra.mxu1 %v12302_v38  ;;  %v12362_v38 = vld [vmem:[%s16880_s7 + $0x130] ss:$8 sps:$4 sm:$0xff]  }
 0x7f2   :  { %6694 = vmatprep.subr.bf16.mxu1 %v12310_v39  ;;  %v12365_v39 = vld [vmem:[%s16880_s7 + $0x830] ss:$8 sps:$4 sm:$0xff]  }
 0x7f5   :  { %6695 = vmatpush1.bf16.msra.mxu1 %v12308_v40  ;;  %v12370_v40 = vld [vmem:[%s16880_s7 + $0x144] ss:$8 sps:$4 sm:$0xff]  }
 0x7f6   :  { %6696 = vmatprep.subr.bf16.mxu1 %v12316_v43  ;;  %v12373_v43 = vld [vmem:[%s16880_s7 + $0x844] ss:$8 sps:$4 sm:$0xff]  }
 0x7f9   :  { %6697 = vmatpush1.bf16.msra.mxu1 %v12314_v41  ;;  %v12368_v41 = vld [vmem:[%s16880_s7 + $0x140] ss:$8 sps:$4 sm:$0xff]  }
 0x7fa   :  { %6698 = vmatprep.subr.bf16.mxu1 %v12322_v44  ;;  %v12371_v44 = vld [vmem:[%s16880_s7 + $0x840] ss:$8 sps:$4 sm:$0xff]  }
 0x7fd   :  { %6699 = vmatpush1.bf16.msra.mxu1 %v12320_v46  ;;  %v12376_v46 = vld [vmem:[%s16880_s7 + $0x154] ss:$8 sps:$4 sm:$0xff]  }
 0x7fe   :  { %6700 = vmatprep.subr.bf16.mxu1 %v12328_v47  ;;  %v12379_v47 = vld [vmem:[%s16880_s7 + $0x854] ss:$8 sps:$4 sm:$0xff]  }
 0x801   :  { %6701 = vmatpush1.bf16.msra.mxu1 %v12326_v51  ;;  %v12377_v51 = vld [vmem:[%s16880_s7 + $0x850] ss:$8 sps:$4 sm:$0xff]  }
 0x802   :  { %6702 = vmatprep.subr.bf16.mxu1 %v12334_v0  ;;  %v12385_v0 = vld [vmem:[%s16880_s7 + $0x864] ss:$8 sps:$4 sm:$0xff]  }
 0x805   :  { %6703 = vmatpush1.bf16.msra.mxu1 %v12332_v60  ;;  %v12383_v60 = vld [vmem:[%s16880_s7 + $0x860] ss:$8 sps:$4 sm:$0xff]  }
 0x806   :  { %6704 = vmatprep.subr.bf16.mxu1 %v12340_v57  ;;  %v12391_v57 = vld [vmem:[%s16880_s7 + $0x874] ss:$8 sps:$4 sm:$0xff]  }
 0x809   :  { %6705 = vmatpush1.bf16.msra.mxu1 %v12338_v36  ;;  %v12389_v36 = vld [vmem:[%s16880_s7 + $0x870] ss:$8 sps:$4 sm:$0xff]  }
 0x80a   :  { %6908 = vmatprep.subr.bf16.mxu1 %v12346_v61  ;;  %v12397_v61 = vld [vmem:[%s16880_s7 + $0x884] ss:$8 sps:$4 sm:$0xff]  }
 0x89f   :  { %v6437_v50 = vpop.f32.mrb[36].mxu1 }
 0x8a0   :  { %v6444_v16 = vadd.f32 %v14595_v29, %v6437_v50  ;;  %v6439_v62 = vpop.f32.mrb[37].mxu1  ;;  %v6475_v29 = vrot.slane %v15833_v15, %v14577_v21  ;;  %v12352_v21 = vld [vmem:[%s16880_s7 + $0x114] ss:$8 sps:$4 sm:$0xff]  }
 0x8a1   :  { %v6445_v9 = vadd.f32 %v14599_v32, %v6439_v62  ;;  %v6441_v10 = vpop.f32.mrb[38].mxu1  ;;  %v12403_v50 = vld [vmem:[%s16880_s7 + $0x894] ss:$8 sps:$4 sm:$0xff]   ;;  %v12404_v62 = vld [vmem:[%s16880_s7 + $0x1a0] ss:$8 sps:$4 sm:$0xff]  }
 0x8a2   :  { %v15845_v2 = vadd.f32 %v6449_v6, %v6444_v16  ;;  %v6442_v14 = vpop.f32.mrb[39].mxu1  ;;  %v12400_v6 = vld [vmem:[%s16880_s7 + $0x194] ss:$8 sps:$4 sm:$0xff]   ;;  %v12406_v16 = vld [vmem:[%s16880_s7 + $0x1a4] ss:$8 sps:$4 sm:$0xff]  }
 0x8a3   :  { %v15849_v20 = vadd.f32 %v6453_v33, %v6445_v9  ;;  %v12401_v33 = vld [vmem:[%s16880_s7 + $0x890] ss:$8 sps:$4 sm:$0xff]   ;;  %v12407_v9 = vld [vmem:[%s16880_s7 + $0x8a0] ss:$8 sps:$4 sm:$0xff]   ;;  %v12415_v10 = vld [vmem:[%s16880_s7 + $0x8b4] ss:$8 sps:$4 sm:$0xff]  }
 0x8a4   :  { %v6466_v52 = vmul.f32 %v6461_v59, %v15845_v2  ;;  %v12409_v59 = vld [vmem:[%s16880_s7 + $0x8a4] ss:$8 sps:$4 sm:$0xff]   ;;  %v12413_v14 = vld [vmem:[%s16880_s7 + $0x8b0] ss:$8 sps:$4 sm:$0xff]  }
 0x8a5   :  { %v6467_v54 = vmul.f32 %v6465_v7, %v15849_v20  ;;  %v12412_v7 = vld [vmem:[%s16880_s7 + $0x1b4] ss:$8 sps:$4 sm:$0xff]  }
 0x8a6   :  { %v6476_v32 = vadd.f32 %v6471_v13, %v6466_v52  ;;  %v12410_v13 = vld [vmem:[%s16880_s7 + $0x1b0] ss:$8 sps:$4 sm:$0xff]   ;;  %v12421_v52 = vld [vmem:[%s16880_s7 + $0x8c4] ss:$8 sps:$4 sm:$0xff]  }
 0x8a7   :  { %v6477_v4 = vadd.f32 %v6475_v29, %v6467_v54  ;;  %v12418_v29 = vld [vmem:[%s16880_s7 + $0x1c4] ss:$8 sps:$4 sm:$0xff]   ;;  %v12416_v54 = vld [vmem:[%s16880_s7 + $0x1c0] ss:$8 sps:$4 sm:$0xff]  }
 0x8a8   :  { %v6478_v8 = vmax.f32 %v6476_v32, 0.0  ;;  %v12419_v32 = vld [vmem:[%s16880_s7 + $0x8c0] ss:$8 sps:$4 sm:$0xff]  }
 0x8a9   :  { %v6479_v19 = vmax.f32 %v6477_v4, 0.0  ;;  %v12424_v4 = vld [vmem:[%s16880_s7 + $0x1d4] ss:$8 sps:$4 sm:$0xff]  }
 0x8aa   :  { %v15863_v22 = vpack.c.bf16 %v6478_v8, %v6478_v8  ;;  %v12427_v8 = vld [vmem:[%s16880_s7 + $0x8d4] ss:$8 sps:$4 sm:$0xff]  }
 0x8ab   :  { %v15855_v5 = vpack.c.bf16 %v6479_v19, %v6479_v19  ;;  %v12422_v19 = vld [vmem:[%s16880_s7 + $0x1d0] ss:$8 sps:$4 sm:$0xff]  }
 0x8ad   :  { %6706 = vmatprep.mubr.bf16.mxu1 %v15855_v5  ;;  %8110 = vmatprep.mubr.bf16.mxu0 %v15855_v5 }
 0x8ae   :  { %6707 = vmatmul.mubr.bf16.vlgmr.msra.gmra.mrb[40].mxu1 %v15863_v22  ;;  %8111 = vmatmul.mubr.bf16.vlgmr.msra.gmra.mrb[4].mxu0 %v15863_v22 }
 0x8af   :  { %6909 = vmatpush1.bf16.msra.mxu1 %v12344_v25  ;;  %8547 = vmatpush1.bf16.msra.mxu0 %v12347_v23  ;;  %v12425_v25 = vld [vmem:[%s16880_s7 + $0x8d0] ss:$8 sps:$4 sm:$0xff]   ;;  %v12430_v23 = vld [vmem:[%s16880_s7 + $0x1e4] ss:$8 sps:$4 sm:$0xff]  }
 0x8b0   :  { %6940 = vmatprep.mubr.bf16.mxu1 %v15855_v5  ;;  %8578 = vmatprep.mubr.bf16.mxu0 %v15855_v5 }
 0x8b1   :  { %6910 = vmatprep.subr.bf16.mxu1 %v12352_v21  ;;  %8548 = vmatprep.subr.bf16.mxu0 %v12355_v26  ;;  %v12433_v21 = vld [vmem:[%s16880_s7 + $0x8e4] ss:$8 sps:$4 sm:$0xff]   ;;  %v12428_v26 = vld [vmem:[%s16880_s7 + $0x1e0] ss:$8 sps:$4 sm:$0xff]  }
 0x8b3   :  { %6911 = vmatpush1.bf16.msra.mxu1 %v12350_v27  ;;  %8549 = vmatpush1.bf16.msra.mxu0 %v12353_v24  ;;  %v12431_v27 = vld [vmem:[%s16880_s7 + $0x8e0] ss:$8 sps:$4 sm:$0xff]   ;;  %v12436_v24 = vld [vmem:[%s16880_s7 + $0x1f4] ss:$8 sps:$4 sm:$0xff]  }
 0x8b4   :  { %6912 = vmatprep.subr.bf16.mxu1 %v12358_v28  ;;  %8550 = vmatprep.subr.bf16.mxu0 %v12361_v30  ;;  %v12439_v28 = vld [vmem:[%s16880_s7 + $0x8f4] ss:$8 sps:$4 sm:$0xff]   ;;  %v12434_v30 = vld [vmem:[%s16880_s7 + $0x1f0] ss:$8 sps:$4 sm:$0xff]  }
 0x8b7   :  { %6913 = vmatpush1.bf16.msra.mxu1 %v12356_v31  ;;  %8551 = vmatpush1.bf16.msra.mxu0 %v12359_v34  ;;  %v12437_v31 = vld [vmem:[%s16880_s7 + $0x8f0] ss:$8 sps:$4 sm:$0xff]   ;;  %v12442_v34 = vld [vmem:[%s16880_s7 + $0x204] ss:$8 sps:$4 sm:$0xff]  }
 0x8b8   :  { %6914 = vmatprep.subr.bf16.mxu1 %v12364_v35  ;;  %8552 = vmatprep.subr.bf16.mxu0 %v12367_v37  ;;  %v12440_v35 = vld [vmem:[%s16880_s7 + $0x200] ss:$8 sps:$4 sm:$0xff]   ;;  %v12445_v37 = vld [vmem:[%s16880_s7 + $0x214] ss:$8 sps:$4 sm:$0xff]  }
 0x8bb   :  { %6915 = vmatpush1.bf16.msra.mxu1 %v12362_v38  ;;  %8553 = vmatpush1.bf16.msra.mxu0 %v12365_v39  ;;  %v12443_v38 = vld [vmem:[%s16880_s7 + $0x210] ss:$8 sps:$4 sm:$0xff]   ;;  %v12448_v39 = vld [vmem:[%s16880_s7 + $0x224] ss:$8 sps:$4 sm:$0xff]  }
 0x8bc   :  { %6916 = vmatprep.subr.bf16.mxu1 %v12370_v40  ;;  %8554 = vmatprep.subr.bf16.mxu0 %v12373_v43  ;;  %v12446_v40 = vld [vmem:[%s16880_s7 + $0x220] ss:$8 sps:$4 sm:$0xff]   ;;  %v12451_v43 = vld [vmem:[%s16880_s7 + $0x234] ss:$8 sps:$4 sm:$0xff]  }
 0x8bf   :  { %6917 = vmatpush1.bf16.msra.mxu1 %v12368_v41  ;;  %8555 = vmatpush1.bf16.msra.mxu0 %v12371_v44  ;;  %v12449_v41 = vld [vmem:[%s16880_s7 + $0x230] ss:$8 sps:$4 sm:$0xff]   ;;  %v12454_v44 = vld [vmem:[%s16880_s7 + $0x244] ss:$8 sps:$4 sm:$0xff]  }
 0x8c0   :  { %6918 = vmatprep.subr.bf16.mxu1 %v12376_v46  ;;  %8556 = vmatprep.subr.bf16.mxu0 %v12379_v47  ;;  %v12452_v46 = vld [vmem:[%s16880_s7 + $0x240] ss:$8 sps:$4 sm:$0xff]   ;;  %v12457_v47 = vld [vmem:[%s16880_s7 + $0x254] ss:$8 sps:$4 sm:$0xff]  }
 0x8c3   :  { %6919 = vmatpush1.bf16.msra.mxu1 %v12374_v49  ;;  %8557 = vmatpush1.bf16.msra.mxu0 %v12377_v51  ;;  %v12455_v49 = vld [vmem:[%s16880_s7 + $0x250] ss:$8 sps:$4 sm:$0xff]   ;;  %v12460_v51 = vld [vmem:[%s16880_s7 + $0x264] ss:$8 sps:$4 sm:$0xff]  }
 0x8c4   :  { %6920 = vmatprep.subr.bf16.mxu1 %v12382_v55  ;;  %8558 = vmatprep.subr.bf16.mxu0 %v12385_v0  ;;  %v12458_v55 = vld [vmem:[%s16880_s7 + $0x260] ss:$8 sps:$4 sm:$0xff]   ;;  %v12463_v0 = vld [vmem:[%s16880_s7 + $0x274] ss:$8 sps:$4 sm:$0xff]  }
 0x8c7   :  { %6921 = vmatpush1.bf16.msra.mxu1 %v12380_v53  ;;  %8559 = vmatpush1.bf16.msra.mxu0 %v12383_v60  ;;  %v12461_v53 = vld [vmem:[%s16880_s7 + $0x270] ss:$8 sps:$4 sm:$0xff]   ;;  %v12466_v60 = vld [vmem:[%s16880_s7 + $0x284] ss:$8 sps:$4 sm:$0xff]  }
 0x8c8   :  { %6922 = vmatprep.subr.bf16.mxu1 %v12388_v56  ;;  %8560 = vmatprep.subr.bf16.mxu0 %v12391_v57  ;;  %v12464_v56 = vld [vmem:[%s16880_s7 + $0x280] ss:$8 sps:$4 sm:$0xff]   ;;  %v12469_v57 = vld [vmem:[%s16880_s7 + $0x294] ss:$8 sps:$4 sm:$0xff]  }
 0x8cb   :  { %6923 = vmatpush1.bf16.msra.mxu1 %v12386_v58  ;;  %8561 = vmatpush1.bf16.msra.mxu0 %v12389_v36  ;;  %v12467_v58 = vld [vmem:[%s16880_s7 + $0x290] ss:$8 sps:$4 sm:$0xff]   ;;  %v12472_v36 = vld [vmem:[%s16880_s7 + $0x2a4] ss:$8 sps:$4 sm:$0xff]  }
 0x8cc   :  { %6924 = vmatprep.subr.bf16.mxu1 %v12394_v11  ;;  %8562 = vmatprep.subr.bf16.mxu0 %v12397_v61  ;;  %v12470_v11 = vld [vmem:[%s16880_s7 + $0x2a0] ss:$8 sps:$4 sm:$0xff]   ;;  %v12475_v61 = vld [vmem:[%s16880_s7 + $0x2b4] ss:$8 sps:$4 sm:$0xff]  }
 0x8cf   :  { %6925 = vmatpush1.bf16.msra.mxu1 %v12392_v63  ;;  %8563 = vmatpush1.bf16.msra.mxu0 %v12395_v45  ;;  %v12473_v63 = vld [vmem:[%s16880_s7 + $0x2b0] ss:$8 sps:$4 sm:$0xff]   ;;  %v12478_v45 = vld [vmem:[%s16880_s7 + $0x2c4] ss:$8 sps:$4 sm:$0xff]  }
 0x8d0   :  { %6926 = vmatprep.subr.bf16.mxu1 %v12400_v6  ;;  %8564 = vmatprep.subr.bf16.mxu0 %v12403_v50  ;;  %v12476_v6 = vld [vmem:[%s16880_s7 + $0x2c0] ss:$8 sps:$4 sm:$0xff]   ;;  %v12481_v50 = vld [vmem:[%s16880_s7 + $0x2d4] ss:$8 sps:$4 sm:$0xff]  }
 0x8d3   :  { %6927 = vmatpush1.bf16.msra.mxu1 %v12398_v18  ;;  %8565 = vmatpush1.bf16.msra.mxu0 %v12401_v33  ;;  %v12479_v18 = vld [vmem:[%s16880_s7 + $0x2d0] ss:$8 sps:$4 sm:$0xff]   ;;  %v12484_v33 = vld [vmem:[%s16880_s7 + $0x2e4] ss:$8 sps:$4 sm:$0xff]  }
 0x8d4   :  { %6928 = vmatprep.subr.bf16.mxu1 %v12406_v16  ;;  %8566 = vmatprep.subr.bf16.mxu0 %v12409_v59  ;;  %v12482_v16 = vld [vmem:[%s16880_s7 + $0x2e0] ss:$8 sps:$4 sm:$0xff]   ;;  %v12487_v59 = vld [vmem:[%s16880_s7 + $0x2f4] ss:$8 sps:$4 sm:$0xff]  }
 0x8d7   :  { %6929 = vmatpush1.bf16.msra.mxu1 %v12404_v62  ;;  %8567 = vmatpush1.bf16.msra.mxu0 %v12407_v9  ;;  %v12485_v62 = vld [vmem:[%s16880_s7 + $0x2f0] ss:$8 sps:$4 sm:$0xff]   ;;  %v12490_v9 = vld [vmem:[%s16880_s7 + $0x304] ss:$8 sps:$4 sm:$0xff]  }
 0x8d8   :  { %6930 = vmatprep.subr.bf16.mxu1 %v12412_v7  ;;  %8568 = vmatprep.subr.bf16.mxu0 %v12415_v10  ;;  %v12488_v7 = vld [vmem:[%s16880_s7 + $0x300] ss:$8 sps:$4 sm:$0xff]   ;;  %v12493_v10 = vld [vmem:[%s16880_s7 + $0x314] ss:$8 sps:$4 sm:$0xff]  }
 0x8db   :  { %6931 = vmatpush1.bf16.msra.mxu1 %v12410_v13  ;;  %8569 = vmatpush1.bf16.msra.mxu0 %v12413_v14  ;;  %v12491_v13 = vld [vmem:[%s16880_s7 + $0x310] ss:$8 sps:$4 sm:$0xff]   ;;  %v12496_v14 = vld [vmem:[%s16880_s7 + $0x324] ss:$8 sps:$4 sm:$0xff]  }
 0x8dc   :  { %6932 = vmatprep.subr.bf16.mxu1 %v12418_v29  ;;  %8570 = vmatprep.subr.bf16.mxu0 %v12421_v52  ;;  %v12494_v29 = vld [vmem:[%s16880_s7 + $0x320] ss:$8 sps:$4 sm:$0xff]   ;;  %v12499_v52 = vld [vmem:[%s16880_s7 + $0x334] ss:$8 sps:$4 sm:$0xff]  }
 0x8df   :  { %6933 = vmatpush1.bf16.msra.mxu1 %v12416_v54  ;;  %8571 = vmatpush1.bf16.msra.mxu0 %v12419_v32  ;;  %v12497_v54 = vld [vmem:[%s16880_s7 + $0x330] ss:$8 sps:$4 sm:$0xff]   ;;  %v12502_v32 = vld [vmem:[%s16880_s7 + $0x344] ss:$8 sps:$4 sm:$0xff]  }
 0x8e0   :  { %6934 = vmatprep.subr.bf16.mxu1 %v12424_v4  ;;  %8572 = vmatprep.subr.bf16.mxu0 %v12427_v8  ;;  %v12500_v4 = vld [vmem:[%s16880_s7 + $0x340] ss:$8 sps:$4 sm:$0xff]   ;;  %v12505_v8 = vld [vmem:[%s16880_s7 + $0x354] ss:$8 sps:$4 sm:$0xff]  }
 0x8e3   :  { %6935 = vmatpush1.bf16.msra.mxu1 %v12422_v19  ;;  %8573 = vmatpush1.bf16.msra.mxu0 %v12425_v25  ;;  %v12503_v19 = vld [vmem:[%s16880_s7 + $0x350] ss:$8 sps:$4 sm:$0xff]   ;;  %v12508_v25 = vld [vmem:[%s16880_s7 + $0x364] ss:$8 sps:$4 sm:$0xff]  }
 0x8e4   :  { %6936 = vmatprep.subr.bf16.mxu1 %v12430_v23  ;;  %8574 = vmatprep.subr.bf16.mxu0 %v12433_v21  ;;  %v12506_v23 = vld [vmem:[%s16880_s7 + $0x360] ss:$8 sps:$4 sm:$0xff]   ;;  %v12511_v21 = vld [vmem:[%s16880_s7 + $0x374] ss:$8 sps:$4 sm:$0xff]  }
 0x8e7   :  { %6937 = vmatpush1.bf16.msra.mxu1 %v12428_v26  ;;  %8575 = vmatpush1.bf16.msra.mxu0 %v12431_v27  ;;  %v12509_v26 = vld [vmem:[%s16880_s7 + $0x370] ss:$8 sps:$4 sm:$0xff]   ;;  %v12514_v27 = vld [vmem:[%s16880_s7 + $0x384] ss:$8 sps:$4 sm:$0xff]  }
 0x8e8   :  { %6938 = vmatprep.subr.bf16.mxu1 %v12436_v24  ;;  %8576 = vmatprep.subr.bf16.mxu0 %v12439_v28  ;;  %v12512_v24 = vld [vmem:[%s16880_s7 + $0x380] ss:$8 sps:$4 sm:$0xff]   ;;  %v12517_v28 = vld [vmem:[%s16880_s7 + $0x394] ss:$8 sps:$4 sm:$0xff]  }
 0x8eb   :  { %6939 = vmatpush1.bf16.msra.mxu1 %v12434_v30  ;;  %8577 = vmatpush1.bf16.msra.mxu0 %v12437_v31  ;;  %v12515_v30 = vld [vmem:[%s16880_s7 + $0x390] ss:$8 sps:$4 sm:$0xff]   ;;  %v12520_v31 = vld [vmem:[%s16880_s7 + $0x3a4] ss:$8 sps:$4 sm:$0xff]  }
 0x8ec   :  { %7142 = vmatprep.subr.bf16.mxu1 %v12442_v34  ;;  %v12518_v34 = vld [vmem:[%s16880_s7 + $0x3a0] ss:$8 sps:$4 sm:$0xff]  }
 0x8ee   :  { %6941 = vmatmul.mubr.bf16.vlgmr.msra.gmra.mrb[44].mxu1 %v15863_v22  ;;  %8579 = vmatmul.mubr.bf16.vlgmr.msra.gmra.mrb[8].mxu0 %v15863_v22 }
 0x8ef   :  { %7143 = vmatpush1.bf16.msra.mxu1 %v12440_v35  ;;  %7174 = vmatprep.mubr.bf16.mxu1 %v15855_v5  ;;  %v12523_v35 = vld [vmem:[%s16880_s7 + $0x3b4] ss:$8 sps:$4 sm:$0xff]  }
 0x8f0   :  { %7144 = vmatprep.subr.bf16.mxu1 %v12445_v37  ;;  %v12521_v37 = vld [vmem:[%s16880_s7 + $0x3b0] ss:$8 sps:$4 sm:$0xff]  }
 0x8f3   :  { %7145 = vmatpush1.bf16.msra.mxu1 %v12443_v38  ;;  %v12526_v38 = vld [vmem:[%s16880_s7 + $0x3c4] ss:$8 sps:$4 sm:$0xff]  }
 0x8f4   :  { %7146 = vmatprep.subr.bf16.mxu1 %v12448_v39  ;;  %v12524_v39 = vld [vmem:[%s16880_s7 + $0x3c0] ss:$8 sps:$4 sm:$0xff]  }
 0x8f7   :  { %7147 = vmatpush1.bf16.msra.mxu1 %v12446_v40  ;;  %v12529_v40 = vld [vmem:[%s16880_s7 + $0x3d4] ss:$8 sps:$4 sm:$0xff]  }
 0x8f8   :  { %7148 = vmatprep.subr.bf16.mxu1 %v12451_v43  ;;  %v12527_v43 = vld [vmem:[%s16880_s7 + $0x3d0] ss:$8 sps:$4 sm:$0xff]  }
 0x8fb   :  { %7149 = vmatpush1.bf16.msra.mxu1 %v12449_v41  ;;  %v12532_v41 = vld [vmem:[%s16880_s7 + $0x3e4] ss:$8 sps:$4 sm:$0xff]  }
 0x8fc   :  { %7150 = vmatprep.subr.bf16.mxu1 %v12454_v44  ;;  %v12530_v44 = vld [vmem:[%s16880_s7 + $0x3e0] ss:$8 sps:$4 sm:$0xff]  }
 0x8ff   :  { %7151 = vmatpush1.bf16.msra.mxu1 %v12452_v46  ;;  %v12535_v46 = vld [vmem:[%s16880_s7 + $0x3f4] ss:$8 sps:$4 sm:$0xff]  }
 0x900   :  { %7152 = vmatprep.subr.bf16.mxu1 %v12457_v47  ;;  %v12533_v47 = vld [vmem:[%s16880_s7 + $0x3f0] ss:$8 sps:$4 sm:$0xff]  }
 0x903   :  { %7153 = vmatpush1.bf16.msra.mxu1 %v12455_v49  ;;  %v12538_v49 = vld [vmem:[%s16880_s7 + $0x404] ss:$8 sps:$4 sm:$0xff]  }
 0x904   :  { %7154 = vmatprep.subr.bf16.mxu1 %v12460_v51  ;;  %v12536_v51 = vld [vmem:[%s16880_s7 + $0x400] ss:$8 sps:$4 sm:$0xff]  }
 0x907   :  { %7155 = vmatpush1.bf16.msra.mxu1 %v12458_v55  ;;  %v12541_v55 = vld [vmem:[%s16880_s7 + $0x414] ss:$8 sps:$4 sm:$0xff]  }
 0x908   :  { %7156 = vmatprep.subr.bf16.mxu1 %v12463_v0  ;;  %v12539_v0 = vld [vmem:[%s16880_s7 + $0x410] ss:$8 sps:$4 sm:$0xff]  }
 0x90b   :  { %7157 = vmatpush1.bf16.msra.mxu1 %v12461_v53  ;;  %v12544_v53 = vld [vmem:[%s16880_s7 + $0x424] ss:$8 sps:$4 sm:$0xff]  }
 0x90c   :  { %7158 = vmatprep.subr.bf16.mxu1 %v12466_v60  ;;  %v12542_v60 = vld [vmem:[%s16880_s7 + $0x420] ss:$8 sps:$4 sm:$0xff]  }
 0x90f   :  { %7159 = vmatpush1.bf16.msra.mxu1 %v12464_v56  ;;  %v12547_v56 = vld [vmem:[%s16880_s7 + $0x434] ss:$8 sps:$4 sm:$0xff]  }
 0x910   :  { %7160 = vmatprep.subr.bf16.mxu1 %v12469_v57  ;;  %v12545_v57 = vld [vmem:[%s16880_s7 + $0x430] ss:$8 sps:$4 sm:$0xff]  }
 0x913   :  { %7161 = vmatpush1.bf16.msra.mxu1 %v12467_v58  ;;  %v12550_v58 = vld [vmem:[%s16880_s7 + $0x444] ss:$8 sps:$4 sm:$0xff]  }
 0x914   :  { %7162 = vmatprep.subr.bf16.mxu1 %v12472_v36  ;;  %v12548_v36 = vld [vmem:[%s16880_s7 + $0x440] ss:$8 sps:$4 sm:$0xff]  }
 0x917   :  { %7163 = vmatpush1.bf16.msra.mxu1 %v12470_v11  ;;  %v12553_v11 = vld [vmem:[%s16880_s7 + $0x454] ss:$8 sps:$4 sm:$0xff]  }
 0x918   :  { %7164 = vmatprep.subr.bf16.mxu1 %v12475_v61  ;;  %v12551_v61 = vld [vmem:[%s16880_s7 + $0x450] ss:$8 sps:$4 sm:$0xff]  }
 0x91b   :  { %7165 = vmatpush1.bf16.msra.mxu1 %v12473_v63  ;;  %v12556_v63 = vld [vmem:[%s16880_s7 + $0x464] ss:$8 sps:$4 sm:$0xff]  }
 0x91c   :  { %7166 = vmatprep.subr.bf16.mxu1 %v12478_v45 }
 0x91f   :  { %7167 = vmatpush1.bf16.msra.mxu1 %v12476_v6 }
 0x920   :  { %7168 = vmatprep.subr.bf16.mxu1 %v12481_v50 }
 0x923   :  { %7169 = vmatpush1.bf16.msra.mxu1 %v12479_v18 }
 0x924   :  { %7170 = vmatprep.subr.bf16.mxu1 %v12484_v33 }
 0x927   :  { %7171 = vmatpush1.bf16.msra.mxu1 %v12482_v16 }
 0x928   :  { %7172 = vmatprep.subr.bf16.mxu1 %v12487_v59  ;;  %v12554_v59 = vld [vmem:[%s16880_s7 + $0x460] ss:$8 sps:$4 sm:$0xff]  }
 0x92b   :  { %7173 = vmatpush1.bf16.msra.mxu1 %v12485_v62 }
 0x92c   :  { %7376 = vmatprep.subr.bf16.mxu1 %v12490_v9 }
 0x92e   :  { %7175 = vmatmul.mubr.bf16.vlgmr.msra.gmra.mrb[48].mxu1 %v15863_v22 }
 0x92f   :  { %7377 = vmatpush1.bf16.msra.mxu1 %v12488_v7  ;;  %7408 = vmatprep.mubr.bf16.mxu1 %v15855_v5  ;;  %v12559_v7 = vld [vmem:[%s16880_s7 + $0x474] ss:$8 sps:$4 sm:$0xff]  }
 0x930   :  { %7378 = vmatprep.subr.bf16.mxu1 %v12493_v10  ;;  %v12557_v10 = vld [vmem:[%s16880_s7 + $0x470] ss:$8 sps:$4 sm:$0xff]  }
 0x933   :  { %7379 = vmatpush1.bf16.msra.mxu1 %v12491_v13  ;;  %v12562_v13 = vld [vmem:[%s16880_s7 + $0x484] ss:$8 sps:$4 sm:$0xff]  }
 0x934   :  { %7380 = vmatprep.subr.bf16.mxu1 %v12496_v14  ;;  %v12560_v14 = vld [vmem:[%s16880_s7 + $0x480] ss:$8 sps:$4 sm:$0xff]  }
 0x937   :  { %7381 = vmatpush1.bf16.msra.mxu1 %v12494_v29  ;;  %v12565_v29 = vld [vmem:[%s16880_s7 + $0x494] ss:$8 sps:$4 sm:$0xff]  }
 0x938   :  { %7382 = vmatprep.subr.bf16.mxu1 %v12499_v52  ;;  %v12563_v52 = vld [vmem:[%s16880_s7 + $0x490] ss:$8 sps:$4 sm:$0xff]  }
 0x93b   :  { %7383 = vmatpush1.bf16.msra.mxu1 %v12497_v54  ;;  %v12568_v54 = vld [vmem:[%s16880_s7 + $0x4a4] ss:$8 sps:$4 sm:$0xff]  }
 0x93c   :  { %7384 = vmatprep.subr.bf16.mxu1 %v12502_v32  ;;  %v12566_v32 = vld [vmem:[%s16880_s7 + $0x4a0] ss:$8 sps:$4 sm:$0xff]  }
 0x93f   :  { %7385 = vmatpush1.bf16.msra.mxu1 %v12500_v4  ;;  %v12571_v4 = vld [vmem:[%s16880_s7 + $0x4b4] ss:$8 sps:$4 sm:$0xff]  }
 0x940   :  { %7386 = vmatprep.subr.bf16.mxu1 %v12505_v8  ;;  %v12569_v8 = vld [vmem:[%s16880_s7 + $0x4b0] ss:$8 sps:$4 sm:$0xff]  }
 0x943   :  { %7387 = vmatpush1.bf16.msra.mxu1 %v12503_v19  ;;  %v12574_v19 = vld [vmem:[%s16880_s7 + $0x4c4] ss:$8 sps:$4 sm:$0xff]  }
 0x944   :  { %7388 = vmatprep.subr.bf16.mxu1 %v12508_v25  ;;  %v12572_v25 = vld [vmem:[%s16880_s7 + $0x4c0] ss:$8 sps:$4 sm:$0xff]  }
 0x947   :  { %7389 = vmatpush1.bf16.msra.mxu1 %v12506_v23  ;;  %v12577_v23 = vld [vmem:[%s16880_s7 + $0x4d4] ss:$8 sps:$4 sm:$0xff]  }
 0x948   :  { %7390 = vmatprep.subr.bf16.mxu1 %v12511_v21  ;;  %v12575_v21 = vld [vmem:[%s16880_s7 + $0x4d0] ss:$8 sps:$4 sm:$0xff]  }
 0x94b   :  { %7391 = vmatpush1.bf16.msra.mxu1 %v12509_v26  ;;  %v12580_v26 = vld [vmem:[%s16880_s7 + $0x4e4] ss:$8 sps:$4 sm:$0xff]  }
 0x94c   :  { %7392 = vmatprep.subr.bf16.mxu1 %v12514_v27  ;;  %v12578_v27 = vld [vmem:[%s16880_s7 + $0x4e0] ss:$8 sps:$4 sm:$0xff]  }
 0x94f   :  { %7393 = vmatpush1.bf16.msra.mxu1 %v12512_v24  ;;  %v12583_v24 = vld [vmem:[%s16880_s7 + $0x4f4] ss:$8 sps:$4 sm:$0xff]  }
 0x950   :  { %7394 = vmatprep.subr.bf16.mxu1 %v12517_v28  ;;  %v12581_v28 = vld [vmem:[%s16880_s7 + $0x4f0] ss:$8 sps:$4 sm:$0xff]  }
 0x953   :  { %7395 = vmatpush1.bf16.msra.mxu1 %v12515_v30  ;;  %v12586_v30 = vld [vmem:[%s16880_s7 + $0x504] ss:$8 sps:$4 sm:$0xff]  }
 0x954   :  { %7396 = vmatprep.subr.bf16.mxu1 %v12520_v31  ;;  %v12584_v31 = vld [vmem:[%s16880_s7 + $0x500] ss:$8 sps:$4 sm:$0xff]  }
 0x957   :  { %7397 = vmatpush1.bf16.msra.mxu1 %v12518_v34  ;;  %v12589_v34 = vld [vmem:[%s16880_s7 + $0x514] ss:$8 sps:$4 sm:$0xff]  }
 0x958   :  { %7398 = vmatprep.subr.bf16.mxu1 %v12523_v35  ;;  %v12587_v35 = vld [vmem:[%s16880_s7 + $0x510] ss:$8 sps:$4 sm:$0xff]  }
 0x95b   :  { %7399 = vmatpush1.bf16.msra.mxu1 %v12521_v37  ;;  %v12592_v37 = vld [vmem:[%s16880_s7 + $0x524] ss:$8 sps:$4 sm:$0xff]  }
 0x95c   :  { %7400 = vmatprep.subr.bf16.mxu1 %v12526_v38  ;;  %v12590_v38 = vld [vmem:[%s16880_s7 + $0x520] ss:$8 sps:$4 sm:$0xff]  }
 0x95f   :  { %7401 = vmatpush1.bf16.msra.mxu1 %v12524_v39  ;;  %v12595_v39 = vld [vmem:[%s16880_s7 + $0x534] ss:$8 sps:$4 sm:$0xff]  }
 0x960   :  { %7402 = vmatprep.subr.bf16.mxu1 %v12529_v40  ;;  %v12593_v40 = vld [vmem:[%s16880_s7 + $0x530] ss:$8 sps:$4 sm:$0xff]  }
 0x963   :  { %7403 = vmatpush1.bf16.msra.mxu1 %v12527_v43  ;;  %v12598_v43 = vld [vmem:[%s16880_s7 + $0x544] ss:$8 sps:$4 sm:$0xff]  }
 0x964   :  { %7404 = vmatprep.subr.bf16.mxu1 %v12532_v41  ;;  %v12596_v41 = vld [vmem:[%s16880_s7 + $0x540] ss:$8 sps:$4 sm:$0xff]  }
 0x967   :  { %7405 = vmatpush1.bf16.msra.mxu1 %v12530_v44  ;;  %v12601_v44 = vld [vmem:[%s16880_s7 + $0x554] ss:$8 sps:$4 sm:$0xff]  }
 0x968   :  { %7406 = vmatprep.subr.bf16.mxu1 %v12535_v46  ;;  %v16391_v46 = vrot.slane %v15824_v3, %v15033_v12 }
 0x96b   :  { %7407 = vmatpush1.bf16.msra.mxu1 %v12533_v47  ;;  %v16395_v47 = vrot.slane %v15833_v15, %v15033_v12 }
 0x96c   :  { %7610 = vmatprep.subr.bf16.mxu1 %v12538_v49  ;;  %v12599_v49 = vld [vmem:[%s16880_s7 + $0x550] ss:$8 sps:$4 sm:$0xff]  }
 0x96e   :  { %7409 = vmatmul.mubr.bf16.vlgmr.msra.gmra.mrb[52].mxu1 %v15863_v22 }
 0x96f   :  { %7611 = vmatpush1.bf16.msra.mxu1 %v12536_v51  ;;  %7642 = vmatprep.mubr.bf16.mxu1 %v15855_v5  ;;  %v12604_v51 = vld [vmem:[%s16880_s7 + $0x564] ss:$8 sps:$4 sm:$0xff]  }
 0x970   :  { %7612 = vmatprep.subr.bf16.mxu1 %v12541_v55 }
 0x973   :  { %7613 = vmatpush1.bf16.msra.mxu1 %v12539_v0 }
 0x974   :  { %7614 = vmatprep.subr.bf16.mxu1 %v12544_v53 }
 0x977   :  { %7615 = vmatpush1.bf16.msra.mxu1 %v12542_v60 }
 0x978   :  { %7616 = vmatprep.subr.bf16.mxu1 %v12547_v56 }
 0x97b   :  { %7617 = vmatpush1.bf16.msra.mxu1 %v12545_v57 }
 0x97c   :  { %7618 = vmatprep.subr.bf16.mxu1 %v12550_v58 }
 0x97f   :  { %7619 = vmatpush1.bf16.msra.mxu1 %v12548_v36  ;;  %v12602_v36 = vld [vmem:[%s16880_s7 + $0x560] ss:$8 sps:$4 sm:$0xff]  }
 0x980   :  { %7620 = vmatprep.subr.bf16.mxu1 %v12553_v11 }
 0x981   :  { %v16289_v45 = vpop.f32.mrb[40].mxu1  ;;  %v16291_v6 = vpop.f32.mrb[4].mxu0 }
 0x982   :  { %v16293_v50 = vpop.f32.mrb[41].mxu1  ;;  %v16295_v18 = vpop.f32.mrb[5].mxu0  ;;  %v8719_v3 = vadd.f32 %v16391_v46, %v16289_v45  ;;  %v12607_v45 = vld [vmem:[%s16880_s7 + $0x574] ss:$8 sps:$4 sm:$0xff]  }
 0x983   :  { %7621 = vmatpush1.bf16.msra.mxu1 %v12551_v61  ;;  %v6712_v33 = vpop.f32.mrb[42].mxu1  ;;  %v8116_v16 = vpop.f32.mrb[6].mxu0  ;;  %v8720_v60 = vadd.f32 %v16395_v47, %v16293_v50  ;;  %v12605_v50 = vld [vmem:[%s16880_s7 + $0x570] ss:$8 sps:$4 sm:$0xff]  }
 0x984   :  { %v6713_v62 = vpop.f32.mrb[43].mxu1  ;;  %v8117_v9 = vpop.f32.mrb[7].mxu0  ;;  %7622 = vmatprep.subr.bf16.mxu1 %v12556_v63  ;;  %v12610_v16 = vld [vmem:[%s16880_s7 + $0x584] ss:$8 sps:$4 sm:$0xff]  }
 0x985   :  { %v12613_v62 = vld [vmem:[%s16880_s7 + $0x594] ss:$8 sps:$4 sm:$0xff]   ;;  %v12611_v9 = vld [vmem:[%s16880_s7 + $0x590] ss:$8 sps:$4 sm:$0xff]  }
 0x987   :  { %7623 = vmatpush1.bf16.msra.mxu1 %v12554_v59  ;;  %v12608_v59 = vld [vmem:[%s16880_s7 + $0x580] ss:$8 sps:$4 sm:$0xff]  }
 0x988   :  { %7624 = vmatprep.subr.bf16.mxu1 %v12559_v7  ;;  %v12616_v7 = vld [vmem:[%s16880_s7 + $0x5a4] ss:$8 sps:$4 sm:$0xff]  }
 0x98b   :  { %7625 = vmatpush1.bf16.msra.mxu1 %v12557_v10  ;;  %v12614_v10 = vld [vmem:[%s16880_s7 + $0x5a0] ss:$8 sps:$4 sm:$0xff]  }
 0x98c   :  { %7626 = vmatprep.subr.bf16.mxu1 %v12562_v13  ;;  %v12619_v13 = vld [vmem:[%s16880_s7 + $0x5b4] ss:$8 sps:$4 sm:$0xff]  }
 0x98f   :  { %7627 = vmatpush1.bf16.msra.mxu1 %v12560_v14  ;;  %v12617_v14 = vld [vmem:[%s16880_s7 + $0x5b0] ss:$8 sps:$4 sm:$0xff]  }
 0x990   :  { %7628 = vmatprep.subr.bf16.mxu1 %v12565_v29  ;;  %v12622_v29 = vld [vmem:[%s16880_s7 + $0x5c4] ss:$8 sps:$4 sm:$0xff]  }
 0x993   :  { %7629 = vmatpush1.bf16.msra.mxu1 %v12563_v52  ;;  %v12620_v52 = vld [vmem:[%s16880_s7 + $0x5c0] ss:$8 sps:$4 sm:$0xff]  }
 0x994   :  { %7630 = vmatprep.subr.bf16.mxu1 %v12568_v54  ;;  %v12625_v54 = vld [vmem:[%s16880_s7 + $0x5d4] ss:$8 sps:$4 sm:$0xff]  }
 0x997   :  { %7631 = vmatpush1.bf16.msra.mxu1 %v12566_v32  ;;  %v12623_v32 = vld [vmem:[%s16880_s7 + $0x5d0] ss:$8 sps:$4 sm:$0xff]  }
 0x998   :  { %7632 = vmatprep.subr.bf16.mxu1 %v12571_v4  ;;  %v12628_v4 = vld [vmem:[%s16880_s7 + $0x5e4] ss:$8 sps:$4 sm:$0xff]  }
 0x99b   :  { %7633 = vmatpush1.bf16.msra.mxu1 %v12569_v8  ;;  %v12626_v8 = vld [vmem:[%s16880_s7 + $0x5e0] ss:$8 sps:$4 sm:$0xff]  }
 0x99c   :  { %7634 = vmatprep.subr.bf16.mxu1 %v12574_v19  ;;  %v12631_v19 = vld [vmem:[%s16880_s7 + $0x5f4] ss:$8 sps:$4 sm:$0xff]  }
 0x99f   :  { %7635 = vmatpush1.bf16.msra.mxu1 %v12572_v25  ;;  %v12629_v25 = vld [vmem:[%s16880_s7 + $0x5f0] ss:$8 sps:$4 sm:$0xff]  }
 0x9a0   :  { %7636 = vmatprep.subr.bf16.mxu1 %v12577_v23  ;;  %v12634_v23 = vld [vmem:[%s16880_s7 + $0x704] ss:$8 sps:$4 sm:$0xff]  }
 0x9a3   :  { %7637 = vmatpush1.bf16.msra.mxu1 %v12575_v21  ;;  %v12632_v21 = vld [vmem:[%s16880_s7 + $0x700] ss:$8 sps:$4 sm:$0xff]  }
 0x9a4   :  { %7638 = vmatprep.subr.bf16.mxu1 %v12580_v26  ;;  %v12637_v26 = vld [vmem:[%s16880_s7 + $0x714] ss:$8 sps:$4 sm:$0xff]  }
 0x9a7   :  { %7639 = vmatpush1.bf16.msra.mxu1 %v12578_v27  ;;  %v12635_v27 = vld [vmem:[%s16880_s7 + $0x710] ss:$8 sps:$4 sm:$0xff]  }
 0x9a8   :  { %7640 = vmatprep.subr.bf16.mxu1 %v12583_v24  ;;  %v12640_v24 = vld [vmem:[%s16880_s7 + $0x724] ss:$8 sps:$4 sm:$0xff]  }
 0x9ab   :  { %7641 = vmatpush1.bf16.msra.mxu1 %v12581_v28  ;;  %v12638_v28 = vld [vmem:[%s16880_s7 + $0x720] ss:$8 sps:$4 sm:$0xff]  }
 0x9ac   :  { %7844 = vmatprep.subr.bf16.mxu1 %v12586_v30  ;;  %v12643_v30 = vld [vmem:[%s16880_s7 + $0x734] ss:$8 sps:$4 sm:$0xff]  }
 0x9ae   :  { %7643 = vmatmul.mubr.bf16.vlgmr.msra.gmra.mrb[56].mxu1 %v15863_v22 }
 0x9af   :  { %7845 = vmatpush1.bf16.msra.mxu1 %v12584_v31  ;;  %7876 = vmatprep.mubr.bf16.mxu1 %v15855_v5  ;;  %v12646_v31 = vld [vmem:[%s16880_s7 + $0x744] ss:$8 sps:$4 sm:$0xff]  }
 0x9b0   :  { %7846 = vmatprep.subr.bf16.mxu1 %v12589_v34  ;;  %v12644_v34 = vld [vmem:[%s16880_s7 + $0x740] ss:$8 sps:$4 sm:$0xff]  }
 0x9b3   :  { %7847 = vmatpush1.bf16.msra.mxu1 %v12587_v35  ;;  %v12649_v35 = vld [vmem:[%s16880_s7 + $0x754] ss:$8 sps:$4 sm:$0xff]  }
 0x9b4   :  { %7848 = vmatprep.subr.bf16.mxu1 %v12592_v37  ;;  %v12647_v37 = vld [vmem:[%s16880_s7 + $0x750] ss:$8 sps:$4 sm:$0xff]  }
 0x9b7   :  { %7849 = vmatpush1.bf16.msra.mxu1 %v12590_v38  ;;  %v12652_v38 = vld [vmem:[%s16880_s7 + $0x764] ss:$8 sps:$4 sm:$0xff]  }
 0x9b8   :  { %7850 = vmatprep.subr.bf16.mxu1 %v12595_v39 }
 0x9bb   :  { %7851 = vmatpush1.bf16.msra.mxu1 %v12593_v40 }
 0x9bc   :  { %7852 = vmatprep.subr.bf16.mxu1 %v12598_v43 }
 0x9bf   :  { %7853 = vmatpush1.bf16.msra.mxu1 %v12596_v41 }
 0x9c0   :  { %7854 = vmatprep.subr.bf16.mxu1 %v12601_v44 }
 0x9c1   :  { %v16403_v55 = vpop.f32.mrb[44].mxu1  ;;  %v16405_v0 = vpop.f32.mrb[8].mxu0 }
 0x9c2   :  { %v8723_v12 = vrot.slane %v16403_v55, 2  ;;  %v16410_v15 = vpop.f32.mrb[45].mxu1  ;;  %v16412_v53 = vpop.f32.mrb[9].mxu0  ;;  %v8683_v40 = vadd.f32 %v16391_v46, %v16403_v55  ;;  %v12655_v55 = vld [vmem:[%s16880_s7 + $0x774] ss:$8 sps:$4 sm:$0xff]  }
 0x9c3   :  { %v8724_v56 = vrot.slane %v16410_v15, 2  ;;  %v6946_v57 = vpop.f32.mrb[46].mxu1  ;;  %7855 = vmatpush1.bf16.msra.mxu1 %v12599_v49  ;;  %v8584_v58 = vpop.f32.mrb[10].mxu0  ;;  %v8684_v44 = vadd.f32 %v16395_v47, %v16410_v15  ;;  %v12653_v15 = vld [vmem:[%s16880_s7 + $0x770] ss:$8 sps:$4 sm:$0xff]  }
 0x9c4   :  { %v16420_v11 = vadd.f32 %v8723_v12, %v8719_v3  ;;  %v6947_v61 = vpop.f32.mrb[47].mxu1  ;;  %v8585_v63 = vpop.f32.mrb[11].mxu0  ;;  %7856 = vmatprep.subr.bf16.mxu1 %v12604_v51  ;;  %v12650_v3 = vld [vmem:[%s16880_s7 + $0x760] ss:$8 sps:$4 sm:$0xff]   ;;  %v12658_v57 = vld [vmem:[%s16880_s7 + $0x784] ss:$8 sps:$4 sm:$0xff]  }
 0x9c5   :  { %v16425_v33 = vadd.f32 %v8724_v56, %v8720_v60  ;;  %v12656_v58 = vld [vmem:[%s16880_s7 + $0x780] ss:$8 sps:$4 sm:$0xff]   ;;  %v12659_v61 = vld [vmem:[%s16880_s7 + $0x790] ss:$8 sps:$4 sm:$0xff]   ;;  %v12664_v63 = vld [vmem:[%s16880_s7 + $0x7a4] ss:$8 sps:$4 sm:$0xff]  }
 0x9c7   :  { %7857 = vmatpush1.bf16.msra.mxu1 %v12602_v36  ;;  %v12661_v36 = vld [vmem:[%s16880_s7 + $0x794] ss:$8 sps:$4 sm:$0xff]  }
 0x9c8   :  { %7858 = vmatprep.subr.bf16.mxu1 %v12607_v45  ;;  %v12662_v45 = vld [vmem:[%s16880_s7 + $0x7a0] ss:$8 sps:$4 sm:$0xff]  }
 0x9cb   :  { %7859 = vmatpush1.bf16.msra.mxu1 %v12605_v50  ;;  %v12667_v50 = vld [vmem:[%s16880_s7 + $0x7b4] ss:$8 sps:$4 sm:$0xff]  }
 0x9cc   :  { %7860 = vmatprep.subr.bf16.mxu1 %v12610_v16  ;;  %v12665_v16 = vld [vmem:[%s16880_s7 + $0x7b0] ss:$8 sps:$4 sm:$0xff]  }
 0x9cf   :  { %7861 = vmatpush1.bf16.msra.mxu1 %v12608_v59  ;;  %v12670_v59 = vld [vmem:[%s16880_s7 + $0x7c4] ss:$8 sps:$4 sm:$0xff]  }
 0x9d0   :  { %7862 = vmatprep.subr.bf16.mxu1 %v12613_v62  ;;  %v12668_v62 = vld [vmem:[%s16880_s7 + $0x7c0] ss:$8 sps:$4 sm:$0xff]  }
 0x9d3   :  { %7863 = vmatpush1.bf16.msra.mxu1 %v12611_v9  ;;  %v12673_v9 = vld [vmem:[%s16880_s7 + $0x7d4] ss:$8 sps:$4 sm:$0xff]  }
 0x9d4   :  { %7864 = vmatprep.subr.bf16.mxu1 %v12616_v7  ;;  %v12671_v7 = vld [vmem:[%s16880_s7 + $0x7d0] ss:$8 sps:$4 sm:$0xff]  }
 0x9d7   :  { %7865 = vmatpush1.bf16.msra.mxu1 %v12614_v10  ;;  %v12676_v10 = vld [vmem:[%s16880_s7 + $0x7e4] ss:$8 sps:$4 sm:$0xff]  }
 0x9d8   :  { %7866 = vmatprep.subr.bf16.mxu1 %v12619_v13  ;;  %v12674_v13 = vld [vmem:[%s16880_s7 + $0x7e0] ss:$8 sps:$4 sm:$0xff]  }
 0x9db   :  { %7867 = vmatpush1.bf16.msra.mxu1 %v12617_v14  ;;  %v12679_v14 = vld [vmem:[%s16880_s7 + $0x7f4] ss:$8 sps:$4 sm:$0xff]  }
 0x9dc   :  { %7868 = vmatprep.subr.bf16.mxu1 %v12622_v29  ;;  %v12677_v29 = vld [vmem:[%s16880_s7 + $0x7f0] ss:$8 sps:$4 sm:$0xff]  }
 0x9df   :  { %7869 = vmatpush1.bf16.msra.mxu1 %v12620_v52 }
 0x9e0   :  { %7870 = vmatprep.subr.bf16.mxu1 %v12625_v54 }
 0x9e3   :  { %7871 = vmatpush1.bf16.msra.mxu1 %v12623_v32 }
 0x9e4   :  { %7872 = vmatprep.subr.bf16.mxu1 %v12628_v4 }
 0x9e7   :  { %7873 = vmatpush1.bf16.msra.mxu1 %v12626_v8 }
 0x9e8   :  { %7874 = vmatprep.subr.bf16.mxu1 %v12631_v19 }
 0x9eb   :  { %7875 = vmatpush1.bf16.msra.mxu1 %v12629_v25 }
 0x9ec   :  { %8312 = vmatprep.subr.bf16.mxu1 %v12634_v23 }
 0x9ee   :  { %7877 = vmatmul.mubr.bf16.vlgmr.msra.gmra.mrb[60].mxu1 %v15863_v22 }
 0x9ef   :  { %8313 = vmatpush1.bf16.msra.mxu1 %v12632_v21  ;;  %8344 = vmatprep.mubr.bf16.mxu1 %v15855_v5  ;;  %v12641_v5 = vld [vmem:[%s16880_s7 + $0x730] ss:$8 sps:$4 sm:$0xff]   ;;  %v12680_v21 = vld [vmem:[%s16882_s8] ss:$8 sps:$4 sm:$0xff]  }
 0x9f0   :  { %8314 = vmatprep.subr.bf16.mxu1 %v12637_v26  ;;  %v12685_v26 = vld [vmem:[%s16882_s8 + $0x14] ss:$8 sps:$4 sm:$0xff]  }
 0x9f3   :  { %8315 = vmatpush1.bf16.msra.mxu1 %v12635_v27  ;;  %v12686_v27 = vld [vmem:[%s16882_s8 + $0x20] ss:$8 sps:$4 sm:$0xff]  }
 0x9f4   :  { %8316 = vmatprep.subr.bf16.mxu1 %v12640_v24  ;;  %v12691_v24 = vld [vmem:[%s16882_s8 + $0x34] ss:$8 sps:$4 sm:$0xff]  }
 0x9f7   :  { %8317 = vmatpush1.bf16.msra.mxu1 %v12638_v28  ;;  %v12689_v28 = vld [vmem:[%s16882_s8 + $0x30] ss:$8 sps:$4 sm:$0xff]  }
 0x9f8   :  { %8318 = vmatprep.subr.bf16.mxu1 %v12643_v30  ;;  %v12694_v30 = vld [vmem:[%s16882_s8 + $0x44] ss:$8 sps:$4 sm:$0xff]  }
 0x9fb   :  { %8319 = vmatpush1.bf16.msra.mxu1 %v12641_v5  ;;  %v12692_v5 = vld [vmem:[%s16882_s8 + $0x40] ss:$8 sps:$4 sm:$0xff]  }
 0x9fc   :  { %8320 = vmatprep.subr.bf16.mxu1 %v12646_v31  ;;  %v12697_v31 = vld [vmem:[%s16882_s8 + $0x54] ss:$8 sps:$4 sm:$0xff]  }
 0x9ff   :  { %8321 = vmatpush1.bf16.msra.mxu1 %v12644_v34  ;;  %v12695_v34 = vld [vmem:[%s16882_s8 + $0x50] ss:$8 sps:$4 sm:$0xff]  }
 0xa00   :  { %8322 = vmatprep.subr.bf16.mxu1 %v12649_v35  ;;  %v12700_v35 = vld [vmem:[%s16882_s8 + $0x64] ss:$8 sps:$4 sm:$0xff]  }
 0xa01   :  { %v7176_v39 = vpop.f32.mrb[48].mxu1 }
 0xa02   :  { %v8687_v43 = vrot.slane %v7176_v39, 2  ;;  %v7178_v41 = vpop.f32.mrb[49].mxu1  ;;  %v12701_v39 = vld [vmem:[%s16882_s8 + $0x70] ss:$8 sps:$4 sm:$0xff]  }
 0xa03   :  { %v8688_v49 = vrot.slane %v7178_v41, 2  ;;  %v7180_v51 = vpop.f32.mrb[50].mxu1  ;;  %8323 = vmatpush1.bf16.msra.mxu1 %v12647_v37  ;;  %v12698_v37 = vld [vmem:[%s16882_s8 + $0x60] ss:$8 sps:$4 sm:$0xff]   ;;  %v12709_v41 = vld [vmem:[%s16882_s8 + $0x94] ss:$8 sps:$4 sm:$0xff]  }
 0xa04   :  { %v16526_v12 = vadd.f32 %v8687_v43, %v8683_v40  ;;  %v7181_v60 = vpop.f32.mrb[51].mxu1  ;;  %8324 = vmatprep.subr.bf16.mxu1 %v12652_v38  ;;  %v12703_v38 = vld [vmem:[%s16882_s8 + $0x74] ss:$8 sps:$4 sm:$0xff]   ;;  %v12706_v40 = vld [vmem:[%s16882_s8 + $0x84] ss:$8 sps:$4 sm:$0xff]   ;;  %v8657_v51 = vrot.slane %v16291_v6, 4 }
 0xa05   :  { %v16531_v56 = vadd.f32 %v8688_v49, %v8684_v44  ;;  %v12704_v43 = vld [vmem:[%s16882_s8 + $0x80] ss:$8 sps:$4 sm:$0xff]   ;;  %v12707_v44 = vld [vmem:[%s16882_s8 + $0x90] ss:$8 sps:$4 sm:$0xff]   ;;  %v12712_v49 = vld [vmem:[%s16882_s8 + $0xa4] ss:$8 sps:$4 sm:$0xff]  }
 0xa07   :  { %8325 = vmatpush1.bf16.msra.mxu1 %v12650_v3  ;;  %v8658_v3 = vrot.slane %v16295_v18, 4  ;;  %v12710_v18 = vld [vmem:[%s16882_s8 + $0xa0] ss:$8 sps:$4 sm:$0xff]  }
 0xa08   :  { %8326 = vmatprep.subr.bf16.mxu1 %v12655_v55  ;;  %v16661_v55 = vld [vmem:[%s16881_s6] sm:$0x3f] }
 0xa0b   :  { %8327 = vmatpush1.bf16.msra.mxu1 %v12653_v15  ;;  %v16665_v15 = vrot.slane %v16661_v55, %v15378_v42 }
 0xa0c   :  { %8328 = vmatprep.subr.bf16.mxu1 %v12658_v57  ;;  %v16670_v57 = vld [vmem:[%s16881_s6 + $0x8] sm:$0x3f] }
 0xa0d   :  { %v16674_v6 = vrot.slane %v16670_v57, %v15378_v42 }
 0xa0f   :  { %8329 = vmatpush1.bf16.msra.mxu1 %v12656_v58 }
 0xa10   :  { %8330 = vmatprep.subr.bf16.mxu1 %v12661_v36 }
 0xa13   :  { %8331 = vmatpush1.bf16.msra.mxu1 %v12659_v61 }
 0xa14   :  { %8332 = vmatprep.subr.bf16.mxu1 %v12664_v63 }
 0xa17   :  { %8333 = vmatpush1.bf16.msra.mxu1 %v12662_v45 }
 0xa18   :  { %8334 = vmatprep.subr.bf16.mxu1 %v12667_v50 }
 0xa1b   :  { %8335 = vmatpush1.bf16.msra.mxu1 %v12665_v16 }
 0xa1c   :  { %8336 = vmatprep.subr.bf16.mxu1 %v12670_v59 }
 0xa1f   :  { %8337 = vmatpush1.bf16.msra.mxu1 %v12668_v62 }
 0xa20   :  { %8338 = vmatprep.subr.bf16.mxu1 %v12673_v9  ;;  %v16691_v9 = vrot.slane %v16661_v55, %v15384_v48 }
 0xa23   :  { %8339 = vmatpush1.bf16.msra.mxu1 %v12671_v7 }
 0xa24   :  { %8340 = vmatprep.subr.bf16.mxu1 %v12676_v10 }
 0xa27   :  { %8341 = vmatpush1.bf16.msra.mxu1 %v12674_v13 }
 0xa28   :  { %8342 = vmatprep.subr.bf16.mxu1 %v12679_v14 }
 0xa2b   :  { %8343 = vmatpush1.bf16.msra.mxu1 %v12677_v29  ;;  %v12715_v29 = vld [vmem:[%s16882_s8 + $0xb4] ss:$8 sps:$4 sm:$0xff]  }
 0xa2e   :  { %8345 = vmatmul.mubr.bf16.vlgmr.msra.gmra.mrb[64].mxu1 %v15863_v22  ;;  %v12682_v22 = vld [vmem:[%s16882_s8 + $0x4] ss:$8 sps:$4 sm:$0xff]  }
 0xa2f   :  { %8953 = vmatprep.subr.bf16.mxu1 %v12682_v22  ;;  %v12716_v22 = vld [vmem:[%s16882_s8 + $0xc0] ss:$8 sps:$4 sm:$0xff]  }
 0xa30   :  { %8954 = vmatpush1.bf16.msra.mxu1 %v12680_v21 }
 0xa31   :  { %8955 = vmatprep.subr.bf16.mxu1 %v12685_v26 }
 0xa41   :  { %v7410_v52 = vpop.f32.mrb[52].mxu1 }
 0xa42   :  { %v8731_v54 = vrot.slane %v7410_v52, 4  ;;  %v7412_v32 = vpop.f32.mrb[53].mxu1  ;;  %v8645_v58 = vadd.f32 %v16391_v46, %v7410_v52  ;;  %v16702_v52 = vrot.slane %v16670_v57, %v15384_v48 }
 0xa43   :  { %v8732_v4 = vrot.slane %v7412_v32, 4  ;;  %v7414_v8 = vpop.f32.mrb[54].mxu1  ;;  %v8646_v50 = vadd.f32 %v16395_v47, %v7412_v32 }
 0xa44   :  { %v16586_v19 = vadd.f32 %v8731_v54, %v16420_v11  ;;  %v7415_v25 = vpop.f32.mrb[55].mxu1  ;;  %v12683_v11 = vld [vmem:[%s16882_s8 + $0x10] ss:$8 sps:$4 sm:$0xff]  }
 0xa45   :  { %v16589_v23 = vadd.f32 %v8732_v4, %v16425_v33  ;;  %v12688_v33 = vld [vmem:[%s16882_s8 + $0x24] ss:$8 sps:$4 sm:$0xff]   ;;  %8956 = vmatpush1.bf16.msra.mxu1 %v12683_v11 }
 0xa46   :  { %8957 = vmatprep.subr.bf16.mxu1 %v12688_v33 }
 0xa49   :  { %8958 = vmatpush1.bf16.msra.mxu1 %v12686_v27  ;;  %v12721_v27 = vld [vmem:[%s16882_s8 + $0xd4] ss:$8 sps:$4 sm:$0xff]  }
 0xa4a   :  { %8959 = vmatprep.subr.bf16.mxu1 %v12691_v24 }
 0xa4d   :  { %8960 = vmatpush1.bf16.msra.mxu1 %v12689_v28  ;;  %v12719_v28 = vld [vmem:[%s16882_s8 + $0xd0] ss:$8 sps:$4 sm:$0xff]  }
 0xa4e   :  { %8961 = vmatprep.subr.bf16.mxu1 %v12694_v30  ;;  %v12722_v30 = vld [vmem:[%s16882_s8 + $0xe0] ss:$8 sps:$4 sm:$0xff]  }
 0xa51   :  { %8962 = vmatpush1.bf16.msra.mxu1 %v12692_v5  ;;  %v12724_v5 = vld [vmem:[%s16882_s8 + $0xe4] ss:$8 sps:$4 sm:$0xff]  }
 0xa52   :  { %8963 = vmatprep.subr.bf16.mxu1 %v12697_v31  ;;  %v12727_v31 = vld [vmem:[%s16882_s8 + $0xf4] ss:$8 sps:$4 sm:$0xff]  }
 0xa55   :  { %8964 = vmatpush1.bf16.msra.mxu1 %v12695_v34  ;;  %v12725_v34 = vld [vmem:[%s16882_s8 + $0xf0] ss:$8 sps:$4 sm:$0xff]  }
 0xa56   :  { %8965 = vmatprep.subr.bf16.mxu1 %v12700_v35  ;;  %v9022_v35 = vld [vmem:[%s16883_s9 + $0x80] sm:$0xff] }
 0xa59   :  { %8966 = vmatpush1.bf16.msra.mxu1 %v12698_v37  ;;  %v9023_v37 = vld [vmem:[%s16883_s9 + $0x88] sm:$0xff] }
 0xa5a   :  { %8967 = vmatprep.subr.bf16.mxu1 %v12703_v38  ;;  %v9006_v38 = vld [vmem:[%s16883_s9] sm:$0xff] }
 0xa5d   :  { %8968 = vmatpush1.bf16.msra.mxu1 %v12701_v39  ;;  %v10874_v39 = vpack.c.bf16 %v9023_v37, %v9022_v35 }
 0xa5e   :  { %8969 = vmatprep.subr.bf16.mxu1 %v12706_v40  ;;  %v9007_v40 = vld [vmem:[%s16883_s9 + $0x8] sm:$0xff] }
 0xa5f   :  { %10875 = vmatprep.subr.bf16.mxu0 %v10874_v39 }
 0xa61   :  { %8970 = vmatpush1.bf16.msra.mxu1 %v12704_v43  ;;  %v9024_v43 = vld [vmem:[%s16883_s9 + $0x90] sm:$0xff] }
 0xa62   :  { %8971 = vmatprep.subr.bf16.mxu1 %v12709_v41  ;;  %v9025_v41 = vld [vmem:[%s16883_s9 + $0x98] sm:$0xff] }
 0xa65   :  { %8972 = vmatpush1.bf16.msra.mxu1 %v12707_v44  ;;  %v10876_v44 = vpack.c.bf16 %v9007_v40, %v9006_v38 }
 0xa66   :  { %8973 = vmatprep.subr.bf16.mxu1 %v12712_v49  ;;  %v10878_v49 = vpack.c.bf16 %v9025_v41, %v9024_v43 }
 0xa67   :  { %10877 = vmatpush3.bf16.msra.mxu0 %v10876_v44 }
 0xa68   :  { %10879 = vmatprep.subr.bf16.mxu0 %v10878_v49 }
 0xa69   :  { %8974 = vmatpush1.bf16.msra.mxu1 %v12710_v18  ;;  %v9026_v18 = vld [vmem:[%s16883_s9 + $0xa0] sm:$0xff] }
 0xa6a   :  { %8975 = vmatprep.subr.bf16.mxu1 %v12715_v29  ;;  %v9031_v29 = vld [vmem:[%s16883_s9 + $0xc8] sm:$0xff] }
 0xa81   :  { %v16656_v60 = vpop.f32.mrb[56].mxu1 }
 0xa82   :  { %v8649_v36 = vrot.slane %v16656_v60, 2  ;;  %v8693_v61 = vrot.slane %v16656_v60, 4  ;;  %v8737_v63 = vrot.slane %v16656_v60, 6  ;;  %v16683_v45 = vpop.f32.mrb[57].mxu1 }
 0xa83   :  { %v8650_v42 = vrot.slane %v16683_v45, 2  ;;  %v8694_v16 = vrot.slane %v16683_v45, 4  ;;  %v8738_v59 = vrot.slane %v16683_v45, 6  ;;  %v7648_v62 = vpop.f32.mrb[58].mxu1  ;;  %v8596_v35 = vadd.f32 %v16395_v47, %v16683_v45 }
 0xa84   :  { %v8741_v7 = vadd.f32 %v8737_v63, %v16586_v19  ;;  %v7649_v10 = vpop.f32.mrb[59].mxu1  ;;  %v16695_v13 = vadd.f32 %v8693_v61, %v16526_v12  ;;  %v8653_v14 = vadd.f32 %v8649_v36, %v8645_v58  ;;  %v12713_v12 = vld [vmem:[%s16882_s8 + $0xb0] ss:$8 sps:$4 sm:$0xff]   ;;  %v9027_v58 = vld [vmem:[%s16883_s9 + $0xa8] sm:$0xff]  ;;  %v9010_v63 = vld [vmem:[%s16883_s9 + $0x20] sm:$0xff] }
 0xa85   :  { %v8742_v54 = vadd.f32 %v8738_v59, %v16589_v23  ;;  %v16706_v32 = vadd.f32 %v8694_v16, %v16531_v56  ;;  %v8654_v4 = vadd.f32 %v8650_v42, %v8646_v50  ;;  %8976 = vmatpush1.bf16.msra.mxu1 %v12713_v12  ;;  %v12718_v56 = vld [vmem:[%s16882_s8 + $0xc4] ss:$8 sps:$4 sm:$0xff]   ;;  %v10882_v61 = vpack.c.bf16 %v9027_v58, %v9026_v18  ;;  %v9028_v42 = vld [vmem:[%s16883_s9 + $0xb0] sm:$0xff]  ;;  %v9029_v16 = vld [vmem:[%s16883_s9 + $0xb8] sm:$0xff] }
 0xa86   :  { %v8743_v8 = vmul.f32 %v8741_v7, %v16665_v15  ;;  %v16712_v19 = vadd.f32 %v8657_v51, %v8653_v14  ;;  %8977 = vmatprep.subr.bf16.mxu1 %v12718_v56  ;;  %v9008_v51 = vld [vmem:[%s16883_s9 + $0x10] sm:$0xff]  ;;  %v9011_v50 = vld [vmem:[%s16883_s9 + $0x28] sm:$0xff]  ;;  %v10886_v62 = vpack.c.bf16 %v9029_v16, %v9028_v42  ;;  %v9013_v10 = vld [vmem:[%s16883_s9 + $0x38] sm:$0xff]  ;;  %v8615_v16 = vrot.slane %v16405_v0, 6 }
 0xa87   :  { %v8744_v25 = vmul.f32 %v8742_v54, %v16674_v6  ;;  %v16715_v21 = vadd.f32 %v8658_v3, %v8654_v4  ;;  %v9009_v3 = vld [vmem:[%s16883_s9 + $0x18] sm:$0xff]  ;;  %v10884_v59 = vpack.c.bf16 %v9011_v50, %v9010_v63  ;;  %v9012_v7 = vld [vmem:[%s16883_s9 + $0x30] sm:$0xff]  ;;  %v9030_v14 = vld [vmem:[%s16883_s9 + $0xc0] sm:$0xff] }
 0xa88   :  { %v8745_v48 = vadd.f32 %v8743_v8, %v16691_v9  ;;  %v10880_v36 = vpack.c.bf16 %v9009_v3, %v9008_v51  ;;  %v10888_v54 = vpack.c.bf16 %v9013_v10, %v9012_v7  ;;  %v10890_v4 = vpack.c.bf16 %v9031_v29, %v9030_v14  ;;  %v9014_v12 = vld [vmem:[%s16883_s9 + $0x40] sm:$0xff]  ;;  %v9015_v8 = vld [vmem:[%s16883_s9 + $0x48] sm:$0xff] }
 0xa89   :  { %v8746_v23 = vadd.f32 %v8744_v25, %v16702_v52  ;;  %8978 = vmatpush1.bf16.msra.mxu1 %v12716_v22  ;;  %v9032_v25 = vld [vmem:[%s16883_s9 + $0xd0] sm:$0xff]  ;;  %v10892_v56 = vpack.c.bf16 %v9015_v8, %v9014_v12  ;;  %v8616_v10 = vrot.slane %v16412_v53, 6 }
 0xa8a   :  { %v8747_v26 = vmax.f32 %v8745_v48, 0.0  ;;  %8979 = vmatprep.subr.bf16.mxu1 %v12721_v27  ;;  %10881 = vmatpush3.bf16.msra.mxu0 %v10880_v36  ;;  %v9033_v48 = vld [vmem:[%s16883_s9 + $0xd8] sm:$0xff]  ;;  %v9016_v22 = vld [vmem:[%s16883_s9 + $0x50] sm:$0xff] }
 0xa8b   :  { %v8748_v11 = vmax.f32 %v8746_v23, 0.0  ;;  %10883 = vmatprep.subr.bf16.mxu0 %v10882_v61  ;;  %v10894_v23 = vpack.c.bf16 %v9033_v48, %v9032_v25 }
 0xa8c   :  { %v8751_v33 = vrot.slane %v8747_v26, 2  ;;  %v9017_v26 = vld [vmem:[%s16883_s9 + $0x58] sm:$0xff] }
 0xa8d   :  { %v8752_v24 = vrot.slane %v8748_v11, 2  ;;  %8980 = vmatpush1.bf16.msra.mxu1 %v12719_v28  ;;  %v9034_v11 = vld [vmem:[%s16883_s9 + $0xe0] sm:$0xff]  ;;  %v10896_v27 = vpack.c.bf16 %v9017_v26, %v9016_v22 }
 0xa8e   :  { %8755 = vst [vmem:[#allocation2] sm:$0xc0] %v8751_v33  ;;  %8981 = vmatprep.subr.bf16.mxu1 %v12724_v5  ;;  %10885 = vmatpush3.bf16.msra.mxu0 %v10884_v59  ;;  %v9035_v33 = vld [vmem:[%s16883_s9 + $0xe8] sm:$0xff] }
 0xa8f   :  { %8756 = vst [vmem:[#allocation2 + $0x8] sm:$0xc0] %v8752_v24  ;;  %10887 = vmatprep.subr.bf16.mxu0 %v10886_v62  ;;  %v10898_v24 = vpack.c.bf16 %v9035_v33, %v9034_v11 }
 0xa91   :  { %8982 = vmatpush1.bf16.msra.mxu1 %v12722_v30  ;;  %v8595_v30 = vadd.f32 %v16391_v46, %v16656_v60 }
 0xa92   :  { %8983 = vmatprep.subr.bf16.mxu1 %v12727_v31  ;;  %10889 = vmatpush3.bf16.msra.mxu0 %v10888_v54 }
 0xa93   :  { %10891 = vmatprep.subr.bf16.mxu0 %v10890_v4 }
 0xa95   :  { %8984 = vmatpush1.bf16.msra.mxu1 %v12725_v34 }
 0xa96   :  { %10893 = vmatpush3.bf16.msra.mxu0 %v10892_v56 }
 0xa97   :  { %10895 = vmatprep.subr.bf16.mxu0 %v10894_v23 }
 0xa9a   :  { %10897 = vmatpush3.bf16.msra.mxu0 %v10896_v27 }
 0xa9b   :  { %10899 = vmatprep.subr.bf16.mxu0 %v10898_v24 }
 0xac1   :  { %v7878_v28 = vpop.f32.mrb[60].mxu1 }
 0xac2   :  { %v8599_v5 = vrot.slane %v7878_v28, 2  ;;  %v8699_v31 = vrot.slane %v7878_v28, 6  ;;  %v7880_v34 = vpop.f32.mrb[61].mxu1 }
 0xac3   :  { %v8600_v37 = vrot.slane %v7880_v34, 2  ;;  %v8700_v38 = vrot.slane %v7880_v34, 6  ;;  %v7882_v39 = vpop.f32.mrb[62].mxu1  ;;  %v9020_v34 = vld [vmem:[%s16883_s9 + $0x70] sm:$0xff] }
 0xac4   :  { %v8603_v40 = vadd.f32 %v8599_v5, %v8595_v30  ;;  %v8703_v43 = vadd.f32 %v8699_v31, %v16695_v13  ;;  %v7883_v41 = vpop.f32.mrb[63].mxu1  ;;  %v9036_v30 = vld [vmem:[%s16883_s9 + $0xf0] sm:$0xff]  ;;  %v9037_v5 = vld [vmem:[%s16883_s9 + $0xf8] sm:$0xff]  ;;  %v9003_v39 = vrot.slane %v16670_v57, %v15819_v1  ;;  %v10838_v57 = vld [vmem:[%s16884_s10] ss:$0 sm:$0xff] }
 0xac5   :  { %v8604_v44 = vadd.f32 %v8600_v37, %v8596_v35  ;;  %v8704_v49 = vadd.f32 %v8700_v38, %v16706_v32  ;;  %v10902_v31 = vpack.c.bf16 %v9037_v5, %v9036_v30  ;;  %v9021_v35 = vld [vmem:[%s16883_s9 + $0x78] sm:$0xff] }
 0xac6   :  { %v8705_v51 = vmul.f32 %v8703_v43, %v16665_v15  ;;  %v10904_v37 = vpack.c.bf16 %v9021_v35, %v9020_v34  ;;  %v8999_v43 = vrot.slane %v16661_v55, %v15819_v1  ;;  %v9120_v1 = vand.u32 127, %v568_v17 }
 0xac7   :  { %v8706_v46 = vmul.f32 %v8704_v49, %v16674_v6 }
 0xac8   :  { %v8707_v60 = vadd.f32 %v8705_v51, %v16691_v9 }
 0xac9   :  { %v8708_v3 = vadd.f32 %v8706_v46, %v16702_v52 }
 0xaca   :  { %v8709_v18 = vmax.f32 %v8707_v60, 0.0 }
 0xacb   :  { %v8710_v47 = vmax.f32 %v8708_v3, 0.0 }
 0xacc   :  { %v8713_v45 = vrot.slane %v8709_v18, 4 }
 0xacd   :  { %v8714_v58 = vrot.slane %v8710_v47, 4 }
 0xace   :  { %8717 = vst [vmem:[#allocation2] sm:$0x30] %v8713_v45 }
 0xacf   :  { %8718 = vst [vmem:[#allocation2 + $0x8] sm:$0x30] %v8714_v58 }
 0xb01   :  { %v8346_v36 = vpop.f32.mrb[64].mxu1 }
 0xb02   :  { %v8607_v13 = vrot.slane %v8346_v36, 4  ;;  %v8663_v61 = vrot.slane %v8346_v36, 6  ;;  %v8348_v63 = vpop.f32.mrb[65].mxu1 }
 0xb03   :  { %v8608_v50 = vrot.slane %v8348_v63, 4  ;;  %v8664_v32 = vrot.slane %v8348_v63, 6  ;;  %v8350_v42 = vpop.f32.mrb[66].mxu1 }
 0xb04   :  { %v8611_v59 = vadd.f32 %v8607_v13, %v8603_v40  ;;  %v8667_v62 = vadd.f32 %v8663_v61, %v16712_v19  ;;  %v8351_v7 = vpop.f32.mrb[67].mxu1 }
 0xb05   :  { %v8612_v14 = vadd.f32 %v8608_v50, %v8604_v44  ;;  %v8668_v29 = vadd.f32 %v8664_v32, %v16715_v21 }
 0xb06   :  { %v8619_v54 = vadd.f32 %v8615_v16, %v8611_v59  ;;  %v8669_v4 = vmul.f32 %v8667_v62, %v16665_v15 }
 0xb07   :  { %v8620_v12 = vadd.f32 %v8616_v10, %v8612_v14  ;;  %v8670_v8 = vmul.f32 %v8668_v29, %v16674_v6 }
 0xb08   :  { %v8629_v25 = vmul.f32 %v16665_v15, %v8619_v54  ;;  %v8671_v48 = vadd.f32 %v8669_v4, %v16691_v9 }
 0xb09   :  { %v8630_v0 = vmul.f32 %v16674_v6, %v8620_v12  ;;  %v8672_v19 = vadd.f32 %v8670_v8, %v16702_v52 }
 0xb0a   :  { %v8639_v56 = vadd.f32 %v16691_v9, %v8629_v25  ;;  %v8673_v53 = vmax.f32 %v8671_v48, 0.0  ;;  %v9018_v9 = vld [vmem:[%s16883_s9 + $0x60] sm:$0xff] }
 0xb0b   :  { %v8640_v23 = vadd.f32 %v16702_v52, %v8630_v0  ;;  %v8674_v21 = vmax.f32 %v8672_v19, 0.0  ;;  %v9019_v52 = vld [vmem:[%s16883_s9 + $0x68] sm:$0xff] }
 0xb0c   :  { %v8641_v22 = vmax.f32 %v8639_v56, 0.0  ;;  %v8677_v26 = vrot.slane %v8673_v53, 6  ;;  %v10900_v28 = vpack.c.bf16 %v9019_v52, %v9018_v9 }
 0xb0d   :  { %v8642_v11 = vmax.f32 %v8640_v23, 0.0  ;;  %v8678_v33 = vrot.slane %v8674_v21, 6 }
 0xb0e   :  { %8643 = vst [vmem:[#allocation2] sm:$0x3] %v8641_v22  ;;  %8681 = vst [vmem:[#allocation2] sm:$0xc] %v8677_v26  ;;  %10901 = vmatpush3.bf16.msra.mxu0 %v10900_v28 }
 0xb0f   :  { %8644 = vst [vmem:[#allocation2 + $0x8] sm:$0x3] %v8642_v11  ;;  %8682 = vst [vmem:[#allocation2 + $0x8] sm:$0xc] %v8678_v33  ;;  %10903 = vmatprep.subr.bf16.mxu0 %v10902_v31 }
 0xb12   :  { %10905 = vmatpush3.bf16.msra.mxu0 %v10904_v37 }
 0xb15   :  { %v8757_v15 = vld [vmem:[#allocation2] sm:$0xff] }
 0xb16   :  { %v8758_v27 = vld [vmem:[#allocation2 + $0x8] sm:$0xff]  ;;  %v8759_v6 = vpack.c.bf16 %v8757_v15, %v8757_v15 }
 0xb17   :  { %v8760_v24 = vpack.c.bf16 %v8758_v27, %v8758_v27 }
 0xb19   :  { %8985 = vmatprep.mubr.bf16.mxu1 %v8760_v24 }
 0xb1a   :  { %8986 = vmatmul.mubr.bf16.vlgmr.msra.gmra.mrb[68].mxu1 %v8759_v6 }
 0xbed   :  { %v8987_v38 = vpop.f32.mrb[68].mxu1 }
 0xbee   :  { %v8994_v40 = vadd.f32 %v8987_v38, %v15845_v2  ;;  %v8989_v41 = vpop.f32.mrb[69].mxu1 }
 0xbef   :  { %v8995_v44 = vadd.f32 %v8989_v41, %v15849_v20  ;;  %v8991_v49 = vpop.f32.mrb[70].mxu1 }
 0xbf0   :  { %v8992_v51 = vpop.f32.mrb[71].mxu1  ;;  %v9004_v60 = vadd.f32 %v8999_v43, %v8994_v40 }
 0xbf1   :  { %v9005_v46 = vadd.f32 %v9003_v39, %v8995_v44 }
 0xbf3   :  { %9102 = vmatprep.mubr.f32.mxu0 %v9005_v46 }
 0xbf4   :  { %9103 = vmatmul.mubr.f32.vlgmr.msra.gmra.mrb[12].mxu0 %v9004_v60 }
 0xcc7   :  { %v10871_v3 = vpop.f32.mrb[12].mxu0 }
 0xcc8   :  { %v10872_v18 = vpop.f32.mrb[13].mxu0 }
 0xcc9   :  { %v10873_v47 = vadd.f32 %v10872_v18, %v10871_v3 }
 0xccb   :  { %v9108_v2 = vmul.f32 2.0, %v10873_v47 }
 0xccd   :  { %v9116_v45 = vsub.f32 %v9108_v2, %v10838_v57 }
 0xccf   :  { %9117 = vmax.xlane.f32.xlu0 %v9116_v45 }
 0xd5c   :  { %v9118_v55 = vpop.xlane.xlu0 %9117 }
 0xd5d   :  { %vm9121_vm0 = vcmp.ge.f32.partialorder %v9116_v45, %v9118_v55 }
 0xd5e   :  { %v9122_v20 = vsel %vm9121_vm0, %v9120_v1, 128 }
 0xd5f   :  { %v9124_v58 = vshra.s32 %v9122_v20, 16  ;;  %v9123_v13 = vand.u32 65535, %v9122_v20 }
 0xd61   :  { %v9126_v36 = vcvt.s32.f32 %v9124_v58  ;;  %v9125_v63 = vcvt.s32.f32 %v9123_v13 }
 0xd63   :  { %9127 = vmin.xlane.f32.xlu0 %v9126_v36 }
 0xdf0   :  { %v9128_v61 = vpop.xlane.xlu0 %9127 }
 0xdf1   :  { %vm9129_vm1 = vcmp.eq.f32.partialorder %v9126_v36, %v9128_v61  ;;  %v9134_v32 = vcvt.f32.s32 %v9128_v61 }
 0xdf2   :  { %v9130_v50 = vsel %vm9129_vm1, %v9125_v63, inf }
 0xdf3   :  { %9131 = vmin.xlane.f32.xlu1 %v9130_v50  ;;  %v9135_v16 = vshll.u32 %v9134_v32, 16 }
 0xe80   :  { %v9132_v42 = vpop.xlane.xlu1 %9131 }
 0xe81   :  { %v9133_v59 = vcvt.f32.s32 %v9132_v42 }
 0xe83   :  { %v9136_v62 = vadd.s32 %v9135_v16, %v9133_v59 }
 0xe85   :  { %9137 = vst [vmem:[%s16885_s11] sm:$0xff] %v9136_v62 }

</bundles_post_ra>
